<compile_context>
chip_gen: v7x
topology: tpu7x:2x2x1
jax: 0.10.0
libtpu: 0.0.40
codegen_flags: <defaults>
</compile_context>

<pallas_src>
import functools
import math

import jax
import jax.numpy as jnp
from jax.experimental import pallas as pl
from jax.experimental.pallas import tpu as pltpu


def _round_up(x, m):
    return -(-x // m) * m


def _vmem_limit_bytes():
    # Per-generation scoped-VMEM cap (v7x only has 64 MiB physical VMEM).
    try:
        info = pltpu.get_tpu_info()
        cap = getattr(info, "vmem_capacity_bytes", None)
        if cap:
            return int(min(64 * 1024 * 1024, max(32 * 1024 * 1024, cap // 2)))
    except Exception:
        pass
    return 32 * 1024 * 1024


_VMEM_LIMIT = _vmem_limit_bytes()
# Matmul weights stay fully VMEM-resident (constant BlockSpec) below this size.
_W_RESIDENT_BYTES = (4 if _VMEM_LIMIT <= 32 * 1024 * 1024 else 8) * 1024 * 1024

_TM_CANDIDATES = (512, 256, 128, 64)     # row tiles: multiples of 16 (bf16 sublanes)
_TKN_CANDIDATES = (512, 256, 128)        # K / N tiles: multiples of 128 (lanes)


# ----------------------------------------------------------------------------
# Helpers from the reference implementation
# ----------------------------------------------------------------------------
def _make_divisible(v, divisor, min_value=None):
    if min_value is None:
        min_value = divisor
    new_v = max(min_value, int(v + divisor / 2) // divisor * divisor)
    if new_v < 0.9 * v:
        new_v += divisor
    return new_v


def _pick_tile(d, candidates, align):
    """Pick the largest reasonable tile; pad the dim up to a multiple of it."""
    dp = _round_up(d, align)
    if dp <= candidates[-1]:
        return dp, dp                       # tiny dim: one full-dim tile
    for t in candidates:                    # largest tile with <=12.5% pad waste
        dpt = _round_up(dp, t)
        if dpt == dp or (dpt - dp) * 8 <= dp:
            return t, dpt
    t = candidates[-1]
    return t, _round_up(dp, t)


# ----------------------------------------------------------------------------
# Fused tiled matmul:  out = act((x [* gate]) @ w * scale + bias) [+ residual]
#   x: (G, M, K), w: (K, N), scale/bias: (N,), gate: (G, K), residual: (G, M, N)
# Weight-resident path (weight fits VMEM): grid (G, M/tm, N/tn), full-K blocks.
# Streamed fallback: grid (G, M/tm, N/tn, K/tk) with a VMEM f32 accumulator.
# ----------------------------------------------------------------------------
def _mm_resident_kernel(*refs, act, has_gate, has_res):
    x_ref, w_ref, s_ref, b_ref = refs[:4]
    idx = 4
    gate_ref = res_ref = None
    if has_gate:
        gate_ref = refs[idx]
        idx += 1
    if has_res:
        res_ref = refs[idx]
        idx += 1
    o_ref = refs[idx]

    j = pl.program_id(2)
    x = x_ref[0]                                    # (tm, Kp) bf16
    if has_gate:
        x = x * gate_ref[0]                         # (1, Kp) broadcast over rows
    y = jnp.dot(x, w_ref[j], preferred_element_type=jnp.float32)
    y = y * s_ref[...] + b_ref[...]
    if act == "silu":
        y = y * jax.nn.sigmoid(y)
    elif act == "sigmoid":
        y = jax.nn.sigmoid(y)
    if has_res:
        y = y + res_ref[0].astype(jnp.float32)
    o_ref[0] = y.astype(o_ref.dtype)


def _mm_streamed_kernel(*refs, act, has_gate, has_res):
    x_ref, w_ref, s_ref, b_ref = refs[:4]
    idx = 4
    gate_ref = res_ref = None
    if has_gate:
        gate_ref = refs[idx]
        idx += 1
    if has_res:
        res_ref = refs[idx]
        idx += 1
    o_ref, acc_ref = refs[idx], refs[idx + 1]

    k = pl.program_id(3)

    @pl.when(k == 0)
    def _():
        acc_ref[...] = jnp.zeros_like(acc_ref)

    x = x_ref[0]                                    # (tm, tk) bf16
    if has_gate:
        x = x * gate_ref[0]                         # (1, tk)
    acc_ref[...] += jnp.dot(x, w_ref[...], preferred_element_type=jnp.float32)

    @pl.when(k == pl.num_programs(3) - 1)
    def _():
        y = acc_ref[...] * s_ref[...] + b_ref[...]
        if act == "silu":
            y = y * jax.nn.sigmoid(y)
        elif act == "sigmoid":
            y = jax.nn.sigmoid(y)
        if has_res:
            y = y + res_ref[0].astype(jnp.float32)
        o_ref[0] = y.astype(o_ref.dtype)


def fused_matmul(x, w, scale, bias, *, act="none", gate=None, residual=None,
                 out_dtype=jnp.bfloat16):
    G, M, K = x.shape
    Kw, N = w.shape
    assert Kw == K
    tm, Mp = _pick_tile(M, _TM_CANDIDATES, 16)
    tn, Np = _pick_tile(N, _TKN_CANDIDATES, 128)
    Kp128 = _round_up(K, 128)
    resident = Kp128 * Np * 2 <= _W_RESIDENT_BYTES
    if resident:
        tk, Kp = Kp128, Kp128
    else:
        tk, Kp = _pick_tile(K, _TKN_CANDIDATES, 128)

    xb = x.astype(jnp.bfloat16)
    if (Mp, Kp) != (M, K):
        xb = jnp.pad(xb, ((0, 0), (0, Mp - M), (0, Kp - K)))
    wb = w.astype(jnp.bfloat16)
    if (Kp, Np) != (K, N):
        wb = jnp.pad(wb, ((0, Kp - K), (0, Np - N)))
    s2 = scale.astype(jnp.float32).reshape(1, N)
    b2 = bias.astype(jnp.float32).reshape(1, N)
    if Np != N:
        s2 = jnp.pad(s2, ((0, 0), (0, Np - N)), constant_values=1.0)
        b2 = jnp.pad(b2, ((0, 0), (0, Np - N)))

    has_gate = gate is not None
    has_res = residual is not None
    gb = rb = None
    if has_gate:
        gb = gate.astype(jnp.bfloat16)
        if Kp != K:
            gb = jnp.pad(gb, ((0, 0), (0, Kp - K)))
        gb = gb.reshape(G, 1, Kp)
    if has_res:
        rb = residual.astype(jnp.bfloat16)
        if (Mp, Np) != (M, N):
            rb = jnp.pad(rb, ((0, 0), (0, Mp - M), (0, Np - N)))

    if resident:
        nj = Np // tn
        wr = wb.reshape(Kp, nj, tn).transpose(1, 0, 2)          # (nj, Kp, tn)
        operands = [xb, wr, s2, b2]
        in_specs = [
            pl.BlockSpec((1, tm, Kp), lambda g, i, j: (g, i, 0)),
            pl.BlockSpec((nj, Kp, tn), lambda g, i, j: (0, 0, 0)),   # resident
            pl.BlockSpec((1, tn), lambda g, i, j: (0, j)),
            pl.BlockSpec((1, tn), lambda g, i, j: (0, j)),
        ]
        if has_gate:
            operands.append(gb)
            in_specs.append(pl.BlockSpec((1, 1, Kp), lambda g, i, j: (g, 0, 0)))
        if has_res:
            operands.append(rb)
            in_specs.append(pl.BlockSpec((1, tm, tn), lambda g, i, j: (g, i, j)))
        kernel = functools.partial(_mm_resident_kernel, act=act,
                                   has_gate=has_gate, has_res=has_res)
        out = pl.pallas_call(
            kernel,
            out_shape=jax.ShapeDtypeStruct((G, Mp, Np), out_dtype),
            grid=(G, Mp // tm, nj),
            in_specs=in_specs,
            out_specs=pl.BlockSpec((1, tm, tn), lambda g, i, j: (g, i, j)),
            compiler_params=pltpu.CompilerParams(
                dimension_semantics=("parallel", "parallel", "parallel"),
                vmem_limit_bytes=_VMEM_LIMIT),
        )(*operands)
    else:
        operands = [xb, wb, s2, b2]
        in_specs = [
            pl.BlockSpec((1, tm, tk), lambda g, i, j, k: (g, i, k)),
            pl.BlockSpec((tk, tn), lambda g, i, j, k: (k, j)),
            pl.BlockSpec((1, tn), lambda g, i, j, k: (0, j)),
            pl.BlockSpec((1, tn), lambda g, i, j, k: (0, j)),
        ]
        if has_gate:
            operands.append(gb)
            in_specs.append(pl.BlockSpec((1, 1, tk), lambda g, i, j, k: (g, 0, k)))
        if has_res:
            operands.append(rb)
            in_specs.append(pl.BlockSpec((1, tm, tn), lambda g, i, j, k: (g, i, j)))
        kernel = functools.partial(_mm_streamed_kernel, act=act,
                                   has_gate=has_gate, has_res=has_res)
        out = pl.pallas_call(
            kernel,
            out_shape=jax.ShapeDtypeStruct((G, Mp, Np), out_dtype),
            grid=(G, Mp // tm, Np // tn, Kp // tk),
            in_specs=in_specs,
            out_specs=pl.BlockSpec((1, tm, tn), lambda g, i, j, k: (g, i, j)),
            scratch_shapes=[pltpu.VMEM((tm, tn), jnp.float32)],
            compiler_params=pltpu.CompilerParams(
                dimension_semantics=("parallel", "parallel", "parallel",
                                     "arbitrary"),
                vmem_limit_bytes=_VMEM_LIMIT),
        )(*operands)

    if (Mp, Np) != (M, N):
        out = out[:, :M, :N]
    return out


# ----------------------------------------------------------------------------
# Fused head 1x1 conv + BN + SiLU + global average pool (activation never
# leaves VMEM).  x: (B, M=H*W, Kp) bf16, w: (Kp, N) -> (B, N) f32 features.
# ----------------------------------------------------------------------------
def _head_gap_kernel(x_ref, w_ref, s_ref, b_ref, o_ref, *, inv_m):
    j = pl.program_id(1)
    y = jnp.dot(x_ref[0], w_ref[j], preferred_element_type=jnp.float32)
    y = y * s_ref[...] + b_ref[...]
    y = y * jax.nn.sigmoid(y)                        # SiLU
    pooled = jnp.sum(y, axis=0, keepdims=True) * inv_m
    o_ref[...] = pooled.reshape(o_ref.shape)


def head_matmul_gap(x, w, scale, bias):
    B, M, Kp = x.shape
    Kw, N = w.shape
    assert Kw == Kp
    tn, Np = _pick_tile(N, _TKN_CANDIDATES, 128)
    wb = w.astype(jnp.bfloat16)
    s2 = scale.astype(jnp.float32).reshape(1, N)
    b2 = bias.astype(jnp.float32).reshape(1, N)
    if Np != N:
        wb = jnp.pad(wb, ((0, 0), (0, Np - N)))
        s2 = jnp.pad(s2, ((0, 0), (0, Np - N)), constant_values=1.0)
        b2 = jnp.pad(b2, ((0, 0), (0, Np - N)))
    nj = Np // tn
    wr = wb.reshape(Kp, nj, tn).transpose(1, 0, 2)              # resident weight
    out = pl.pallas_call(
        functools.partial(_head_gap_kernel, inv_m=1.0 / M),
        out_shape=jax.ShapeDtypeStruct((B, 1, Np), jnp.float32),
        grid=(B, nj),
        in_specs=[
            pl.BlockSpec((1, M, Kp), lambda b, j: (b, 0, 0)),
            pl.BlockSpec((nj, Kp, tn), lambda b, j: (0, 0, 0)),
            pl.BlockSpec((1, tn), lambda b, j: (0, j)),
            pl.BlockSpec((1, tn), lambda b, j: (0, j)),
        ],
        out_specs=pl.BlockSpec((1, 1, tn), lambda b, j: (b, 0, j)),
        compiler_params=pltpu.CompilerParams(
            dimension_semantics=("parallel", "parallel"),
            vmem_limit_bytes=_VMEM_LIMIT),
    )(x.astype(jnp.bfloat16), wr, s2, b2)
    return out[:, 0, :N]


# ----------------------------------------------------------------------------
# Squeeze/excite FCs (fc1 + SiLU + fc2 + sigmoid) as one tiny resident kernel.
# ----------------------------------------------------------------------------
def _se_kernel(p_ref, w1_ref, b1_ref, w2_ref, b2_ref, g_ref):
    p = p_ref[...].reshape(p_ref.shape[0], p_ref.shape[2]).astype(jnp.bfloat16)
    a = jnp.dot(p, w1_ref[...], preferred_element_type=jnp.float32) + b1_ref[...]
    a = a * jax.nn.sigmoid(a)                        # SiLU
    z = jnp.dot(a.astype(jnp.bfloat16), w2_ref[...],
                preferred_element_type=jnp.float32) + b2_ref[...]
    g_ref[...] = jax.nn.sigmoid(z).reshape(g_ref.shape)


def se_gate(pooled, w1, b1, w2, b2):
    # pooled: (B, 1, C) f32  ->  gate (B, C) f32
    B, _, C = pooled.shape
    Ch = w1.shape[1]
    Bp = _round_up(B, 8)
    pp = pooled if Bp == B else jnp.pad(pooled, ((0, Bp - B), (0, 0), (0, 0)))
    out = pl.pallas_call(
        _se_kernel,
        out_shape=jax.ShapeDtypeStruct((Bp, 1, C), jnp.float32),
        grid=(1,),
        in_specs=[
            pl.BlockSpec((Bp, 1, C), lambda i: (0, 0, 0)),
            pl.BlockSpec((C, Ch), lambda i: (0, 0)),
            pl.BlockSpec((1, Ch), lambda i: (0, 0)),
            pl.BlockSpec((Ch, C), lambda i: (0, 0)),
            pl.BlockSpec((1, C), lambda i: (0, 0)),
        ],
        out_specs=pl.BlockSpec((Bp, 1, C), lambda i: (0, 0, 0)),
        compiler_params=pltpu.CompilerParams(vmem_limit_bytes=_VMEM_LIMIT),
    )(pp, w1, b1.reshape(1, Ch), w2, b2.reshape(1, C))
    return out[:B, 0, :]


# ----------------------------------------------------------------------------
# Spatial phase layout for 3x3 convs (stride handled via a 4-phase layout so
# only the needed output positions are computed); phases folded into rows so
# the Pallas blocks stay 4-D.
# ----------------------------------------------------------------------------
def _phase_layout(xp, stride):
    """xp: padded NHWC.  Returns (folded input, taps [(row, col)]*9, Ho, Wo)."""
    B, Hp2, Wp2, _ = xp.shape
    H, W = Hp2 - 2, Wp2 - 2
    if stride == 1:
        taps = tuple((kh, kw) for kh in range(3) for kw in range(3))
        return xp, taps, H, W
    Hh, Wh = H // 2 + 1, W // 2 + 1
    xph = jnp.concatenate([xp[:, a::2, b::2, :] for a in (0, 1) for b in (0, 1)],
                          axis=1)                     # (B, 4*Hh, Wh, C)
    taps = tuple(((((kh % 2) * 2 + (kw % 2)) * Hh + kh // 2), kw // 2)
                 for kh in range(3) for kw in range(3))
    return xph, taps, H // 2, W // 2


# ----------------------------------------------------------------------------
# Dense 3x3 conv + BN + SiLU: 9 accumulated MXU matmuls into a VMEM scratch.
# ----------------------------------------------------------------------------
def _conv3x3_kernel(x_ref, w_ref, s_ref, b_ref, o_ref, acc_ref, *, taps, Ho, Wo):
    Cin = x_ref.shape[-1]
    Cout = o_ref.shape[-1]
    for t, (r0, c0) in enumerate(taps):
        patch = x_ref[0, r0:r0 + Ho, c0:c0 + Wo, :]              # (Ho, Wo, Cin)
        contrib = jnp.dot(patch.reshape(Ho * Wo, Cin), w_ref[t],
                          preferred_element_type=jnp.float32)
        if t == 0:
            acc_ref[...] = contrib
        else:
            acc_ref[...] += contrib
    y = acc_ref[...] * s_ref[...] + b_ref[...]
    y = y * jax.nn.sigmoid(y)
    o_ref[0] = y.reshape(Ho, Wo, Cout).astype(o_ref.dtype)


def conv3x3_bn_silu(x, w9, scale, bias, stride):
    # x: (B, H, W, Cin) bf16, w9: (9, Cin, Coutp) bf16, scale/bias: (Coutp,) f32
    B, H, W, Cin = x.shape
    Coutp = w9.shape[2]
    xp = jnp.pad(x, ((0, 0), (1, 1), (1, 1), (0, 0)))
    xph, taps, Ho, Wo = _phase_layout(xp, stride)
    assert Wo % 8 == 0, "conv3x3 kernel assumes output width multiple of 8"
    R, Wh = xph.shape[1], xph.shape[2]
    kernel = functools.partial(_conv3x3_kernel, taps=taps, Ho=Ho, Wo=Wo)
    return pl.pallas_call(
        kernel,
        out_shape=jax.ShapeDtypeStruct((B, Ho, Wo, Coutp), jnp.bfloat16),
        grid=(B,),
        in_specs=[
            pl.BlockSpec((1, R, Wh, Cin), lambda b: (b, 0, 0, 0)),
            pl.BlockSpec((9, Cin, Coutp), lambda b: (0, 0, 0)),
            pl.BlockSpec((1, Coutp), lambda b: (0, 0)),
            pl.BlockSpec((1, Coutp), lambda b: (0, 0)),
        ],
        out_specs=pl.BlockSpec((1, Ho, Wo, Coutp), lambda b: (b, 0, 0, 0)),
        scratch_shapes=[pltpu.VMEM((Ho * Wo, Coutp), jnp.float32)],
        compiler_params=pltpu.CompilerParams(
            dimension_semantics=("parallel",), vmem_limit_bytes=_VMEM_LIMIT),
    )(xph, w9, scale.reshape(1, Coutp), bias.reshape(1, Coutp))


# ----------------------------------------------------------------------------
# Depthwise 3x3 conv + BN + SiLU with fused SE average-pool output.
# Input block is cast to f32 once into a scratch; taps accumulate into VMEM.
# ----------------------------------------------------------------------------
def _dwconv_kernel(x_ref, w_ref, s_ref, b_ref, o_ref, pool_ref, xf_ref, acc_ref,
                   *, taps, Ho, Wo):
    xf_ref[...] = x_ref[0].astype(jnp.float32)        # one bf16->f32 cast
    for t, (r0, c0) in enumerate(taps):
        contrib = xf_ref[r0:r0 + Ho, c0:c0 + Wo, :] * w_ref[t]   # (1, C) bcast
        if t == 0:
            acc_ref[...] = contrib
        else:
            acc_ref[...] += contrib
    y = acc_ref[...] * s_ref[...] + b_ref[...]
    y = y * jax.nn.sigmoid(y)
    o_ref[0] = y.astype(o_ref.dtype)
    pool_ref[...] = jnp.sum(y, axis=(0, 1), keepdims=True) * (1.0 / (Ho * Wo))


def dwconv3x3_bn_silu(x, w9, scale, bias, stride):
    # x: (B, H, W, C) bf16, w9: (9, 1, C) f32 -> (y bf16, pooled f32 (B, 1, C))
    B, H, W, C = x.shape
    xp = jnp.pad(x, ((0, 0), (1, 1), (1, 1), (0, 0)))
    xph, taps, Ho, Wo = _phase_layout(xp, stride)
    R, Wh = xph.shape[1], xph.shape[2]
    kernel = functools.partial(_dwconv_kernel, taps=taps, Ho=Ho, Wo=Wo)
    return pl.pallas_call(
        kernel,
        out_shape=(jax.ShapeDtypeStruct((B, Ho, Wo, C), jnp.bfloat16),
                   jax.ShapeDtypeStruct((B, 1, C), jnp.float32)),
        grid=(B,),
        in_specs=[
            pl.BlockSpec((1, R, Wh, C), lambda b: (b, 0, 0, 0)),
            pl.BlockSpec((9, 1, C), lambda b: (0, 0, 0)),
            pl.BlockSpec((1, C), lambda b: (0, 0)),
            pl.BlockSpec((1, C), lambda b: (0, 0)),
        ],
        out_specs=(pl.BlockSpec((1, Ho, Wo, C), lambda b: (b, 0, 0, 0)),
                   pl.BlockSpec((1, 1, C), lambda b: (b, 0, 0))),
        scratch_shapes=[pltpu.VMEM((R, Wh, C), jnp.float32),
                        pltpu.VMEM((Ho, Wo, C), jnp.float32)],
        compiler_params=pltpu.CompilerParams(
            dimension_semantics=("parallel",), vmem_limit_bytes=_VMEM_LIMIT),
    )(xph, w9, scale.reshape(1, C), bias.reshape(1, C))


# ----------------------------------------------------------------------------
# Stem: im2col (9 taps x 3 channels -> K = 27) in the wrapper, one matmul.
# ----------------------------------------------------------------------------
def stem_im2col(x, stride=2):
    B, H, W, C = x.shape
    xp = jnp.pad(x, ((0, 0), (1, 1), (1, 1), (0, 0)))
    Ho, Wo = H // stride, W // stride
    cols = [xp[:, a:a + stride * Ho:stride, b:b + stride * Wo:stride, :]
            for a in range(3) for b in range(3)]
    patches = jnp.concatenate(cols, axis=-1)            # (B, Ho, Wo, 9*C)
    return patches.reshape(B, Ho * Wo, 9 * C), Ho, Wo


# ----------------------------------------------------------------------------
# Parameter construction (PyTorch-style init), channels padded to 128-multiples
# ----------------------------------------------------------------------------
def bn_fold_padded(c, cp, eps=1e-5):
    scale = jnp.concatenate([
        jnp.full((c,), 1.0 / math.sqrt(1.0 + eps), jnp.float32),
        jnp.ones((cp - c,), jnp.float32)])
    bias = jnp.zeros((cp,), jnp.float32)
    return scale, bias


def conv1x1_weight_padded(key, cin, cout, cinp, coutp):
    std = math.sqrt(2.0 / cout)
    w = jax.random.normal(key, (cin, cout), jnp.float32) * std
    return jnp.pad(w, ((0, cinp - cin), (0, coutp - cout))).astype(jnp.bfloat16)


def conv3x3_weight_padded(key, cin, cout, cinp, coutp):
    std = math.sqrt(2.0 / (9 * cout))
    w = jax.random.normal(key, (3, 3, cin, cout), jnp.float32) * std
    w = jnp.pad(w, ((0, 0), (0, 0), (0, cinp - cin), (0, coutp - cout)))
    return w.reshape(9, cinp, coutp).astype(jnp.bfloat16)


def stem_weight(key, cin, cout, coutp):
    std = math.sqrt(2.0 / (9 * cout))
    w = jax.random.normal(key, (3, 3, cin, cout), jnp.float32) * std
    w = jnp.pad(w, ((0, 0), (0, 0), (0, 0), (0, coutp - cout)))
    return w.reshape(9 * cin, coutp).astype(jnp.bfloat16)     # im2col (kh,kw,c) order


def dwconv_weight_padded(key, c, cp):
    std = math.sqrt(2.0 / (9 * c))
    w = jax.random.normal(key, (3, 3, c), jnp.float32) * std
    return jnp.pad(w, ((0, 0), (0, 0), (0, cp - c))).reshape(9, 1, cp)


def linear_weight_padded(key, fin, fout, finp, foutp):
    w = jax.random.normal(key, (fin, fout), jnp.float32) * 0.001
    return jnp.pad(w, ((0, finp - fin), (0, foutp - fout))).astype(jnp.bfloat16)


def init_effnetv2(key, img_dim, cfgs, width_mult=1.0):
    keys = iter(jax.random.split(key, 128))
    params = {}
    input_channel = _make_divisible(24 * width_mult, 8)
    in_p = _round_up(input_channel, 128)
    params["stem_w"] = stem_weight(next(keys), img_dim, input_channel, in_p)
    params["stem_bn"] = bn_fold_padded(input_channel, in_p)

    blocks = []
    for t, c, n, s, use_se in cfgs:
        output_channel = _make_divisible(c * width_mult, 8)
        out_p = _round_up(output_channel, 128)
        for i in range(n):
            stride = s if i == 0 else 1
            hidden = int(round(input_channel * t))
            hid_p = _round_up(hidden, 128)
            bp = {"stride": stride, "use_se": bool(use_se),
                  "identity": stride == 1 and input_channel == output_channel}
            if use_se:
                bp["expand_w"] = conv1x1_weight_padded(next(keys), input_channel,
                                                       hidden, in_p, hid_p)
                bp["expand_bn"] = bn_fold_padded(hidden, hid_p)
                bp["dw_w"] = dwconv_weight_padded(next(keys), hidden, hid_p)
                bp["dw_bn"] = bn_fold_padded(hidden, hid_p)
                se_h = _make_divisible(input_channel // 4, 8)
                se_hp = _round_up(se_h, 128)
                bp["se_w1"] = linear_weight_padded(next(keys), hidden, se_h,
                                                   hid_p, se_hp)
                bp["se_b1"] = jnp.zeros((se_hp,), jnp.float32)
                bp["se_w2"] = linear_weight_padded(next(keys), se_h, hidden,
                                                   se_hp, hid_p)
                bp["se_b2"] = jnp.zeros((hid_p,), jnp.float32)
                bp["proj_w"] = conv1x1_weight_padded(next(keys), hidden,
                                                     output_channel, hid_p, out_p)
                bp["proj_bn"] = bn_fold_padded(output_channel, out_p)
            else:
                bp["conv3_w"] = conv3x3_weight_padded(next(keys), input_channel,
                                                      hidden, in_p, hid_p)
                bp["conv3_bn"] = bn_fold_padded(hidden, hid_p)
                bp["proj_w"] = conv1x1_weight_padded(next(keys), hidden,
                                                     output_channel, hid_p, out_p)
                bp["proj_bn"] = bn_fold_padded(output_channel, out_p)
            blocks.append(bp)
            input_channel = output_channel
            in_p = out_p
    params["blocks"] = blocks

    head_c = _make_divisible(1792 * width_mult, 8) if width_mult > 1.0 else 1792
    head_p = _round_up(head_c, 128)
    params["head_w"] = conv1x1_weight_padded(next(keys), input_channel, head_c,
                                             in_p, head_p)
    params["head_bn"] = bn_fold_padded(head_c, head_p)
    params["head_c"] = head_c
    return params


# ----------------------------------------------------------------------------
# Forward pass
# ----------------------------------------------------------------------------
def mbconv_forward(bp, x):
    B, H, W, Cp = x.shape
    res = x.reshape(B, H * W, Cp) if bp["identity"] else None
    if bp["use_se"]:
        h = fused_matmul(x.reshape(B, H * W, Cp), bp["expand_w"],
                         *bp["expand_bn"], act="silu")
        hid_p = h.shape[-1]
        h, pooled = dwconv3x3_bn_silu(h.reshape(B, H, W, hid_p), bp["dw_w"],
                                      *bp["dw_bn"], bp["stride"])
        Ho, Wo = h.shape[1], h.shape[2]
        gate = se_gate(pooled, bp["se_w1"], bp["se_b1"], bp["se_w2"], bp["se_b2"])
        out = fused_matmul(h.reshape(B, Ho * Wo, hid_p), bp["proj_w"],
                           *bp["proj_bn"], act="none", gate=gate, residual=res)
        return out.reshape(B, Ho, Wo, out.shape[-1])
    h = conv3x3_bn_silu(x, bp["conv3_w"], *bp["conv3_bn"], bp["stride"])
    Ho, Wo = h.shape[1], h.shape[2]
    out = fused_matmul(h.reshape(B, Ho * Wo, h.shape[-1]), bp["proj_w"],
                       *bp["proj_bn"], act="none", residual=res)
    return out.reshape(B, Ho, Wo, out.shape[-1])


def effnetv2_forward(params, x_nchw):
    x = jnp.transpose(x_nchw, (0, 2, 3, 1)).astype(jnp.bfloat16)   # NCHW -> NHWC
    B = x.shape[0]
    patches, Ho, Wo = stem_im2col(x, stride=2)                     # (B, Ho*Wo, 27)
    x = fused_matmul(patches, params["stem_w"], *params["stem_bn"], act="silu")
    x = x.reshape(B, Ho, Wo, x.shape[-1])
    for bp in params["blocks"]:
        x = mbconv_forward(bp, x)
    B2, H2, W2, Cp = x.shape
    pooled = head_matmul_gap(x.reshape(B2, H2 * W2, Cp), params["head_w"],
                             *params["head_bn"])                   # (B, head_p) f32
    return pooled[:, :params["head_c"]]


# ----------------------------------------------------------------------------
# Main
# ----------------------------------------------------------------------------
if __name__ == "__main__":
    # Small EffNetV2-style config: (t, c, n, s, use_se)
    cfgs = [
        [1, 24, 1, 1, 0],
        [4, 32, 1, 2, 0],
        [4, 48, 1, 2, 1],
    ]
    img_dim = 3
    key = jax.random.PRNGKey(0)
    pkey, xkey = jax.random.split(key)

    params = init_effnetv2(pkey, img_dim, cfgs, width_mult=1.0)
    x = jax.random.normal(xkey, (2, img_dim, 32, 32), jnp.float32)  # NCHW input

    @jax.jit
    def run(inp):
        return effnetv2_forward(params, inp)

    out = run(x)
    jax.block_until_ready(out)
    assert out.shape == (2, 1792), out.shape
    assert bool(jnp.all(jnp.isfinite(out))), "non-finite output"
    print("KERNEL_OK")
</pallas_src>

<mosaic_0001>
module attributes {stable_mosaic.version = 11 : i64} {
  func.func @_mm_resident_kernel(%arg0: i32, %arg1: i32, %arg2: i32, %arg3: memref<1x256x128xbf16, #tpu.memory_space<vmem>>, %arg4: memref<1x128x128xbf16, #tpu.memory_space<vmem>>, %arg5: memref<1x128xf32, #tpu.memory_space<vmem>>, %arg6: memref<1x128xf32, #tpu.memory_space<vmem>>, %arg7: memref<1x256x128xbf16, #tpu.memory_space<vmem>>) attributes {dimension_semantics = [#tpu.dimension_semantics<parallel>, #tpu.dimension_semantics<parallel>, #tpu.dimension_semantics<parallel>], iteration_bounds = array<i64: 2, 1, 1>, scalar_prefetch = 0 : i64, scratch_operands = 0 : i64, tpu.core_type = #tpu.core_type<tc>, window_params = [{transform_indices = @transform_0, window_bounds = array<i64: 1, 256, 128>}, {pipeline_mode = #tpu.pipeline_mode<synchronous>, transform_indices = @transform_1, window_bounds = array<i64: 1, 128, 128>}, {transform_indices = @transform_2, window_bounds = array<i64: 1, 128>}, {transform_indices = @transform_3, window_bounds = array<i64: 1, 128>}, {transform_indices = @transform_4, window_bounds = array<i64: 1, 256, 128>}]} {
    %c0 = arith.constant 0 : index
    %c0_0 = arith.constant 0 : index
    %c0_1 = arith.constant 0 : index
    %0 = vector.load %arg3[%c0, %c0_0, %c0_1] : memref<1x256x128xbf16, #tpu.memory_space<vmem>>, vector<1x256x128xbf16>
    %1 = vector.shape_cast %0 : vector<1x256x128xbf16> to vector<256x128xbf16>
    %2 = arith.index_cast %arg2 : i32 to index
    %c0_2 = arith.constant 0 : index
    %c0_3 = arith.constant 0 : index
    %3 = vector.load %arg4[%2, %c0_2, %c0_3] : memref<1x128x128xbf16, #tpu.memory_space<vmem>>, vector<1x128x128xbf16>
    %4 = vector.shape_cast %3 : vector<1x128x128xbf16> to vector<128x128xbf16>
    %cst = arith.constant dense<0.000000e+00> : vector<256x128xf32>
    %5 = tpu.matmul %1, %4, %cst {dimension_numbers = #tpu.dot_dimension_numbers<[1], [0], [0], [1], [0, 0, 1, 1], [], []>} : vector<256x128xbf16>, vector<128x128xbf16>, vector<256x128xf32> -> vector<256x128xf32>
    %c0_4 = arith.constant 0 : index
    %c0_5 = arith.constant 0 : index
    %6 = vector.load %arg5[%c0_4, %c0_5] : memref<1x128xf32, #tpu.memory_space<vmem>>, vector<1x128xf32>
    %7 = vector.broadcast %6 : vector<1x128xf32> to vector<256x128xf32>
    %8 = arith.mulf %5, %7 : vector<256x128xf32>
    %c0_6 = arith.constant 0 : index
    %c0_7 = arith.constant 0 : index
    %9 = vector.load %arg6[%c0_6, %c0_7] : memref<1x128xf32, #tpu.memory_space<vmem>>, vector<1x128xf32>
    %10 = vector.broadcast %9 : vector<1x128xf32> to vector<256x128xf32>
    %11 = arith.addf %8, %10 : vector<256x128xf32>
    %12 = arith.negf %11 : vector<256x128xf32>
    %13 = math.exp %12 : vector<256x128xf32>
    %cst_8 = arith.constant 1.000000e+00 : f32
    %14 = vector.broadcast %cst_8 : f32 to vector<256x128xf32>
    %15 = arith.addf %14, %13 : vector<256x128xf32>
    %16 = arith.divf %14, %15 : vector<256x128xf32>
    %17 = arith.mulf %11, %16 : vector<256x128xf32>
    %18 = arith.truncf %17 : vector<256x128xf32> to vector<256x128xbf16>
    %c0_9 = arith.constant 0 : index
    %c0_10 = arith.constant 0 : index
    %c0_11 = arith.constant 0 : index
    %19 = vector.load %arg7[%c0_9, %c0_10, %c0_11] : memref<1x256x128xbf16, #tpu.memory_space<vmem>>, vector<1x256x128xbf16>
    %20 = vector.shape_cast %19 : vector<1x256x128xbf16> to vector<256x128xbf16>
    %21 = vector.shape_cast %18 : vector<256x128xbf16> to vector<1x256x128xbf16>
    tpu.vector_store %arg7[%c0_9, %c0_10, %c0_11], %21 {strides = array<i32>} : memref<1x256x128xbf16, #tpu.memory_space<vmem>>, vector<1x256x128xbf16>,
    return
  }
  func.func @transform_0(%arg0: i32, %arg1: i32, %arg2: i32) -> (i32, i32, i32) {
    %c0_i32 = arith.constant 0 : i32
    %c0_i32_0 = arith.constant 0 : i32
    return %arg0, %arg1, %c0_i32 : i32, i32, i32
  }
  func.func @transform_1(%arg0: i32, %arg1: i32, %arg2: i32) -> (i32, i32, i32) {
    %c0_i32 = arith.constant 0 : i32
    %c0_i32_0 = arith.constant 0 : i32
    %c0_i32_1 = arith.constant 0 : i32
    %c0_i32_2 = arith.constant 0 : i32
    return %c0_i32, %c0_i32_0, %c0_i32_1 : i32, i32, i32
  }
  func.func @transform_2(%arg0: i32, %arg1: i32, %arg2: i32) -> (i32, i32) {
    %c0_i32 = arith.constant 0 : i32
    %c0_i32_0 = arith.constant 0 : i32
    return %c0_i32, %arg2 : i32, i32
  }
  func.func @transform_3(%arg0: i32, %arg1: i32, %arg2: i32) -> (i32, i32) {
    %c0_i32 = arith.constant 0 : i32
    %c0_i32_0 = arith.constant 0 : i32
    return %c0_i32, %arg2 : i32, i32
  }
  func.func @transform_4(%arg0: i32, %arg1: i32, %arg2: i32) -> (i32, i32, i32) {
    %c0_i32 = arith.constant 0 : i32
    return %arg0, %arg1, %arg2 : i32, i32, i32
  }
}

module attributes {stable_mosaic.version = 11 : i64} {
  func.func @_conv3x3_kernel(%arg0: i32, %arg1: memref<1x18x18x128xbf16, #tpu.memory_space<vmem>>, %arg2: memref<9x128x128xbf16, #tpu.memory_space<vmem>>, %arg3: memref<1x128xf32, #tpu.memory_space<vmem>>, %arg4: memref<1x128xf32, #tpu.memory_space<vmem>>, %arg5: memref<1x16x16x128xbf16, #tpu.memory_space<vmem>>, %arg6: memref<256x128xf32, #tpu.memory_space<vmem>>) attributes {dimension_semantics = [#tpu.dimension_semantics<parallel>], iteration_bounds = array<i64: 2>, scalar_prefetch = 0 : i64, scratch_operands = 1 : i64, tpu.core_type = #tpu.core_type<tc>, window_params = [{transform_indices = @transform_0, window_bounds = array<i64: 1, 18, 18, 128>}, {pipeline_mode = #tpu.pipeline_mode<synchronous>, transform_indices = @transform_1, window_bounds = array<i64: 9, 128, 128>}, {pipeline_mode = #tpu.pipeline_mode<synchronous>, transform_indices = @transform_2, window_bounds = array<i64: 1, 128>}, {pipeline_mode = #tpu.pipeline_mode<synchronous>, transform_indices = @transform_3, window_bounds = array<i64: 1, 128>}, {transform_indices = @transform_4, window_bounds = array<i64: 1, 16, 16, 128>}]} {
    %c0 = arith.constant 0 : index
    %c0_0 = arith.constant 0 : index
    %c0_1 = arith.constant 0 : index
    %c0_2 = arith.constant 0 : index
    %0 = vector.load %arg1[%c0, %c0_0, %c0_1, %c0_2] : memref<1x18x18x128xbf16, #tpu.memory_space<vmem>>, vector<1x16x16x128xbf16>
    %1 = vector.shape_cast %0 : vector<1x16x16x128xbf16> to vector<16x16x128xbf16>
    %2 = vector.shape_cast %1 : vector<16x16x128xbf16> to vector<256x128xbf16>
    %c0_3 = arith.constant 0 : index
    %c0_4 = arith.constant 0 : index
    %c0_5 = arith.constant 0 : index
    %3 = vector.load %arg2[%c0_3, %c0_4, %c0_5] : memref<9x128x128xbf16, #tpu.memory_space<vmem>>, vector<1x128x128xbf16>
    %4 = vector.shape_cast %3 : vector<1x128x128xbf16> to vector<128x128xbf16>
    %cst = arith.constant dense<0.000000e+00> : vector<256x128xf32>
    %5 = tpu.matmul %2, %4, %cst {dimension_numbers = #tpu.dot_dimension_numbers<[1], [0], [0], [1], [0, 0, 1, 1], [], []>} : vector<256x128xbf16>, vector<128x128xbf16>, vector<256x128xf32> -> vector<256x128xf32>
    %c0_6 = arith.constant 0 : index
    %c0_7 = arith.constant 0 : index
    %6 = vector.load %arg6[%c0_6, %c0_7] : memref<256x128xf32, #tpu.memory_space<vmem>>, vector<256x128xf32>
    tpu.vector_store %arg6[%c0_6, %c0_7], %5 {strides = array<i32>} : memref<256x128xf32, #tpu.memory_space<vmem>>, vector<256x128xf32>,
    %c0_8 = arith.constant 0 : index
    %c0_9 = arith.constant 0 : index
    %c1 = arith.constant 1 : index
    %c0_10 = arith.constant 0 : index
    %7 = vector.load %arg1[%c0_8, %c0_9, %c1, %c0_10] : memref<1x18x18x128xbf16, #tpu.memory_space<vmem>>, vector<1x16x16x128xbf16>
    %8 = vector.shape_cast %7 : vector<1x16x16x128xbf16> to vector<16x16x128xbf16>
    %9 = vector.shape_cast %8 : vector<16x16x128xbf16> to vector<256x128xbf16>
    %c1_11 = arith.constant 1 : index
    %c0_12 = arith.constant 0 : index
    %c0_13 = arith.constant 0 : index
    %10 = vector.load %arg2[%c1_11, %c0_12, %c0_13] : memref<9x128x128xbf16, #tpu.memory_space<vmem>>, vector<1x128x128xbf16>
    %11 = vector.shape_cast %10 : vector<1x128x128xbf16> to vector<128x128xbf16>
    %cst_14 = arith.constant dense<0.000000e+00> : vector<256x128xf32>
    %12 = tpu.matmul %9, %11, %cst_14 {dimension_numbers = #tpu.dot_dimension_numbers<[1], [0], [0], [1], [0, 0, 1, 1], [], []>} : vector<256x128xbf16>, vector<128x128xbf16>, vector<256x128xf32> -> vector<256x128xf32>
    %c0_15 = arith.constant 0 : index
    %c0_16 = arith.constant 0 : index
    %13 = vector.load %arg6[%c0_15, %c0_16] : memref<256x128xf32, #tpu.memory_space<vmem>>, vector<256x128xf32>
    %14 = arith.addf %13, %12 : vector<256x128xf32>
    %c0_17 = arith.constant 0 : index
    %c0_18 = arith.constant 0 : index
    %15 = vector.load %arg6[%c0_17, %c0_18] : memref<256x128xf32, #tpu.memory_space<vmem>>, vector<256x128xf32>
    tpu.vector_store %arg6[%c0_17, %c0_18], %14 {strides = array<i32>} : memref<256x128xf32, #tpu.memory_space<vmem>>, vector<256x128xf32>,
    %c0_19 = arith.constant 0 : index
    %c0_20 = arith.constant 0 : index
    %c2 = arith.constant 2 : index
    %c0_21 = arith.constant 0 : index
    %16 = vector.load %arg1[%c0_19, %c0_20, %c2, %c0_21] : memref<1x18x18x128xbf16, #tpu.memory_space<vmem>>, vector<1x16x16x128xbf16>
    %17 = vector.shape_cast %16 : vector<1x16x16x128xbf16> to vector<16x16x128xbf16>
    %18 = vector.shape_cast %17 : vector<16x16x128xbf16> to vector<256x128xbf16>
    %c2_22 = arith.constant 2 : index
    %c0_23 = arith.constant 0 : index
    %c0_24 = arith.constant 0 : index
    %19 = vector.load %arg2[%c2_22, %c0_23, %c0_24] : memref<9x128x128xbf16, #tpu.memory_space<vmem>>, vector<1x128x128xbf16>
    %20 = vector.shape_cast %19 : vector<1x128x128xbf16> to vector<128x128xbf16>
    %cst_25 = arith.constant dense<0.000000e+00> : vector<256x128xf32>
    %21 = tpu.matmul %18, %20, %cst_25 {dimension_numbers = #tpu.dot_dimension_numbers<[1], [0], [0], [1], [0, 0, 1, 1], [], []>} : vector<256x128xbf16>, vector<128x128xbf16>, vector<256x128xf32> -> vector<256x128xf32>
    %c0_26 = arith.constant 0 : index
    %c0_27 = arith.constant 0 : index
    %22 = vector.load %arg6[%c0_26, %c0_27] : memref<256x128xf32, #tpu.memory_space<vmem>>, vector<256x128xf32>
    %23 = arith.addf %22, %21 : vector<256x128xf32>
    %c0_28 = arith.constant 0 : index
    %c0_29 = arith.constant 0 : index
    %24 = vector.load %arg6[%c0_28, %c0_29] : memref<256x128xf32, #tpu.memory_space<vmem>>, vector<256x128xf32>
    tpu.vector_store %arg6[%c0_28, %c0_29], %23 {strides = array<i32>} : memref<256x128xf32, #tpu.memory_space<vmem>>, vector<256x128xf32>,
    %c0_30 = arith.constant 0 : index
    %c1_31 = arith.constant 1 : index
    %c0_32 = arith.constant 0 : index
    %c0_33 = arith.constant 0 : index
    %25 = vector.load %arg1[%c0_30, %c1_31, %c0_32, %c0_33] : memref<1x18x18x128xbf16, #tpu.memory_space<vmem>>, vector<1x16x16x128xbf16>
    %26 = vector.shape_cast %25 : vector<1x16x16x128xbf16> to vector<16x16x128xbf16>
    %27 = vector.shape_cast %26 : vector<16x16x128xbf16> to vector<256x128xbf16>
    %c3 = arith.constant 3 : index
    %c0_34 = arith.constant 0 : index
    %c0_35 = arith.constant 0 : index
    %28 = vector.load %arg2[%c3, %c0_34, %c0_35] : memref<9x128x128xbf16, #tpu.memory_space<vmem>>, vector<1x128x128xbf16>
    %29 = vector.shape_cast %28 : vector<1x128x128xbf16> to vector<128x128xbf16>
    %cst_36 = arith.constant dense<0.000000e+00> : vector<256x128xf32>
    %30 = tpu.matmul %27, %29, %cst_36 {dimension_numbers = #tpu.dot_dimension_numbers<[1], [0], [0], [1], [0, 0, 1, 1], [], []>} : vector<256x128xbf16>, vector<128x128xbf16>, vector<256x128xf32> -> vector<256x128xf32>
    %c0_37 = arith.constant 0 : index
    %c0_38 = arith.constant 0 : index
    %31 = vector.load %arg6[%c0_37, %c0_38] : memref<256x128xf32, #tpu.memory_space<vmem>>, vector<256x128xf32>
    %32 = arith.addf %31, %30 : vector<256x128xf32>
    %c0_39 = arith.constant 0 : index
    %c0_40 = arith.constant 0 : index
    %33 = vector.load %arg6[%c0_39, %c0_40] : memref<256x128xf32, #tpu.memory_space<vmem>>, vector<256x128xf32>
    tpu.vector_store %arg6[%c0_39, %c0_40], %32 {strides = array<i32>} : memref<256x128xf32, #tpu.memory_space<vmem>>, vector<256x128xf32>,
    %c0_41 = arith.constant 0 : index
    %c1_42 = arith.constant 1 : index
    %c1_43 = arith.constant 1 : index
    %c0_44 = arith.constant 0 : index
    %34 = vector.load %arg1[%c0_41, %c1_42, %c1_43, %c0_44] : memref<1x18x18x128xbf16, #tpu.memory_space<vmem>>, vector<1x16x16x128xbf16>
    %35 = vector.shape_cast %34 : vector<1x16x16x128xbf16> to vector<16x16x128xbf16>
    %36 = vector.shape_cast %35 : vector<16x16x128xbf16> to vector<256x128xbf16>
    %c4 = arith.constant 4 : index
    %c0_45 = arith.constant 0 : index
    %c0_46 = arith.constant 0 : index
    %37 = vector.load %arg2[%c4, %c0_45, %c0_46] : memref<9x128x128xbf16, #tpu.memory_space<vmem>>, vector<1x128x128xbf16>
    %38 = vector.shape_cast %37 : vector<1x128x128xbf16> to vector<128x128xbf16>
    %cst_47 = arith.constant dense<0.000000e+00> : vector<256x128xf32>
    %39 = tpu.matmul %36, %38, %cst_47 {dimension_numbers = #tpu.dot_dimension_numbers<[1], [0], [0], [1], [0, 0, 1, 1], [], []>} : vector<256x128xbf16>, vector<128x128xbf16>, vector<256x128xf32> -> vector<256x128xf32>
    %c0_48 = arith.constant 0 : index
    %c0_49 = arith.constant 0 : index
    %40 = vector.load %arg6[%c0_48, %c0_49] : memref<256x128xf32, #tpu.memory_space<vmem>>, vector<256x128xf32>
    %41 = arith.addf %40, %39 : vector<256x128xf32>
    %c0_50 = arith.constant 0 : index
    %c0_51 = arith.constant 0 : index
    %42 = vector.load %arg6[%c0_50, %c0_51] : memref<256x128xf32, #tpu.memory_space<vmem>>, vector<256x128xf32>
    tpu.vector_store %arg6[%c0_50, %c0_51], %41 {strides = array<i32>} : memref<256x128xf32, #tpu.memory_space<vmem>>, vector<256x128xf32>,
    %c0_52 = arith.constant 0 : index
    %c1_53 = arith.constant 1 : index
    %c2_54 = arith.constant 2 : index
    %c0_55 = arith.constant 0 : index
    %43 = vector.load %arg1[%c0_52, %c1_53, %c2_54, %c0_55] : memref<1x18x18x128xbf16, #tpu.memory_space<vmem>>, vector<1x16x16x128xbf16>
    %44 = vector.shape_cast %43 : vector<1x16x16x128xbf16> to vector<16x16x128xbf16>
    %45 = vector.shape_cast %44 : vector<16x16x128xbf16> to vector<256x128xbf16>
    %c5 = arith.constant 5 : index
    %c0_56 = arith.constant 0 : index
    %c0_57 = arith.constant 0 : index
    %46 = vector.load %arg2[%c5, %c0_56, %c0_57] : memref<9x128x128xbf16, #tpu.memory_space<vmem>>, vector<1x128x128xbf16>
    %47 = vector.shape_cast %46 : vector<1x128x128xbf16> to vector<128x128xbf16>
    %cst_58 = arith.constant dense<0.000000e+00> : vector<256x128xf32>
    %48 = tpu.matmul %45, %47, %cst_58 {dimension_numbers = #tpu.dot_dimension_numbers<[1], [0], [0], [1], [0, 0, 1, 1], [], []>} : vector<256x128xbf16>, vector<128x128xbf16>, vector<256x128xf32> -> vector<256x128xf32>
    %c0_59 = arith.constant 0 : index
    %c0_60 = arith.constant 0 : index
    %49 = vector.load %arg6[%c0_59, %c0_60] : memref<256x128xf32, #tpu.memory_space<vmem>>, vector<256x128xf32>
    %50 = arith.addf %49, %48 : vector<256x128xf32>
    %c0_61 = arith.constant 0 : index
    %c0_62 = arith.constant 0 : index
    %51 = vector.load %arg6[%c0_61, %c0_62] : memref<256x128xf32, #tpu.memory_space<vmem>>, vector<256x128xf32>
    tpu.vector_store %arg6[%c0_61, %c0_62], %50 {strides = array<i32>} : memref<256x128xf32, #tpu.memory_space<vmem>>, vector<256x128xf32>,
    %c0_63 = arith.constant 0 : index
    %c2_64 = arith.constant 2 : index
    %c0_65 = arith.constant 0 : index
    %c0_66 = arith.constant 0 : index
    %52 = vector.load %arg1[%c0_63, %c2_64, %c0_65, %c0_66] : memref<1x18x18x128xbf16, #tpu.memory_space<vmem>>, vector<1x16x16x128xbf16>
    %53 = vector.shape_cast %52 : vector<1x16x16x128xbf16> to vector<16x16x128xbf16>
    %54 = vector.shape_cast %53 : vector<16x16x128xbf16> to vector<256x128xbf16>
    %c6 = arith.constant 6 : index
    %c0_67 = arith.constant 0 : index
    %c0_68 = arith.constant 0 : index
    %55 = vector.load %arg2[%c6, %c0_67, %c0_68] : memref<9x128x128xbf16, #tpu.memory_space<vmem>>, vector<1x128x128xbf16>
    %56 = vector.shape_cast %55 : vector<1x128x128xbf16> to vector<128x128xbf16>
    %cst_69 = arith.constant dense<0.000000e+00> : vector<256x128xf32>
    %57 = tpu.matmul %54, %56, %cst_69 {dimension_numbers = #tpu.dot_dimension_numbers<[1], [0], [0], [1], [0, 0, 1, 1], [], []>} : vector<256x128xbf16>, vector<128x128xbf16>, vector<256x128xf32> -> vector<256x128xf32>
    %c0_70 = arith.constant 0 : index
    %c0_71 = arith.constant 0 : index
    %58 = vector.load %arg6[%c0_70, %c0_71] : memref<256x128xf32, #tpu.memory_space<vmem>>, vector<256x128xf32>
    %59 = arith.addf %58, %57 : vector<256x128xf32>
    %c0_72 = arith.constant 0 : index
    %c0_73 = arith.constant 0 : index
    %60 = vector.load %arg6[%c0_72, %c0_73] : memref<256x128xf32, #tpu.memory_space<vmem>>, vector<256x128xf32>
    tpu.vector_store %arg6[%c0_72, %c0_73], %59 {strides = array<i32>} : memref<256x128xf32, #tpu.memory_space<vmem>>, vector<256x128xf32>,
    %c0_74 = arith.constant 0 : index
    %c2_75 = arith.constant 2 : index
    %c1_76 = arith.constant 1 : index
    %c0_77 = arith.constant 0 : index
    %61 = vector.load %arg1[%c0_74, %c2_75, %c1_76, %c0_77] : memref<1x18x18x128xbf16, #tpu.memory_space<vmem>>, vector<1x16x16x128xbf16>
    %62 = vector.shape_cast %61 : vector<1x16x16x128xbf16> to vector<16x16x128xbf16>
    %63 = vector.shape_cast %62 : vector<16x16x128xbf16> to vector<256x128xbf16>
    %c7 = arith.constant 7 : index
    %c0_78 = arith.constant 0 : index
    %c0_79 = arith.constant 0 : index
    %64 = vector.load %arg2[%c7, %c0_78, %c0_79] : memref<9x128x128xbf16, #tpu.memory_space<vmem>>, vector<1x128x128xbf16>
    %65 = vector.shape_cast %64 : vector<1x128x128xbf16> to vector<128x128xbf16>
    %cst_80 = arith.constant dense<0.000000e+00> : vector<256x128xf32>
    %66 = tpu.matmul %63, %65, %cst_80 {dimension_numbers = #tpu.dot_dimension_numbers<[1], [0], [0], [1], [0, 0, 1, 1], [], []>} : vector<256x128xbf16>, vector<128x128xbf16>, vector<256x128xf32> -> vector<256x128xf32>
    %c0_81 = arith.constant 0 : index
    %c0_82 = arith.constant 0 : index
    %67 = vector.load %arg6[%c0_81, %c0_82] : memref<256x128xf32, #tpu.memory_space<vmem>>, vector<256x128xf32>
    %68 = arith.addf %67, %66 : vector<256x128xf32>
    %c0_83 = arith.constant 0 : index
    %c0_84 = arith.constant 0 : index
    %69 = vector.load %arg6[%c0_83, %c0_84] : memref<256x128xf32, #tpu.memory_space<vmem>>, vector<256x128xf32>
    tpu.vector_store %arg6[%c0_83, %c0_84], %68 {strides = array<i32>} : memref<256x128xf32, #tpu.memory_space<vmem>>, vector<256x128xf32>,
    %c0_85 = arith.constant 0 : index
    %c2_86 = arith.constant 2 : index
    %c2_87 = arith.constant 2 : index
    %c0_88 = arith.constant 0 : index
    %70 = vector.load %arg1[%c0_85, %c2_86, %c2_87, %c0_88] : memref<1x18x18x128xbf16, #tpu.memory_space<vmem>>, vector<1x16x16x128xbf16>
    %71 = vector.shape_cast %70 : vector<1x16x16x128xbf16> to vector<16x16x128xbf16>
    %72 = vector.shape_cast %71 : vector<16x16x128xbf16> to vector<256x128xbf16>
    %c8 = arith.constant 8 : index
    %c0_89 = arith.constant 0 : index
    %c0_90 = arith.constant 0 : index
    %73 = vector.load %arg2[%c8, %c0_89, %c0_90] : memref<9x128x128xbf16, #tpu.memory_space<vmem>>, vector<1x128x128xbf16>
    %74 = vector.shape_cast %73 : vector<1x128x128xbf16> to vector<128x128xbf16>
    %cst_91 = arith.constant dense<0.000000e+00> : vector<256x128xf32>
    %75 = tpu.matmul %72, %74, %cst_91 {dimension_numbers = #tpu.dot_dimension_numbers<[1], [0], [0], [1], [0, 0, 1, 1], [], []>} : vector<256x128xbf16>, vector<128x128xbf16>, vector<256x128xf32> -> vector<256x128xf32>
    %c0_92 = arith.constant 0 : index
    %c0_93 = arith.constant 0 : index
    %76 = vector.load %arg6[%c0_92, %c0_93] : memref<256x128xf32, #tpu.memory_space<vmem>>, vector<256x128xf32>
    %77 = arith.addf %76, %75 : vector<256x128xf32>
    %c0_94 = arith.constant 0 : index
    %c0_95 = arith.constant 0 : index
    %78 = vector.load %arg6[%c0_94, %c0_95] : memref<256x128xf32, #tpu.memory_space<vmem>>, vector<256x128xf32>
    tpu.vector_store %arg6[%c0_94, %c0_95], %77 {strides = array<i32>} : memref<256x128xf32, #tpu.memory_space<vmem>>, vector<256x128xf32>,
    %c0_96 = arith.constant 0 : index
    %c0_97 = arith.constant 0 : index
    %79 = vector.load %arg6[%c0_96, %c0_97] : memref<256x128xf32, #tpu.memory_space<vmem>>, vector<256x128xf32>
    %c0_98 = arith.constant 0 : index
    %c0_99 = arith.constant 0 : index
    %80 = vector.load %arg3[%c0_98, %c0_99] : memref<1x128xf32, #tpu.memory_space<vmem>>, vector<1x128xf32>
    %81 = vector.broadcast %80 : vector<1x128xf32> to vector<256x128xf32>
    %82 = arith.mulf %79, %81 : vector<256x128xf32>
    %c0_100 = arith.constant 0 : index
    %c0_101 = arith.constant 0 : index
    %83 = vector.load %arg4[%c0_100, %c0_101] : memref<1x128xf32, #tpu.memory_space<vmem>>, vector<1x128xf32>
    %84 = vector.broadcast %83 : vector<1x128xf32> to vector<256x128xf32>
    %85 = arith.addf %82, %84 : vector<256x128xf32>
    %86 = arith.negf %85 : vector<256x128xf32>
    %87 = math.exp %86 : vector<256x128xf32>
    %cst_102 = arith.constant 1.000000e+00 : f32
    %88 = vector.broadcast %cst_102 : f32 to vector<256x128xf32>
    %89 = arith.addf %88, %87 : vector<256x128xf32>
    %90 = arith.divf %88, %89 : vector<256x128xf32>
    %91 = arith.mulf %85, %90 : vector<256x128xf32>
    %92 = vector.shape_cast %91 : vector<256x128xf32> to vector<16x16x128xf32>
    %93 = arith.truncf %92 : vector<16x16x128xf32> to vector<16x16x128xbf16>
    %c0_103 = arith.constant 0 : index
    %c0_104 = arith.constant 0 : index
    %c0_105 = arith.constant 0 : index
    %c0_106 = arith.constant 0 : index
    %94 = vector.load %arg5[%c0_103, %c0_104, %c0_105, %c0_106] : memref<1x16x16x128xbf16, #tpu.memory_space<vmem>>, vector<1x16x16x128xbf16>
    %95 = vector.shape_cast %94 : vector<1x16x16x128xbf16> to vector<16x16x128xbf16>
    %96 = vector.shape_cast %93 : vector<16x16x128xbf16> to vector<1x16x16x128xbf16>
    tpu.vector_store %arg5[%c0_103, %c0_104, %c0_105, %c0_106], %96 {strides = array<i32>} : memref<1x16x16x128xbf16, #tpu.memory_space<vmem>>, vector<1x16x16x128xbf16>,
    return
  }
  func.func @transform_0(%arg0: i32) -> (i32, i32, i32, i32) {
    %c0_i32 = arith.constant 0 : i32
    %c0_i32_0 = arith.constant 0 : i32
    %c0_i32_1 = arith.constant 0 : i32
    %c0_i32_2 = arith.constant 0 : i32
    return %arg0, %c0_i32, %c0_i32_0, %c0_i32_1 : i32, i32, i32, i32
  }
  func.func @transform_1(%arg0: i32) -> (i32, i32, i32) {
    %c0_i32 = arith.constant 0 : i32
    %c0_i32_0 = arith.constant 0 : i32
    %c0_i32_1 = arith.constant 0 : i32
    %c0_i32_2 = arith.constant 0 : i32
    return %c0_i32, %c0_i32_0, %c0_i32_1 : i32, i32, i32
  }
  func.func @transform_2(%arg0: i32) -> (i32, i32) {
    %c0_i32 = arith.constant 0 : i32
    %c0_i32_0 = arith.constant 0 : i32
    %c0_i32_1 = arith.constant 0 : i32
    return %c0_i32, %c0_i32_0 : i32, i32
  }
  func.func @transform_3(%arg0: i32) -> (i32, i32) {
    %c0_i32 = arith.constant 0 : i32
    %c0_i32_0 = arith.constant 0 : i32
    %c0_i32_1 = arith.constant 0 : i32
    return %c0_i32, %c0_i32_0 : i32, i32
  }
  func.func @transform_4(%arg0: i32) -> (i32, i32, i32, i32) {
    %c0_i32 = arith.constant 0 : i32
    %c0_i32_0 = arith.constant 0 : i32
    %c0_i32_1 = arith.constant 0 : i32
    %c0_i32_2 = arith.constant 0 : i32
    return %arg0, %c0_i32, %c0_i32_0, %c0_i32_1 : i32, i32, i32, i32
  }
}

module attributes {stable_mosaic.version = 11 : i64} {
  func.func @_mm_resident_kernel(%arg0: i32, %arg1: i32, %arg2: i32, %arg3: memref<1x256x128xbf16, #tpu.memory_space<vmem>>, %arg4: memref<1x128x128xbf16, #tpu.memory_space<vmem>>, %arg5: memref<1x128xf32, #tpu.memory_space<vmem>>, %arg6: memref<1x128xf32, #tpu.memory_space<vmem>>, %arg7: memref<1x256x128xbf16, #tpu.memory_space<vmem>>, %arg8: memref<1x256x128xbf16, #tpu.memory_space<vmem>>) attributes {dimension_semantics = [#tpu.dimension_semantics<parallel>, #tpu.dimension_semantics<parallel>, #tpu.dimension_semantics<parallel>], iteration_bounds = array<i64: 2, 1, 1>, scalar_prefetch = 0 : i64, scratch_operands = 0 : i64, tpu.core_type = #tpu.core_type<tc>, window_params = [{transform_indices = @transform_0, window_bounds = array<i64: 1, 256, 128>}, {pipeline_mode = #tpu.pipeline_mode<synchronous>, transform_indices = @transform_1, window_bounds = array<i64: 1, 128, 128>}, {transform_indices = @transform_2, window_bounds = array<i64: 1, 128>}, {transform_indices = @transform_3, window_bounds = array<i64: 1, 128>}, {transform_indices = @transform_4, window_bounds = array<i64: 1, 256, 128>}, {transform_indices = @transform_5, window_bounds = array<i64: 1, 256, 128>}]} {
    %c0 = arith.constant 0 : index
    %c0_0 = arith.constant 0 : index
    %c0_1 = arith.constant 0 : index
    %0 = vector.load %arg3[%c0, %c0_0, %c0_1] : memref<1x256x128xbf16, #tpu.memory_space<vmem>>, vector<1x256x128xbf16>
    %1 = vector.shape_cast %0 : vector<1x256x128xbf16> to vector<256x128xbf16>
    %2 = arith.index_cast %arg2 : i32 to index
    %c0_2 = arith.constant 0 : index
    %c0_3 = arith.constant 0 : index
    %3 = vector.load %arg4[%2, %c0_2, %c0_3] : memref<1x128x128xbf16, #tpu.memory_space<vmem>>, vector<1x128x128xbf16>
    %4 = vector.shape_cast %3 : vector<1x128x128xbf16> to vector<128x128xbf16>
    %cst = arith.constant dense<0.000000e+00> : vector<256x128xf32>
    %5 = tpu.matmul %1, %4, %cst {dimension_numbers = #tpu.dot_dimension_numbers<[1], [0], [0], [1], [0, 0, 1, 1], [], []>} : vector<256x128xbf16>, vector<128x128xbf16>, vector<256x128xf32> -> vector<256x128xf32>
    %c0_4 = arith.constant 0 : index
    %c0_5 = arith.constant 0 : index
    %6 = vector.load %arg5[%c0_4, %c0_5] : memref<1x128xf32, #tpu.memory_space<vmem>>, vector<1x128xf32>
    %7 = vector.broadcast %6 : vector<1x128xf32> to vector<256x128xf32>
    %8 = arith.mulf %5, %7 : vector<256x128xf32>
    %c0_6 = arith.constant 0 : index
    %c0_7 = arith.constant 0 : index
    %9 = vector.load %arg6[%c0_6, %c0_7] : memref<1x128xf32, #tpu.memory_space<vmem>>, vector<1x128xf32>
    %10 = vector.broadcast %9 : vector<1x128xf32> to vector<256x128xf32>
    %11 = arith.addf %8, %10 : vector<256x128xf32>
    %c0_8 = arith.constant 0 : index
    %c0_9 = arith.constant 0 : index
    %c0_10 = arith.constant 0 : index
    %12 = vector.load %arg7[%c0_8, %c0_9, %c0_10] : memref<1x256x128xbf16, #tpu.memory_space<vmem>>, vector<1x256x128xbf16>
    %13 = vector.shape_cast %12 : vector<1x256x128xbf16> to vector<256x128xbf16>
    %14 = arith.extf %13 : vector<256x128xbf16> to vector<256x128xf32>
    %15 = arith.addf %11, %14 : vector<256x128xf32>
    %16 = arith.truncf %15 : vector<256x128xf32> to vector<256x128xbf16>
    %c0_11 = arith.constant 0 : index
    %c0_12 = arith.constant 0 : index
    %c0_13 = arith.constant 0 : index
    %17 = vector.load %arg8[%c0_11, %c0_12, %c0_13] : memref<1x256x128xbf16, #tpu.memory_space<vmem>>, vector<1x256x128xbf16>
    %18 = vector.shape_cast %17 : vector<1x256x128xbf16> to vector<256x128xbf16>
    %19 = vector.shape_cast %16 : vector<256x128xbf16> to vector<1x256x128xbf16>
    tpu.vector_store %arg8[%c0_11, %c0_12, %c0_13], %19 {strides = array<i32>} : memref<1x256x128xbf16, #tpu.memory_space<vmem>>, vector<1x256x128xbf16>,
    return
  }
  func.func @transform_0(%arg0: i32, %arg1: i32, %arg2: i32) -> (i32, i32, i32) {
    %c0_i32 = arith.constant 0 : i32
    %c0_i32_0 = arith.constant 0 : i32
    return %arg0, %arg1, %c0_i32 : i32, i32, i32
  }
  func.func @transform_1(%arg0: i32, %arg1: i32, %arg2: i32) -> (i32, i32, i32) {
    %c0_i32 = arith.constant 0 : i32
    %c0_i32_0 = arith.constant 0 : i32
    %c0_i32_1 = arith.constant 0 : i32
    %c0_i32_2 = arith.constant 0 : i32
    return %c0_i32, %c0_i32_0, %c0_i32_1 : i32, i32, i32
  }
  func.func @transform_2(%arg0: i32, %arg1: i32, %arg2: i32) -> (i32, i32) {
    %c0_i32 = arith.constant 0 : i32
    %c0_i32_0 = arith.constant 0 : i32
    return %c0_i32, %arg2 : i32, i32
  }
  func.func @transform_3(%arg0: i32, %arg1: i32, %arg2: i32) -> (i32, i32) {
    %c0_i32 = arith.constant 0 : i32
    %c0_i32_0 = arith.constant 0 : i32
    return %c0_i32, %arg2 : i32, i32
  }
  func.func @transform_4(%arg0: i32, %arg1: i32, %arg2: i32) -> (i32, i32, i32) {
    %c0_i32 = arith.constant 0 : i32
    return %arg0, %arg1, %arg2 : i32, i32, i32
  }
  func.func @transform_5(%arg0: i32, %arg1: i32, %arg2: i32) -> (i32, i32, i32) {
    %c0_i32 = arith.constant 0 : i32
    return %arg0, %arg1, %arg2 : i32, i32, i32
  }
}

module attributes {stable_mosaic.version = 11 : i64} {
  func.func @_conv3x3_kernel(%arg0: i32, %arg1: memref<1x36x9x128xbf16, #tpu.memory_space<vmem>>, %arg2: memref<9x128x128xbf16, #tpu.memory_space<vmem>>, %arg3: memref<1x128xf32, #tpu.memory_space<vmem>>, %arg4: memref<1x128xf32, #tpu.memory_space<vmem>>, %arg5: memref<1x8x8x128xbf16, #tpu.memory_space<vmem>>, %arg6: memref<64x128xf32, #tpu.memory_space<vmem>>) attributes {dimension_semantics = [#tpu.dimension_semantics<parallel>], iteration_bounds = array<i64: 2>, scalar_prefetch = 0 : i64, scratch_operands = 1 : i64, tpu.core_type = #tpu.core_type<tc>, window_params = [{transform_indices = @transform_0, window_bounds = array<i64: 1, 36, 9, 128>}, {pipeline_mode = #tpu.pipeline_mode<synchronous>, transform_indices = @transform_1, window_bounds = array<i64: 9, 128, 128>}, {pipeline_mode = #tpu.pipeline_mode<synchronous>, transform_indices = @transform_2, window_bounds = array<i64: 1, 128>}, {pipeline_mode = #tpu.pipeline_mode<synchronous>, transform_indices = @transform_3, window_bounds = array<i64: 1, 128>}, {transform_indices = @transform_4, window_bounds = array<i64: 1, 8, 8, 128>}]} {
    %c0 = arith.constant 0 : index
    %c0_0 = arith.constant 0 : index
    %c0_1 = arith.constant 0 : index
    %c0_2 = arith.constant 0 : index
    %0 = vector.load %arg1[%c0, %c0_0, %c0_1, %c0_2] : memref<1x36x9x128xbf16, #tpu.memory_space<vmem>>, vector<1x8x8x128xbf16>
    %1 = vector.shape_cast %0 : vector<1x8x8x128xbf16> to vector<8x8x128xbf16>
    %2 = vector.shape_cast %1 : vector<8x8x128xbf16> to vector<64x128xbf16>
    %c0_3 = arith.constant 0 : index
    %c0_4 = arith.constant 0 : index
    %c0_5 = arith.constant 0 : index
    %3 = vector.load %arg2[%c0_3, %c0_4, %c0_5] : memref<9x128x128xbf16, #tpu.memory_space<vmem>>, vector<1x128x128xbf16>
    %4 = vector.shape_cast %3 : vector<1x128x128xbf16> to vector<128x128xbf16>
    %cst = arith.constant dense<0.000000e+00> : vector<64x128xf32>
    %5 = tpu.matmul %2, %4, %cst {dimension_numbers = #tpu.dot_dimension_numbers<[1], [0], [0], [1], [0, 0, 1, 1], [], []>} : vector<64x128xbf16>, vector<128x128xbf16>, vector<64x128xf32> -> vector<64x128xf32>
    %c0_6 = arith.constant 0 : index
    %c0_7 = arith.constant 0 : index
    %6 = vector.load %arg6[%c0_6, %c0_7] : memref<64x128xf32, #tpu.memory_space<vmem>>, vector<64x128xf32>
    tpu.vector_store %arg6[%c0_6, %c0_7], %5 {strides = array<i32>} : memref<64x128xf32, #tpu.memory_space<vmem>>, vector<64x128xf32>,
    %c0_8 = arith.constant 0 : index
    %c9 = arith.constant 9 : index
    %c0_9 = arith.constant 0 : index
    %c0_10 = arith.constant 0 : index
    %7 = vector.load %arg1[%c0_8, %c9, %c0_9, %c0_10] : memref<1x36x9x128xbf16, #tpu.memory_space<vmem>>, vector<1x8x8x128xbf16>
    %8 = vector.shape_cast %7 : vector<1x8x8x128xbf16> to vector<8x8x128xbf16>
    %9 = vector.shape_cast %8 : vector<8x8x128xbf16> to vector<64x128xbf16>
    %c1 = arith.constant 1 : index
    %c0_11 = arith.constant 0 : index
    %c0_12 = arith.constant 0 : index
    %10 = vector.load %arg2[%c1, %c0_11, %c0_12] : memref<9x128x128xbf16, #tpu.memory_space<vmem>>, vector<1x128x128xbf16>
    %11 = vector.shape_cast %10 : vector<1x128x128xbf16> to vector<128x128xbf16>
    %cst_13 = arith.constant dense<0.000000e+00> : vector<64x128xf32>
    %12 = tpu.matmul %9, %11, %cst_13 {dimension_numbers = #tpu.dot_dimension_numbers<[1], [0], [0], [1], [0, 0, 1, 1], [], []>} : vector<64x128xbf16>, vector<128x128xbf16>, vector<64x128xf32> -> vector<64x128xf32>
    %c0_14 = arith.constant 0 : index
    %c0_15 = arith.constant 0 : index
    %13 = vector.load %arg6[%c0_14, %c0_15] : memref<64x128xf32, #tpu.memory_space<vmem>>, vector<64x128xf32>
    %14 = arith.addf %13, %12 : vector<64x128xf32>
    %c0_16 = arith.constant 0 : index
    %c0_17 = arith.constant 0 : index
    %15 = vector.load %arg6[%c0_16, %c0_17] : memref<64x128xf32, #tpu.memory_space<vmem>>, vector<64x128xf32>
    tpu.vector_store %arg6[%c0_16, %c0_17], %14 {strides = array<i32>} : memref<64x128xf32, #tpu.memory_space<vmem>>, vector<64x128xf32>,
    %c0_18 = arith.constant 0 : index
    %c0_19 = arith.constant 0 : index
    %c1_20 = arith.constant 1 : index
    %c0_21 = arith.constant 0 : index
    %16 = vector.load %arg1[%c0_18, %c0_19, %c1_20, %c0_21] : memref<1x36x9x128xbf16, #tpu.memory_space<vmem>>, vector<1x8x8x128xbf16>
    %17 = vector.shape_cast %16 : vector<1x8x8x128xbf16> to vector<8x8x128xbf16>
    %18 = vector.shape_cast %17 : vector<8x8x128xbf16> to vector<64x128xbf16>
    %c2 = arith.constant 2 : index
    %c0_22 = arith.constant 0 : index
    %c0_23 = arith.constant 0 : index
    %19 = vector.load %arg2[%c2, %c0_22, %c0_23] : memref<9x128x128xbf16, #tpu.memory_space<vmem>>, vector<1x128x128xbf16>
    %20 = vector.shape_cast %19 : vector<1x128x128xbf16> to vector<128x128xbf16>
    %cst_24 = arith.constant dense<0.000000e+00> : vector<64x128xf32>
    %21 = tpu.matmul %18, %20, %cst_24 {dimension_numbers = #tpu.dot_dimension_numbers<[1], [0], [0], [1], [0, 0, 1, 1], [], []>} : vector<64x128xbf16>, vector<128x128xbf16>, vector<64x128xf32> -> vector<64x128xf32>
    %c0_25 = arith.constant 0 : index
    %c0_26 = arith.constant 0 : index
    %22 = vector.load %arg6[%c0_25, %c0_26] : memref<64x128xf32, #tpu.memory_space<vmem>>, vector<64x128xf32>
    %23 = arith.addf %22, %21 : vector<64x128xf32>
    %c0_27 = arith.constant 0 : index
    %c0_28 = arith.constant 0 : index
    %24 = vector.load %arg6[%c0_27, %c0_28] : memref<64x128xf32, #tpu.memory_space<vmem>>, vector<64x128xf32>
    tpu.vector_store %arg6[%c0_27, %c0_28], %23 {strides = array<i32>} : memref<64x128xf32, #tpu.memory_space<vmem>>, vector<64x128xf32>,
    %c0_29 = arith.constant 0 : index
    %c18 = arith.constant 18 : index
    %c0_30 = arith.constant 0 : index
    %c0_31 = arith.constant 0 : index
    %25 = vector.load %arg1[%c0_29, %c18, %c0_30, %c0_31] : memref<1x36x9x128xbf16, #tpu.memory_space<vmem>>, vector<1x8x8x128xbf16>
    %26 = vector.shape_cast %25 : vector<1x8x8x128xbf16> to vector<8x8x128xbf16>
    %27 = vector.shape_cast %26 : vector<8x8x128xbf16> to vector<64x128xbf16>
    %c3 = arith.constant 3 : index
    %c0_32 = arith.constant 0 : index
    %c0_33 = arith.constant 0 : index
    %28 = vector.load %arg2[%c3, %c0_32, %c0_33] : memref<9x128x128xbf16, #tpu.memory_space<vmem>>, vector<1x128x128xbf16>
    %29 = vector.shape_cast %28 : vector<1x128x128xbf16> to vector<128x128xbf16>
    %cst_34 = arith.constant dense<0.000000e+00> : vector<64x128xf32>
    %30 = tpu.matmul %27, %29, %cst_34 {dimension_numbers = #tpu.dot_dimension_numbers<[1], [0], [0], [1], [0, 0, 1, 1], [], []>} : vector<64x128xbf16>, vector<128x128xbf16>, vector<64x128xf32> -> vector<64x128xf32>
    %c0_35 = arith.constant 0 : index
    %c0_36 = arith.constant 0 : index
    %31 = vector.load %arg6[%c0_35, %c0_36] : memref<64x128xf32, #tpu.memory_space<vmem>>, vector<64x128xf32>
    %32 = arith.addf %31, %30 : vector<64x128xf32>
    %c0_37 = arith.constant 0 : index
    %c0_38 = arith.constant 0 : index
    %33 = vector.load %arg6[%c0_37, %c0_38] : memref<64x128xf32, #tpu.memory_space<vmem>>, vector<64x128xf32>
    tpu.vector_store %arg6[%c0_37, %c0_38], %32 {strides = array<i32>} : memref<64x128xf32, #tpu.memory_space<vmem>>, vector<64x128xf32>,
    %c0_39 = arith.constant 0 : index
    %c27 = arith.constant 27 : index
    %c0_40 = arith.constant 0 : index
    %c0_41 = arith.constant 0 : index
    %34 = vector.load %arg1[%c0_39, %c27, %c0_40, %c0_41] : memref<1x36x9x128xbf16, #tpu.memory_space<vmem>>, vector<1x8x8x128xbf16>
    %35 = vector.shape_cast %34 : vector<1x8x8x128xbf16> to vector<8x8x128xbf16>
    %36 = vector.shape_cast %35 : vector<8x8x128xbf16> to vector<64x128xbf16>
    %c4 = arith.constant 4 : index
    %c0_42 = arith.constant 0 : index
    %c0_43 = arith.constant 0 : index
    %37 = vector.load %arg2[%c4, %c0_42, %c0_43] : memref<9x128x128xbf16, #tpu.memory_space<vmem>>, vector<1x128x128xbf16>
    %38 = vector.shape_cast %37 : vector<1x128x128xbf16> to vector<128x128xbf16>
    %cst_44 = arith.constant dense<0.000000e+00> : vector<64x128xf32>
    %39 = tpu.matmul %36, %38, %cst_44 {dimension_numbers = #tpu.dot_dimension_numbers<[1], [0], [0], [1], [0, 0, 1, 1], [], []>} : vector<64x128xbf16>, vector<128x128xbf16>, vector<64x128xf32> -> vector<64x128xf32>
    %c0_45 = arith.constant 0 : index
    %c0_46 = arith.constant 0 : index
    %40 = vector.load %arg6[%c0_45, %c0_46] : memref<64x128xf32, #tpu.memory_space<vmem>>, vector<64x128xf32>
    %41 = arith.addf %40, %39 : vector<64x128xf32>
    %c0_47 = arith.constant 0 : index
    %c0_48 = arith.constant 0 : index
    %42 = vector.load %arg6[%c0_47, %c0_48] : memref<64x128xf32, #tpu.memory_space<vmem>>, vector<64x128xf32>
    tpu.vector_store %arg6[%c0_47, %c0_48], %41 {strides = array<i32>} : memref<64x128xf32, #tpu.memory_space<vmem>>, vector<64x128xf32>,
    %c0_49 = arith.constant 0 : index
    %c18_50 = arith.constant 18 : index
    %c1_51 = arith.constant 1 : index
    %c0_52 = arith.constant 0 : index
    %43 = vector.load %arg1[%c0_49, %c18_50, %c1_51, %c0_52] : memref<1x36x9x128xbf16, #tpu.memory_space<vmem>>, vector<1x8x8x128xbf16>
    %44 = vector.shape_cast %43 : vector<1x8x8x128xbf16> to vector<8x8x128xbf16>
    %45 = vector.shape_cast %44 : vector<8x8x128xbf16> to vector<64x128xbf16>
    %c5 = arith.constant 5 : index
    %c0_53 = arith.constant 0 : index
    %c0_54 = arith.constant 0 : index
    %46 = vector.load %arg2[%c5, %c0_53, %c0_54] : memref<9x128x128xbf16, #tpu.memory_space<vmem>>, vector<1x128x128xbf16>
    %47 = vector.shape_cast %46 : vector<1x128x128xbf16> to vector<128x128xbf16>
    %cst_55 = arith.constant dense<0.000000e+00> : vector<64x128xf32>
    %48 = tpu.matmul %45, %47, %cst_55 {dimension_numbers = #tpu.dot_dimension_numbers<[1], [0], [0], [1], [0, 0, 1, 1], [], []>} : vector<64x128xbf16>, vector<128x128xbf16>, vector<64x128xf32> -> vector<64x128xf32>
    %c0_56 = arith.constant 0 : index
    %c0_57 = arith.constant 0 : index
    %49 = vector.load %arg6[%c0_56, %c0_57] : memref<64x128xf32, #tpu.memory_space<vmem>>, vector<64x128xf32>
    %50 = arith.addf %49, %48 : vector<64x128xf32>
    %c0_58 = arith.constant 0 : index
    %c0_59 = arith.constant 0 : index
    %51 = vector.load %arg6[%c0_58, %c0_59] : memref<64x128xf32, #tpu.memory_space<vmem>>, vector<64x128xf32>
    tpu.vector_store %arg6[%c0_58, %c0_59], %50 {strides = array<i32>} : memref<64x128xf32, #tpu.memory_space<vmem>>, vector<64x128xf32>,
    %c0_60 = arith.constant 0 : index
    %c1_61 = arith.constant 1 : index
    %c0_62 = arith.constant 0 : index
    %c0_63 = arith.constant 0 : index
    %52 = vector.load %arg1[%c0_60, %c1_61, %c0_62, %c0_63] : memref<1x36x9x128xbf16, #tpu.memory_space<vmem>>, vector<1x8x8x128xbf16>
    %53 = vector.shape_cast %52 : vector<1x8x8x128xbf16> to vector<8x8x128xbf16>
    %54 = vector.shape_cast %53 : vector<8x8x128xbf16> to vector<64x128xbf16>
    %c6 = arith.constant 6 : index
    %c0_64 = arith.constant 0 : index
    %c0_65 = arith.constant 0 : index
    %55 = vector.load %arg2[%c6, %c0_64, %c0_65] : memref<9x128x128xbf16, #tpu.memory_space<vmem>>, vector<1x128x128xbf16>
    %56 = vector.shape_cast %55 : vector<1x128x128xbf16> to vector<128x128xbf16>
    %cst_66 = arith.constant dense<0.000000e+00> : vector<64x128xf32>
    %57 = tpu.matmul %54, %56, %cst_66 {dimension_numbers = #tpu.dot_dimension_numbers<[1], [0], [0], [1], [0, 0, 1, 1], [], []>} : vector<64x128xbf16>, vector<128x128xbf16>, vector<64x128xf32> -> vector<64x128xf32>
    %c0_67 = arith.constant 0 : index
    %c0_68 = arith.constant 0 : index
    %58 = vector.load %arg6[%c0_67, %c0_68] : memref<64x128xf32, #tpu.memory_space<vmem>>, vector<64x128xf32>
    %59 = arith.addf %58, %57 : vector<64x128xf32>
    %c0_69 = arith.constant 0 : index
    %c0_70 = arith.constant 0 : index
    %60 = vector.load %arg6[%c0_69, %c0_70] : memref<64x128xf32, #tpu.memory_space<vmem>>, vector<64x128xf32>
    tpu.vector_store %arg6[%c0_69, %c0_70], %59 {strides = array<i32>} : memref<64x128xf32, #tpu.memory_space<vmem>>, vector<64x128xf32>,
    %c0_71 = arith.constant 0 : index
    %c10 = arith.constant 10 : index
    %c0_72 = arith.constant 0 : index
    %c0_73 = arith.constant 0 : index
    %61 = vector.load %arg1[%c0_71, %c10, %c0_72, %c0_73] : memref<1x36x9x128xbf16, #tpu.memory_space<vmem>>, vector<1x8x8x128xbf16>
    %62 = vector.shape_cast %61 : vector<1x8x8x128xbf16> to vector<8x8x128xbf16>
    %63 = vector.shape_cast %62 : vector<8x8x128xbf16> to vector<64x128xbf16>
    %c7 = arith.constant 7 : index
    %c0_74 = arith.constant 0 : index
    %c0_75 = arith.constant 0 : index
    %64 = vector.load %arg2[%c7, %c0_74, %c0_75] : memref<9x128x128xbf16, #tpu.memory_space<vmem>>, vector<1x128x128xbf16>
    %65 = vector.shape_cast %64 : vector<1x128x128xbf16> to vector<128x128xbf16>
    %cst_76 = arith.constant dense<0.000000e+00> : vector<64x128xf32>
    %66 = tpu.matmul %63, %65, %cst_76 {dimension_numbers = #tpu.dot_dimension_numbers<[1], [0], [0], [1], [0, 0, 1, 1], [], []>} : vector<64x128xbf16>, vector<128x128xbf16>, vector<64x128xf32> -> vector<64x128xf32>
    %c0_77 = arith.constant 0 : index
    %c0_78 = arith.constant 0 : index
    %67 = vector.load %arg6[%c0_77, %c0_78] : memref<64x128xf32, #tpu.memory_space<vmem>>, vector<64x128xf32>
    %68 = arith.addf %67, %66 : vector<64x128xf32>
    %c0_79 = arith.constant 0 : index
    %c0_80 = arith.constant 0 : index
    %69 = vector.load %arg6[%c0_79, %c0_80] : memref<64x128xf32, #tpu.memory_space<vmem>>, vector<64x128xf32>
    tpu.vector_store %arg6[%c0_79, %c0_80], %68 {strides = array<i32>} : memref<64x128xf32, #tpu.memory_space<vmem>>, vector<64x128xf32>,
    %c0_81 = arith.constant 0 : index
    %c1_82 = arith.constant 1 : index
    %c1_83 = arith.constant 1 : index
    %c0_84 = arith.constant 0 : index
    %70 = vector.load %arg1[%c0_81, %c1_82, %c1_83, %c0_84] : memref<1x36x9x128xbf16, #tpu.memory_space<vmem>>, vector<1x8x8x128xbf16>
    %71 = vector.shape_cast %70 : vector<1x8x8x128xbf16> to vector<8x8x128xbf16>
    %72 = vector.shape_cast %71 : vector<8x8x128xbf16> to vector<64x128xbf16>
    %c8 = arith.constant 8 : index
    %c0_85 = arith.constant 0 : index
    %c0_86 = arith.constant 0 : index
    %73 = vector.load %arg2[%c8, %c0_85, %c0_86] : memref<9x128x128xbf16, #tpu.memory_space<vmem>>, vector<1x128x128xbf16>
    %74 = vector.shape_cast %73 : vector<1x128x128xbf16> to vector<128x128xbf16>
    %cst_87 = arith.constant dense<0.000000e+00> : vector<64x128xf32>
    %75 = tpu.matmul %72, %74, %cst_87 {dimension_numbers = #tpu.dot_dimension_numbers<[1], [0], [0], [1], [0, 0, 1, 1], [], []>} : vector<64x128xbf16>, vector<128x128xbf16>, vector<64x128xf32> -> vector<64x128xf32>
    %c0_88 = arith.constant 0 : index
    %c0_89 = arith.constant 0 : index
    %76 = vector.load %arg6[%c0_88, %c0_89] : memref<64x128xf32, #tpu.memory_space<vmem>>, vector<64x128xf32>
    %77 = arith.addf %76, %75 : vector<64x128xf32>
    %c0_90 = arith.constant 0 : index
    %c0_91 = arith.constant 0 : index
    %78 = vector.load %arg6[%c0_90, %c0_91] : memref<64x128xf32, #tpu.memory_space<vmem>>, vector<64x128xf32>
    tpu.vector_store %arg6[%c0_90, %c0_91], %77 {strides = array<i32>} : memref<64x128xf32, #tpu.memory_space<vmem>>, vector<64x128xf32>,
    %c0_92 = arith.constant 0 : index
    %c0_93 = arith.constant 0 : index
    %79 = vector.load %arg6[%c0_92, %c0_93] : memref<64x128xf32, #tpu.memory_space<vmem>>, vector<64x128xf32>
    %c0_94 = arith.constant 0 : index
    %c0_95 = arith.constant 0 : index
    %80 = vector.load %arg3[%c0_94, %c0_95] : memref<1x128xf32, #tpu.memory_space<vmem>>, vector<1x128xf32>
    %81 = vector.broadcast %80 : vector<1x128xf32> to vector<64x128xf32>
    %82 = arith.mulf %79, %81 : vector<64x128xf32>
    %c0_96 = arith.constant 0 : index
    %c0_97 = arith.constant 0 : index
    %83 = vector.load %arg4[%c0_96, %c0_97] : memref<1x128xf32, #tpu.memory_space<vmem>>, vector<1x128xf32>
    %84 = vector.broadcast %83 : vector<1x128xf32> to vector<64x128xf32>
    %85 = arith.addf %82, %84 : vector<64x128xf32>
    %86 = arith.negf %85 : vector<64x128xf32>
    %87 = math.exp %86 : vector<64x128xf32>
    %cst_98 = arith.constant 1.000000e+00 : f32
    %88 = vector.broadcast %cst_98 : f32 to vector<64x128xf32>
    %89 = arith.addf %88, %87 : vector<64x128xf32>
    %90 = arith.divf %88, %89 : vector<64x128xf32>
    %91 = arith.mulf %85, %90 : vector<64x128xf32>
    %92 = vector.shape_cast %91 : vector<64x128xf32> to vector<8x8x128xf32>
    %93 = arith.truncf %92 : vector<8x8x128xf32> to vector<8x8x128xbf16>
    %c0_99 = arith.constant 0 : index
    %c0_100 = arith.constant 0 : index
    %c0_101 = arith.constant 0 : index
    %c0_102 = arith.constant 0 : index
    %94 = vector.load %arg5[%c0_99, %c0_100, %c0_101, %c0_102] : memref<1x8x8x128xbf16, #tpu.memory_space<vmem>>, vector<1x8x8x128xbf16>
    %95 = vector.shape_cast %94 : vector<1x8x8x128xbf16> to vector<8x8x128xbf16>
    %96 = vector.shape_cast %93 : vector<8x8x128xbf16> to vector<1x8x8x128xbf16>
    tpu.vector_store %arg5[%c0_99, %c0_100, %c0_101, %c0_102], %96 {strides = array<i32>} : memref<1x8x8x128xbf16, #tpu.memory_space<vmem>>, vector<1x8x8x128xbf16>,
    return
  }
  func.func @transform_0(%arg0: i32) -> (i32, i32, i32, i32) {
    %c0_i32 = arith.constant 0 : i32
    %c0_i32_0 = arith.constant 0 : i32
    %c0_i32_1 = arith.constant 0 : i32
    %c0_i32_2 = arith.constant 0 : i32
    return %arg0, %c0_i32, %c0_i32_0, %c0_i32_1 : i32, i32, i32, i32
  }
  func.func @transform_1(%arg0: i32) -> (i32, i32, i32) {
    %c0_i32 = arith.constant 0 : i32
    %c0_i32_0 = arith.constant 0 : i32
    %c0_i32_1 = arith.constant 0 : i32
    %c0_i32_2 = arith.constant 0 : i32
    return %c0_i32, %c0_i32_0, %c0_i32_1 : i32, i32, i32
  }
  func.func @transform_2(%arg0: i32) -> (i32, i32) {
    %c0_i32 = arith.constant 0 : i32
    %c0_i32_0 = arith.constant 0 : i32
    %c0_i32_1 = arith.constant 0 : i32
    return %c0_i32, %c0_i32_0 : i32, i32
  }
  func.func @transform_3(%arg0: i32) -> (i32, i32) {
    %c0_i32 = arith.constant 0 : i32
    %c0_i32_0 = arith.constant 0 : i32
    %c0_i32_1 = arith.constant 0 : i32
    return %c0_i32, %c0_i32_0 : i32, i32
  }
  func.func @transform_4(%arg0: i32) -> (i32, i32, i32, i32) {
    %c0_i32 = arith.constant 0 : i32
    %c0_i32_0 = arith.constant 0 : i32
    %c0_i32_1 = arith.constant 0 : i32
    %c0_i32_2 = arith.constant 0 : i32
    return %arg0, %c0_i32, %c0_i32_0, %c0_i32_1 : i32, i32, i32, i32
  }
}

module attributes {stable_mosaic.version = 11 : i64} {
  func.func @_mm_resident_kernel(%arg0: i32, %arg1: i32, %arg2: i32, %arg3: memref<1x64x128xbf16, #tpu.memory_space<vmem>>, %arg4: memref<1x128x128xbf16, #tpu.memory_space<vmem>>, %arg5: memref<1x128xf32, #tpu.memory_space<vmem>>, %arg6: memref<1x128xf32, #tpu.memory_space<vmem>>, %arg7: memref<1x64x128xbf16, #tpu.memory_space<vmem>>) attributes {dimension_semantics = [#tpu.dimension_semantics<parallel>, #tpu.dimension_semantics<parallel>, #tpu.dimension_semantics<parallel>], iteration_bounds = array<i64: 2, 1, 1>, scalar_prefetch = 0 : i64, scratch_operands = 0 : i64, tpu.core_type = #tpu.core_type<tc>, window_params = [{transform_indices = @transform_0, window_bounds = array<i64: 1, 64, 128>}, {pipeline_mode = #tpu.pipeline_mode<synchronous>, transform_indices = @transform_1, window_bounds = array<i64: 1, 128, 128>}, {transform_indices = @transform_2, window_bounds = array<i64: 1, 128>}, {transform_indices = @transform_3, window_bounds = array<i64: 1, 128>}, {transform_indices = @transform_4, window_bounds = array<i64: 1, 64, 128>}]} {
    %c0 = arith.constant 0 : index
    %c0_0 = arith.constant 0 : index
    %c0_1 = arith.constant 0 : index
    %0 = vector.load %arg3[%c0, %c0_0, %c0_1] : memref<1x64x128xbf16, #tpu.memory_space<vmem>>, vector<1x64x128xbf16>
    %1 = vector.shape_cast %0 : vector<1x64x128xbf16> to vector<64x128xbf16>
    %2 = arith.index_cast %arg2 : i32 to index
    %c0_2 = arith.constant 0 : index
    %c0_3 = arith.constant 0 : index
    %3 = vector.load %arg4[%2, %c0_2, %c0_3] : memref<1x128x128xbf16, #tpu.memory_space<vmem>>, vector<1x128x128xbf16>
    %4 = vector.shape_cast %3 : vector<1x128x128xbf16> to vector<128x128xbf16>
    %cst = arith.constant dense<0.000000e+00> : vector<64x128xf32>
    %5 = tpu.matmul %1, %4, %cst {dimension_numbers = #tpu.dot_dimension_numbers<[1], [0], [0], [1], [0, 0, 1, 1], [], []>} : vector<64x128xbf16>, vector<128x128xbf16>, vector<64x128xf32> -> vector<64x128xf32>
    %c0_4 = arith.constant 0 : index
    %c0_5 = arith.constant 0 : index
    %6 = vector.load %arg5[%c0_4, %c0_5] : memref<1x128xf32, #tpu.memory_space<vmem>>, vector<1x128xf32>
    %7 = vector.broadcast %6 : vector<1x128xf32> to vector<64x128xf32>
    %8 = arith.mulf %5, %7 : vector<64x128xf32>
    %c0_6 = arith.constant 0 : index
    %c0_7 = arith.constant 0 : index
    %9 = vector.load %arg6[%c0_6, %c0_7] : memref<1x128xf32, #tpu.memory_space<vmem>>, vector<1x128xf32>
    %10 = vector.broadcast %9 : vector<1x128xf32> to vector<64x128xf32>
    %11 = arith.addf %8, %10 : vector<64x128xf32>
    %12 = arith.truncf %11 : vector<64x128xf32> to vector<64x128xbf16>
    %c0_8 = arith.constant 0 : index
    %c0_9 = arith.constant 0 : index
    %c0_10 = arith.constant 0 : index
    %13 = vector.load %arg7[%c0_8, %c0_9, %c0_10] : memref<1x64x128xbf16, #tpu.memory_space<vmem>>, vector<1x64x128xbf16>
    %14 = vector.shape_cast %13 : vector<1x64x128xbf16> to vector<64x128xbf16>
    %15 = vector.shape_cast %12 : vector<64x128xbf16> to vector<1x64x128xbf16>
    tpu.vector_store %arg7[%c0_8, %c0_9, %c0_10], %15 {strides = array<i32>} : memref<1x64x128xbf16, #tpu.memory_space<vmem>>, vector<1x64x128xbf16>,
    return
  }
  func.func @transform_0(%arg0: i32, %arg1: i32, %arg2: i32) -> (i32, i32, i32) {
    %c0_i32 = arith.constant 0 : i32
    %c0_i32_0 = arith.constant 0 : i32
    return %arg0, %arg1, %c0_i32 : i32, i32, i32
  }
  func.func @transform_1(%arg0: i32, %arg1: i32, %arg2: i32) -> (i32, i32, i32) {
    %c0_i32 = arith.constant 0 : i32
    %c0_i32_0 = arith.constant 0 : i32
    %c0_i32_1 = arith.constant 0 : i32
    %c0_i32_2 = arith.constant 0 : i32
    return %c0_i32, %c0_i32_0, %c0_i32_1 : i32, i32, i32
  }
  func.func @transform_2(%arg0: i32, %arg1: i32, %arg2: i32) -> (i32, i32) {
    %c0_i32 = arith.constant 0 : i32
    %c0_i32_0 = arith.constant 0 : i32
    return %c0_i32, %arg2 : i32, i32
  }
  func.func @transform_3(%arg0: i32, %arg1: i32, %arg2: i32) -> (i32, i32) {
    %c0_i32 = arith.constant 0 : i32
    %c0_i32_0 = arith.constant 0 : i32
    return %c0_i32, %arg2 : i32, i32
  }
  func.func @transform_4(%arg0: i32, %arg1: i32, %arg2: i32) -> (i32, i32, i32) {
    %c0_i32 = arith.constant 0 : i32
    return %arg0, %arg1, %arg2 : i32, i32, i32
  }
}

module attributes {stable_mosaic.version = 11 : i64} {
  func.func @_mm_resident_kernel(%arg0: i32, %arg1: i32, %arg2: i32, %arg3: memref<1x64x128xbf16, #tpu.memory_space<vmem>>, %arg4: memref<1x128x128xbf16, #tpu.memory_space<vmem>>, %arg5: memref<1x128xf32, #tpu.memory_space<vmem>>, %arg6: memref<1x128xf32, #tpu.memory_space<vmem>>, %arg7: memref<1x64x128xbf16, #tpu.memory_space<vmem>>) attributes {dimension_semantics = [#tpu.dimension_semantics<parallel>, #tpu.dimension_semantics<parallel>, #tpu.dimension_semantics<parallel>], iteration_bounds = array<i64: 2, 1, 1>, scalar_prefetch = 0 : i64, scratch_operands = 0 : i64, tpu.core_type = #tpu.core_type<tc>, window_params = [{transform_indices = @transform_0, window_bounds = array<i64: 1, 64, 128>}, {pipeline_mode = #tpu.pipeline_mode<synchronous>, transform_indices = @transform_1, window_bounds = array<i64: 1, 128, 128>}, {transform_indices = @transform_2, window_bounds = array<i64: 1, 128>}, {transform_indices = @transform_3, window_bounds = array<i64: 1, 128>}, {transform_indices = @transform_4, window_bounds = array<i64: 1, 64, 128>}]} {
    %c0 = arith.constant 0 : index
    %c0_0 = arith.constant 0 : index
    %c0_1 = arith.constant 0 : index
    %0 = vector.load %arg3[%c0, %c0_0, %c0_1] : memref<1x64x128xbf16, #tpu.memory_space<vmem>>, vector<1x64x128xbf16>
    %1 = vector.shape_cast %0 : vector<1x64x128xbf16> to vector<64x128xbf16>
    %2 = arith.index_cast %arg2 : i32 to index
    %c0_2 = arith.constant 0 : index
    %c0_3 = arith.constant 0 : index
    %3 = vector.load %arg4[%2, %c0_2, %c0_3] : memref<1x128x128xbf16, #tpu.memory_space<vmem>>, vector<1x128x128xbf16>
    %4 = vector.shape_cast %3 : vector<1x128x128xbf16> to vector<128x128xbf16>
    %cst = arith.constant dense<0.000000e+00> : vector<64x128xf32>
    %5 = tpu.matmul %1, %4, %cst {dimension_numbers = #tpu.dot_dimension_numbers<[1], [0], [0], [1], [0, 0, 1, 1], [], []>} : vector<64x128xbf16>, vector<128x128xbf16>, vector<64x128xf32> -> vector<64x128xf32>
    %c0_4 = arith.constant 0 : index
    %c0_5 = arith.constant 0 : index
    %6 = vector.load %arg5[%c0_4, %c0_5] : memref<1x128xf32, #tpu.memory_space<vmem>>, vector<1x128xf32>
    %7 = vector.broadcast %6 : vector<1x128xf32> to vector<64x128xf32>
    %8 = arith.mulf %5, %7 : vector<64x128xf32>
    %c0_6 = arith.constant 0 : index
    %c0_7 = arith.constant 0 : index
    %9 = vector.load %arg6[%c0_6, %c0_7] : memref<1x128xf32, #tpu.memory_space<vmem>>, vector<1x128xf32>
    %10 = vector.broadcast %9 : vector<1x128xf32> to vector<64x128xf32>
    %11 = arith.addf %8, %10 : vector<64x128xf32>
    %12 = arith.negf %11 : vector<64x128xf32>
    %13 = math.exp %12 : vector<64x128xf32>
    %cst_8 = arith.constant 1.000000e+00 : f32
    %14 = vector.broadcast %cst_8 : f32 to vector<64x128xf32>
    %15 = arith.addf %14, %13 : vector<64x128xf32>
    %16 = arith.divf %14, %15 : vector<64x128xf32>
    %17 = arith.mulf %11, %16 : vector<64x128xf32>
    %18 = arith.truncf %17 : vector<64x128xf32> to vector<64x128xbf16>
    %c0_9 = arith.constant 0 : index
    %c0_10 = arith.constant 0 : index
    %c0_11 = arith.constant 0 : index
    %19 = vector.load %arg7[%c0_9, %c0_10, %c0_11] : memref<1x64x128xbf16, #tpu.memory_space<vmem>>, vector<1x64x128xbf16>
    %20 = vector.shape_cast %19 : vector<1x64x128xbf16> to vector<64x128xbf16>
    %21 = vector.shape_cast %18 : vector<64x128xbf16> to vector<1x64x128xbf16>
    tpu.vector_store %arg7[%c0_9, %c0_10, %c0_11], %21 {strides = array<i32>} : memref<1x64x128xbf16, #tpu.memory_space<vmem>>, vector<1x64x128xbf16>,
    return
  }
  func.func @transform_0(%arg0: i32, %arg1: i32, %arg2: i32) -> (i32, i32, i32) {
    %c0_i32 = arith.constant 0 : i32
    %c0_i32_0 = arith.constant 0 : i32
    return %arg0, %arg1, %c0_i32 : i32, i32, i32
  }
  func.func @transform_1(%arg0: i32, %arg1: i32, %arg2: i32) -> (i32, i32, i32) {
    %c0_i32 = arith.constant 0 : i32
    %c0_i32_0 = arith.constant 0 : i32
    %c0_i32_1 = arith.constant 0 : i32
    %c0_i32_2 = arith.constant 0 : i32
    return %c0_i32, %c0_i32_0, %c0_i32_1 : i32, i32, i32
  }
  func.func @transform_2(%arg0: i32, %arg1: i32, %arg2: i32) -> (i32, i32) {
    %c0_i32 = arith.constant 0 : i32
    %c0_i32_0 = arith.constant 0 : i32
    return %c0_i32, %arg2 : i32, i32
  }
  func.func @transform_3(%arg0: i32, %arg1: i32, %arg2: i32) -> (i32, i32) {
    %c0_i32 = arith.constant 0 : i32
    %c0_i32_0 = arith.constant 0 : i32
    return %c0_i32, %arg2 : i32, i32
  }
  func.func @transform_4(%arg0: i32, %arg1: i32, %arg2: i32) -> (i32, i32, i32) {
    %c0_i32 = arith.constant 0 : i32
    return %arg0, %arg1, %arg2 : i32, i32, i32
  }
}

module attributes {stable_mosaic.version = 11 : i64} {
  func.func @_dwconv_kernel(%arg0: i32, %arg1: memref<1x20x5x128xbf16, #tpu.memory_space<vmem>>, %arg2: memref<9x1x128xf32, #tpu.memory_space<vmem>>, %arg3: memref<1x128xf32, #tpu.memory_space<vmem>>, %arg4: memref<1x128xf32, #tpu.memory_space<vmem>>, %arg5: memref<1x4x4x128xbf16, #tpu.memory_space<vmem>>, %arg6: memref<1x1x128xf32, #tpu.memory_space<vmem>>, %arg7: memref<20x5x128xf32, #tpu.memory_space<vmem>>, %arg8: memref<4x4x128xf32, #tpu.memory_space<vmem>>) attributes {dimension_semantics = [#tpu.dimension_semantics<parallel>], iteration_bounds = array<i64: 2>, scalar_prefetch = 0 : i64, scratch_operands = 2 : i64, tpu.core_type = #tpu.core_type<tc>, window_params = [{transform_indices = @transform_0, window_bounds = array<i64: 1, 20, 5, 128>}, {pipeline_mode = #tpu.pipeline_mode<synchronous>, transform_indices = @transform_1, window_bounds = array<i64: 9, 1, 128>}, {pipeline_mode = #tpu.pipeline_mode<synchronous>, transform_indices = @transform_2, window_bounds = array<i64: 1, 128>}, {pipeline_mode = #tpu.pipeline_mode<synchronous>, transform_indices = @transform_3, window_bounds = array<i64: 1, 128>}, {transform_indices = @transform_4, window_bounds = array<i64: 1, 4, 4, 128>}, {transform_indices = @transform_5, window_bounds = array<i64: 1, 1, 128>}]} {
    %c0 = arith.constant 0 : index
    %c0_0 = arith.constant 0 : index
    %c0_1 = arith.constant 0 : index
    %c0_2 = arith.constant 0 : index
    %0 = vector.load %arg1[%c0, %c0_0, %c0_1, %c0_2] : memref<1x20x5x128xbf16, #tpu.memory_space<vmem>>, vector<1x20x5x128xbf16>
    %1 = vector.shape_cast %0 : vector<1x20x5x128xbf16> to vector<20x5x128xbf16>
    %2 = arith.extf %1 : vector<20x5x128xbf16> to vector<20x5x128xf32>
    %c0_3 = arith.constant 0 : index
    %c0_4 = arith.constant 0 : index
    %c0_5 = arith.constant 0 : index
    %3 = vector.load %arg7[%c0_3, %c0_4, %c0_5] : memref<20x5x128xf32, #tpu.memory_space<vmem>>, vector<20x5x128xf32>
    tpu.vector_store %arg7[%c0_3, %c0_4, %c0_5], %2 {strides = array<i32>} : memref<20x5x128xf32, #tpu.memory_space<vmem>>, vector<20x5x128xf32>,
    %c0_6 = arith.constant 0 : index
    %c0_7 = arith.constant 0 : index
    %c0_8 = arith.constant 0 : index
    %4 = vector.load %arg7[%c0_6, %c0_7, %c0_8] : memref<20x5x128xf32, #tpu.memory_space<vmem>>, vector<4x4x128xf32>
    %c0_9 = arith.constant 0 : index
    %c0_10 = arith.constant 0 : index
    %c0_11 = arith.constant 0 : index
    %5 = vector.load %arg2[%c0_9, %c0_10, %c0_11] : memref<9x1x128xf32, #tpu.memory_space<vmem>>, vector<1x1x128xf32>
    %6 = vector.shape_cast %5 : vector<1x1x128xf32> to vector<1x128xf32>
    %7 = vector.shape_cast %6 : vector<1x128xf32> to vector<1x1x128xf32>
    %8 = vector.broadcast %7 : vector<1x1x128xf32> to vector<4x4x128xf32>
    %9 = arith.mulf %4, %8 : vector<4x4x128xf32>
    %c0_12 = arith.constant 0 : index
    %c0_13 = arith.constant 0 : index
    %c0_14 = arith.constant 0 : index
    %10 = vector.load %arg8[%c0_12, %c0_13, %c0_14] : memref<4x4x128xf32, #tpu.memory_space<vmem>>, vector<4x4x128xf32>
    tpu.vector_store %arg8[%c0_12, %c0_13, %c0_14], %9 {strides = array<i32>} : memref<4x4x128xf32, #tpu.memory_space<vmem>>, vector<4x4x128xf32>,
    %c5 = arith.constant 5 : index
    %c0_15 = arith.constant 0 : index
    %c0_16 = arith.constant 0 : index
    %11 = vector.load %arg7[%c5, %c0_15, %c0_16] : memref<20x5x128xf32, #tpu.memory_space<vmem>>, vector<4x4x128xf32>
    %c1 = arith.constant 1 : index
    %c0_17 = arith.constant 0 : index
    %c0_18 = arith.constant 0 : index
    %12 = vector.load %arg2[%c1, %c0_17, %c0_18] : memref<9x1x128xf32, #tpu.memory_space<vmem>>, vector<1x1x128xf32>
    %13 = vector.shape_cast %12 : vector<1x1x128xf32> to vector<1x128xf32>
    %14 = vector.shape_cast %13 : vector<1x128xf32> to vector<1x1x128xf32>
    %15 = vector.broadcast %14 : vector<1x1x128xf32> to vector<4x4x128xf32>
    %16 = arith.mulf %11, %15 : vector<4x4x128xf32>
    %c0_19 = arith.constant 0 : index
    %c0_20 = arith.constant 0 : index
    %c0_21 = arith.constant 0 : index
    %17 = vector.load %arg8[%c0_19, %c0_20, %c0_21] : memref<4x4x128xf32, #tpu.memory_space<vmem>>, vector<4x4x128xf32>
    %18 = arith.addf %17, %16 : vector<4x4x128xf32>
    %c0_22 = arith.constant 0 : index
    %c0_23 = arith.constant 0 : index
    %c0_24 = arith.constant 0 : index
    %19 = vector.load %arg8[%c0_22, %c0_23, %c0_24] : memref<4x4x128xf32, #tpu.memory_space<vmem>>, vector<4x4x128xf32>
    tpu.vector_store %arg8[%c0_22, %c0_23, %c0_24], %18 {strides = array<i32>} : memref<4x4x128xf32, #tpu.memory_space<vmem>>, vector<4x4x128xf32>,
    %c0_25 = arith.constant 0 : index
    %c1_26 = arith.constant 1 : index
    %c0_27 = arith.constant 0 : index
    %20 = vector.load %arg7[%c0_25, %c1_26, %c0_27] : memref<20x5x128xf32, #tpu.memory_space<vmem>>, vector<4x4x128xf32>
    %c2 = arith.constant 2 : index
    %c0_28 = arith.constant 0 : index
    %c0_29 = arith.constant 0 : index
    %21 = vector.load %arg2[%c2, %c0_28, %c0_29] : memref<9x1x128xf32, #tpu.memory_space<vmem>>, vector<1x1x128xf32>
    %22 = vector.shape_cast %21 : vector<1x1x128xf32> to vector<1x128xf32>
    %23 = vector.shape_cast %22 : vector<1x128xf32> to vector<1x1x128xf32>
    %24 = vector.broadcast %23 : vector<1x1x128xf32> to vector<4x4x128xf32>
    %25 = arith.mulf %20, %24 : vector<4x4x128xf32>
    %c0_30 = arith.constant 0 : index
    %c0_31 = arith.constant 0 : index
    %c0_32 = arith.constant 0 : index
    %26 = vector.load %arg8[%c0_30, %c0_31, %c0_32] : memref<4x4x128xf32, #tpu.memory_space<vmem>>, vector<4x4x128xf32>
    %27 = arith.addf %26, %25 : vector<4x4x128xf32>
    %c0_33 = arith.constant 0 : index
    %c0_34 = arith.constant 0 : index
    %c0_35 = arith.constant 0 : index
    %28 = vector.load %arg8[%c0_33, %c0_34, %c0_35] : memref<4x4x128xf32, #tpu.memory_space<vmem>>, vector<4x4x128xf32>
    tpu.vector_store %arg8[%c0_33, %c0_34, %c0_35], %27 {strides = array<i32>} : memref<4x4x128xf32, #tpu.memory_space<vmem>>, vector<4x4x128xf32>,
    %c10 = arith.constant 10 : index
    %c0_36 = arith.constant 0 : index
    %c0_37 = arith.constant 0 : index
    %29 = vector.load %arg7[%c10, %c0_36, %c0_37] : memref<20x5x128xf32, #tpu.memory_space<vmem>>, vector<4x4x128xf32>
    %c3 = arith.constant 3 : index
    %c0_38 = arith.constant 0 : index
    %c0_39 = arith.constant 0 : index
    %30 = vector.load %arg2[%c3, %c0_38, %c0_39] : memref<9x1x128xf32, #tpu.memory_space<vmem>>, vector<1x1x128xf32>
    %31 = vector.shape_cast %30 : vector<1x1x128xf32> to vector<1x128xf32>
    %32 = vector.shape_cast %31 : vector<1x128xf32> to vector<1x1x128xf32>
    %33 = vector.broadcast %32 : vector<1x1x128xf32> to vector<4x4x128xf32>
    %34 = arith.mulf %29, %33 : vector<4x4x128xf32>
    %c0_40 = arith.constant 0 : index
    %c0_41 = arith.constant 0 : index
    %c0_42 = arith.constant 0 : index
    %35 = vector.load %arg8[%c0_40, %c0_41, %c0_42] : memref<4x4x128xf32, #tpu.memory_space<vmem>>, vector<4x4x128xf32>
    %36 = arith.addf %35, %34 : vector<4x4x128xf32>
    %c0_43 = arith.constant 0 : index
    %c0_44 = arith.constant 0 : index
    %c0_45 = arith.constant 0 : index
    %37 = vector.load %arg8[%c0_43, %c0_44, %c0_45] : memref<4x4x128xf32, #tpu.memory_space<vmem>>, vector<4x4x128xf32>
    tpu.vector_store %arg8[%c0_43, %c0_44, %c0_45], %36 {strides = array<i32>} : memref<4x4x128xf32, #tpu.memory_space<vmem>>, vector<4x4x128xf32>,
    %c15 = arith.constant 15 : index
    %c0_46 = arith.constant 0 : index
    %c0_47 = arith.constant 0 : index
    %38 = vector.load %arg7[%c15, %c0_46, %c0_47] : memref<20x5x128xf32, #tpu.memory_space<vmem>>, vector<4x4x128xf32>
    %c4 = arith.constant 4 : index
    %c0_48 = arith.constant 0 : index
    %c0_49 = arith.constant 0 : index
    %39 = vector.load %arg2[%c4, %c0_48, %c0_49] : memref<9x1x128xf32, #tpu.memory_space<vmem>>, vector<1x1x128xf32>
    %40 = vector.shape_cast %39 : vector<1x1x128xf32> to vector<1x128xf32>
    %41 = vector.shape_cast %40 : vector<1x128xf32> to vector<1x1x128xf32>
    %42 = vector.broadcast %41 : vector<1x1x128xf32> to vector<4x4x128xf32>
    %43 = arith.mulf %38, %42 : vector<4x4x128xf32>
    %c0_50 = arith.constant 0 : index
    %c0_51 = arith.constant 0 : index
    %c0_52 = arith.constant 0 : index
    %44 = vector.load %arg8[%c0_50, %c0_51, %c0_52] : memref<4x4x128xf32, #tpu.memory_space<vmem>>, vector<4x4x128xf32>
    %45 = arith.addf %44, %43 : vector<4x4x128xf32>
    %c0_53 = arith.constant 0 : index
    %c0_54 = arith.constant 0 : index
    %c0_55 = arith.constant 0 : index
    %46 = vector.load %arg8[%c0_53, %c0_54, %c0_55] : memref<4x4x128xf32, #tpu.memory_space<vmem>>, vector<4x4x128xf32>
    tpu.vector_store %arg8[%c0_53, %c0_54, %c0_55], %45 {strides = array<i32>} : memref<4x4x128xf32, #tpu.memory_space<vmem>>, vector<4x4x128xf32>,
    %c10_56 = arith.constant 10 : index
    %c1_57 = arith.constant 1 : index
    %c0_58 = arith.constant 0 : index
    %47 = vector.load %arg7[%c10_56, %c1_57, %c0_58] : memref<20x5x128xf32, #tpu.memory_space<vmem>>, vector<4x4x128xf32>
    %c5_59 = arith.constant 5 : index
    %c0_60 = arith.constant 0 : index
    %c0_61 = arith.constant 0 : index
    %48 = vector.load %arg2[%c5_59, %c0_60, %c0_61] : memref<9x1x128xf32, #tpu.memory_space<vmem>>, vector<1x1x128xf32>
    %49 = vector.shape_cast %48 : vector<1x1x128xf32> to vector<1x128xf32>
    %50 = vector.shape_cast %49 : vector<1x128xf32> to vector<1x1x128xf32>
    %51 = vector.broadcast %50 : vector<1x1x128xf32> to vector<4x4x128xf32>
    %52 = arith.mulf %47, %51 : vector<4x4x128xf32>
    %c0_62 = arith.constant 0 : index
    %c0_63 = arith.constant 0 : index
    %c0_64 = arith.constant 0 : index
    %53 = vector.load %arg8[%c0_62, %c0_63, %c0_64] : memref<4x4x128xf32, #tpu.memory_space<vmem>>, vector<4x4x128xf32>
    %54 = arith.addf %53, %52 : vector<4x4x128xf32>
    %c0_65 = arith.constant 0 : index
    %c0_66 = arith.constant 0 : index
    %c0_67 = arith.constant 0 : index
    %55 = vector.load %arg8[%c0_65, %c0_66, %c0_67] : memref<4x4x128xf32, #tpu.memory_space<vmem>>, vector<4x4x128xf32>
    tpu.vector_store %arg8[%c0_65, %c0_66, %c0_67], %54 {strides = array<i32>} : memref<4x4x128xf32, #tpu.memory_space<vmem>>, vector<4x4x128xf32>,
    %c1_68 = arith.constant 1 : index
    %c0_69 = arith.constant 0 : index
    %c0_70 = arith.constant 0 : index
    %56 = vector.load %arg7[%c1_68, %c0_69, %c0_70] : memref<20x5x128xf32, #tpu.memory_space<vmem>>, vector<4x4x128xf32>
    %c6 = arith.constant 6 : index
    %c0_71 = arith.constant 0 : index
    %c0_72 = arith.constant 0 : index
    %57 = vector.load %arg2[%c6, %c0_71, %c0_72] : memref<9x1x128xf32, #tpu.memory_space<vmem>>, vector<1x1x128xf32>
    %58 = vector.shape_cast %57 : vector<1x1x128xf32> to vector<1x128xf32>
    %59 = vector.shape_cast %58 : vector<1x128xf32> to vector<1x1x128xf32>
    %60 = vector.broadcast %59 : vector<1x1x128xf32> to vector<4x4x128xf32>
    %61 = arith.mulf %56, %60 : vector<4x4x128xf32>
    %c0_73 = arith.constant 0 : index
    %c0_74 = arith.constant 0 : index
    %c0_75 = arith.constant 0 : index
    %62 = vector.load %arg8[%c0_73, %c0_74, %c0_75] : memref<4x4x128xf32, #tpu.memory_space<vmem>>, vector<4x4x128xf32>
    %63 = arith.addf %62, %61 : vector<4x4x128xf32>
    %c0_76 = arith.constant 0 : index
    %c0_77 = arith.constant 0 : index
    %c0_78 = arith.constant 0 : index
    %64 = vector.load %arg8[%c0_76, %c0_77, %c0_78] : memref<4x4x128xf32, #tpu.memory_space<vmem>>, vector<4x4x128xf32>
    tpu.vector_store %arg8[%c0_76, %c0_77, %c0_78], %63 {strides = array<i32>} : memref<4x4x128xf32, #tpu.memory_space<vmem>>, vector<4x4x128xf32>,
    %c6_79 = arith.constant 6 : index
    %c0_80 = arith.constant 0 : index
    %c0_81 = arith.constant 0 : index
    %65 = vector.load %arg7[%c6_79, %c0_80, %c0_81] : memref<20x5x128xf32, #tpu.memory_space<vmem>>, vector<4x4x128xf32>
    %c7 = arith.constant 7 : index
    %c0_82 = arith.constant 0 : index
    %c0_83 = arith.constant 0 : index
    %66 = vector.load %arg2[%c7, %c0_82, %c0_83] : memref<9x1x128xf32, #tpu.memory_space<vmem>>, vector<1x1x128xf32>
    %67 = vector.shape_cast %66 : vector<1x1x128xf32> to vector<1x128xf32>
    %68 = vector.shape_cast %67 : vector<1x128xf32> to vector<1x1x128xf32>
    %69 = vector.broadcast %68 : vector<1x1x128xf32> to vector<4x4x128xf32>
    %70 = arith.mulf %65, %69 : vector<4x4x128xf32>
    %c0_84 = arith.constant 0 : index
    %c0_85 = arith.constant 0 : index
    %c0_86 = arith.constant 0 : index
    %71 = vector.load %arg8[%c0_84, %c0_85, %c0_86] : memref<4x4x128xf32, #tpu.memory_space<vmem>>, vector<4x4x128xf32>
    %72 = arith.addf %71, %70 : vector<4x4x128xf32>
    %c0_87 = arith.constant 0 : index
    %c0_88 = arith.constant 0 : index
    %c0_89 = arith.constant 0 : index
    %73 = vector.load %arg8[%c0_87, %c0_88, %c0_89] : memref<4x4x128xf32, #tpu.memory_space<vmem>>, vector<4x4x128xf32>
    tpu.vector_store %arg8[%c0_87, %c0_88, %c0_89], %72 {strides = array<i32>} : memref<4x4x128xf32, #tpu.memory_space<vmem>>, vector<4x4x128xf32>,
    %c1_90 = arith.constant 1 : index
    %c1_91 = arith.constant 1 : index
    %c0_92 = arith.constant 0 : index
    %74 = vector.load %arg7[%c1_90, %c1_91, %c0_92] : memref<20x5x128xf32, #tpu.memory_space<vmem>>, vector<4x4x128xf32>
    %c8 = arith.constant 8 : index
    %c0_93 = arith.constant 0 : index
    %c0_94 = arith.constant 0 : index
    %75 = vector.load %arg2[%c8, %c0_93, %c0_94] : memref<9x1x128xf32, #tpu.memory_space<vmem>>, vector<1x1x128xf32>
    %76 = vector.shape_cast %75 : vector<1x1x128xf32> to vector<1x128xf32>
    %77 = vector.shape_cast %76 : vector<1x128xf32> to vector<1x1x128xf32>
    %78 = vector.broadcast %77 : vector<1x1x128xf32> to vector<4x4x128xf32>
    %79 = arith.mulf %74, %78 : vector<4x4x128xf32>
    %c0_95 = arith.constant 0 : index
    %c0_96 = arith.constant 0 : index
    %c0_97 = arith.constant 0 : index
    %80 = vector.load %arg8[%c0_95, %c0_96, %c0_97] : memref<4x4x128xf32, #tpu.memory_space<vmem>>, vector<4x4x128xf32>
    %81 = arith.addf %80, %79 : vector<4x4x128xf32>
    %c0_98 = arith.constant 0 : index
    %c0_99 = arith.constant 0 : index
    %c0_100 = arith.constant 0 : index
    %82 = vector.load %arg8[%c0_98, %c0_99, %c0_100] : memref<4x4x128xf32, #tpu.memory_space<vmem>>, vector<4x4x128xf32>
    tpu.vector_store %arg8[%c0_98, %c0_99, %c0_100], %81 {strides = array<i32>} : memref<4x4x128xf32, #tpu.memory_space<vmem>>, vector<4x4x128xf32>,
    %c0_101 = arith.constant 0 : index
    %c0_102 = arith.constant 0 : index
    %c0_103 = arith.constant 0 : index
    %83 = vector.load %arg8[%c0_101, %c0_102, %c0_103] : memref<4x4x128xf32, #tpu.memory_space<vmem>>, vector<4x4x128xf32>
    %c0_104 = arith.constant 0 : index
    %c0_105 = arith.constant 0 : index
    %84 = vector.load %arg3[%c0_104, %c0_105] : memref<1x128xf32, #tpu.memory_space<vmem>>, vector<1x128xf32>
    %85 = vector.shape_cast %84 : vector<1x128xf32> to vector<1x1x128xf32>
    %86 = vector.broadcast %85 : vector<1x1x128xf32> to vector<4x4x128xf32>
    %87 = arith.mulf %83, %86 : vector<4x4x128xf32>
    %c0_106 = arith.constant 0 : index
    %c0_107 = arith.constant 0 : index
    %88 = vector.load %arg4[%c0_106, %c0_107] : memref<1x128xf32, #tpu.memory_space<vmem>>, vector<1x128xf32>
    %89 = vector.shape_cast %88 : vector<1x128xf32> to vector<1x1x128xf32>
    %90 = vector.broadcast %89 : vector<1x1x128xf32> to vector<4x4x128xf32>
    %91 = arith.addf %87, %90 : vector<4x4x128xf32>
    %92 = arith.negf %91 : vector<4x4x128xf32>
    %93 = math.exp %92 : vector<4x4x128xf32>
    %cst = arith.constant 1.000000e+00 : f32
    %94 = vector.broadcast %cst : f32 to vector<4x4x128xf32>
    %95 = arith.addf %94, %93 : vector<4x4x128xf32>
    %96 = arith.divf %94, %95 : vector<4x4x128xf32>
    %97 = arith.mulf %91, %96 : vector<4x4x128xf32>
    %98 = arith.truncf %97 : vector<4x4x128xf32> to vector<4x4x128xbf16>
    %c0_108 = arith.constant 0 : index
    %c0_109 = arith.constant 0 : index
    %c0_110 = arith.constant 0 : index
    %c0_111 = arith.constant 0 : index
    %99 = vector.load %arg5[%c0_108, %c0_109, %c0_110, %c0_111] : memref<1x4x4x128xbf16, #tpu.memory_space<vmem>>, vector<1x4x4x128xbf16>
    %100 = vector.shape_cast %99 : vector<1x4x4x128xbf16> to vector<4x4x128xbf16>
    %101 = vector.shape_cast %98 : vector<4x4x128xbf16> to vector<1x4x4x128xbf16>
    tpu.vector_store %arg5[%c0_108, %c0_109, %c0_110, %c0_111], %101 {strides = array<i32>} : memref<1x4x4x128xbf16, #tpu.memory_space<vmem>>, vector<1x4x4x128xbf16>,
    %cst_112 = arith.constant dense<0.000000e+00> : vector<128xf32>
    %102 = vector.multi_reduction <add>, %97, %cst_112 [0, 1] : vector<4x4x128xf32> to vector<128xf32>
    %103 = vector.shape_cast %102 : vector<128xf32> to vector<1x1x128xf32>
    %cst_113 = arith.constant 6.250000e-02 : f32
    %104 = vector.broadcast %cst_113 : f32 to vector<1x1x128xf32>
    %105 = arith.mulf %103, %104 : vector<1x1x128xf32>
    %c0_114 = arith.constant 0 : index
    %c0_115 = arith.constant 0 : index
    %c0_116 = arith.constant 0 : index
    %106 = vector.load %arg6[%c0_114, %c0_115, %c0_116] : memref<1x1x128xf32, #tpu.memory_space<vmem>>, vector<1x1x128xf32>
    tpu.vector_store %arg6[%c0_114, %c0_115, %c0_116], %105 {strides = array<i32>} : memref<1x1x128xf32, #tpu.memory_space<vmem>>, vector<1x1x128xf32>,
    return
  }
  func.func @transform_0(%arg0: i32) -> (i32, i32, i32, i32) {
    %c0_i32 = arith.constant 0 : i32
    %c0_i32_0 = arith.constant 0 : i32
    %c0_i32_1 = arith.constant 0 : i32
    %c0_i32_2 = arith.constant 0 : i32
    return %arg0, %c0_i32, %c0_i32_0, %c0_i32_1 : i32, i32, i32, i32
  }
  func.func @transform_1(%arg0: i32) -> (i32, i32, i32) {
    %c0_i32 = arith.constant 0 : i32
    %c0_i32_0 = arith.constant 0 : i32
    %c0_i32_1 = arith.constant 0 : i32
    %c0_i32_2 = arith.constant 0 : i32
    return %c0_i32, %c0_i32_0, %c0_i32_1 : i32, i32, i32
  }
  func.func @transform_2(%arg0: i32) -> (i32, i32) {
    %c0_i32 = arith.constant 0 : i32
    %c0_i32_0 = arith.constant 0 : i32
    %c0_i32_1 = arith.constant 0 : i32
    return %c0_i32, %c0_i32_0 : i32, i32
  }
  func.func @transform_3(%arg0: i32) -> (i32, i32) {
    %c0_i32 = arith.constant 0 : i32
    %c0_i32_0 = arith.constant 0 : i32
    %c0_i32_1 = arith.constant 0 : i32
    return %c0_i32, %c0_i32_0 : i32, i32
  }
  func.func @transform_4(%arg0: i32) -> (i32, i32, i32, i32) {
    %c0_i32 = arith.constant 0 : i32
    %c0_i32_0 = arith.constant 0 : i32
    %c0_i32_1 = arith.constant 0 : i32
    %c0_i32_2 = arith.constant 0 : i32
    return %arg0, %c0_i32, %c0_i32_0, %c0_i32_1 : i32, i32, i32, i32
  }
  func.func @transform_5(%arg0: i32) -> (i32, i32, i32) {
    %c0_i32 = arith.constant 0 : i32
    %c0_i32_0 = arith.constant 0 : i32
    %c0_i32_1 = arith.constant 0 : i32
    return %arg0, %c0_i32, %c0_i32_0 : i32, i32, i32
  }
}

module attributes {stable_mosaic.version = 11 : i64} {
  func.func @_se_kernel(%arg0: i32, %arg1: memref<8x1x128xf32, #tpu.memory_space<vmem>>, %arg2: memref<128x128xbf16, #tpu.memory_space<vmem>>, %arg3: memref<1x128xf32, #tpu.memory_space<vmem>>, %arg4: memref<128x128xbf16, #tpu.memory_space<vmem>>, %arg5: memref<1x128xf32, #tpu.memory_space<vmem>>, %arg6: memref<8x1x128xf32, #tpu.memory_space<vmem>>) attributes {dimension_semantics = [#tpu.dimension_semantics<arbitrary>], iteration_bounds = array<i64: 1>, scalar_prefetch = 0 : i64, scratch_operands = 0 : i64, tpu.core_type = #tpu.core_type<tc>, window_params = [{pipeline_mode = #tpu.pipeline_mode<synchronous>, transform_indices = @transform_0, window_bounds = array<i64: 8, 1, 128>}, {pipeline_mode = #tpu.pipeline_mode<synchronous>, transform_indices = @transform_1, window_bounds = array<i64: 128, 128>}, {pipeline_mode = #tpu.pipeline_mode<synchronous>, transform_indices = @transform_2, window_bounds = array<i64: 1, 128>}, {pipeline_mode = #tpu.pipeline_mode<synchronous>, transform_indices = @transform_3, window_bounds = array<i64: 128, 128>}, {pipeline_mode = #tpu.pipeline_mode<synchronous>, transform_indices = @transform_4, window_bounds = array<i64: 1, 128>}, {pipeline_mode = #tpu.pipeline_mode<synchronous>, transform_indices = @transform_5, window_bounds = array<i64: 8, 1, 128>}]} {
    %c0 = arith.constant 0 : index
    %c0_0 = arith.constant 0 : index
    %c0_1 = arith.constant 0 : index
    %0 = vector.load %arg1[%c0, %c0_0, %c0_1] : memref<8x1x128xf32, #tpu.memory_space<vmem>>, vector<8x1x128xf32>
    %1 = vector.shape_cast %0 : vector<8x1x128xf32> to vector<8x128xf32>
    %2 = arith.truncf %1 : vector<8x128xf32> to vector<8x128xbf16>
    %c0_2 = arith.constant 0 : index
    %c0_3 = arith.constant 0 : index
    %3 = vector.load %arg2[%c0_2, %c0_3] : memref<128x128xbf16, #tpu.memory_space<vmem>>, vector<128x128xbf16>
    %cst = arith.constant dense<0.000000e+00> : vector<8x128xf32>
    %4 = tpu.matmul %2, %3, %cst {dimension_numbers = #tpu.dot_dimension_numbers<[1], [0], [0], [1], [0, 0, 1, 1], [], []>} : vector<8x128xbf16>, vector<128x128xbf16>, vector<8x128xf32> -> vector<8x128xf32>
    %c0_4 = arith.constant 0 : index
    %c0_5 = arith.constant 0 : index
    %5 = vector.load %arg3[%c0_4, %c0_5] : memref<1x128xf32, #tpu.memory_space<vmem>>, vector<1x128xf32>
    %6 = vector.broadcast %5 : vector<1x128xf32> to vector<8x128xf32>
    %7 = arith.addf %4, %6 : vector<8x128xf32>
    %8 = arith.negf %7 : vector<8x128xf32>
    %9 = math.exp %8 : vector<8x128xf32>
    %cst_6 = arith.constant 1.000000e+00 : f32
    %10 = vector.broadcast %cst_6 : f32 to vector<8x128xf32>
    %11 = arith.addf %10, %9 : vector<8x128xf32>
    %12 = arith.divf %10, %11 : vector<8x128xf32>
    %13 = arith.mulf %7, %12 : vector<8x128xf32>
    %14 = arith.truncf %13 : vector<8x128xf32> to vector<8x128xbf16>
    %c0_7 = arith.constant 0 : index
    %c0_8 = arith.constant 0 : index
    %15 = vector.load %arg4[%c0_7, %c0_8] : memref<128x128xbf16, #tpu.memory_space<vmem>>, vector<128x128xbf16>
    %cst_9 = arith.constant dense<0.000000e+00> : vector<8x128xf32>
    %16 = tpu.matmul %14, %15, %cst_9 {dimension_numbers = #tpu.dot_dimension_numbers<[1], [0], [0], [1], [0, 0, 1, 1], [], []>} : vector<8x128xbf16>, vector<128x128xbf16>, vector<8x128xf32> -> vector<8x128xf32>
    %c0_10 = arith.constant 0 : index
    %c0_11 = arith.constant 0 : index
    %17 = vector.load %arg5[%c0_10, %c0_11] : memref<1x128xf32, #tpu.memory_space<vmem>>, vector<1x128xf32>
    %18 = vector.broadcast %17 : vector<1x128xf32> to vector<8x128xf32>
    %19 = arith.addf %16, %18 : vector<8x128xf32>
    %20 = arith.negf %19 : vector<8x128xf32>
    %21 = math.exp %20 : vector<8x128xf32>
    %cst_12 = arith.constant 1.000000e+00 : f32
    %22 = vector.broadcast %cst_12 : f32 to vector<8x128xf32>
    %23 = arith.addf %22, %21 : vector<8x128xf32>
    %24 = arith.divf %22, %23 : vector<8x128xf32>
    %25 = vector.shape_cast %24 : vector<8x128xf32> to vector<8x1x128xf32>
    %c0_13 = arith.constant 0 : index
    %c0_14 = arith.constant 0 : index
    %c0_15 = arith.constant 0 : index
    %26 = vector.load %arg6[%c0_13, %c0_14, %c0_15] : memref<8x1x128xf32, #tpu.memory_space<vmem>>, vector<8x1x128xf32>
    tpu.vector_store %arg6[%c0_13, %c0_14, %c0_15], %25 {strides = array<i32>} : memref<8x1x128xf32, #tpu.memory_space<vmem>>, vector<8x1x128xf32>,
    return
  }
  func.func @transform_0(%arg0: i32) -> (i32, i32, i32) {
    %c0_i32 = arith.constant 0 : i32
    %c0_i32_0 = arith.constant 0 : i32
    %c0_i32_1 = arith.constant 0 : i32
    %c0_i32_2 = arith.constant 0 : i32
    return %c0_i32, %c0_i32_0, %c0_i32_1 : i32, i32, i32
  }
  func.func @transform_1(%arg0: i32) -> (i32, i32) {
    %c0_i32 = arith.constant 0 : i32
    %c0_i32_0 = arith.constant 0 : i32
    %c0_i32_1 = arith.constant 0 : i32
    return %c0_i32, %c0_i32_0 : i32, i32
  }
  func.func @transform_2(%arg0: i32) -> (i32, i32) {
    %c0_i32 = arith.constant 0 : i32
    %c0_i32_0 = arith.constant 0 : i32
    %c0_i32_1 = arith.constant 0 : i32
    return %c0_i32, %c0_i32_0 : i32, i32
  }
  func.func @transform_3(%arg0: i32) -> (i32, i32) {
    %c0_i32 = arith.constant 0 : i32
    %c0_i32_0 = arith.constant 0 : i32
    %c0_i32_1 = arith.constant 0 : i32
    return %c0_i32, %c0_i32_0 : i32, i32
  }
  func.func @transform_4(%arg0: i32) -> (i32, i32) {
    %c0_i32 = arith.constant 0 : i32
    %c0_i32_0 = arith.constant 0 : i32
    %c0_i32_1 = arith.constant 0 : i32
    return %c0_i32, %c0_i32_0 : i32, i32
  }
  func.func @transform_5(%arg0: i32) -> (i32, i32, i32) {
    %c0_i32 = arith.constant 0 : i32
    %c0_i32_0 = arith.constant 0 : i32
    %c0_i32_1 = arith.constant 0 : i32
    %c0_i32_2 = arith.constant 0 : i32
    return %c0_i32, %c0_i32_0, %c0_i32_1 : i32, i32, i32
  }
}

module attributes {stable_mosaic.version = 11 : i64} {
  func.func @_mm_resident_kernel(%arg0: i32, %arg1: i32, %arg2: i32, %arg3: memref<1x16x128xbf16, #tpu.memory_space<vmem>>, %arg4: memref<1x128x128xbf16, #tpu.memory_space<vmem>>, %arg5: memref<1x128xf32, #tpu.memory_space<vmem>>, %arg6: memref<1x128xf32, #tpu.memory_space<vmem>>, %arg7: memref<1x1x128xbf16, #tpu.memory_space<vmem>>, %arg8: memref<1x16x128xbf16, #tpu.memory_space<vmem>>) attributes {dimension_semantics = [#tpu.dimension_semantics<parallel>, #tpu.dimension_semantics<parallel>, #tpu.dimension_semantics<parallel>], iteration_bounds = array<i64: 2, 1, 1>, scalar_prefetch = 0 : i64, scratch_operands = 0 : i64, tpu.core_type = #tpu.core_type<tc>, window_params = [{transform_indices = @transform_0, window_bounds = array<i64: 1, 16, 128>}, {pipeline_mode = #tpu.pipeline_mode<synchronous>, transform_indices = @transform_1, window_bounds = array<i64: 1, 128, 128>}, {transform_indices = @transform_2, window_bounds = array<i64: 1, 128>}, {transform_indices = @transform_3, window_bounds = array<i64: 1, 128>}, {transform_indices = @transform_4, window_bounds = array<i64: 1, 1, 128>}, {transform_indices = @transform_5, window_bounds = array<i64: 1, 16, 128>}]} {
    %c0 = arith.constant 0 : index
    %c0_0 = arith.constant 0 : index
    %c0_1 = arith.constant 0 : index
    %0 = vector.load %arg3[%c0, %c0_0, %c0_1] : memref<1x16x128xbf16, #tpu.memory_space<vmem>>, vector<1x16x128xbf16>
    %1 = vector.shape_cast %0 : vector<1x16x128xbf16> to vector<16x128xbf16>
    %c0_2 = arith.constant 0 : index
    %c0_3 = arith.constant 0 : index
    %c0_4 = arith.constant 0 : index
    %2 = vector.load %arg7[%c0_2, %c0_3, %c0_4] : memref<1x1x128xbf16, #tpu.memory_space<vmem>>, vector<1x1x128xbf16>
    %3 = vector.shape_cast %2 : vector<1x1x128xbf16> to vector<1x128xbf16>
    %4 = vector.broadcast %3 : vector<1x128xbf16> to vector<16x128xbf16>
    %5 = arith.mulf %1, %4 : vector<16x128xbf16>
    %6 = arith.index_cast %arg2 : i32 to index
    %c0_5 = arith.constant 0 : index
    %c0_6 = arith.constant 0 : index
    %7 = vector.load %arg4[%6, %c0_5, %c0_6] : memref<1x128x128xbf16, #tpu.memory_space<vmem>>, vector<1x128x128xbf16>
    %8 = vector.shape_cast %7 : vector<1x128x128xbf16> to vector<128x128xbf16>
    %cst = arith.constant dense<0.000000e+00> : vector<16x128xf32>
    %9 = tpu.matmul %5, %8, %cst {dimension_numbers = #tpu.dot_dimension_numbers<[1], [0], [0], [1], [0, 0, 1, 1], [], []>} : vector<16x128xbf16>, vector<128x128xbf16>, vector<16x128xf32> -> vector<16x128xf32>
    %c0_7 = arith.constant 0 : index
    %c0_8 = arith.constant 0 : index
    %10 = vector.load %arg5[%c0_7, %c0_8] : memref<1x128xf32, #tpu.memory_space<vmem>>, vector<1x128xf32>
    %11 = vector.broadcast %10 : vector<1x128xf32> to vector<16x128xf32>
    %12 = arith.mulf %9, %11 : vector<16x128xf32>
    %c0_9 = arith.constant 0 : index
    %c0_10 = arith.constant 0 : index
    %13 = vector.load %arg6[%c0_9, %c0_10] : memref<1x128xf32, #tpu.memory_space<vmem>>, vector<1x128xf32>
    %14 = vector.broadcast %13 : vector<1x128xf32> to vector<16x128xf32>
    %15 = arith.addf %12, %14 : vector<16x128xf32>
    %16 = arith.truncf %15 : vector<16x128xf32> to vector<16x128xbf16>
    %c0_11 = arith.constant 0 : index
    %c0_12 = arith.constant 0 : index
    %c0_13 = arith.constant 0 : index
    %17 = vector.load %arg8[%c0_11, %c0_12, %c0_13] : memref<1x16x128xbf16, #tpu.memory_space<vmem>>, vector<1x16x128xbf16>
    %18 = vector.shape_cast %17 : vector<1x16x128xbf16> to vector<16x128xbf16>
    %19 = vector.shape_cast %16 : vector<16x128xbf16> to vector<1x16x128xbf16>
    tpu.vector_store %arg8[%c0_11, %c0_12, %c0_13], %19 {strides = array<i32>} : memref<1x16x128xbf16, #tpu.memory_space<vmem>>, vector<1x16x128xbf16>,
    return
  }
  func.func @transform_0(%arg0: i32, %arg1: i32, %arg2: i32) -> (i32, i32, i32) {
    %c0_i32 = arith.constant 0 : i32
    %c0_i32_0 = arith.constant 0 : i32
    return %arg0, %arg1, %c0_i32 : i32, i32, i32
  }
  func.func @transform_1(%arg0: i32, %arg1: i32, %arg2: i32) -> (i32, i32, i32) {
    %c0_i32 = arith.constant 0 : i32
    %c0_i32_0 = arith.constant 0 : i32
    %c0_i32_1 = arith.constant 0 : i32
    %c0_i32_2 = arith.constant 0 : i32
    return %c0_i32, %c0_i32_0, %c0_i32_1 : i32, i32, i32
  }
  func.func @transform_2(%arg0: i32, %arg1: i32, %arg2: i32) -> (i32, i32) {
    %c0_i32 = arith.constant 0 : i32
    %c0_i32_0 = arith.constant 0 : i32
    return %c0_i32, %arg2 : i32, i32
  }
  func.func @transform_3(%arg0: i32, %arg1: i32, %arg2: i32) -> (i32, i32) {
    %c0_i32 = arith.constant 0 : i32
    %c0_i32_0 = arith.constant 0 : i32
    return %c0_i32, %arg2 : i32, i32
  }
  func.func @transform_4(%arg0: i32, %arg1: i32, %arg2: i32) -> (i32, i32, i32) {
    %c0_i32 = arith.constant 0 : i32
    %c0_i32_0 = arith.constant 0 : i32
    %c0_i32_1 = arith.constant 0 : i32
    return %arg0, %c0_i32, %c0_i32_0 : i32, i32, i32
  }
  func.func @transform_5(%arg0: i32, %arg1: i32, %arg2: i32) -> (i32, i32, i32) {
    %c0_i32 = arith.constant 0 : i32
    return %arg0, %arg1, %arg2 : i32, i32, i32
  }
}

module attributes {stable_mosaic.version = 11 : i64} {
  func.func @_head_gap_kernel(%arg0: i32, %arg1: i32, %arg2: memref<1x16x128xbf16, #tpu.memory_space<vmem>>, %arg3: memref<7x128x256xbf16, #tpu.memory_space<vmem>>, %arg4: memref<1x256xf32, #tpu.memory_space<vmem>>, %arg5: memref<1x256xf32, #tpu.memory_space<vmem>>, %arg6: memref<1x1x256xf32, #tpu.memory_space<vmem>>) attributes {dimension_semantics = [#tpu.dimension_semantics<parallel>, #tpu.dimension_semantics<parallel>], iteration_bounds = array<i64: 2, 7>, scalar_prefetch = 0 : i64, scratch_operands = 0 : i64, tpu.core_type = #tpu.core_type<tc>, window_params = [{transform_indices = @transform_0, window_bounds = array<i64: 1, 16, 128>}, {pipeline_mode = #tpu.pipeline_mode<synchronous>, transform_indices = @transform_1, window_bounds = array<i64: 7, 128, 256>}, {transform_indices = @transform_2, window_bounds = array<i64: 1, 256>}, {transform_indices = @transform_3, window_bounds = array<i64: 1, 256>}, {transform_indices = @transform_4, window_bounds = array<i64: 1, 1, 256>}]} {
    %c0 = arith.constant 0 : index
    %c0_0 = arith.constant 0 : index
    %c0_1 = arith.constant 0 : index
    %0 = vector.load %arg2[%c0, %c0_0, %c0_1] : memref<1x16x128xbf16, #tpu.memory_space<vmem>>, vector<1x16x128xbf16>
    %1 = vector.shape_cast %0 : vector<1x16x128xbf16> to vector<16x128xbf16>
    %2 = arith.index_cast %arg1 : i32 to index
    %c0_2 = arith.constant 0 : index
    %c0_3 = arith.constant 0 : index
    %3 = vector.load %arg3[%2, %c0_2, %c0_3] : memref<7x128x256xbf16, #tpu.memory_space<vmem>>, vector<1x128x256xbf16>
    %4 = vector.shape_cast %3 : vector<1x128x256xbf16> to vector<128x256xbf16>
    %cst = arith.constant dense<0.000000e+00> : vector<16x256xf32>
    %5 = tpu.matmul %1, %4, %cst {dimension_numbers = #tpu.dot_dimension_numbers<[1], [0], [0], [1], [0, 0, 1, 1], [], []>} : vector<16x128xbf16>, vector<128x256xbf16>, vector<16x256xf32> -> vector<16x256xf32>
    %c0_4 = arith.constant 0 : index
    %c0_5 = arith.constant 0 : index
    %6 = vector.load %arg4[%c0_4, %c0_5] : memref<1x256xf32, #tpu.memory_space<vmem>>, vector<1x256xf32>
    %7 = vector.broadcast %6 : vector<1x256xf32> to vector<16x256xf32>
    %8 = arith.mulf %5, %7 : vector<16x256xf32>
    %c0_6 = arith.constant 0 : index
    %c0_7 = arith.constant 0 : index
    %9 = vector.load %arg5[%c0_6, %c0_7] : memref<1x256xf32, #tpu.memory_space<vmem>>, vector<1x256xf32>
    %10 = vector.broadcast %9 : vector<1x256xf32> to vector<16x256xf32>
    %11 = arith.addf %8, %10 : vector<16x256xf32>
    %12 = arith.negf %11 : vector<16x256xf32>
    %13 = math.exp %12 : vector<16x256xf32>
    %cst_8 = arith.constant 1.000000e+00 : f32
    %14 = vector.broadcast %cst_8 : f32 to vector<16x256xf32>
    %15 = arith.addf %14, %13 : vector<16x256xf32>
    %16 = arith.divf %14, %15 : vector<16x256xf32>
    %17 = arith.mulf %11, %16 : vector<16x256xf32>
    %cst_9 = arith.constant dense<0.000000e+00> : vector<256xf32>
    %18 = vector.multi_reduction <add>, %17, %cst_9 [0] : vector<16x256xf32> to vector<256xf32>
    %19 = vector.shape_cast %18 : vector<256xf32> to vector<1x256xf32>
    %cst_10 = arith.constant 6.250000e-02 : f32
    %20 = vector.broadcast %cst_10 : f32 to vector<1x256xf32>
    %21 = arith.mulf %19, %20 : vector<1x256xf32>
    %22 = vector.shape_cast %21 : vector<1x256xf32> to vector<1x1x256xf32>
    %c0_11 = arith.constant 0 : index
    %c0_12 = arith.constant 0 : index
    %c0_13 = arith.constant 0 : index
    %23 = vector.load %arg6[%c0_11, %c0_12, %c0_13] : memref<1x1x256xf32, #tpu.memory_space<vmem>>, vector<1x1x256xf32>
    tpu.vector_store %arg6[%c0_11, %c0_12, %c0_13], %22 {strides = array<i32>} : memref<1x1x256xf32, #tpu.memory_space<vmem>>, vector<1x1x256xf32>,
    return
  }
  func.func @transform_0(%arg0: i32, %arg1: i32) -> (i32, i32, i32) {
    %c0_i32 = arith.constant 0 : i32
    %c0_i32_0 = arith.constant 0 : i32
    %c0_i32_1 = arith.constant 0 : i32
    return %arg0, %c0_i32, %c0_i32_0 : i32, i32, i32
  }
  func.func @transform_1(%arg0: i32, %arg1: i32) -> (i32, i32, i32) {
    %c0_i32 = arith.constant 0 : i32
    %c0_i32_0 = arith.constant 0 : i32
    %c0_i32_1 = arith.constant 0 : i32
    %c0_i32_2 = arith.constant 0 : i32
    return %c0_i32, %c0_i32_0, %c0_i32_1 : i32, i32, i32
  }
  func.func @transform_2(%arg0: i32, %arg1: i32) -> (i32, i32) {
    %c0_i32 = arith.constant 0 : i32
    %c0_i32_0 = arith.constant 0 : i32
    return %c0_i32, %arg1 : i32, i32
  }
  func.func @transform_3(%arg0: i32, %arg1: i32) -> (i32, i32) {
    %c0_i32 = arith.constant 0 : i32
    %c0_i32_0 = arith.constant 0 : i32
    return %c0_i32, %arg1 : i32, i32
  }
  func.func @transform_4(%arg0: i32, %arg1: i32) -> (i32, i32, i32) {
    %c0_i32 = arith.constant 0 : i32
    %c0_i32_0 = arith.constant 0 : i32
    return %arg0, %c0_i32, %arg1 : i32, i32, i32
  }
}

</mosaic_0001>

<bundles_post_ra>
// kernel: run.10
= control target key start
LH: loop header
LB: loop body
LE: loop exit
PB: predicated region body
PF: predicated region fallthrough
CT: control target
= control target key end

     0   :  { %s1770_s15 = smov 0   ;;  %s1772_s16 = smov 0   ;;  %s2102_s0 = inlined_call_operand.vmem [shape: bf16[2,256,128], index: 0, kind: input, shape index: {}]   ;;  %s2103_s1 = inlined_call_operand.vmem [shape: bf16[1,128,128], index: 1, kind: input, shape index: {}]   ;;  %s2104_s2 = inlined_call_operand.vmem [shape: f32[1,128], index: 2, kind: input, shape index: {}]   ;;  %s2105_s3 = inlined_call_operand.vmem [shape: f32[1,128], index: 3, kind: input, shape index: {}]   ;;  %s2106_s4 = inlined_call_operand.vmem [shape: bf16[2,256,128], index: 4, kind: output, shape index: {}]  }
   0x1   :  { %s1774_s17 = smov 0  }
   0x2 LB: > { %s33_s18 = sadd.s32 1, %s1739_s16  ;;  %p1231_p0 = scmp.ge.s32.totalorder %s1743_s17, 1  ;;  %s1743_s17 = sphi %s1774_s17, %s14_s17   ;;  %s1739_s16 = sphi %s1772_s16, %s2108_s16   ;;  %s1735_s15 = sphi %s1770_s15, %s2107_s15  }
   0x3   : > { %p35_p1 = scmp.ge.s32.totalorder %s33_s18, 2  ;;  %p208_p2 = scmp.lt.s32.totalorder %s1743_s17, 3 }
   0x5   : > { %s2110_s18 = smov (%p35_p1, %s33_s18), 0  ;;  %p209_p3 = pnand %p1231_p0, %p208_p2 }
   0x6   : > { %v1569_v0 = vld [vmem:[%s2103_s1] sm:$0xff] (!%p209_p3)   ;;  %p252_p4 = scmp.lt.s32.totalorder (!%p209_p3), %s1735_s15, 1  ;;  %v1570_v1 = vld [vmem:[%s2103_s1 + $0x8] sm:$0xff] (!%p209_p3)   ;;  %v1571_v2 = vld [vmem:[%s2103_s1 + $0x10] sm:$0xff] (!%p209_p3)  }
   0x7   : > { %212 = sbr.rel (%p209_p3) target bundleno = 343 (0x157), region = 36  ;;  %1481 = vmatprep.subr.bf16.mxu0 (!%p209_p3), %v1569_v0  ;;  %1529 = vmatprep.subr.bf16.mxu1 (!%p209_p3), %v1569_v0  ;;  %v1572_v3 = vld [vmem:[%s2103_s1 + $0x18] sm:$0xff] (!%p209_p3)   ;;  %v1573_v6 = vld [vmem:[%s2103_s1 + $0x20] sm:$0xff] (!%p209_p3)   ;;  %v1574_v7 = vld [vmem:[%s2103_s1 + $0x28] sm:$0xff] (!%p209_p3)  }
   0x8   : > { %1482 = vmatpush3.bf16.msra.mxu0 (!%p209_p3), %v1569_v0  ;;  %1537 = vmatpush3.bf16.msra.mxu1 (!%p209_p3), %v1569_v0  ;;  %v1575_v8 = vld [vmem:[%s2103_s1 + $0x30] sm:$0xff] (!%p209_p3)   ;;  %v1576_v9 = vld [vmem:[%s2103_s1 + $0x38] sm:$0xff] (!%p209_p3)   ;;  %v1841_v24 = vld [vmem:[%s2104_s2] ss:$0 sm:$0xff] (!%p209_p3) }
   0x9   : > { %1483 = vmatprep.subr.bf16.mxu0 (!%p209_p3), %v1570_v1  ;;  %1530 = vmatprep.subr.bf16.mxu1 (!%p209_p3), %v1570_v1  ;;  %v1846_v26 = vld [vmem:[%s2105_s3] ss:$0 sm:$0xff] (!%p209_p3) }
   0xc   : > { %1484 = vmatpush3.bf16.msra.mxu0 (!%p209_p3), %v1570_v1  ;;  %1538 = vmatpush3.bf16.msra.mxu1 (!%p209_p3), %v1570_v1 }
   0xd   : > { %1485 = vmatprep.subr.bf16.mxu0 (!%p209_p3), %v1571_v2  ;;  %1531 = vmatprep.subr.bf16.mxu1 (!%p209_p3), %v1571_v2 }
   0xe   : > { %s2112_s15 = smov (!%p252_p4, %s1735_s15), 1 }
   0xf   : > { %s1328_s25 = sshll.u32 %s2112_s15, 7 }
  0x10   : > { %s1805_s28 = scalar_lea.vmem %s2102_s0, %s1328_s25  ;;  %1486 = vmatpush3.bf16.msra.mxu0 %v1571_v2  ;;  %1539 = vmatpush3.bf16.msra.mxu1 %v1571_v2  ;;  %s1992_s23 = scalar_lea.vmem %s2106_s4, %s1328_s25 }
  0x11   : > { %v1577_v4 = vld [vmem:[%s1805_s28] sm:$0xff]   ;;  %1487 = vmatprep.subr.bf16.mxu0 %v1572_v3  ;;  %1532 = vmatprep.subr.bf16.mxu1 %v1572_v3  ;;  %v1579_v10 = vld [vmem:[%s1805_s28 + $0x8] sm:$0xff]   ;;  %v1581_v12 = vld [vmem:[%s1805_s28 + $0x10] sm:$0xff]  }
  0x12   : > { %v1578_v5 = vld [vmem:[%s1805_s28 + $0x40] sm:$0xff]   ;;  %1497 = vmatprep.mubr.bf16.mxu0 %v1577_v4  ;;  %v1580_v11 = vld [vmem:[%s1805_s28 + $0x48] sm:$0xff]   ;;  %v1582_v13 = vld [vmem:[%s1805_s28 + $0x50] sm:$0xff]  }
  0x13   : > { %1513 = vmatprep.mubr.bf16.mxu1 %v1578_v5  ;;  %v1583_v14 = vld [vmem:[%s1805_s28 + $0x18] sm:$0xff]   ;;  %v1585_v16 = vld [vmem:[%s1805_s28 + $0x20] sm:$0xff]   ;;  %v1587_v18 = vld [vmem:[%s1805_s28 + $0x28] sm:$0xff]  }
  0x14   : > { %1488 = vmatpush3.bf16.msra.mxu0 %v1572_v3  ;;  %1540 = vmatpush3.bf16.msra.mxu1 %v1572_v3  ;;  %v1584_v15 = vld [vmem:[%s1805_s28 + $0x58] sm:$0xff]   ;;  %v1586_v17 = vld [vmem:[%s1805_s28 + $0x60] sm:$0xff]   ;;  %v1588_v19 = vld [vmem:[%s1805_s28 + $0x68] sm:$0xff]  }
  0x15   : > { %1489 = vmatprep.subr.bf16.mxu0 %v1573_v6  ;;  %1533 = vmatprep.subr.bf16.mxu1 %v1573_v6  ;;  %v1589_v20 = vld [vmem:[%s1805_s28 + $0x30] sm:$0xff]   ;;  %v1591_v22 = vld [vmem:[%s1805_s28 + $0x38] sm:$0xff]  }
  0x16   : > { %v1590_v21 = vld [vmem:[%s1805_s28 + $0x70] sm:$0xff]   ;;  %v1592_v23 = vld [vmem:[%s1805_s28 + $0x78] sm:$0xff]  }
  0x18   : > { %1490 = vmatpush3.bf16.msra.mxu0 %v1573_v6  ;;  %1541 = vmatpush3.bf16.msra.mxu1 %v1573_v6 }
  0x19   : > { %1491 = vmatprep.subr.bf16.mxu0 %v1574_v7  ;;  %1534 = vmatprep.subr.bf16.mxu1 %v1574_v7 }
  0x1c   : > { %1492 = vmatpush3.bf16.msra.mxu0 %v1574_v7  ;;  %1542 = vmatpush3.bf16.msra.mxu1 %v1574_v7 }
  0x1d   : > { %1493 = vmatprep.subr.bf16.mxu0 %v1575_v8  ;;  %1535 = vmatprep.subr.bf16.mxu1 %v1575_v8 }
  0x20   : > { %1494 = vmatpush3.bf16.msra.mxu0 %v1575_v8  ;;  %1543 = vmatpush3.bf16.msra.mxu1 %v1575_v8 }
  0x21   : > { %1495 = vmatprep.subr.bf16.mxu0 %v1576_v9  ;;  %1536 = vmatprep.subr.bf16.mxu1 %v1576_v9 }
  0x24   : > { %1496 = vmatpush3.bf16.msra.mxu0 %v1576_v9  ;;  %1544 = vmatpush3.bf16.msra.mxu1 %v1576_v9 }
  0x27   : > { %1498 = vmatmul.mubr.bf16.vlgmr.msra.gmra.mrb[0].mxu0 %v1579_v10  ;;  %1514 = vmatmul.mubr.bf16.vlgmr.msra.gmra.mrb[0].mxu1 %v1580_v11 }
  0x28   : > { %1501 = vmatprep.mubr.bf16.mxu0 %v1581_v12  ;;  %1517 = vmatprep.mubr.bf16.mxu1 %v1582_v13 }
  0x2f   : > { %1502 = vmatmul.mubr.bf16.gmra.mrb[4].mxu0 %v1583_v14  ;;  %1518 = vmatmul.mubr.bf16.gmra.mrb[4].mxu1 %v1584_v15 }
  0x30   : > { %1505 = vmatprep.mubr.bf16.mxu0 %v1585_v16  ;;  %1521 = vmatprep.mubr.bf16.mxu1 %v1586_v17 }
  0x37   : > { %1506 = vmatmul.mubr.bf16.gmra.mrb[8].mxu0 %v1587_v18  ;;  %1522 = vmatmul.mubr.bf16.gmra.mrb[8].mxu1 %v1588_v19 }
  0x38   : > { %1509 = vmatprep.mubr.bf16.mxu0 %v1589_v20  ;;  %1525 = vmatprep.mubr.bf16.mxu1 %v1590_v21 }
  0x3f   : > { %1510 = vmatmul.mubr.bf16.gmra.mrb[12].mxu0 %v1591_v22  ;;  %1526 = vmatmul.mubr.bf16.gmra.mrb[12].mxu1 %v1592_v23 }
  0xfa   : > { %v1499_v25 = vpop.f32.mrb[0].mxu0  ;;  %v1515_v27 = vpop.f32.mrb[0].mxu1 }
  0xfb   : > { %v646_v28 = vmul.f32 %v1499_v25, %v1841_v24  ;;  %v662_v29 = vmul.f32 %v1515_v27, %v1841_v24  ;;  %v510_v30 = vpop.f32.mrb[1].mxu0  ;;  %v574_v31 = vpop.f32.mrb[1].mxu1 }
  0xfc   : > { %v644_v32 = vmul.f32 %v1841_v24, %v510_v30  ;;  %v660_v33 = vmul.f32 %v1841_v24, %v574_v31  ;;  %v1500_v34 = vpop.f32.mrb[2].mxu0  ;;  %v1516_v35 = vpop.f32.mrb[2].mxu1 }
  0xfd   : > { %v1853_v36 = vadd.f32 %v1846_v26, %v646_v28  ;;  %v1856_v37 = vadd.f32 %v1846_v26, %v662_v29  ;;  %v647_v38 = vmul.f32 %v1500_v34, %v1841_v24  ;;  %v663_v39 = vmul.f32 %v1516_v35, %v1841_v24  ;;  %v513_v40 = vpop.f32.mrb[3].mxu0  ;;  %v577_v41 = vpop.f32.mrb[3].mxu1 }
  0xfe   : > { %v1861_v42 = vadd.f32 %v1846_v26, %v644_v32  ;;  %v1864_v43 = vadd.f32 %v1846_v26, %v660_v33  ;;  %v645_v44 = vmul.f32 %v1841_v24, %v513_v40  ;;  %v661_v45 = vmul.f32 %v1841_v24, %v577_v41 }
  0xff   : > { %v1264_v46 = vmul.f32 -1.442695, %v1853_v36  ;;  %v1280_v47 = vmul.f32 -1.442695, %v1856_v37  ;;  %v1871_v48 = vadd.f32 %v1846_v26, %v647_v38  ;;  %v1874_v49 = vadd.f32 %v1846_v26, %v663_v39 }
 0x100   : > { %v1262_v50 = vmul.f32 -1.442695, %v1861_v42  ;;  %v1278_v51 = vmul.f32 -1.442695, %v1864_v43  ;;  %v1879_v52 = vadd.f32 %v1846_v26, %v645_v44  ;;  %v1882_v53 = vadd.f32 %v1846_v26, %v661_v45 }
 0x101   : > { %1593 = vpow2.f32 %v1264_v46  ;;  %v1265_v54 = vmul.f32 -1.442695, %v1871_v48  ;;  %v1281_v55 = vmul.f32 -1.442695, %v1874_v49 }
 0x102   : > { %1595 = vpow2.f32 %v1280_v47  ;;  %v1503_v56 = vpop.f32.mrb[4].mxu0  ;;  %v1519_v57 = vpop.f32.mrb[4].mxu1  ;;  %v1263_v58 = vmul.f32 -1.442695, %v1879_v52  ;;  %v1279_v63 = vmul.f32 -1.442695, %v1882_v53 }
 0x103   : > { %1597 = vpow2.f32 %v1262_v50  ;;  %v650_v59 = vmul.f32 %v1503_v56, %v1841_v24  ;;  %v666_v60 = vmul.f32 %v1519_v57, %v1841_v24  ;;  %v526_v61 = vpop.f32.mrb[5].mxu0  ;;  %v590_v62 = vpop.f32.mrb[5].mxu1 }
 0x104   : > { %1599 = vpow2.f32 %v1278_v51  ;;  %v648_v0 = vmul.f32 %v1841_v24, %v526_v61  ;;  %v664_v1 = vmul.f32 %v1841_v24, %v590_v62  ;;  %v1504_v2 = vpop.f32.mrb[6].mxu0  ;;  %v1520_v3 = vpop.f32.mrb[6].mxu1 }
 0x105   : > { %1601 = vpow2.f32 %v1265_v54  ;;  %v1893_v4 = vadd.f32 %v1846_v26, %v650_v59  ;;  %v1896_v5 = vadd.f32 %v1846_v26, %v666_v60  ;;  %v651_v6 = vmul.f32 %v1504_v2, %v1841_v24  ;;  %v529_v7 = vpop.f32.mrb[7].mxu0  ;;  %v593_v8 = vpop.f32.mrb[7].mxu1 }
 0x106   : > { %1603 = vpow2.f32 %v1281_v55  ;;  %v1900_v9 = vadd.f32 %v1846_v26, %v648_v0  ;;  %v1903_v10 = vadd.f32 %v1846_v26, %v664_v1  ;;  %v667_v11 = vmul.f32 %v1520_v3, %v1841_v24 }
 0x107   : > { %1605 = vpow2.f32 %v1263_v58  ;;  %v1268_v12 = vmul.f32 -1.442695, %v1893_v4  ;;  %v1284_v13 = vmul.f32 -1.442695, %v1896_v5  ;;  %v1909_v14 = vadd.f32 %v1846_v26, %v651_v6 }
 0x108   : > { %1607 = vpow2.f32 %v1279_v63  ;;  %v1266_v15 = vmul.f32 -1.442695, %v1900_v9  ;;  %v1282_v16 = vmul.f32 -1.442695, %v1903_v10  ;;  %v1915_v21 = vadd.f32 %v1846_v26, %v667_v11 }
 0x109   : > { %1609 = vpow2.f32 %v1268_v12  ;;  %v1269_v17 = vmul.f32 -1.442695, %v1909_v14  ;;  %v649_v28 = vmul.f32 %v1841_v24, %v529_v7  ;;  %v665_v29 = vmul.f32 %v1841_v24, %v593_v8 }
 0x10a   : > { %1611 = vpow2.f32 %v1284_v13  ;;  %v1507_v18 = vpop.f32.mrb[8].mxu0  ;;  %v1523_v19 = vpop.f32.mrb[8].mxu1  ;;  %v1920_v44 = vmul.f32 -1.442695, %v1915_v21 }
 0x10b   : > { %v1594_v20 = vpop.eup %1593  ;;  %1613 = vpow2.f32 %v1266_v15  ;;  %v542_v22 = vpop.f32.mrb[9].mxu0  ;;  %v1923_v47 = vadd.f32 %v1846_v26, %v649_v28  ;;  %v1926_v50 = vadd.f32 %v1846_v26, %v665_v29  ;;  %v654_v55 = vmul.f32 %v1507_v18, %v1841_v24 }
 0x10c   : > { %v606_v23 = vpop.f32.mrb[9].mxu1  ;;  %v1596_v25 = vpop.eup %1595  ;;  %v813_v27 = vadd.f32 1.0, %v1594_v20  ;;  %1615 = vpow2.f32 %v1282_v16  ;;  %v670_v56 = vmul.f32 %v1523_v19, %v1841_v24  ;;  %v652_v59 = vmul.f32 %v1841_v24, %v542_v22 }
 0x10d   : > { %v1508_v30 = vpop.f32.mrb[10].mxu0  ;;  %v1524_v31 = vpop.f32.mrb[10].mxu1  ;;  %v829_v33 = vadd.f32 1.0, %v1596_v25  ;;  %1617 = vpow2.f32 %v1269_v17  ;;  %v668_v60 = vmul.f32 %v1841_v24, %v606_v23  ;;  %v1267_v11 = vmul.f32 -1.442695, %v1923_v47 }
 0x10e   : > { %v1598_v32 = vpop.eup %1597  ;;  %v545_v34 = vpop.f32.mrb[11].mxu0  ;;  %1619 = vrcp.f32 %v813_v27  ;;  %v655_v1 = vmul.f32 %v1508_v30, %v1841_v24  ;;  %v671_v2 = vmul.f32 %v1524_v31, %v1841_v24  ;;  %v1945_v18 = vadd.f32 %v1846_v26, %v654_v55 }
 0x10f   : > { %v1600_v35 = vpop.eup %1599  ;;  %v811_v38 = vadd.f32 1.0, %v1598_v32  ;;  %v609_v39 = vpop.f32.mrb[11].mxu1  ;;  %1621 = vrcp.f32 %v829_v33  ;;  %v653_v12 = vmul.f32 %v1841_v24, %v545_v34  ;;  %v1948_v19 = vadd.f32 %v1846_v26, %v670_v56 }
 0x110   : > { %v1602_v40 = vpop.eup %1601  ;;  %v827_v41 = vadd.f32 1.0, %v1600_v35  ;;  %v1955_v27 = vadd.f32 %v1846_v26, %v652_v59  ;;  %v1958_v28 = vadd.f32 %v1846_v26, %v668_v60  ;;  %v1961_v31 = vadd.f32 %v1846_v26, %v655_v1 }
 0x111   : > { %v1604_v45 = vpop.eup %1603  ;;  %1623 = vrcp.f32 %v811_v38  ;;  %v814_v46 = vadd.f32 1.0, %v1602_v40  ;;  %v1964_v32 = vadd.f32 %v1846_v26, %v671_v2  ;;  %v1967_v35 = vadd.f32 %v1846_v26, %v653_v12 }
 0x112   : > { %v1606_v51 = vpop.eup %1605  ;;  %1625 = vrcp.f32 %v827_v41  ;;  %v830_v54 = vadd.f32 1.0, %v1604_v45  ;;  %v1511_v61 = vpop.f32.mrb[12].mxu0  ;;  %v669_v38 = vmul.f32 %v1841_v24, %v609_v39  ;;  %v1283_v41 = vmul.f32 -1.442695, %v1926_v50 }
 0x113   : > { %v1608_v57 = vpop.eup %1607  ;;  %1627 = vrcp.f32 %v814_v46  ;;  %v812_v58 = vadd.f32 1.0, %v1606_v51  ;;  %v1527_v62 = vpop.f32.mrb[12].mxu1  ;;  %v1272_v45 = vmul.f32 -1.442695, %v1945_v18  ;;  %v1288_v51 = vmul.f32 -1.442695, %v1948_v19 }
 0x114   : > { %v1610_v63 = vpop.eup %1609  ;;  %1629 = vrcp.f32 %v830_v54  ;;  %v828_v0 = vadd.f32 1.0, %v1608_v57  ;;  %v1934_v3 = vpop.f32.mrb[13].mxu0  ;;  %v658_v54 = vmul.f32 %v1511_v61, %v1841_v24  ;;  %v674_v55 = vmul.f32 %v1527_v62, %v1841_v24 }
 0x115   : > { %v1936_v6 = vpop.f32.mrb[13].mxu1  ;;  %v1612_v7 = vpop.eup %1611  ;;  %1631 = vrcp.f32 %v812_v58  ;;  %v817_v8 = vadd.f32 1.0, %v1610_v63  ;;  %v1270_v39 = vmul.f32 -1.442695, %v1955_v27  ;;  %v1286_v57 = vmul.f32 -1.442695, %v1958_v28 }
 0x116   : > { %v1940_v13 = vpop.f32.mrb[14].mxu0  ;;  %v1942_v15 = vpop.f32.mrb[14].mxu1  ;;  %1633 = vrcp.f32 %v828_v0  ;;  %v833_v17 = vadd.f32 1.0, %v1612_v7  ;;  %v1273_v58 = vmul.f32 -1.442695, %v1961_v31  ;;  %v1982_v61 = vadd.f32 %v1846_v26, %v669_v38 }
 0x117   : > { %v1614_v16 = vpop.eup %1613  ;;  %v1950_v20 = vpop.f32.mrb[15].mxu0  ;;  %1635 = vrcp.f32 %v817_v8  ;;  %v1289_v60 = vmul.f32 -1.442695, %v1964_v32  ;;  %v1271_v63 = vmul.f32 -1.442695, %v1967_v35  ;;  %v1996_v8 = vadd.f32 %v1846_v26, %v658_v54 }
 0x118   : > { %v1952_v22 = vpop.f32.mrb[15].mxu1  ;;  %v1616_v23 = vpop.eup %1615  ;;  %v815_v25 = vadd.f32 1.0, %v1614_v16  ;;  %1637 = vrcp.f32 %v833_v17 }
 0x119   : > { %v1618_v29 = vpop.eup %1617  ;;  %v831_v30 = vadd.f32 1.0, %v1616_v23 }
 0x11a   : > { %v1620_v33 = vpop.eup %1619  ;;  %1639 = vrcp.f32 %v815_v25  ;;  %v818_v34 = vadd.f32 1.0, %v1618_v29 }
 0x11b   : > { %v1622_v40 = vpop.eup %1621  ;;  %1641 = vrcp.f32 %v831_v30  ;;  %v909_v0 = vmul.f32 %v1620_v33, %v1853_v36  ;;  %v1999_v36 = vadd.f32 %v1846_v26, %v674_v55  ;;  %v1276_v33 = vmul.f32 -1.442695, %v1996_v8 }
 0x11c   : > { %v1624_v46 = vpop.eup %1623  ;;  %1643 = vrcp.f32 %v818_v34 }
 0x11d   : > { %v1626_v56 = vpop.eup %1625  ;;  %1645 = vpow2.f32 %v1920_v44  ;;  %v925_v44 = vmul.f32 %v1622_v40, %v1856_v37 }
 0x11e   : > { %v1628_v59 = vpop.eup %1627  ;;  %1647 = vpow2.f32 %v1267_v11  ;;  %v923_v17 = vmul.f32 %v1626_v56, %v1864_v43 }
 0x11f   : > { %v1630_v62 = vpop.eup %1629  ;;  %v910_v1 = vmul.f32 %v1628_v59, %v1871_v48  ;;  %1649 = vpow2.f32 %v1283_v41  ;;  %v907_v48 = vmul.f32 %v1624_v46, %v1861_v42  ;;  %v1287_v42 = vmul.f32 -1.442695, %v1982_v61 }
 0x120   : > { %v1632_v2 = vpop.eup %1631  ;;  %v926_v7 = vmul.f32 %v1630_v62, %v1874_v49  ;;  %1651 = vpow2.f32 %v1272_v45 }
 0x121   : > { %v1634_v37 = vpop.eup %1633  ;;  %v1370_v11 = vpack.c.bf16 %v910_v1, %v909_v0  ;;  %v908_v12 = vmul.f32 %v1632_v2, %v1879_v52  ;;  %1653 = vpow2.f32 %v1288_v51  ;;  %v659_v0 = vmul.f32 %v1940_v13, %v1841_v24 }
 0x122   : > { %v1636_v16 = vpop.eup %1635  ;;  %v1410_v49 = vpack.c.bf16 %v926_v7, %v925_v44  ;;  %v924_v23 = vmul.f32 %v1634_v37, %v1882_v53  ;;  %1655 = vpow2.f32 %v1270_v39  ;;  %v1292_v53 = vmul.f32 -1.442695, %v1999_v36 }
 0x123   : > { %v2005_v25 = vpop.eup %1637  ;;  %1442 = vst [vmem:[%s1992_s23 + $0x8] sm:$0xff] %v1370_v11   ;;  %v1365_v29 = vpack.c.bf16 %v908_v12, %v907_v48  ;;  %1657 = vpow2.f32 %v1286_v57  ;;  %v913_v40 = vmul.f32 %v1636_v16, %v1893_v4  ;;  %v656_v4 = vmul.f32 %v1841_v24, %v1934_v3 }
 0x124   : > { %v2009_v30 = vpop.eup %1639  ;;  %1450 = vst [vmem:[%s1992_s23 + $0x48] sm:$0xff] %v1410_v49   ;;  %v1405_v52 = vpack.c.bf16 %v924_v23, %v923_v17  ;;  %1659 = vpow2.f32 %v1273_v58  ;;  %v675_v2 = vmul.f32 %v1942_v15, %v1841_v24  ;;  %v673_v12 = vmul.f32 %v1841_v24, %v1952_v22 }
 0x125   : > { %v2013_v43 = vpop.eup %1641  ;;  %1366 = vst [vmem:[%s1992_s23] sm:$0xff] %v1365_v29   ;;  %1661 = vpow2.f32 %v1289_v60  ;;  %v672_v60 = vmul.f32 %v1841_v24, %v1936_v6  ;;  %v2030_v37 = vadd.f32 %v1846_v26, %v656_v4  ;;  %v657_v6 = vmul.f32 %v1841_v24, %v1950_v20 }
 0x126   : > { %v1644_v34 = vpop.eup %1643  ;;  %1449 = vst [vmem:[%s1992_s23 + $0x40] sm:$0xff] %v1405_v52   ;;  %1663 = vpow2.f32 %v1271_v63  ;;  %v2040_v17 = vadd.f32 %v1846_v26, %v659_v0  ;;  %v2043_v20 = vadd.f32 %v1846_v26, %v675_v2 }
 0x127   : > { %v1646_v38 = vpop.eup %1645  ;;  %v914_v41 = vmul.f32 %v1644_v34, %v1909_v14  ;;  %1665 = vpow2.f32 %v1287_v42  ;;  %v2035_v13 = vadd.f32 %v1846_v26, %v672_v60  ;;  %v1274_v42 = vmul.f32 -1.442695, %v2030_v37 }
 0x128   : > { %v1648_v45 = vpop.eup %1647  ;;  %v834_v46 = vadd.f32 1.0, %v1646_v38  ;;  %1667 = vpow2.f32 %v1276_v33  ;;  %v2047_v52 = vadd.f32 %v1846_v26, %v657_v6  ;;  %v2051_v33 = vadd.f32 %v1846_v26, %v673_v12 }
 0x129   : > { %v1650_v51 = vpop.eup %1649  ;;  %v1380_v54 = vpack.c.bf16 %v914_v41, %v913_v40  ;;  %v816_v55 = vadd.f32 1.0, %v1648_v45  ;;  %1669 = vpow2.f32 %v1292_v53  ;;  %v1290_v22 = vmul.f32 -1.442695, %v2035_v13 }
 0x12a   : > { %v1652_v56 = vpop.eup %1651  ;;  %1671 = vrcp.f32 %v834_v46  ;;  %v832_v39 = vadd.f32 1.0, %v1650_v51  ;;  %v929_v34 = vmul.f32 %v2005_v25, %v1896_v5  ;;  %v1277_v40 = vmul.f32 -1.442695, %v2040_v17 }
 0x12b   : > { %v1654_v57 = vpop.eup %1653  ;;  %1444 = vst [vmem:[%s1992_s23 + $0x18] sm:$0xff] %v1380_v54   ;;  %1673 = vrcp.f32 %v816_v55  ;;  %v821_v58 = vadd.f32 1.0, %v1652_v56  ;;  %v911_v45 = vmul.f32 %v2009_v30, %v1900_v9  ;;  %v927_v46 = vmul.f32 %v2013_v43, %v1903_v10 }
 0x12c   : > { %v1656_v59 = vpop.eup %1655  ;;  %1675 = vrcp.f32 %v832_v39  ;;  %v837_v14 = vadd.f32 1.0, %v1654_v57  ;;  %v1293_v26 = vmul.f32 -1.442695, %v2043_v20  ;;  %v1291_v9 = vmul.f32 -1.442695, %v2051_v33 }
 0x12d   : > { %v1658_v63 = vpop.eup %1657  ;;  %1677 = vrcp.f32 %v821_v58  ;;  %v819_v62 = vadd.f32 1.0, %v1656_v59 }
 0x12e   : > { %v1660_v44 = vpop.eup %1659  ;;  %1679 = vrcp.f32 %v837_v14  ;;  %v835_v1 = vadd.f32 1.0, %v1658_v63 }
 0x12f   : > { %v1662_v7 = vpop.eup %1661  ;;  %1681 = vrcp.f32 %v819_v62  ;;  %v822_v3 = vadd.f32 1.0, %v1660_v44 }
 0x130   : > { %v1664_v48 = vpop.eup %1663  ;;  %1683 = vrcp.f32 %v835_v1  ;;  %v838_v11 = vadd.f32 1.0, %v1662_v7 }
 0x131   : > { %v1666_v16 = vpop.eup %1665  ;;  %1685 = vrcp.f32 %v822_v3  ;;  %v820_v15 = vadd.f32 1.0, %v1664_v48 }
 0x132   : > { %v1668_v49 = vpop.eup %1667  ;;  %1687 = vrcp.f32 %v838_v11  ;;  %v836_v23 = vadd.f32 1.0, %v1666_v16 }
 0x133   : > { %v1670_v29 = vpop.eup %1669  ;;  %1689 = vrcp.f32 %v820_v15  ;;  %v825_v0 = vadd.f32 1.0, %v1668_v49 }
 0x134   : > { %v1672_v24 = vpop.eup %1671  ;;  %1691 = vrcp.f32 %v836_v23  ;;  %v841_v1 = vadd.f32 1.0, %v1670_v29 }
 0x135   : > { %v1674_v53 = vpop.eup %1673  ;;  %v930_v38 = vmul.f32 %v1672_v24, %v1915_v21  ;;  %1693 = vpow2.f32 %v1274_v42  ;;  %v1275_v21 = vmul.f32 -1.442695, %v2047_v52 }
 0x136   : > { %v1676_v41 = vpop.eup %1675  ;;  %v912_v51 = vmul.f32 %v1674_v53, %v1923_v47  ;;  %1695 = vpow2.f32 %v1290_v22 }
 0x137   : > { %v1678_v54 = vpop.eup %1677  ;;  %v1420_v55 = vpack.c.bf16 %v930_v38, %v929_v34  ;;  %v928_v5 = vmul.f32 %v1676_v41, %v1926_v50  ;;  %1697 = vpow2.f32 %v1277_v40 }
 0x138   : > { %v1680_v25 = vpop.eup %1679  ;;  %v1375_v56 = vpack.c.bf16 %v912_v51, %v911_v45  ;;  %1699 = vpow2.f32 %v1293_v26  ;;  %v917_v50 = vmul.f32 %v1678_v54, %v1945_v18 }
 0x139   : > { %v1682_v30 = vpop.eup %1681  ;;  %1452 = vst [vmem:[%s1992_s23 + $0x58] sm:$0xff] %v1420_v55   ;;  %v1415_v10 = vpack.c.bf16 %v928_v5, %v927_v46  ;;  %1701 = vpow2.f32 %v1275_v21  ;;  %v933_v4 = vmul.f32 %v1680_v25, %v1948_v19 }
 0x13a   : > { %v1684_v47 = vpop.eup %1683  ;;  %1443 = vst [vmem:[%s1992_s23 + $0x10] sm:$0xff] %v1375_v56   ;;  %1703 = vpow2.f32 %v1291_v9  ;;  %v915_v60 = vmul.f32 %v1682_v30, %v1955_v27 }
 0x13b   : > { %v1686_v43 = vpop.eup %1685  ;;  %1451 = vst [vmem:[%s1992_s23 + $0x50] sm:$0xff] %v1415_v10   ;;  %v931_v18 = vmul.f32 %v1684_v47, %v1958_v28  ;;  %1705 = vrcp.f32 %v825_v0 }
 0x13c   : > { %v1688_v39 = vpop.eup %1687  ;;  %v918_v57 = vmul.f32 %v1686_v43, %v1961_v31  ;;  %1707 = vrcp.f32 %v841_v1 }
 0x13d   : > { %v1690_v58 = vpop.eup %1689  ;;  %v934_v59 = vmul.f32 %v1688_v39, %v1964_v32 }
 0x13e   : > { %v1692_v14 = vpop.eup %1691  ;;  %v1390_v63 = vpack.c.bf16 %v918_v57, %v917_v50  ;;  %v916_v62 = vmul.f32 %v1690_v58, %v1967_v35 }
 0x13f   : > { %v1430_v44 = vpack.c.bf16 %v934_v59, %v933_v4  ;;  %v932_v31 = vmul.f32 %v1692_v14, %v1982_v61  ;;  %v1694_v19 = vpop.eup %1693 }
 0x140   : > { %1446 = vst [vmem:[%s1992_s23 + $0x28] sm:$0xff] %v1390_v63   ;;  %v1385_v2 = vpack.c.bf16 %v916_v62, %v915_v60  ;;  %v1696_v7 = vpop.eup %1695  ;;  %v823_v27 = vadd.f32 1.0, %v1694_v19 }
 0x141   : > { %1454 = vst [vmem:[%s1992_s23 + $0x68] sm:$0xff] %v1430_v44   ;;  %v1425_v32 = vpack.c.bf16 %v932_v31, %v931_v18  ;;  %v1698_v3 = vpop.eup %1697  ;;  %v839_v35 = vadd.f32 1.0, %v1696_v7 }
 0x142   : > { %1445 = vst [vmem:[%s1992_s23 + $0x20] sm:$0xff] %v1385_v2   ;;  %v1700_v6 = vpop.eup %1699  ;;  %1709 = vrcp.f32 %v823_v27  ;;  %v826_v28 = vadd.f32 1.0, %v1698_v3 }
 0x143   : > { %1453 = vst [vmem:[%s1992_s23 + $0x60] sm:$0xff] %v1425_v32   ;;  %v1702_v48 = vpop.eup %1701  ;;  %1711 = vrcp.f32 %v839_v35  ;;  %v842_v61 = vadd.f32 1.0, %v1700_v6 }
 0x144   : > { %v1704_v11 = vpop.eup %1703  ;;  %1713 = vrcp.f32 %v826_v28  ;;  %v824_v12 = vadd.f32 1.0, %v1702_v48 }
 0x145   : > { %1715 = vrcp.f32 %v842_v61  ;;  %v840_v16 = vadd.f32 1.0, %v1704_v11  ;;  %v1706_v15 = vpop.eup %1705 }
 0x146   : > { %1717 = vrcp.f32 %v824_v12  ;;  %v1708_v49 = vpop.eup %1707  ;;  %v921_v22 = vmul.f32 %v1706_v15, %v1996_v8 }
 0x147   : > { %1719 = vrcp.f32 %v840_v16  ;;  %v937_v38 = vmul.f32 %v1708_v49, %v1999_v36 }
 0x14c   : > { %v1710_v23 = vpop.eup %1709 }
 0x14d   : > { %v1712_v29 = vpop.eup %1711  ;;  %v919_v45 = vmul.f32 %v1710_v23, %v2030_v37 }
 0x14e   : > { %v1714_v42 = vpop.eup %1713  ;;  %v935_v26 = vmul.f32 %v1712_v29, %v2035_v13 }
 0x14f   : > { %v1716_v24 = vpop.eup %1715  ;;  %v922_v53 = vmul.f32 %v1714_v42, %v2040_v17 }
 0x150   : > { %v1718_v34 = vpop.eup %1717  ;;  %v938_v40 = vmul.f32 %v1716_v24, %v2043_v20 }
 0x151   : > { %v1720_v41 = vpop.eup %1719  ;;  %v1400_v46 = vpack.c.bf16 %v922_v53, %v921_v22  ;;  %v920_v51 = vmul.f32 %v1718_v34, %v2047_v52 }
 0x152   : > { %v1440_v54 = vpack.c.bf16 %v938_v40, %v937_v38  ;;  %v936_v8 = vmul.f32 %v1720_v41, %v2051_v33 }
 0x153   : > { %1448 = vst [vmem:[%s1992_s23 + $0x38] sm:$0xff] %v1400_v46   ;;  %v1395_v55 = vpack.c.bf16 %v920_v51, %v919_v45 }
 0x154   : > { %1456 = vst [vmem:[%s1992_s23 + $0x78] sm:$0xff] %v1440_v54   ;;  %v1435_v17 = vpack.c.bf16 %v936_v8, %v935_v26 }
 0x155   : > { %1447 = vst [vmem:[%s1992_s23 + $0x30] sm:$0xff] %v1395_v55  }
 0x156   : > { %1455 = vst [vmem:[%s1992_s23 + $0x70] sm:$0xff] %v1435_v17  }
 0x157 PF: > { %s14_s17 = sadd.s32 1, %s1743_s17   ;;  %s2107_s15 = smov %s1739_s16 }
 0x158   : > { %p11_p5 = scmp.ge.s32.totalorder %s14_s17, 4   ;;  %s2108_s16 = smov %s2110_s18 }
 0x15a   :  { %13 = sbr.rel (!%p11_p5) target bundleno = 2 (0x2), region = 73 }

// kernel: run.12
= control target key start
LH: loop header
LB: loop body
LE: loop exit
PB: predicated region body
PF: predicated region fallthrough
CT: control target
= control target key end

     0   :  { %s1664_s18 = smov 0   ;;  %s1666_s19 = smov 0   ;;  %s1961_s0 = inlined_call_operand.vmem [shape: bf16[2,256,128], index: 0, kind: input, shape index: {}]   ;;  %s1962_s1 = inlined_call_operand.vmem [shape: bf16[1,128,128], index: 1, kind: input, shape index: {}]   ;;  %s1963_s2 = inlined_call_operand.vmem [shape: f32[1,128], index: 2, kind: input, shape index: {}]   ;;  %s1964_s3 = inlined_call_operand.vmem [shape: f32[1,128], index: 3, kind: input, shape index: {}]   ;;  %s1965_s4 = inlined_call_operand.vmem [shape: bf16[2,256,128], index: 4, kind: input, shape index: {}]   ;;  %s1966_s5 = inlined_call_operand.vmem [shape: bf16[2,256,128], index: 5, kind: output, shape index: {}]  }
   0x1   :  { %s1668_s20 = smov 0  }
   0x2 LB: > { %s34_s21 = sadd.s32 1, %s1628_s19  ;;  %p1198_p0 = scmp.ge.s32.totalorder %s1632_s20, 1  ;;  %s1632_s20 = sphi %s1668_s20, %s15_s20   ;;  %s1628_s19 = sphi %s1666_s19, %s1968_s19   ;;  %s1624_s18 = sphi %s1664_s18, %s1967_s18  }
   0x3   : > { %p36_p1 = scmp.ge.s32.totalorder %s34_s21, 2  ;;  %p255_p2 = scmp.lt.s32.totalorder %s1632_s20, 3 }
   0x5   : > { %s1970_s21 = smov (%p36_p1, %s34_s21), 0  ;;  %p256_p3 = pnand %p1198_p0, %p255_p2 }
   0x6   : > { %v1586_v0 = vld [vmem:[%s1962_s1] sm:$0xff] (!%p256_p3)   ;;  %p313_p4 = scmp.lt.s32.totalorder (!%p256_p3), %s1624_s18, 1  ;;  %v1587_v1 = vld [vmem:[%s1962_s1 + $0x8] sm:$0xff] (!%p256_p3)   ;;  %v1588_v2 = vld [vmem:[%s1962_s1 + $0x10] sm:$0xff] (!%p256_p3)  }
   0x7   : > { %259 = sbr.rel (%p256_p3) target bundleno = 288 (0x120), region = 40  ;;  %1498 = vmatprep.subr.bf16.mxu0 (!%p256_p3), %v1586_v0  ;;  %1546 = vmatprep.subr.bf16.mxu1 (!%p256_p3), %v1586_v0  ;;  %v1589_v3 = vld [vmem:[%s1962_s1 + $0x18] sm:$0xff] (!%p256_p3)   ;;  %v1590_v6 = vld [vmem:[%s1962_s1 + $0x20] sm:$0xff] (!%p256_p3)   ;;  %v1591_v7 = vld [vmem:[%s1962_s1 + $0x28] sm:$0xff] (!%p256_p3)  }
   0x8   : > { %1499 = vmatpush3.bf16.msra.mxu0 (!%p256_p3), %v1586_v0  ;;  %1554 = vmatpush3.bf16.msra.mxu1 (!%p256_p3), %v1586_v0  ;;  %v1592_v8 = vld [vmem:[%s1962_s1 + $0x30] sm:$0xff] (!%p256_p3)   ;;  %v1593_v9 = vld [vmem:[%s1962_s1 + $0x38] sm:$0xff] (!%p256_p3)   ;;  %v1767_v36 = vld [vmem:[%s1963_s2] ss:$0 sm:$0xff] (!%p256_p3) }
   0x9   : > { %1500 = vmatprep.subr.bf16.mxu0 (!%p256_p3), %v1587_v1  ;;  %1547 = vmatprep.subr.bf16.mxu1 (!%p256_p3), %v1587_v1  ;;  %v1792_v50 = vld [vmem:[%s1964_s3] ss:$0 sm:$0xff] (!%p256_p3) }
   0xc   : > { %1501 = vmatpush3.bf16.msra.mxu0 (!%p256_p3), %v1587_v1  ;;  %1555 = vmatpush3.bf16.msra.mxu1 (!%p256_p3), %v1587_v1 }
   0xd   : > { %1502 = vmatprep.subr.bf16.mxu0 (!%p256_p3), %v1588_v2  ;;  %1548 = vmatprep.subr.bf16.mxu1 (!%p256_p3), %v1588_v2 }
   0xe   : > { %s1972_s18 = smov (!%p313_p4, %s1624_s18), 1 }
   0xf   : > { %s1691_s28 = sshll.u32 %s1972_s18, 7 }
  0x10   : > { %s1697_s6 = scalar_lea.vmem %s1961_s0, %s1691_s28  ;;  %1503 = vmatpush3.bf16.msra.mxu0 %v1588_v2  ;;  %1556 = vmatpush3.bf16.msra.mxu1 %v1588_v2  ;;  %s1734_s22 = scalar_lea.vmem %s1965_s4, %s1691_s28 }
  0x11   : > { %v1594_v4 = vld [vmem:[%s1697_s6] sm:$0xff]   ;;  %1504 = vmatprep.subr.bf16.mxu0 %v1589_v3  ;;  %1549 = vmatprep.subr.bf16.mxu1 %v1589_v3  ;;  %v1596_v10 = vld [vmem:[%s1697_s6 + $0x8] sm:$0xff]   ;;  %v1598_v12 = vld [vmem:[%s1697_s6 + $0x10] sm:$0xff]   ;;  %s1826_s30 = scalar_lea.vmem %s1966_s5, %s1691_s28 }
  0x12   : > { %v1595_v5 = vld [vmem:[%s1697_s6 + $0x40] sm:$0xff]   ;;  %1514 = vmatprep.mubr.bf16.mxu0 %v1594_v4  ;;  %v1597_v11 = vld [vmem:[%s1697_s6 + $0x48] sm:$0xff]   ;;  %v1599_v13 = vld [vmem:[%s1697_s6 + $0x50] sm:$0xff]  }
  0x13   : > { %1530 = vmatprep.mubr.bf16.mxu1 %v1595_v5  ;;  %v1600_v14 = vld [vmem:[%s1697_s6 + $0x18] sm:$0xff]   ;;  %v1602_v16 = vld [vmem:[%s1697_s6 + $0x20] sm:$0xff]   ;;  %v1604_v18 = vld [vmem:[%s1697_s6 + $0x28] sm:$0xff]  }
  0x14   : > { %1505 = vmatpush3.bf16.msra.mxu0 %v1589_v3  ;;  %1557 = vmatpush3.bf16.msra.mxu1 %v1589_v3  ;;  %v1601_v15 = vld [vmem:[%s1697_s6 + $0x58] sm:$0xff]   ;;  %v1603_v17 = vld [vmem:[%s1697_s6 + $0x60] sm:$0xff]   ;;  %v1605_v19 = vld [vmem:[%s1697_s6 + $0x68] sm:$0xff]  }
  0x15   : > { %1506 = vmatprep.subr.bf16.mxu0 %v1590_v6  ;;  %1550 = vmatprep.subr.bf16.mxu1 %v1590_v6  ;;  %v1606_v20 = vld [vmem:[%s1697_s6 + $0x30] sm:$0xff]   ;;  %v1608_v22 = vld [vmem:[%s1697_s6 + $0x38] sm:$0xff]   ;;  %v1737_v24 = vld [vmem:[%s1734_s22 + $0x8] sm:$0xff]  }
  0x16   : > { %v1607_v21 = vld [vmem:[%s1697_s6 + $0x70] sm:$0xff]   ;;  %v1609_v23 = vld [vmem:[%s1697_s6 + $0x78] sm:$0xff]   ;;  %v1740_v25 = vld [vmem:[%s1734_s22 + $0x48] sm:$0xff]   ;;  %v1306_v32 = vunpack.c.l.bf16 %v1737_v24  ;;  %v1307_v37 = vunpack.c.h.bf16 %v1737_v24 }
  0x17   : > { %v1743_v26 = vld [vmem:[%s1734_s22] sm:$0xff]   ;;  %v1749_v28 = vld [vmem:[%s1734_s22 + $0x18] sm:$0xff]   ;;  %v1755_v30 = vld [vmem:[%s1734_s22 + $0x10] sm:$0xff]   ;;  %v1338_v33 = vunpack.c.l.bf16 %v1740_v25  ;;  %v1339_v38 = vunpack.c.h.bf16 %v1740_v25 }
  0x18   : > { %1507 = vmatpush3.bf16.msra.mxu0 %v1590_v6  ;;  %1558 = vmatpush3.bf16.msra.mxu1 %v1590_v6  ;;  %v1746_v27 = vld [vmem:[%s1734_s22 + $0x40] sm:$0xff]   ;;  %v1752_v29 = vld [vmem:[%s1734_s22 + $0x58] sm:$0xff]   ;;  %v1758_v31 = vld [vmem:[%s1734_s22 + $0x50] sm:$0xff]   ;;  %v1302_v34 = vunpack.c.l.bf16 %v1743_v26  ;;  %v1303_v39 = vunpack.c.h.bf16 %v1743_v26  ;;  %v1314_v43 = vunpack.c.l.bf16 %v1749_v28  ;;  %v1310_v45 = vunpack.c.l.bf16 %v1755_v30 }
  0x19   : > { %1508 = vmatprep.subr.bf16.mxu0 %v1591_v7  ;;  %1551 = vmatprep.subr.bf16.mxu1 %v1591_v7  ;;  %v1334_v35 = vunpack.c.l.bf16 %v1746_v27  ;;  %v1335_v40 = vunpack.c.h.bf16 %v1746_v27  ;;  %v1774_v41 = vld [vmem:[%s1734_s22 + $0x28] sm:$0xff]   ;;  %v1346_v44 = vunpack.c.l.bf16 %v1752_v29  ;;  %v1342_v46 = vunpack.c.l.bf16 %v1758_v31  ;;  %v1784_v47 = vld [vmem:[%s1734_s22 + $0x20] sm:$0xff]  }
  0x1a   : > { %v1777_v42 = vld [vmem:[%s1734_s22 + $0x68] sm:$0xff]   ;;  %v1787_v48 = vld [vmem:[%s1734_s22 + $0x60] sm:$0xff]   ;;  %v1315_v52 = vunpack.c.h.bf16 %v1749_v28  ;;  %v1347_v53 = vunpack.c.h.bf16 %v1752_v29  ;;  %v1311_v54 = vunpack.c.h.bf16 %v1755_v30  ;;  %v1343_v55 = vunpack.c.h.bf16 %v1758_v31 }
  0x1b   : > { %v1322_v60 = vunpack.c.l.bf16 %v1774_v41  ;;  %v1354_v61 = vunpack.c.l.bf16 %v1777_v42  ;;  %v1318_v2 = vunpack.c.l.bf16 %v1784_v47  ;;  %v1350_v3 = vunpack.c.l.bf16 %v1787_v48 }
  0x1c   : > { %1509 = vmatpush3.bf16.msra.mxu0 %v1591_v7  ;;  %1559 = vmatpush3.bf16.msra.mxu1 %v1591_v7 }
  0x1d   : > { %1510 = vmatprep.subr.bf16.mxu0 %v1592_v8  ;;  %1552 = vmatprep.subr.bf16.mxu1 %v1592_v8 }
  0x20   : > { %1511 = vmatpush3.bf16.msra.mxu0 %v1592_v8  ;;  %1560 = vmatpush3.bf16.msra.mxu1 %v1592_v8 }
  0x21   : > { %1512 = vmatprep.subr.bf16.mxu0 %v1593_v9  ;;  %1553 = vmatprep.subr.bf16.mxu1 %v1593_v9 }
  0x24   : > { %1513 = vmatpush3.bf16.msra.mxu0 %v1593_v9  ;;  %1561 = vmatpush3.bf16.msra.mxu1 %v1593_v9 }
  0x27   : > { %1515 = vmatmul.mubr.bf16.vlgmr.msra.gmra.mrb[0].mxu0 %v1596_v10  ;;  %1531 = vmatmul.mubr.bf16.vlgmr.msra.gmra.mrb[0].mxu1 %v1597_v11 }
  0x28   : > { %1518 = vmatprep.mubr.bf16.mxu0 %v1598_v12  ;;  %1534 = vmatprep.mubr.bf16.mxu1 %v1599_v13 }
  0x2f   : > { %1519 = vmatmul.mubr.bf16.gmra.mrb[4].mxu0 %v1600_v14  ;;  %1535 = vmatmul.mubr.bf16.gmra.mrb[4].mxu1 %v1601_v15 }
  0x30   : > { %1522 = vmatprep.mubr.bf16.mxu0 %v1602_v16  ;;  %1538 = vmatprep.mubr.bf16.mxu1 %v1603_v17  ;;  %v1323_v16 = vunpack.c.h.bf16 %v1774_v41  ;;  %v1355_v17 = vunpack.c.h.bf16 %v1777_v42 }
  0x37   : > { %1523 = vmatmul.mubr.bf16.gmra.mrb[8].mxu0 %v1604_v18  ;;  %1539 = vmatmul.mubr.bf16.gmra.mrb[8].mxu1 %v1605_v19 }
  0x38   : > { %1526 = vmatprep.mubr.bf16.mxu0 %v1606_v20  ;;  %1542 = vmatprep.mubr.bf16.mxu1 %v1607_v21  ;;  %v1319_v20 = vunpack.c.h.bf16 %v1784_v47  ;;  %v1351_v21 = vunpack.c.h.bf16 %v1787_v48 }
  0x3f   : > { %1527 = vmatmul.mubr.bf16.gmra.mrb[12].mxu0 %v1608_v22  ;;  %1543 = vmatmul.mubr.bf16.gmra.mrb[12].mxu1 %v1609_v23 }
  0xfa   : > { %v1516_v49 = vpop.f32.mrb[0].mxu0  ;;  %v1532_v51 = vpop.f32.mrb[0].mxu1 }
  0xfb   : > { %v720_v56 = vmul.f32 %v1516_v49, %v1767_v36  ;;  %v736_v57 = vmul.f32 %v1532_v51, %v1767_v36  ;;  %v584_v58 = vpop.f32.mrb[1].mxu0  ;;  %v648_v59 = vpop.f32.mrb[1].mxu1 }
  0xfc   : > { %v718_v62 = vmul.f32 %v1767_v36, %v584_v58  ;;  %v734_v63 = vmul.f32 %v1767_v36, %v648_v59  ;;  %v1517_v0 = vpop.f32.mrb[2].mxu0  ;;  %v1533_v1 = vpop.f32.mrb[2].mxu1 }
  0xfd   : > { %v759_v4 = vadd.f32 %v1792_v50, %v720_v56  ;;  %v775_v5 = vadd.f32 %v1792_v50, %v736_v57  ;;  %v721_v6 = vmul.f32 %v1517_v0, %v1767_v36  ;;  %v737_v7 = vmul.f32 %v1533_v1, %v1767_v36  ;;  %v587_v8 = vpop.f32.mrb[3].mxu0  ;;  %v651_v9 = vpop.f32.mrb[3].mxu1  ;;  %v1833_v0 = vld [vmem:[%s1734_s22 + $0x38] sm:$0xff]  }
  0xfe   : > { %v757_v10 = vadd.f32 %v1792_v50, %v718_v62  ;;  %v773_v11 = vadd.f32 %v1792_v50, %v734_v63  ;;  %v719_v12 = vmul.f32 %v1767_v36, %v587_v8  ;;  %v735_v13 = vmul.f32 %v1767_v36, %v651_v9  ;;  %v1836_v1 = vld [vmem:[%s1734_s22 + $0x78] sm:$0xff]  }
  0xff   : > { %v760_v14 = vadd.f32 %v1792_v50, %v721_v6  ;;  %v776_v15 = vadd.f32 %v1792_v50, %v737_v7  ;;  %v855_v22 = vadd.f32 %v1306_v32, %v759_v4  ;;  %v871_v23 = vadd.f32 %v1338_v33, %v775_v5 }
 0x100   : > { %v758_v18 = vadd.f32 %v1792_v50, %v719_v12  ;;  %v774_v19 = vadd.f32 %v1792_v50, %v735_v13  ;;  %v853_v26 = vadd.f32 %v1302_v34, %v757_v10  ;;  %v869_v27 = vadd.f32 %v1334_v35, %v773_v11  ;;  %v1845_v10 = vld [vmem:[%s1734_s22 + $0x30] sm:$0xff]  }
 0x101   : > { %v856_v24 = vadd.f32 %v1307_v37, %v760_v14  ;;  %v872_v25 = vadd.f32 %v1339_v38, %v776_v15  ;;  %v1848_v11 = vld [vmem:[%s1734_s22 + $0x70] sm:$0xff]  }
 0x102   : > { %v854_v49 = vadd.f32 %v1303_v39, %v758_v18  ;;  %v870_v51 = vadd.f32 %v1335_v40, %v774_v19  ;;  %v1520_v56 = vpop.f32.mrb[4].mxu0  ;;  %v1536_v57 = vpop.f32.mrb[4].mxu1 }
 0x103   : > { %v1372_v58 = vpack.c.bf16 %v856_v24, %v855_v22  ;;  %v1412_v32 = vpack.c.bf16 %v872_v25, %v871_v23  ;;  %v724_v33 = vmul.f32 %v1520_v56, %v1767_v36  ;;  %v740_v34 = vmul.f32 %v1536_v57, %v1767_v36  ;;  %v600_v35 = vpop.f32.mrb[5].mxu0  ;;  %v664_v37 = vpop.f32.mrb[5].mxu1 }
 0x104   : > { %v1367_v38 = vpack.c.bf16 %v854_v49, %v853_v26  ;;  %v1407_v59 = vpack.c.bf16 %v870_v51, %v869_v27  ;;  %v722_v39 = vmul.f32 %v1767_v36, %v600_v35  ;;  %v738_v40 = vmul.f32 %v1767_v36, %v664_v37  ;;  %v1521_v62 = vpop.f32.mrb[6].mxu0  ;;  %v1537_v63 = vpop.f32.mrb[6].mxu1 }
 0x105   : > { %1459 = vst [vmem:[%s1826_s30 + $0x8] sm:$0xff] %v1372_v58   ;;  %1467 = vst [vmem:[%s1826_s30 + $0x48] sm:$0xff] %v1412_v32   ;;  %v763_v4 = vadd.f32 %v1792_v50, %v724_v33  ;;  %v779_v5 = vadd.f32 %v1792_v50, %v740_v34  ;;  %v725_v6 = vmul.f32 %v1521_v62, %v1767_v36  ;;  %v603_v8 = vpop.f32.mrb[7].mxu0  ;;  %v667_v9 = vpop.f32.mrb[7].mxu1  ;;  %v1330_v22 = vunpack.c.l.bf16 %v1833_v0 }
 0x106   : > { %v741_v7 = vmul.f32 %v1537_v63, %v1767_v36  ;;  %1368 = vst [vmem:[%s1826_s30] sm:$0xff] %v1367_v38   ;;  %1466 = vst [vmem:[%s1826_s30 + $0x40] sm:$0xff] %v1407_v59   ;;  %v761_v12 = vadd.f32 %v1792_v50, %v722_v39  ;;  %v777_v13 = vadd.f32 %v1792_v50, %v738_v40  ;;  %v1362_v23 = vunpack.c.l.bf16 %v1836_v1 }
 0x107   : > { %v723_v14 = vmul.f32 %v1767_v36, %v603_v8  ;;  %v739_v15 = vmul.f32 %v1767_v36, %v667_v9  ;;  %v764_v18 = vadd.f32 %v1792_v50, %v725_v6  ;;  %v1326_v26 = vunpack.c.l.bf16 %v1845_v10 }
 0x108   : > { %v780_v19 = vadd.f32 %v1792_v50, %v741_v7  ;;  %v1358_v27 = vunpack.c.l.bf16 %v1848_v11  ;;  %v859_v49 = vadd.f32 %v1314_v43, %v763_v4  ;;  %v875_v51 = vadd.f32 %v1346_v44, %v779_v5 }
 0x109   : > { %v762_v24 = vadd.f32 %v1792_v50, %v723_v14  ;;  %v778_v25 = vadd.f32 %v1792_v50, %v739_v15  ;;  %v860_v56 = vadd.f32 %v1315_v52, %v764_v18  ;;  %v857_v58 = vadd.f32 %v1310_v45, %v761_v12 }
 0x10a   : > { %v876_v57 = vadd.f32 %v1347_v53, %v780_v19  ;;  %v873_v32 = vadd.f32 %v1342_v46, %v777_v13  ;;  %v1524_v44 = vpop.f32.mrb[8].mxu0  ;;  %v1540_v28 = vpop.f32.mrb[8].mxu1  ;;  %v1331_v12 = vunpack.c.h.bf16 %v1833_v0  ;;  %v1363_v13 = vunpack.c.h.bf16 %v1836_v1 }
 0x10b   : > { %v858_v33 = vadd.f32 %v1311_v54, %v762_v24  ;;  %v874_v43 = vadd.f32 %v1343_v55, %v778_v25  ;;  %v1382_v52 = vpack.c.bf16 %v860_v56, %v859_v49  ;;  %v728_v29 = vmul.f32 %v1524_v44, %v1767_v36  ;;  %v616_v45 = vpop.f32.mrb[9].mxu0  ;;  %v680_v35 = vpop.f32.mrb[9].mxu1 }
 0x10c   : > { %v1422_v34 = vpack.c.bf16 %v876_v57, %v875_v51  ;;  %v744_v53 = vmul.f32 %v1540_v28, %v1767_v36  ;;  %v726_v54 = vmul.f32 %v1767_v36, %v616_v45  ;;  %v742_v31 = vmul.f32 %v1767_v36, %v680_v35  ;;  %v1525_v55 = vpop.f32.mrb[10].mxu0  ;;  %v1541_v37 = vpop.f32.mrb[10].mxu1 }
 0x10d   : > { %v1377_v46 = vpack.c.bf16 %v858_v33, %v857_v58  ;;  %v1417_v30 = vpack.c.bf16 %v874_v43, %v873_v32  ;;  %1461 = vst [vmem:[%s1826_s30 + $0x18] sm:$0xff] %v1382_v52   ;;  %v767_v38 = vadd.f32 %v1792_v50, %v728_v29  ;;  %v729_v39 = vmul.f32 %v1525_v55, %v1767_v36  ;;  %v619_v62 = vpop.f32.mrb[11].mxu0  ;;  %v683_v63 = vpop.f32.mrb[11].mxu1 }
 0x10e   : > { %1469 = vst [vmem:[%s1826_s30 + $0x58] sm:$0xff] %v1422_v34   ;;  %v783_v59 = vadd.f32 %v1792_v50, %v744_v53  ;;  %v745_v40 = vmul.f32 %v1541_v37, %v1767_v36  ;;  %v765_v4 = vadd.f32 %v1792_v50, %v726_v54  ;;  %v781_v5 = vadd.f32 %v1792_v50, %v742_v31 }
 0x10f   : > { %1460 = vst [vmem:[%s1826_s30 + $0x10] sm:$0xff] %v1377_v46   ;;  %1468 = vst [vmem:[%s1826_s30 + $0x50] sm:$0xff] %v1417_v30   ;;  %v727_v6 = vmul.f32 %v1767_v36, %v619_v62  ;;  %v743_v7 = vmul.f32 %v1767_v36, %v683_v63  ;;  %v768_v8 = vadd.f32 %v1792_v50, %v729_v39  ;;  %v1327_v18 = vunpack.c.h.bf16 %v1845_v10 }
 0x110   : > { %v784_v9 = vadd.f32 %v1792_v50, %v745_v40  ;;  %v1359_v19 = vunpack.c.h.bf16 %v1848_v11  ;;  %v863_v24 = vadd.f32 %v1322_v60, %v767_v38  ;;  %v879_v25 = vadd.f32 %v1354_v61, %v783_v59 }
 0x111   : > { %v766_v14 = vadd.f32 %v1792_v50, %v727_v6  ;;  %v782_v15 = vadd.f32 %v1792_v50, %v743_v7  ;;  %v864_v49 = vadd.f32 %v1323_v16, %v768_v8  ;;  %v861_v56 = vadd.f32 %v1318_v2, %v765_v4 }
 0x112   : > { %v880_v51 = vadd.f32 %v1355_v17, %v784_v9  ;;  %v877_v57 = vadd.f32 %v1350_v3, %v781_v5  ;;  %v1528_v61 = vpop.f32.mrb[12].mxu0  ;;  %v1544_v41 = vpop.f32.mrb[12].mxu1 }
 0x113   : > { %v862_v58 = vadd.f32 %v1319_v20, %v766_v14  ;;  %v878_v60 = vadd.f32 %v1351_v21, %v782_v15  ;;  %v1392_v16 = vpack.c.bf16 %v864_v49, %v863_v24  ;;  %v732_v42 = vmul.f32 %v1528_v61, %v1767_v36  ;;  %v632_v2 = vpop.f32.mrb[13].mxu0  ;;  %v696_v33 = vpop.f32.mrb[13].mxu1 }
 0x114   : > { %v1432_v32 = vpack.c.bf16 %v880_v51, %v879_v25  ;;  %v748_v17 = vmul.f32 %v1544_v41, %v1767_v36  ;;  %v730_v20 = vmul.f32 %v1767_v36, %v632_v2  ;;  %v746_v48 = vmul.f32 %v1767_v36, %v696_v33  ;;  %v1529_v21 = vpop.f32.mrb[14].mxu0  ;;  %v1545_v43 = vpop.f32.mrb[14].mxu1 }
 0x115   : > { %v1387_v3 = vpack.c.bf16 %v862_v58, %v861_v56  ;;  %v1427_v47 = vpack.c.bf16 %v878_v60, %v877_v57  ;;  %1463 = vst [vmem:[%s1826_s30 + $0x28] sm:$0xff] %v1392_v16   ;;  %v771_v44 = vadd.f32 %v1792_v50, %v732_v42  ;;  %v733_v52 = vmul.f32 %v1529_v21, %v1767_v36  ;;  %v635_v29 = vpop.f32.mrb[15].mxu0  ;;  %v699_v53 = vpop.f32.mrb[15].mxu1 }
 0x116   : > { %1471 = vst [vmem:[%s1826_s30 + $0x68] sm:$0xff] %v1432_v32   ;;  %v787_v28 = vadd.f32 %v1792_v50, %v748_v17  ;;  %v749_v34 = vmul.f32 %v1545_v43, %v1767_v36  ;;  %v769_v45 = vadd.f32 %v1792_v50, %v730_v20  ;;  %v785_v35 = vadd.f32 %v1792_v50, %v746_v48 }
 0x117   : > { %1462 = vst [vmem:[%s1826_s30 + $0x20] sm:$0xff] %v1387_v3   ;;  %1470 = vst [vmem:[%s1826_s30 + $0x60] sm:$0xff] %v1427_v47   ;;  %v731_v46 = vmul.f32 %v1767_v36, %v635_v29  ;;  %v747_v30 = vmul.f32 %v1767_v36, %v699_v53  ;;  %v772_v54 = vadd.f32 %v1792_v50, %v733_v52 }
 0x118   : > { %v788_v31 = vadd.f32 %v1792_v50, %v749_v34  ;;  %v867_v38 = vadd.f32 %v1330_v22, %v771_v44  ;;  %v883_v59 = vadd.f32 %v1362_v23, %v787_v28  ;;  %v865_v40 = vadd.f32 %v1326_v26, %v769_v45 }
 0x119   : > { %v770_v55 = vadd.f32 %v1792_v50, %v731_v46  ;;  %v786_v37 = vadd.f32 %v1792_v50, %v747_v30  ;;  %v868_v39 = vadd.f32 %v1331_v12, %v772_v54  ;;  %v881_v62 = vadd.f32 %v1358_v27, %v785_v35 }
 0x11a   : > { %v884_v36 = vadd.f32 %v1363_v13, %v788_v31 }
 0x11b   : > { %v866_v63 = vadd.f32 %v1327_v18, %v770_v55  ;;  %v882_v4 = vadd.f32 %v1359_v19, %v786_v37  ;;  %v1402_v5 = vpack.c.bf16 %v868_v39, %v867_v38 }
 0x11c   : > { %v1442_v6 = vpack.c.bf16 %v884_v36, %v883_v59 }
 0x11d   : > { %v1397_v50 = vpack.c.bf16 %v866_v63, %v865_v40  ;;  %v1437_v7 = vpack.c.bf16 %v882_v4, %v881_v62  ;;  %1465 = vst [vmem:[%s1826_s30 + $0x38] sm:$0xff] %v1402_v5  }
 0x11e   : > { %1473 = vst [vmem:[%s1826_s30 + $0x78] sm:$0xff] %v1442_v6  }
 0x11f   : > { %1464 = vst [vmem:[%s1826_s30 + $0x30] sm:$0xff] %v1397_v50   ;;  %1472 = vst [vmem:[%s1826_s30 + $0x70] sm:$0xff] %v1437_v7  }
 0x120 PF: > { %s15_s20 = sadd.s32 1, %s1632_s20   ;;  %s1967_s18 = smov %s1628_s19 }
 0x121   : > { %p12_p5 = scmp.ge.s32.totalorder %s15_s20, 4   ;;  %s1968_s19 = smov %s1970_s21 }
 0x123   :  { %14 = sbr.rel (!%p12_p5) target bundleno = 2 (0x2), region = 80 }

// kernel: run.14
= control target key start
LH: loop header
LB: loop body
LE: loop exit
PB: predicated region body
PF: predicated region fallthrough
CT: control target
= control target key end

     0   :  { %s846_s15 = smov 0   ;;  %s848_s16 = smov 0   ;;  %s922_s0 = inlined_call_operand.vmem [shape: bf16[2,64,128], index: 0, kind: input, shape index: {}]   ;;  %s923_s1 = inlined_call_operand.vmem [shape: bf16[1,128,128], index: 1, kind: input, shape index: {}]   ;;  %s924_s2 = inlined_call_operand.vmem [shape: f32[1,128], index: 2, kind: input, shape index: {}]   ;;  %s925_s3 = inlined_call_operand.vmem [shape: f32[1,128], index: 3, kind: input, shape index: {}]   ;;  %s926_s4 = inlined_call_operand.vmem [shape: bf16[2,64,128], index: 4, kind: output, shape index: {}]  }
   0x1   :  { %s850_s17 = smov 0  }
   0x2 LB: > { %s33_s18 = sadd.s32 1, %s815_s16  ;;  %p647_p0 = scmp.ge.s32.totalorder %s819_s17, 1  ;;  %s819_s17 = sphi %s850_s17, %s14_s17   ;;  %s815_s16 = sphi %s848_s16, %s928_s16   ;;  %s811_s15 = sphi %s846_s15, %s927_s15  }
   0x3   : > { %p35_p1 = scmp.ge.s32.totalorder %s33_s18, 2  ;;  %p208_p2 = scmp.lt.s32.totalorder %s819_s17, 3 }
   0x5   : > { %s930_s18 = smov (%p35_p1, %s33_s18), 0  ;;  %p209_p3 = pnand %p647_p0, %p208_p2 }
   0x6   : > { %v785_v0 = vld [vmem:[%s923_s1] sm:$0xff] (!%p209_p3)   ;;  %p252_p4 = scmp.lt.s32.totalorder (!%p209_p3), %s811_s15, 1  ;;  %v786_v1 = vld [vmem:[%s923_s1 + $0x8] sm:$0xff] (!%p209_p3)   ;;  %v787_v2 = vld [vmem:[%s923_s1 + $0x10] sm:$0xff] (!%p209_p3)  }
   0x7   : > { %212 = sbr.rel (%p209_p3) target bundleno = 261 (0x105), region = 36  ;;  %721 = vmatprep.subr.bf16.mxu0 (!%p209_p3), %v785_v0  ;;  %745 = vmatprep.subr.bf16.mxu1 (!%p209_p3), %v785_v0  ;;  %v788_v3 = vld [vmem:[%s923_s1 + $0x18] sm:$0xff] (!%p209_p3)   ;;  %v789_v6 = vld [vmem:[%s923_s1 + $0x20] sm:$0xff] (!%p209_p3)   ;;  %v790_v7 = vld [vmem:[%s923_s1 + $0x28] sm:$0xff] (!%p209_p3)  }
   0x8   : > { %722 = vmatpush3.bf16.msra.mxu0 (!%p209_p3), %v785_v0  ;;  %753 = vmatpush3.bf16.msra.mxu1 (!%p209_p3), %v785_v0  ;;  %v791_v8 = vld [vmem:[%s923_s1 + $0x30] sm:$0xff] (!%p209_p3)   ;;  %v792_v9 = vld [vmem:[%s923_s1 + $0x38] sm:$0xff] (!%p209_p3)   ;;  %v664_v12 = vld [vmem:[%s924_s2] ss:$0 sm:$0xff] (!%p209_p3) }
   0x9   : > { %723 = vmatprep.subr.bf16.mxu0 (!%p209_p3), %v786_v1  ;;  %746 = vmatprep.subr.bf16.mxu1 (!%p209_p3), %v786_v1  ;;  %v665_v19 = vld [vmem:[%s925_s3] ss:$0 sm:$0xff] (!%p209_p3) }
   0xc   : > { %724 = vmatpush3.bf16.msra.mxu0 (!%p209_p3), %v786_v1  ;;  %754 = vmatpush3.bf16.msra.mxu1 (!%p209_p3), %v786_v1 }
   0xd   : > { %725 = vmatprep.subr.bf16.mxu0 (!%p209_p3), %v787_v2  ;;  %747 = vmatprep.subr.bf16.mxu1 (!%p209_p3), %v787_v2 }
   0xe   : > { %s932_s15 = smov (!%p252_p4, %s811_s15), 1 }
   0xf   : > { %s676_s25 = sshll.u32 %s932_s15, 5 }
  0x10   : > { %s881_s28 = scalar_lea.vmem %s922_s0, %s676_s25  ;;  %726 = vmatpush3.bf16.msra.mxu0 %v787_v2  ;;  %755 = vmatpush3.bf16.msra.mxu1 %v787_v2  ;;  %s278_s23 = scalar_lea.vmem %s926_s4, %s676_s25 }
  0x11   : > { %v793_v4 = vld [vmem:[%s881_s28] sm:$0xff]   ;;  %v794_v5 = vld [vmem:[%s881_s28 + $0x10] sm:$0xff]   ;;  %727 = vmatprep.subr.bf16.mxu0 %v788_v3  ;;  %748 = vmatprep.subr.bf16.mxu1 %v788_v3  ;;  %v795_v10 = vld [vmem:[%s881_s28 + $0x8] sm:$0xff]  }
  0x12   : > { %737 = vmatprep.mubr.bf16.mxu0 %v793_v4  ;;  %741 = vmatprep.mubr.bf16.mxu1 %v794_v5  ;;  %v796_v11 = vld [vmem:[%s881_s28 + $0x18] sm:$0xff]  }
  0x14   : > { %728 = vmatpush3.bf16.msra.mxu0 %v788_v3  ;;  %756 = vmatpush3.bf16.msra.mxu1 %v788_v3 }
  0x15   : > { %729 = vmatprep.subr.bf16.mxu0 %v789_v6  ;;  %749 = vmatprep.subr.bf16.mxu1 %v789_v6 }
  0x18   : > { %730 = vmatpush3.bf16.msra.mxu0 %v789_v6  ;;  %757 = vmatpush3.bf16.msra.mxu1 %v789_v6 }
  0x19   : > { %731 = vmatprep.subr.bf16.mxu0 %v790_v7  ;;  %750 = vmatprep.subr.bf16.mxu1 %v790_v7 }
  0x1c   : > { %732 = vmatpush3.bf16.msra.mxu0 %v790_v7  ;;  %758 = vmatpush3.bf16.msra.mxu1 %v790_v7 }
  0x1d   : > { %733 = vmatprep.subr.bf16.mxu0 %v791_v8  ;;  %751 = vmatprep.subr.bf16.mxu1 %v791_v8 }
  0x20   : > { %734 = vmatpush3.bf16.msra.mxu0 %v791_v8  ;;  %759 = vmatpush3.bf16.msra.mxu1 %v791_v8 }
  0x21   : > { %735 = vmatprep.subr.bf16.mxu0 %v792_v9  ;;  %752 = vmatprep.subr.bf16.mxu1 %v792_v9 }
  0x24   : > { %736 = vmatpush3.bf16.msra.mxu0 %v792_v9  ;;  %760 = vmatpush3.bf16.msra.mxu1 %v792_v9 }
  0x27   : > { %738 = vmatmul.mubr.bf16.vlgmr.msra.gmra.mrb[0].mxu0 %v795_v10  ;;  %742 = vmatmul.mubr.bf16.vlgmr.msra.gmra.mrb[0].mxu1 %v796_v11 }
  0xfa   : > { %v739_v13 = vpop.f32.mrb[0].mxu0  ;;  %v743_v14 = vpop.f32.mrb[0].mxu1 }
  0xfb   : > { %v454_v15 = vmul.f32 %v739_v13, %v664_v12  ;;  %v458_v16 = vmul.f32 %v743_v14, %v664_v12  ;;  %v414_v17 = vpop.f32.mrb[1].mxu0  ;;  %v430_v18 = vpop.f32.mrb[1].mxu1 }
  0xfc   : > { %v452_v20 = vmul.f32 %v664_v12, %v414_v17  ;;  %v456_v21 = vmul.f32 %v664_v12, %v430_v18  ;;  %v740_v22 = vpop.f32.mrb[2].mxu0  ;;  %v744_v23 = vpop.f32.mrb[2].mxu1 }
  0xfd   : > { %v455_v24 = vmul.f32 %v740_v22, %v664_v12  ;;  %v459_v25 = vmul.f32 %v744_v23, %v664_v12  ;;  %v417_v26 = vpop.f32.mrb[3].mxu0  ;;  %v433_v27 = vpop.f32.mrb[3].mxu1  ;;  %v469_v30 = vadd.f32 %v665_v19, %v454_v15  ;;  %v473_v31 = vadd.f32 %v665_v19, %v458_v16 }
  0xfe   : > { %v453_v28 = vmul.f32 %v664_v12, %v417_v26  ;;  %v457_v29 = vmul.f32 %v664_v12, %v433_v27  ;;  %v467_v34 = vadd.f32 %v665_v19, %v452_v20  ;;  %v471_v35 = vadd.f32 %v665_v19, %v456_v21 }
  0xff   : > { %v470_v32 = vadd.f32 %v665_v19, %v455_v24  ;;  %v474_v33 = vadd.f32 %v665_v19, %v459_v25 }
 0x100   : > { %v468_v36 = vadd.f32 %v665_v19, %v453_v28  ;;  %v472_v37 = vadd.f32 %v665_v19, %v457_v29 }
 0x101   : > { %v694_v38 = vpack.c.bf16 %v470_v32, %v469_v30  ;;  %v704_v39 = vpack.c.bf16 %v474_v33, %v473_v31 }
 0x102   : > { %v689_v40 = vpack.c.bf16 %v468_v36, %v467_v34  ;;  %v699_v41 = vpack.c.bf16 %v472_v37, %v471_v35 }
 0x103   : > { %706 = vst [vmem:[%s278_s23 + $0x8] sm:$0xff] %v694_v38   ;;  %708 = vst [vmem:[%s278_s23 + $0x18] sm:$0xff] %v704_v39  }
 0x104   : > { %690 = vst [vmem:[%s278_s23] sm:$0xff] %v689_v40   ;;  %707 = vst [vmem:[%s278_s23 + $0x10] sm:$0xff] %v699_v41  }
 0x105 PF: > { %s14_s17 = sadd.s32 1, %s819_s17   ;;  %s927_s15 = smov %s815_s16 }
 0x106   : > { %p11_p5 = scmp.ge.s32.totalorder %s14_s17, 4   ;;  %s928_s16 = smov %s930_s18 }
 0x108   :  { %13 = sbr.rel (!%p11_p5) target bundleno = 2 (0x2), region = 73 }

// kernel: run.15
= control target key start
LH: loop header
LB: loop body
LE: loop exit
PB: predicated region body
PF: predicated region fallthrough
CT: control target
= control target key end

     0   :  { %s942_s15 = smov 0   ;;  %s944_s16 = smov 0   ;;  %s1022_s0 = inlined_call_operand.vmem [shape: bf16[2,64,128], index: 0, kind: input, shape index: {}]   ;;  %s1023_s1 = inlined_call_operand.vmem [shape: bf16[1,128,128], index: 1, kind: input, shape index: {}]   ;;  %s1024_s2 = inlined_call_operand.vmem [shape: f32[1,128], index: 2, kind: input, shape index: {}]   ;;  %s1025_s3 = inlined_call_operand.vmem [shape: f32[1,128], index: 3, kind: input, shape index: {}]   ;;  %s1026_s4 = inlined_call_operand.vmem [shape: bf16[2,64,128], index: 4, kind: output, shape index: {}]  }
   0x1   :  { %s946_s17 = smov 0  }
   0x2 LB: > { %s33_s18 = sadd.s32 1, %s911_s16  ;;  %p703_p0 = scmp.ge.s32.totalorder %s915_s17, 1  ;;  %s915_s17 = sphi %s946_s17, %s14_s17   ;;  %s911_s16 = sphi %s944_s16, %s1028_s16   ;;  %s907_s15 = sphi %s942_s15, %s1027_s15  }
   0x3   : > { %p35_p1 = scmp.ge.s32.totalorder %s33_s18, 2  ;;  %p208_p2 = scmp.lt.s32.totalorder %s915_s17, 3 }
   0x5   : > { %s1030_s18 = smov (%p35_p1, %s33_s18), 0  ;;  %p209_p3 = pnand %p703_p0, %p208_p2 }
   0x6   : > { %v849_v0 = vld [vmem:[%s1023_s1] sm:$0xff] (!%p209_p3)   ;;  %p252_p4 = scmp.lt.s32.totalorder (!%p209_p3), %s907_s15, 1  ;;  %v850_v1 = vld [vmem:[%s1023_s1 + $0x8] sm:$0xff] (!%p209_p3)   ;;  %v851_v2 = vld [vmem:[%s1023_s1 + $0x10] sm:$0xff] (!%p209_p3)  }
   0x7   : > { %212 = sbr.rel (%p209_p3) target bundleno = 293 (0x125), region = 36  ;;  %785 = vmatprep.subr.bf16.mxu0 (!%p209_p3), %v849_v0  ;;  %809 = vmatprep.subr.bf16.mxu1 (!%p209_p3), %v849_v0  ;;  %v852_v3 = vld [vmem:[%s1023_s1 + $0x18] sm:$0xff] (!%p209_p3)   ;;  %v853_v6 = vld [vmem:[%s1023_s1 + $0x20] sm:$0xff] (!%p209_p3)   ;;  %v854_v7 = vld [vmem:[%s1023_s1 + $0x28] sm:$0xff] (!%p209_p3)  }
   0x8   : > { %786 = vmatpush3.bf16.msra.mxu0 (!%p209_p3), %v849_v0  ;;  %817 = vmatpush3.bf16.msra.mxu1 (!%p209_p3), %v849_v0  ;;  %v855_v8 = vld [vmem:[%s1023_s1 + $0x30] sm:$0xff] (!%p209_p3)   ;;  %v856_v9 = vld [vmem:[%s1023_s1 + $0x38] sm:$0xff] (!%p209_p3)   ;;  %v720_v12 = vld [vmem:[%s1024_s2] ss:$0 sm:$0xff] (!%p209_p3) }
   0x9   : > { %787 = vmatprep.subr.bf16.mxu0 (!%p209_p3), %v850_v1  ;;  %810 = vmatprep.subr.bf16.mxu1 (!%p209_p3), %v850_v1  ;;  %v721_v14 = vld [vmem:[%s1025_s3] ss:$0 sm:$0xff] (!%p209_p3) }
   0xc   : > { %788 = vmatpush3.bf16.msra.mxu0 (!%p209_p3), %v850_v1  ;;  %818 = vmatpush3.bf16.msra.mxu1 (!%p209_p3), %v850_v1 }
   0xd   : > { %789 = vmatprep.subr.bf16.mxu0 (!%p209_p3), %v851_v2  ;;  %811 = vmatprep.subr.bf16.mxu1 (!%p209_p3), %v851_v2 }
   0xe   : > { %s1032_s15 = smov (!%p252_p4, %s907_s15), 1 }
   0xf   : > { %s740_s25 = sshll.u32 %s1032_s15, 5 }
  0x10   : > { %s977_s28 = scalar_lea.vmem %s1022_s0, %s740_s25  ;;  %790 = vmatpush3.bf16.msra.mxu0 %v851_v2  ;;  %819 = vmatpush3.bf16.msra.mxu1 %v851_v2  ;;  %s278_s23 = scalar_lea.vmem %s1026_s4, %s740_s25 }
  0x11   : > { %v857_v4 = vld [vmem:[%s977_s28] sm:$0xff]   ;;  %v858_v5 = vld [vmem:[%s977_s28 + $0x10] sm:$0xff]   ;;  %791 = vmatprep.subr.bf16.mxu0 %v852_v3  ;;  %812 = vmatprep.subr.bf16.mxu1 %v852_v3  ;;  %v859_v10 = vld [vmem:[%s977_s28 + $0x8] sm:$0xff]  }
  0x12   : > { %801 = vmatprep.mubr.bf16.mxu0 %v857_v4  ;;  %805 = vmatprep.mubr.bf16.mxu1 %v858_v5  ;;  %v860_v11 = vld [vmem:[%s977_s28 + $0x18] sm:$0xff]  }
  0x14   : > { %792 = vmatpush3.bf16.msra.mxu0 %v852_v3  ;;  %820 = vmatpush3.bf16.msra.mxu1 %v852_v3 }
  0x15   : > { %793 = vmatprep.subr.bf16.mxu0 %v853_v6  ;;  %813 = vmatprep.subr.bf16.mxu1 %v853_v6 }
  0x18   : > { %794 = vmatpush3.bf16.msra.mxu0 %v853_v6  ;;  %821 = vmatpush3.bf16.msra.mxu1 %v853_v6 }
  0x19   : > { %795 = vmatprep.subr.bf16.mxu0 %v854_v7  ;;  %814 = vmatprep.subr.bf16.mxu1 %v854_v7 }
  0x1c   : > { %796 = vmatpush3.bf16.msra.mxu0 %v854_v7  ;;  %822 = vmatpush3.bf16.msra.mxu1 %v854_v7 }
  0x1d   : > { %797 = vmatprep.subr.bf16.mxu0 %v855_v8  ;;  %815 = vmatprep.subr.bf16.mxu1 %v855_v8 }
  0x20   : > { %798 = vmatpush3.bf16.msra.mxu0 %v855_v8  ;;  %823 = vmatpush3.bf16.msra.mxu1 %v855_v8 }
  0x21   : > { %799 = vmatprep.subr.bf16.mxu0 %v856_v9  ;;  %816 = vmatprep.subr.bf16.mxu1 %v856_v9 }
  0x24   : > { %800 = vmatpush3.bf16.msra.mxu0 %v856_v9  ;;  %824 = vmatpush3.bf16.msra.mxu1 %v856_v9 }
  0x27   : > { %802 = vmatmul.mubr.bf16.vlgmr.msra.gmra.mrb[0].mxu0 %v859_v10  ;;  %806 = vmatmul.mubr.bf16.vlgmr.msra.gmra.mrb[0].mxu1 %v860_v11 }
  0xfa   : > { %v803_v13 = vpop.f32.mrb[0].mxu0  ;;  %v807_v15 = vpop.f32.mrb[0].mxu1 }
  0xfb   : > { %v454_v16 = vmul.f32 %v803_v13, %v720_v12  ;;  %v458_v17 = vmul.f32 %v807_v15, %v720_v12  ;;  %v414_v18 = vpop.f32.mrb[1].mxu0  ;;  %v430_v19 = vpop.f32.mrb[1].mxu1 }
  0xfc   : > { %v452_v20 = vmul.f32 %v720_v12, %v414_v18  ;;  %v456_v21 = vmul.f32 %v720_v12, %v430_v19  ;;  %v804_v22 = vpop.f32.mrb[2].mxu0  ;;  %v808_v23 = vpop.f32.mrb[2].mxu1 }
  0xfd   : > { %v469_v24 = vadd.f32 %v721_v14, %v454_v16  ;;  %v473_v25 = vadd.f32 %v721_v14, %v458_v17  ;;  %v455_v26 = vmul.f32 %v804_v22, %v720_v12  ;;  %v459_v27 = vmul.f32 %v808_v23, %v720_v12  ;;  %v417_v28 = vpop.f32.mrb[3].mxu0  ;;  %v433_v29 = vpop.f32.mrb[3].mxu1 }
  0xfe   : > { %v467_v30 = vadd.f32 %v721_v14, %v452_v20  ;;  %v1004_v31 = vadd.f32 %v721_v14, %v456_v21  ;;  %v453_v32 = vmul.f32 %v720_v12, %v417_v28  ;;  %v457_v33 = vmul.f32 %v720_v12, %v433_v29 }
  0xff   : > { %v724_v34 = vmul.f32 -1.442695, %v469_v24  ;;  %v728_v35 = vmul.f32 -1.442695, %v473_v25  ;;  %v470_v36 = vadd.f32 %v721_v14, %v455_v26  ;;  %v474_v37 = vadd.f32 %v721_v14, %v459_v27 }
 0x100   : > { %v722_v38 = vmul.f32 -1.442695, %v467_v30  ;;  %v726_v39 = vmul.f32 -1.442695, %v1004_v31  ;;  %v468_v40 = vadd.f32 %v721_v14, %v453_v32  ;;  %v472_v41 = vadd.f32 %v721_v14, %v457_v33 }
 0x101   : > { %861 = vpow2.f32 %v724_v34  ;;  %v725_v42 = vmul.f32 -1.442695, %v470_v36  ;;  %v729_v43 = vmul.f32 -1.442695, %v474_v37 }
 0x102   : > { %863 = vpow2.f32 %v728_v35  ;;  %v723_v44 = vmul.f32 -1.442695, %v468_v40  ;;  %v727_v45 = vmul.f32 -1.442695, %v472_v41 }
 0x103   : > { %865 = vpow2.f32 %v722_v38 }
 0x104   : > { %867 = vpow2.f32 %v726_v39 }
 0x105   : > { %869 = vpow2.f32 %v725_v42 }
 0x106   : > { %871 = vpow2.f32 %v729_v43 }
 0x107   : > { %873 = vpow2.f32 %v723_v44 }
 0x108   : > { %875 = vpow2.f32 %v727_v45 }
 0x10b   : > { %v862_v46 = vpop.eup %861 }
 0x10c   : > { %v864_v47 = vpop.eup %863  ;;  %v501_v48 = vadd.f32 1.0, %v862_v46 }
 0x10d   : > { %v866_v49 = vpop.eup %865  ;;  %v505_v50 = vadd.f32 1.0, %v864_v47 }
 0x10e   : > { %v868_v51 = vpop.eup %867  ;;  %877 = vrcp.f32 %v501_v48  ;;  %v499_v52 = vadd.f32 1.0, %v866_v49 }
 0x10f   : > { %v870_v53 = vpop.eup %869  ;;  %879 = vrcp.f32 %v505_v50  ;;  %v503_v54 = vadd.f32 1.0, %v868_v51 }
 0x110   : > { %v872_v55 = vpop.eup %871  ;;  %881 = vrcp.f32 %v499_v52  ;;  %v502_v56 = vadd.f32 1.0, %v870_v53 }
 0x111   : > { %v874_v57 = vpop.eup %873  ;;  %883 = vrcp.f32 %v503_v54  ;;  %v506_v58 = vadd.f32 1.0, %v872_v55 }
 0x112   : > { %v876_v59 = vpop.eup %875  ;;  %885 = vrcp.f32 %v502_v56  ;;  %v500_v60 = vadd.f32 1.0, %v874_v57 }
 0x113   : > { %887 = vrcp.f32 %v506_v58  ;;  %v504_v61 = vadd.f32 1.0, %v876_v59 }
 0x114   : > { %889 = vrcp.f32 %v500_v60 }
 0x115   : > { %891 = vrcp.f32 %v504_v61 }
 0x118   : > { %v878_v62 = vpop.eup %877 }
 0x119   : > { %v880_v63 = vpop.eup %879  ;;  %v525_v4 = vmul.f32 %v878_v62, %v469_v24 }
 0x11a   : > { %v882_v0 = vpop.eup %881  ;;  %v529_v7 = vmul.f32 %v880_v63, %v473_v25 }
 0x11b   : > { %v884_v1 = vpop.eup %883  ;;  %v523_v10 = vmul.f32 %v882_v0, %v467_v30 }
 0x11c   : > { %v886_v2 = vpop.eup %885  ;;  %v527_v13 = vmul.f32 %v884_v1, %v1004_v31 }
 0x11d   : > { %v888_v3 = vpop.eup %887  ;;  %v526_v5 = vmul.f32 %v886_v2, %v470_v36 }
 0x11e   : > { %v890_v6 = vpop.eup %889  ;;  %v530_v8 = vmul.f32 %v888_v3, %v474_v37 }
 0x11f   : > { %v892_v9 = vpop.eup %891  ;;  %v758_v11 = vpack.c.bf16 %v526_v5, %v525_v4  ;;  %v524_v12 = vmul.f32 %v890_v6, %v468_v40 }
 0x120   : > { %v768_v14 = vpack.c.bf16 %v530_v8, %v529_v7  ;;  %v528_v15 = vmul.f32 %v892_v9, %v472_v41 }
 0x121   : > { %770 = vst [vmem:[%s278_s23 + $0x8] sm:$0xff] %v758_v11   ;;  %v753_v16 = vpack.c.bf16 %v524_v12, %v523_v10 }
 0x122   : > { %772 = vst [vmem:[%s278_s23 + $0x18] sm:$0xff] %v768_v14   ;;  %v763_v17 = vpack.c.bf16 %v528_v15, %v527_v13 }
 0x123   : > { %754 = vst [vmem:[%s278_s23] sm:$0xff] %v753_v16  }
 0x124   : > { %771 = vst [vmem:[%s278_s23 + $0x10] sm:$0xff] %v763_v17  }
 0x125 PF: > { %s14_s17 = sadd.s32 1, %s915_s17   ;;  %s1027_s15 = smov %s911_s16 }
 0x126   : > { %p11_p5 = scmp.ge.s32.totalorder %s14_s17, 4   ;;  %s1028_s16 = smov %s1030_s18 }
 0x128   :  { %13 = sbr.rel (!%p11_p5) target bundleno = 2 (0x2), region = 73 }

// kernel: run.13
= control target key start
LH: loop header
LB: loop body
LE: loop exit
PB: predicated region body
PF: predicated region fallthrough
CT: control target
= control target key end

     0   :  { %s3291_s15 = smov 0   ;;  %s3670_s0 = inlined_call_operand.vmem [shape: bf16[2,36,9,128], index: 0, kind: input, shape index: {}]   ;;  %s3671_s1 = inlined_call_operand.vmem [shape: bf16[9,128,128], index: 1, kind: input, shape index: {}]   ;;  %s3672_s2 = inlined_call_operand.vmem [shape: f32[1,128], index: 2, kind: input, shape index: {}]   ;;  %s3673_s3 = inlined_call_operand.vmem [shape: f32[1,128], index: 3, kind: input, shape index: {}]   ;;  %s3674_s4 = inlined_call_operand.vmem [shape: bf16[2,8,8,128], index: 4, kind: output, shape index: {}]  }
   0x1 LB: > { %s2365_s16 = sadd.s32 4294967295, %s3264_s15   ;;  %p2369_p0 = scmp.ge.s32.totalorder %s3264_s15, 1  ;;  %s3264_s15 = sphi %s3291_s15, %s14_s15  }
   0x2   : > { %p162_p1 = scmp.lt.s32.totalorder %s3264_s15, 3 }
   0x4   : > { %p163_p2 = pnand %p2369_p0, %p162_p1 }
   0x5   : > { %v3130_v0 = vld [vmem:[%s3671_s1] sm:$0xff] (!%p163_p2)   ;;  %p188_p3 = scmp.lt.s32.totalorder (!%p163_p2), %s2365_s16, 1  ;;  %v3132_v2 = vld [vmem:[%s3671_s1 + $0x8] sm:$0xff] (!%p163_p2)   ;;  %v3134_v4 = vld [vmem:[%s3671_s1 + $0x10] sm:$0xff] (!%p163_p2)   ;;  %vm571_vm0 = vsmask.f32 (!%p163_p2), 3328 }
   0x6   : > { %166 = sbr.rel (%p163_p2) target bundleno = 422 (0x1a6), region = 36  ;;  %v3131_v1 = vld [vmem:[%s3671_s1 + $0x100] sm:$0xff] (!%p163_p2)   ;;  %2825 = vmatprep.subr.bf16.mxu1 (!%p163_p2), %v3130_v0  ;;  %v3133_v3 = vld [vmem:[%s3671_s1 + $0x108] sm:$0xff] (!%p163_p2)   ;;  %v3135_v5 = vld [vmem:[%s3671_s1 + $0x110] sm:$0xff] (!%p163_p2)   ;;  %vm572_vm1 = vsmask.f32 (!%p163_p2), 7440 }
   0x7   : > { %2921 = vmatprep.subr.bf16.mxu0 (!%p163_p2), %v3131_v1  ;;  %2826 = vmatpush3.bf16.msra.mxu1 (!%p163_p2), %v3130_v0  ;;  %v3136_v6 = vld [vmem:[%s3671_s1 + $0x18] sm:$0xff] (!%p163_p2)   ;;  %v3138_v8 = vld [vmem:[%s3671_s1 + $0x20] sm:$0xff] (!%p163_p2)   ;;  %v3140_v10 = vld [vmem:[%s3671_s1 + $0x28] sm:$0xff] (!%p163_p2)  }
   0x8   : > { %2922 = vmatpush3.bf16.msra.mxu0 (!%p163_p2), %v3131_v1  ;;  %2827 = vmatprep.subr.bf16.mxu1 (!%p163_p2), %v3132_v2  ;;  %v3137_v7 = vld [vmem:[%s3671_s1 + $0x118] sm:$0xff] (!%p163_p2)   ;;  %v3139_v9 = vld [vmem:[%s3671_s1 + $0x120] sm:$0xff] (!%p163_p2)   ;;  %v3141_v12 = vld [vmem:[%s3671_s1 + $0x128] sm:$0xff] (!%p163_p2)  }
   0x9   : > { %2923 = vmatprep.subr.bf16.mxu0 (!%p163_p2), %v3133_v3  ;;  %v3142_v14 = vld [vmem:[%s3671_s1 + $0x30] sm:$0xff] (!%p163_p2)   ;;  %v3144_v16 = vld [vmem:[%s3671_s1 + $0x38] sm:$0xff] (!%p163_p2)   ;;  %v3147_v18 = vld [vmem:[%s3671_s1 + $0x40] sm:$0xff] (!%p163_p2)  }
   0xa   : > { %v3143_v15 = vld [vmem:[%s3671_s1 + $0x130] sm:$0xff] (!%p163_p2)   ;;  %v3145_v17 = vld [vmem:[%s3671_s1 + $0x138] sm:$0xff] (!%p163_p2)   ;;  %v3149_v19 = vld [vmem:[%s3671_s1 + $0x140] sm:$0xff] (!%p163_p2)  }
   0xb   : > { %2828 = vmatpush3.bf16.msra.mxu1 (!%p163_p2), %v3132_v2  ;;  %v3152_v22 = vld [vmem:[%s3671_s1 + $0x48] sm:$0xff] (!%p163_p2)   ;;  %v3154_v26 = vld [vmem:[%s3671_s1 + $0x50] sm:$0xff] (!%p163_p2)   ;;  %v3156_v28 = vld [vmem:[%s3671_s1 + $0x58] sm:$0xff] (!%p163_p2)  }
   0xc   : > { %2924 = vmatpush3.bf16.msra.mxu0 (!%p163_p2), %v3133_v3  ;;  %2829 = vmatprep.subr.bf16.mxu1 (!%p163_p2), %v3134_v4  ;;  %v3153_v23 = vld [vmem:[%s3671_s1 + $0x148] sm:$0xff] (!%p163_p2)   ;;  %v3155_v27 = vld [vmem:[%s3671_s1 + $0x150] sm:$0xff] (!%p163_p2)   ;;  %v3157_v31 = vld [vmem:[%s3671_s1 + $0x158] sm:$0xff] (!%p163_p2)  }
   0xd   : > { %s3678_s16 = smov (!%p188_p3, %s2365_s16), 1  ;;  %2925 = vmatprep.subr.bf16.mxu0 %v3135_v5  ;;  %v3158_v38 = vld [vmem:[%s3671_s1 + $0x60] sm:$0xff]   ;;  %v3160_v47 = vld [vmem:[%s3671_s1 + $0x68] sm:$0xff]   ;;  %vm3406_vm2 = vmor %vm571_vm0, %vm572_vm1 }
   0xe   : > { %s3121_s7 = smul.u32 288, %s3678_s16  ;;  %v3159_v43 = vld [vmem:[%s3671_s1 + $0x160] sm:$0xff]   ;;  %v3161_v50 = vld [vmem:[%s3671_s1 + $0x168] sm:$0xff]   ;;  %v3163_v2 = vld [vmem:[%s3671_s1 + $0x70] sm:$0xff]   ;;  %s2693_s29 = sshll.u32 %s3678_s16, 5 }
   0xf   : > { %2830 = vmatpush3.bf16.msra.mxu1 %v3134_v4  ;;  %s197_s6 = scalar_lea.vmem %s3674_s4, %s2693_s29 }
  0x10   : > { %2926 = vmatpush3.bf16.msra.mxu0 %v3135_v5  ;;  %2831 = vmatprep.subr.bf16.mxu1 %v3136_v6  ;;  %s3335_s14 = scalar_lea.vmem %s3670_s0, %s3121_s7 }
  0x11   : > { %2927 = vmatprep.subr.bf16.mxu0 %v3137_v7  ;;  %v3146_v11 = vld [vmem:[%s3335_s14] ss:$8 sps:$4 sm:$0xff]   ;;  %v3150_v20 = vld [vmem:[%s3335_s14 + $0x10] ss:$8 sps:$4 sm:$0xff]   ;;  %v2522_v34 = vld [vmem:[%s3335_s14 + $0x94] sm:$0x1] }
  0x12   : > { %2841 = vmatprep.mubr.bf16.mxu1 %v3146_v11  ;;  %v3148_v13 = vld [vmem:[%s3335_s14 + $0xd8] ss:$8 sps:$4 sm:$0xff]   ;;  %v3151_v21 = vld [vmem:[%s3335_s14 + $0xe8] ss:$8 sps:$4 sm:$0xff]   ;;  %v2524_v39 = vld [vmem:[%s3335_s14 + $0x9c] sm:$0x1] }
  0x13   : > { %2832 = vmatpush3.bf16.msra.mxu1 %v3136_v6  ;;  %2937 = vmatprep.mubr.bf16.mxu0 %v3148_v13  ;;  %v3162_v24 = vld [vmem:[%s3335_s14 + $0x20] ss:$8 sps:$4 sm:$0xff]   ;;  %v3166_v29 = vld [vmem:[%s3335_s14 + $0x30] ss:$8 sps:$4 sm:$0xff]   ;;  %v1256_v40 = vshll.u32 %v2522_v34, 16  ;;  %v1270_v46 = vshll.u32 %v2524_v39, 16 }
  0x14   : > { %2928 = vmatpush3.bf16.msra.mxu0 %v3137_v7  ;;  %2833 = vmatprep.subr.bf16.mxu1 %v3138_v8  ;;  %v3164_v25 = vld [vmem:[%s3335_s14 + $0xf8] ss:$8 sps:$4 sm:$0xff]   ;;  %v3167_v30 = vld [vmem:[%s3335_s14 + $0x108] ss:$8 sps:$4 sm:$0xff]   ;;  %v2526_v57 = vld [vmem:[%s3335_s14 + $0xa4] sm:$0x1] }
  0x15   : > { %2929 = vmatprep.subr.bf16.mxu0 %v3139_v9  ;;  %v3170_v32 = vld [vmem:[%s3335_s14 + $0x48] ss:$8 sps:$4 sm:$0xff]   ;;  %v2523_v35 = vld [vmem:[%s3335_s14 + $0x98] sm:$0xf]  ;;  %v1258_v52 = vrot.slane %v1256_v40, 5  ;;  %v1272_v55 = vrot.slane %v1270_v46, 5 }
  0x16   : > { %v2521_v33 = vld [vmem:[%s3335_s14 + $0x90] sm:$0xf]  ;;  %v1261_v41 = vshrl.u32 %v2523_v35, 16  ;;  %v1264_v42 = vshll.u32 %v2523_v35, 16  ;;  %v2525_v56 = vld [vmem:[%s3335_s14 + $0xa0] sm:$0xf] }
  0x17   : > { %2834 = vmatpush3.bf16.msra.mxu1 %v3138_v8  ;;  %v1247_v36 = vshrl.u32 %v2521_v33, 16  ;;  %v1250_v37 = vshll.u32 %v2521_v33, 16  ;;  %v2527_v59 = vld [vmem:[%s3335_s14 + $0xa8] sm:$0xf]  ;;  %v2528_v60 = vld [vmem:[%s3335_s14 + $0xac] sm:$0x1] }
  0x18   : > { %2930 = vmatpush3.bf16.msra.mxu0 %v3139_v9  ;;  %2835 = vmatprep.subr.bf16.mxu1 %v3140_v10  ;;  %v1263_v48 = vrot.slane %v1261_v41, 4  ;;  %v1266_v49 = vrot.slane %v1264_v42, 5  ;;  %v1275_v61 = vshrl.u32 %v2525_v56, 16  ;;  %v1278_v63 = vshll.u32 %v2525_v56, 16  ;;  %v3165_v6 = vld [vmem:[%s3671_s1 + $0x170] sm:$0xff]  }
  0x19   : > { %2931 = vmatprep.subr.bf16.mxu0 %v3141_v12  ;;  %v1249_v44 = vrot.slane %v1247_v36, 4  ;;  %v1252_v45 = vrot.slane %v1250_v37, 5  ;;  %v1284_v0 = vshll.u32 %v2526_v57, 16  ;;  %v1289_v1 = vshrl.u32 %v2527_v59, 16  ;;  %v3184_v37 = vld [vmem:[%s3335_s14 + $0x68] ss:$8 sps:$4 sm:$0xff]  }
  0x1a   : > { %v1267_v54 = vor.u32 %v1266_v49, %v1263_v48  ;;  %v1277_v4 = vrot.slane %v1275_v61, 4  ;;  %v1292_v5 = vshll.u32 %v2527_v59, 16  ;;  %v1280_v8 = vrot.slane %v1278_v63, 5  ;;  %v3187_v48 = vld [vmem:[%s3335_s14 + $0x78] ss:$8 sps:$4 sm:$0xff]  }
  0x1b   : > { %2836 = vmatpush3.bf16.msra.mxu1 %v3140_v10  ;;  %v1253_v51 = vor.u32 %v1252_v45, %v1249_v44  ;;  %v1291_v9 = vrot.slane %v1289_v1, 4  ;;  %v1298_v10 = vshll.u32 %v2528_v60, 16  ;;  %v2533_v49 = vld [vmem:[%s3335_s14 + $0xc0] sm:$0xf]  ;;  %v3178_v59 = vld [vmem:[%s3671_s1 + $0x98] sm:$0xff]  }
  0x1c   : > { %2932 = vmatpush3.bf16.msra.mxu0 %v3141_v12  ;;  %2837 = vmatprep.subr.bf16.mxu1 %v3142_v14  ;;  %v1268_v62 = vrot.slane %v1267_v54, 4  ;;  %v1286_v12 = vrot.slane %v1284_v0, 5  ;;  %v1294_v13 = vrot.slane %v1292_v5, 5  ;;  %v1331_v56 = vshrl.u32 %v2533_v49, 16 }
  0x1d   : > { %2933 = vmatprep.subr.bf16.mxu0 %v3143_v15  ;;  %v1254_v58 = vrot.slane %v1253_v51, 4  ;;  %v2535_v51 = vld [vmem:[%s3335_s14 + $0xc8] sm:$0xf]  ;;  %v1334_v57 = vshll.u32 %v2533_v49, 16 }
  0x1e   : > { %v1273_v7 = vsel %vm3406_vm2, %v1268_v62, %v1272_v55  ;;  %v2536_v55 = vld [vmem:[%s3335_s14 + $0xcc] sm:$0x1]  ;;  %v1345_v61 = vshrl.u32 %v2535_v51, 16  ;;  %v1348_v62 = vshll.u32 %v2535_v51, 16  ;;  %v1333_v1 = vrot.slane %v1331_v56, 4 }
  0x1f   : > { %2838 = vmatpush3.bf16.msra.mxu1 %v3142_v14  ;;  %v1259_v3 = vsel %vm3406_vm2, %v1254_v58, %v1258_v52  ;;  %v3168_v14 = vld [vmem:[%s3671_s1 + $0x78] sm:$0xff]   ;;  %v3177_v52 = vld [vmem:[%s3671_s1 + $0x190] sm:$0xff]   ;;  %v1354_v63 = vshll.u32 %v2536_v55, 16 }
  0x20   : > { %2934 = vmatpush3.bf16.msra.mxu0 %v3143_v15  ;;  %2839 = vmatprep.subr.bf16.mxu1 %v3144_v16  ;;  %v2553_v11 = vcombine.low %v1259_v3, %v1273_v7  ;;  %v1281_v15 = vor.u32 %v1280_v8, %v1277_v4  ;;  %v3179_v4 = vld [vmem:[%s3671_s1 + $0x198] sm:$0xff]   ;;  %v1350_v7 = vrot.slane %v1348_v62, 5 }
  0x21   : > { %2935 = vmatprep.subr.bf16.mxu0 %v3145_v17  ;;  %v1356_v8 = vrot.slane %v1354_v63, 5 }
  0x23   : > { %2840 = vmatpush3.bf16.msra.mxu1 %v3144_v16  ;;  %v1295_v16 = vor.u32 %v1294_v13, %v1291_v9  ;;  %v3180_v13 = vld [vmem:[%s3671_s1 + $0xa0] sm:$0xff]  }
  0x24   : > { %2936 = vmatpush3.bf16.msra.mxu0 %v3145_v17  ;;  %2849 = vmatprep.subr.bf16.mxu1 %v3147_v18  ;;  %v1282_v17 = vrot.slane %v1281_v15, 4 }
  0x25   : > { %2945 = vmatprep.subr.bf16.mxu0 %v3149_v19 }
  0x26   : > { %2842 = vmatmul.mubr.bf16.vlgmr.msra.gmra.mrb[0].mxu1 %v3150_v20  ;;  %v1296_v20 = vrot.slane %v1295_v16, 4  ;;  %v557_v16 = vld [vmem:[%s3335_s14 + $0x8] sm:$0xf] }
  0x27   : > { %2850 = vmatpush3.bf16.msra.mxu1 %v3147_v18  ;;  %2938 = vmatmul.mubr.bf16.vlgmr.msra.gmra.mrb[0].mxu0 %v3151_v21  ;;  %v1300_v18 = vrot.slane %v1298_v10, 5  ;;  %v3171_v21 = vld [vmem:[%s3671_s1 + $0x80] sm:$0xff]  }
  0x28   : > { %2946 = vmatpush3.bf16.msra.mxu0 %v3149_v19  ;;  %2851 = vmatprep.subr.bf16.mxu1 %v3152_v22  ;;  %v3169_v19 = vld [vmem:[%s3671_s1 + $0x178] sm:$0xff]  }
  0x29   : > { %2947 = vmatprep.subr.bf16.mxu0 %v3153_v23  ;;  %2845 = vmatprep.mubr.bf16.mxu1 %v3162_v24  ;;  %v3172_v24 = vld [vmem:[%s3671_s1 + $0x180] sm:$0xff]  }
  0x2a   : > { %2941 = vmatprep.mubr.bf16.mxu0 %v3164_v25  ;;  %v3173_v25 = vld [vmem:[%s3335_s14 + $0x58] ss:$8 sps:$4 sm:$0xff]  }
  0x2b   : > { %2852 = vmatpush3.bf16.msra.mxu1 %v3152_v22  ;;  %v1287_v22 = vsel %vm3406_vm2, %v1282_v17, %v1286_v12  ;;  %v556_v12 = vld [vmem:[%s3335_s14 + $0x4] sm:$0x1]  ;;  %v558_v17 = vld [vmem:[%s3335_s14 + $0xc] sm:$0x1] }
  0x2c   : > { %2948 = vmatpush3.bf16.msra.mxu0 %v3153_v23  ;;  %2853 = vmatprep.subr.bf16.mxu1 %v3154_v26  ;;  %v1301_v23 = vsel %vm3406_vm2, %v1296_v20, %v1300_v18 }
  0x2d   : > { %2949 = vmatprep.subr.bf16.mxu0 %v3155_v27 }
  0x2e   : > { %2846 = vmatmul.mubr.bf16.gmra.mrb[4].mxu1 %v3166_v29  ;;  %v3175_v29 = vld [vmem:[%s3671_s1 + $0x188] sm:$0xff]  }
  0x2f   : > { %2854 = vmatpush3.bf16.msra.mxu1 %v3154_v26  ;;  %2942 = vmatmul.mubr.bf16.gmra.mrb[4].mxu0 %v3167_v30  ;;  %v3174_v26 = vld [vmem:[%s3671_s1 + $0x88] sm:$0xff]   ;;  %v2530_v30 = vld [vmem:[%s3335_s14 + $0xb4] sm:$0x1] }
  0x30   : > { %2950 = vmatpush3.bf16.msra.mxu0 %v3155_v27  ;;  %2855 = vmatprep.subr.bf16.mxu1 %v3156_v28  ;;  %v2529_v27 = vld [vmem:[%s3335_s14 + $0xb0] sm:$0xf]  ;;  %v1312_v35 = vshll.u32 %v2530_v30, 16 }
  0x31   : > { %2951 = vmatprep.subr.bf16.mxu0 %v3157_v31  ;;  %2865 = vmatprep.mubr.bf16.mxu1 %v3170_v32  ;;  %v2532_v32 = vld [vmem:[%s3335_s14 + $0xbc] sm:$0x1]  ;;  %v1303_v33 = vshrl.u32 %v2529_v27, 16  ;;  %v1306_v34 = vshll.u32 %v2529_v27, 16  ;;  %v598_v27 = vshll.u32 %v558_v17, 16 }
  0x32   : > { %2961 = vmatprep.mubr.bf16.mxu0 %v2553_v11  ;;  %v1326_v39 = vshll.u32 %v2532_v32, 16  ;;  %v1314_v44 = vrot.slane %v1312_v35, 5  ;;  %v555_v11 = vld [vmem:[%s3335_s14] sm:$0xf]  ;;  %v3182_v32 = vld [vmem:[%s3671_s1 + $0xa8] sm:$0xff]  }
  0x33   : > { %2856 = vmatpush3.bf16.msra.mxu1 %v3156_v28  ;;  %v2554_v28 = vcombine.low %v1287_v22, %v1301_v23  ;;  %v1305_v40 = vrot.slane %v1303_v33, 4  ;;  %v1308_v41 = vrot.slane %v1306_v34, 5  ;;  %v575_v18 = vshrl.u32 %v555_v11, 16  ;;  %v566_v17 = vld [vmem:[%s3335_s14 + $0x2c] sm:$0x1] }
  0x34   : > { %2952 = vmatpush3.bf16.msra.mxu0 %v3157_v31  ;;  %2857 = vmatprep.subr.bf16.mxu1 %v3158_v38  ;;  %v2531_v31 = vld [vmem:[%s3335_s14 + $0xb8] sm:$0xf]  ;;  %v1328_v46 = vrot.slane %v1326_v39, 5  ;;  %v589_v22 = vshrl.u32 %v557_v16, 16  ;;  %v592_v23 = vshll.u32 %v557_v16, 16 }
  0x35   : > { %2953 = vmatprep.subr.bf16.mxu0 %v3159_v43  ;;  %v1317_v36 = vshrl.u32 %v2531_v31, 16  ;;  %v565_v16 = vld [vmem:[%s3335_s14 + $0x28] sm:$0xf] }
  0x36   : > { %v591_v30 = vrot.slane %v589_v22, 4  ;;  %v645_v22 = vshrl.u32 %v565_v16, 16 }
  0x37   : > { %2858 = vmatpush3.bf16.msra.mxu1 %v3158_v38  ;;  %v1320_v38 = vshll.u32 %v2531_v31, 16  ;;  %v1319_v42 = vrot.slane %v1317_v36, 4  ;;  %v594_v31 = vrot.slane %v592_v23, 5  ;;  %v600_v36 = vrot.slane %v598_v27, 5 }
  0x38   : > { %2954 = vmatpush3.bf16.msra.mxu0 %v3159_v43  ;;  %2859 = vmatprep.subr.bf16.mxu1 %v3160_v47  ;;  %v3176_v43 = vld [vmem:[%s3671_s1 + $0x90] sm:$0xff]   ;;  %v648_v23 = vshll.u32 %v565_v16, 16  ;;  %v2638_v16 = vld [vmem:[%s3335_s14 + $0xc] sm:$0x1] }
  0x39   : > { %2955 = vmatprep.subr.bf16.mxu0 %v3161_v50  ;;  %v1322_v45 = vrot.slane %v1320_v38, 5  ;;  %v3183_v38 = vld [vmem:[%s3671_s1 + $0x1a8] sm:$0xff]  }
  0x3b   : > { %2860 = vmatpush3.bf16.msra.mxu1 %v3160_v47  ;;  %v1309_v47 = vor.u32 %v1308_v41, %v1305_v40  ;;  %v1323_v54 = vor.u32 %v1322_v45, %v1319_v42  ;;  %v595_v40 = vor.u32 %v594_v31, %v591_v30  ;;  %v559_v41 = vld [vmem:[%s3335_s14 + $0x10] sm:$0xf]  ;;  %v650_v31 = vrot.slane %v648_v23, 5 }
  0x3c   : > { %2956 = vmatpush3.bf16.msra.mxu0 %v3161_v50  ;;  %2861 = vmatprep.subr.bf16.mxu1 %v3163_v2  ;;  %v2534_v50 = vld [vmem:[%s3335_s14 + $0xc4] sm:$0x1]  ;;  %v603_v45 = vshrl.u32 %v559_v41, 16  ;;  %v567_v30 = vld [vmem:[%s3335_s14 + $0x30] sm:$0xf] }
  0x3d   : > { %2957 = vmatprep.subr.bf16.mxu0 %v3165_v6  ;;  %v1340_v58 = vshll.u32 %v2534_v50, 16  ;;  %v1310_v60 = vrot.slane %v1309_v47, 4  ;;  %v1324_v0 = vrot.slane %v1323_v54, 4  ;;  %v562_v47 = vld [vmem:[%s3335_s14 + $0x1c] sm:$0x1] }
  0x3f   : > { %2862 = vmatpush3.bf16.msra.mxu1 %v3163_v2  ;;  %v1336_v2 = vrot.slane %v1334_v57, 5  ;;  %v1342_v3 = vrot.slane %v1340_v58, 5  ;;  %v1315_v5 = vsel %vm3406_vm2, %v1310_v60, %v1314_v44  ;;  %v1329_v9 = vsel %vm3406_vm2, %v1324_v0, %v1328_v46  ;;  %v561_v44 = vld [vmem:[%s3335_s14 + $0x18] sm:$0xf]  ;;  %v3186_v60 = vld [vmem:[%s3671_s1 + $0x1b0] sm:$0xff]  }
  0x40   : > { %2958 = vmatpush3.bf16.msra.mxu0 %v3165_v6  ;;  %2863 = vmatprep.subr.bf16.mxu1 %v3168_v14  ;;  %v1347_v6 = vrot.slane %v1345_v61, 4  ;;  %v596_v46 = vrot.slane %v595_v40, 4  ;;  %v617_v50 = vshrl.u32 %v561_v44, 16  ;;  %v620_v54 = vshll.u32 %v561_v44, 16 }
  0x41   : > { %2959 = vmatprep.subr.bf16.mxu0 %v3169_v19  ;;  %v1337_v10 = vor.u32 %v1336_v2, %v1333_v1  ;;  %v626_v58 = vshll.u32 %v562_v47, 16 }
  0x42   : > { %v1351_v15 = vor.u32 %v1350_v7, %v1347_v6  ;;  %v601_v55 = vsel %vm3406_vm2, %v596_v46, %v600_v36  ;;  %v619_v57 = vrot.slane %v617_v50, 4  ;;  %v622_v63 = vrot.slane %v620_v54, 5  ;;  %v3189_v6 = vld [vmem:[%s3671_s1 + $0x1b8] sm:$0xff]   ;;  %v3190_v7 = vld [vmem:[%s3671_s1 + $0xc0] sm:$0xff]  }
  0x43   : > { %2864 = vmatpush3.bf16.msra.mxu1 %v3168_v14  ;;  %v2555_v14 = vcombine.low %v1315_v5, %v1329_v9  ;;  %v1338_v20 = vrot.slane %v1337_v10, 4  ;;  %v3192_v10 = vld [vmem:[%s3671_s1 + $0x1c0] sm:$0xff]   ;;  %v3198_v50 = vld [vmem:[%s3671_s1 + $0xd8] sm:$0xff]  }
  0x44   : > { %2960 = vmatpush3.bf16.msra.mxu0 %v3169_v19  ;;  %2873 = vmatprep.subr.bf16.mxu1 %v3171_v21  ;;  %v578_v19 = vshll.u32 %v555_v11, 16  ;;  %v623_v1 = vor.u32 %v622_v63, %v619_v57  ;;  %v3193_v11 = vld [vmem:[%s3335_s14 + $0x18] ss:$8 sps:$4 sm:$0xff]  }
  0x45   : > { %2969 = vmatprep.subr.bf16.mxu0 %v3172_v24 }
  0x46   : > { %2866 = vmatmul.mubr.bf16.vlgmr.msra.gmra.mrb[0].mxu1 %v3173_v25  ;;  %v577_v25 = vrot.slane %v575_v18, 4  ;;  %v624_v5 = vrot.slane %v623_v1, 4  ;;  %v3195_v18 = vld [vmem:[%s3671_s1 + $0x1c8] sm:$0xff]   ;;  %v3200_v1 = vld [vmem:[%s3671_s1 + $0xe0] sm:$0xff]  }
  0x47   : > { %2874 = vmatpush3.bf16.msra.mxu1 %v3171_v21  ;;  %2962 = vmatmul.mubr.bf16.vlgmr.msra.gmra.mrb[0].mxu0 %v2554_v28  ;;  %v584_v21 = vshll.u32 %v556_v12, 16  ;;  %v3181_v28 = vld [vmem:[%s3671_s1 + $0x1a0] sm:$0xff]  }
  0x48   : > { %2970 = vmatpush3.bf16.msra.mxu0 %v3172_v24  ;;  %2875 = vmatprep.subr.bf16.mxu1 %v3174_v26  ;;  %v1352_v24 = vrot.slane %v1351_v15, 4  ;;  %v563_v12 = vld [vmem:[%s3335_s14 + $0x20] sm:$0xf]  ;;  %v564_v15 = vld [vmem:[%s3335_s14 + $0x24] sm:$0x1] }
  0x49   : > { %2971 = vmatprep.subr.bf16.mxu0 %v3175_v29  ;;  %2869 = vmatprep.mubr.bf16.mxu1 %v3184_v37  ;;  %v586_v35 = vrot.slane %v584_v21, 5  ;;  %v3191_v37 = vld [vmem:[%s3335_s14 + $0x8] ss:$8 sps:$4 sm:$0xff]   ;;  %v640_v21 = vshll.u32 %v564_v15, 16 }
  0x4a   : > { %2965 = vmatprep.mubr.bf16.mxu0 %v2555_v14  ;;  %v1357_v33 = vsel %vm3406_vm2, %v1352_v24, %v1356_v8  ;;  %v3194_v14 = vld [vmem:[%s3671_s1 + $0xc8] sm:$0xff]   ;;  %v654_v24 = vshll.u32 %v566_v17, 16  ;;  %v2639_v17 = vld [vmem:[%s3335_s14 + $0x10] sm:$0xf] }
  0x4b   : > { %2876 = vmatpush3.bf16.msra.mxu1 %v3174_v26  ;;  %v580_v26 = vrot.slane %v578_v19, 5  ;;  %v631_v19 = vshrl.u32 %v563_v12, 16  ;;  %v2637_v15 = vld [vmem:[%s3335_s14 + $0x8] sm:$0xf]  ;;  %v1936_v23 = vshll.u32 %v2639_v17, 16 }
  0x4c   : > { %2972 = vmatpush3.bf16.msra.mxu0 %v3175_v29  ;;  %2877 = vmatprep.subr.bf16.mxu1 %v3176_v43  ;;  %v1343_v29 = vsel %vm3406_vm2, %v1338_v20, %v1342_v3  ;;  %v628_v3 = vrot.slane %v626_v58, 5  ;;  %v634_v20 = vshll.u32 %v563_v12, 16  ;;  %v3206_v58 = vld [vmem:[%s3335_s14 + $0x38] ss:$8 sps:$4 sm:$0xff]  }
  0x4d   : > { %2973 = vmatprep.subr.bf16.mxu0 %v3177_v52  ;;  %v581_v34 = vor.u32 %v580_v26, %v577_v25  ;;  %v2556_v39 = vcombine.low %v1343_v29, %v1357_v33  ;;  %v3204_v25 = vld [vmem:[%s3335_s14 + $0x28] ss:$8 sps:$4 sm:$0xff]   ;;  %v633_v26 = vrot.slane %v631_v19, 4  ;;  %v647_v29 = vrot.slane %v645_v22, 4  ;;  %v568_v33 = vld [vmem:[%s3335_s14 + $0x34] sm:$0x1] }
  0x4e   : > { %2870 = vmatmul.mubr.bf16.gmra.mrb[4].mxu1 %v3187_v48  ;;  %v606_v48 = vshll.u32 %v559_v41, 16  ;;  %v629_v9 = vsel %vm3406_vm2, %v624_v5, %v628_v3  ;;  %v636_v27 = vrot.slane %v634_v20, 5  ;;  %v668_v40 = vshll.u32 %v568_v33, 16  ;;  %v3197_v41 = vld [vmem:[%s3671_s1 + $0x1d0] sm:$0xff]   ;;  %v3201_v5 = vld [vmem:[%s3671_s1 + $0x1e0] sm:$0xff]   ;;  %v3208_v12 = vld [vmem:[%s3671_s1 + $0xf8] sm:$0xff]  }
  0x4f   : > { %2878 = vmatpush3.bf16.msra.mxu1 %v3176_v43  ;;  %v582_v42 = vrot.slane %v581_v34, 4  ;;  %v560_v43 = vld [vmem:[%s3335_s14 + $0x14] sm:$0x1]  ;;  %2966 = vmatmul.mubr.bf16.gmra.mrb[4].mxu0 %v2556_v39  ;;  %v569_v34 = vld [vmem:[%s3335_s14 + $0x38] sm:$0xf]  ;;  %v662_v39 = vshll.u32 %v567_v30, 16 }
  0x50   : > { %2974 = vmatpush3.bf16.msra.mxu0 %v3177_v52  ;;  %2879 = vmatprep.subr.bf16.mxu1 %v3178_v59  ;;  %v612_v49 = vshll.u32 %v560_v43, 16  ;;  %v605_v52 = vrot.slane %v603_v45, 4  ;;  %v608_v56 = vrot.slane %v606_v48, 5  ;;  %v637_v36 = vor.u32 %v636_v27, %v633_v26  ;;  %v2648_v33 = vld [vmem:[%s3335_s14 + $0x34] sm:$0x1] }
  0x51   : > { %2975 = vmatprep.subr.bf16.mxu0 %v3179_v4  ;;  %v587_v51 = vsel %vm3406_vm2, %v582_v42, %v586_v35  ;;  %2985 = vmatprep.mubr.bf16.mxu0 %v3191_v37  ;;  %v3196_v35 = vld [vmem:[%s3671_s1 + $0xd0] sm:$0xff]   ;;  %v570_v37 = vld [vmem:[%s3335_s14 + $0x3c] sm:$0x1]  ;;  %v651_v42 = vor.u32 %v650_v31, %v647_v29  ;;  %v673_v43 = vshrl.u32 %v569_v34, 16  ;;  %v676_v44 = vshll.u32 %v569_v34, 16 }
  0x52   : > { %v2437_v61 = vcombine.low %v587_v51, %v601_v55  ;;  %v614_v62 = vrot.slane %v612_v49, 5  ;;  %v609_v0 = vor.u32 %v608_v56, %v605_v52  ;;  %v682_v45 = vshll.u32 %v570_v37, 16  ;;  %v2647_v29 = vld [vmem:[%s3335_s14 + $0x30] sm:$0xf]  ;;  %v3213_v34 = vld [vmem:[%s3335_s14 + $0x60] ss:$8 sps:$4 sm:$0xff]  }
  0x53   : > { %2880 = vmatpush3.bf16.msra.mxu1 %v3178_v59  ;;  %v3185_v59 = vld [vmem:[%s3671_s1 + $0xb0] sm:$0xff]   ;;  %v638_v46 = vrot.slane %v637_v36, 4  ;;  %v664_v48 = vrot.slane %v662_v39, 5  ;;  %v670_v49 = vrot.slane %v668_v40, 5  ;;  %v652_v51 = vrot.slane %v651_v42, 4  ;;  %v3215_v39 = vld [vmem:[%s3671_s1 + $0x208] sm:$0xff]  }
  0x54   : > { %2976 = vmatpush3.bf16.msra.mxu0 %v3179_v4  ;;  %2881 = vmatprep.subr.bf16.mxu1 %v3180_v13  ;;  %v610_v2 = vrot.slane %v609_v0, 4  ;;  %v3188_v4 = vld [vmem:[%s3671_s1 + $0xb8] sm:$0xff]   ;;  %v675_v52 = vrot.slane %v673_v43, 4  ;;  %v678_v54 = vrot.slane %v676_v44, 5  ;;  %v684_v55 = vrot.slane %v682_v45, 5 }
  0x55   : > { %2977 = vmatprep.subr.bf16.mxu0 %v3181_v28  ;;  %2889 = vmatprep.mubr.bf16.mxu1 %v2437_v61  ;;  %v3199_v61 = vld [vmem:[%s3671_s1 + $0x1d8] sm:$0xff]   ;;  %v1919_v19 = vshrl.u32 %v2637_v15, 16  ;;  %v1922_v20 = vshll.u32 %v2637_v15, 16  ;;  %v1933_v22 = vshrl.u32 %v2639_v17, 16  ;;  %v1992_v42 = vshll.u32 %v2647_v29, 16  ;;  %v3222_v15 = vld [vmem:[%s3671_s1 + $0x220] sm:$0xff]  }
  0x56   : > { %v615_v8 = vsel %vm3406_vm2, %v610_v2, %v614_v62  ;;  %v1998_v43 = vshll.u32 %v2648_v33, 16  ;;  %v3216_v44 = vld [vmem:[%s3335_s14 + $0xb0] ss:$8 sps:$4 sm:$0xff]  }
  0x57   : > { %2882 = vmatpush3.bf16.msra.mxu1 %v3180_v13  ;;  %v2438_v13 = vcombine.low %v615_v8, %v629_v9  ;;  %v3202_v8 = vld [vmem:[%s3671_s1 + $0xe8] sm:$0xff]   ;;  %v1921_v26 = vrot.slane %v1919_v19, 4  ;;  %v1924_v27 = vrot.slane %v1922_v20, 5  ;;  %v1935_v31 = vrot.slane %v1933_v22, 4 }
  0x58   : > { %2978 = vmatpush3.bf16.msra.mxu0 %v3181_v28  ;;  %2883 = vmatprep.subr.bf16.mxu1 %v3182_v32  ;;  %v642_v28 = vrot.slane %v640_v21, 5  ;;  %v3203_v9 = vld [vmem:[%s3671_s1 + $0x1e8] sm:$0xff]   ;;  %v1928_v21 = vshll.u32 %v2638_v16, 16 }
  0x59   : > { %2979 = vmatprep.subr.bf16.mxu0 %v3183_v38  ;;  %v3223_v20 = vld [vmem:[%s3671_s1 + $0x228] sm:$0xff]  }
  0x5a   : > { %v643_v56 = vsel %vm3406_vm2, %v638_v46, %v642_v28  ;;  %v2646_v28 = vld [vmem:[%s3335_s14 + $0x2c] sm:$0x1]  ;;  %v1930_v45 = vrot.slane %v1928_v21, 5  ;;  %v2650_v21 = vld [vmem:[%s3335_s14 + $0x3c] sm:$0x1] }
  0x5b   : > { %2884 = vmatpush3.bf16.msra.mxu1 %v3182_v32  ;;  %v656_v32 = vrot.slane %v654_v24, 5 }
  0x5c   : > { %2980 = vmatpush3.bf16.msra.mxu0 %v3183_v38  ;;  %2885 = vmatprep.subr.bf16.mxu1 %v3185_v59  ;;  %v659_v38 = vshrl.u32 %v567_v30, 16  ;;  %v3212_v30 = vld [vmem:[%s3335_s14 + $0xa0] ss:$8 sps:$4 sm:$0xff]  }
  0x5d   : > { %2981 = vmatprep.subr.bf16.mxu0 %v3186_v60 }
  0x5e   : > { %v661_v47 = vrot.slane %v659_v38, 4  ;;  %v1984_v38 = vshll.u32 %v2646_v28, 16 }
  0x5f   : > { %2886 = vmatpush3.bf16.msra.mxu1 %v3185_v59  ;;  %v657_v59 = vsel %vm3406_vm2, %v652_v51, %v656_v32  ;;  %v1938_v32 = vrot.slane %v1936_v23, 5 }
  0x60   : > { %2982 = vmatpush3.bf16.msra.mxu0 %v3186_v60  ;;  %2887 = vmatprep.subr.bf16.mxu1 %v3188_v4  ;;  %v665_v57 = vor.u32 %v664_v48, %v661_v47  ;;  %v679_v60 = vor.u32 %v678_v54, %v675_v52  ;;  %v2439_v62 = vcombine.low %v643_v56, %v657_v59  ;;  %v1994_v54 = vrot.slane %v1992_v42, 5 }
  0x61   : > { %2983 = vmatprep.subr.bf16.mxu0 %v3189_v6  ;;  %v1939_v40 = vor.u32 %v1938_v32, %v1935_v31  ;;  %v1986_v56 = vrot.slane %v1984_v38, 5  ;;  %v2000_v59 = vrot.slane %v1998_v43, 5  ;;  %v2642_v31 = vld [vmem:[%s3335_s14 + $0x1c] sm:$0x1]  ;;  %v2644_v32 = vld [vmem:[%s3335_s14 + $0x24] sm:$0x1] }
  0x62   : > { %v666_v63 = vrot.slane %v665_v57, 4  ;;  %v680_v0 = vrot.slane %v679_v60, 4  ;;  %v3220_v57 = vld [vmem:[%s3671_s1 + $0x210] sm:$0xff]  }
  0x63   : > { %2888 = vmatpush3.bf16.msra.mxu1 %v3188_v4  ;;  %v3211_v4 = vld [vmem:[%s3335_s14 + $0x50] ss:$8 sps:$4 sm:$0xff]   ;;  %v1940_v51 = vrot.slane %v1939_v40, 4 }
  0x64   : > { %2984 = vmatpush3.bf16.msra.mxu0 %v3189_v6  ;;  %2897 = vmatprep.subr.bf16.mxu1 %v3190_v7  ;;  %v671_v2 = vsel %vm3406_vm2, %v666_v63, %v670_v49  ;;  %v685_v3 = vsel %vm3406_vm2, %v680_v0, %v684_v55  ;;  %v3217_v49 = vld [vmem:[%s3335_s14 + $0x70] ss:$8 sps:$4 sm:$0xff]  }
  0x65   : > { %2993 = vmatprep.subr.bf16.mxu0 %v3192_v10  ;;  %v2440_v6 = vcombine.low %v671_v2, %v685_v3  ;;  %v3221_v3 = vld [vmem:[%s3671_s1 + $0x218] sm:$0xff]  }
  0x66   : > { %2890 = vmatmul.mubr.bf16.vlgmr.msra.gmra.mrb[0].mxu1 %v2438_v13  ;;  %v3209_v13 = vld [vmem:[%s3671_s1 + $0x1f8] sm:$0xff]  }
  0x67   : > { %2898 = vmatpush3.bf16.msra.mxu1 %v3190_v7  ;;  %2986 = vmatmul.mubr.bf16.vlgmr.msra.gmra.mrb[0].mxu0 %v3193_v11  ;;  %v3210_v7 = vld [vmem:[%s3335_s14 + $0x90] ss:$8 sps:$4 sm:$0xff]  }
  0x68   : > { %2994 = vmatpush3.bf16.msra.mxu0 %v3192_v10  ;;  %2899 = vmatprep.subr.bf16.mxu1 %v3194_v14  ;;  %v3205_v10 = vld [vmem:[%s3671_s1 + $0xf0] sm:$0xff]  }
  0x69   : > { %2995 = vmatprep.subr.bf16.mxu0 %v3195_v18  ;;  %2989 = vmatprep.mubr.bf16.mxu0 %v3204_v25  ;;  %v3207_v11 = vld [vmem:[%s3671_s1 + $0x1f0] sm:$0xff]   ;;  %v2645_v25 = vld [vmem:[%s3335_s14 + $0x28] sm:$0xf] }
  0x6a   : > { %2893 = vmatprep.mubr.bf16.mxu1 %v2439_v62  ;;  %v1975_v36 = vshrl.u32 %v2645_v25, 16  ;;  %v1978_v37 = vshll.u32 %v2645_v25, 16 }
  0x6b   : > { %2900 = vmatpush3.bf16.msra.mxu1 %v3194_v14  ;;  %v3214_v14 = vld [vmem:[%s3671_s1 + $0x200] sm:$0xff]  }
  0x6c   : > { %2996 = vmatpush3.bf16.msra.mxu0 %v3195_v18  ;;  %2901 = vmatprep.subr.bf16.mxu1 %v3196_v35  ;;  %v2640_v18 = vld [vmem:[%s3335_s14 + $0x14] sm:$0x1]  ;;  %v1977_v47 = vrot.slane %v1975_v36, 4  ;;  %v1980_v48 = vrot.slane %v1978_v37, 5 }
  0x6d   : > { %2997 = vmatprep.subr.bf16.mxu0 %v3197_v41  ;;  %v1942_v24 = vshll.u32 %v2640_v18, 16  ;;  %v3224_v37 = vld [vmem:[%s3671_s1 + $0x230] sm:$0xff]  }
  0x6e   : > { %2894 = vmatmul.mubr.bf16.gmra.mrb[4].mxu1 %v2440_v6  ;;  %v1981_v55 = vor.u32 %v1980_v48, %v1977_v47  ;;  %v2651_v6 = vld [vmem:[%s3335_s14 + $0x40] sm:$0xf] }
  0x6f   : > { %2902 = vmatpush3.bf16.msra.mxu1 %v3196_v35  ;;  %2990 = vmatmul.mubr.bf16.gmra.mrb[4].mxu0 %v3206_v58  ;;  %v1925_v35 = vor.u32 %v1924_v27, %v1921_v26  ;;  %v1944_v46 = vrot.slane %v1942_v24, 5 }
  0x70   : > { %2998 = vmatpush3.bf16.msra.mxu0 %v3197_v41  ;;  %2903 = vmatprep.subr.bf16.mxu1 %v3198_v50  ;;  %v1989_v41 = vshrl.u32 %v2647_v29, 16  ;;  %v1982_v60 = vrot.slane %v1981_v55, 4 }
  0x71   : > { %2999 = vmatprep.subr.bf16.mxu0 %v3199_v61  ;;  %3009 = vmatprep.mubr.bf16.mxu0 %v3211_v4  ;;  %v1945_v63 = vsel %vm3406_vm2, %v1940_v51, %v1944_v46  ;;  %v3225_v46 = vld [vmem:[%s3671_s1 + $0x238] sm:$0xff]  }
  0x72   : > { %2913 = vmatprep.mubr.bf16.mxu1 %v3210_v7  ;;  %v1991_v52 = vrot.slane %v1989_v41, 4  ;;  %v1987_v2 = vsel %vm3406_vm2, %v1982_v60, %v1986_v56  ;;  %v1970_v41 = vshll.u32 %v2644_v32, 16 }
  0x73   : > { %2904 = vmatpush3.bf16.msra.mxu1 %v3198_v50  ;;  %v1926_v50 = vrot.slane %v1925_v35, 4 }
  0x74   : > { %3000 = vmatpush3.bf16.msra.mxu0 %v3199_v61  ;;  %2905 = vmatprep.subr.bf16.mxu1 %v3200_v1  ;;  %v1995_v58 = vor.u32 %v1994_v54, %v1991_v52  ;;  %v3218_v61 = vld [vmem:[%s3335_s14 + $0xc0] ss:$8 sps:$4 sm:$0xff]  }
  0x75   : > { %3001 = vmatprep.subr.bf16.mxu0 %v3201_v5  ;;  %v1931_v62 = vsel %vm3406_vm2, %v1926_v50, %v1930_v45  ;;  %v1972_v50 = vrot.slane %v1970_v41, 5 }
  0x76   : > { %v1996_v0 = vrot.slane %v1995_v58, 4  ;;  %v2669_v7 = vcombine.low %v1931_v62, %v1945_v63 }
  0x77   : > { %2906 = vmatpush3.bf16.msra.mxu1 %v3200_v1  ;;  %v3219_v1 = vld [vmem:[%s3335_s14 + $0x80] ss:$8 sps:$4 sm:$0xff]  }
  0x78   : > { %3002 = vmatpush3.bf16.msra.mxu0 %v3201_v5  ;;  %2907 = vmatprep.subr.bf16.mxu1 %v3202_v8  ;;  %v2001_v4 = vsel %vm3406_vm2, %v1996_v0, %v2000_v59  ;;  %v2649_v5 = vld [vmem:[%s3335_s14 + $0x38] sm:$0xf] }
  0x79   : > { %3003 = vmatprep.subr.bf16.mxu0 %v3203_v9 }
  0x7b   : > { %2908 = vmatpush3.bf16.msra.mxu1 %v3202_v8  ;;  %v2641_v8 = vld [vmem:[%s3335_s14 + $0x18] sm:$0xf] }
  0x7c   : > { %3004 = vmatpush3.bf16.msra.mxu0 %v3203_v9  ;;  %2909 = vmatprep.subr.bf16.mxu1 %v3205_v10  ;;  %v2643_v9 = vld [vmem:[%s3335_s14 + $0x20] sm:$0xf]  ;;  %v1947_v16 = vshrl.u32 %v2641_v8, 16  ;;  %v1950_v17 = vshll.u32 %v2641_v8, 16 }
  0x7d   : > { %3005 = vmatprep.subr.bf16.mxu0 %v3207_v11  ;;  %v1961_v18 = vshrl.u32 %v2643_v9, 16  ;;  %v1964_v19 = vshll.u32 %v2643_v9, 16  ;;  %v2681_v9 = vld [vmem:[%s3672_s2] ss:$0 sm:$0xff] }
  0x7e   : > { %v1949_v26 = vrot.slane %v1947_v16, 4  ;;  %v1952_v27 = vrot.slane %v1950_v17, 5 }
  0x7f   : > { %2910 = vmatpush3.bf16.msra.mxu1 %v3205_v10  ;;  %v2671_v10 = vcombine.low %v1987_v2, %v2001_v4  ;;  %v1963_v28 = vrot.slane %v1961_v18, 4  ;;  %v1966_v29 = vrot.slane %v1964_v19, 5 }
  0x80   : > { %3006 = vmatpush3.bf16.msra.mxu0 %v3207_v11  ;;  %2911 = vmatprep.subr.bf16.mxu1 %v3208_v12  ;;  %v2003_v11 = vshrl.u32 %v2649_v5, 16  ;;  %v1953_v38 = vor.u32 %v1952_v27, %v1949_v26 }
  0x81   : > { %3007 = vmatprep.subr.bf16.mxu0 %v3209_v13  ;;  %v1967_v40 = vor.u32 %v1966_v29, %v1963_v28 }
  0x82   : > { %v2005_v22 = vrot.slane %v2003_v11, 4  ;;  %v1954_v47 = vrot.slane %v1953_v38, 4 }
  0x83   : > { %2912 = vmatpush3.bf16.msra.mxu1 %v3208_v12  ;;  %v2006_v12 = vshll.u32 %v2649_v5, 16 }
  0x84   : > { %3008 = vmatpush3.bf16.msra.mxu0 %v3209_v13  ;;  %3041 = vmatprep.subr.bf16.mxu1 %v3214_v14  ;;  %v2017_v13 = vshrl.u32 %v2651_v6, 16 }
  0x85   : > { %3017 = vmatprep.subr.bf16.mxu0 %v3214_v14  ;;  %v2008_v23 = vrot.slane %v2006_v12, 5 }
  0x86   : > { %2914 = vmatmul.mubr.bf16.vlgmr.msra.gmra.mrb[0].mxu1 %v3212_v30  ;;  %v2019_v24 = vrot.slane %v2017_v13, 4  ;;  %v2652_v30 = vld [vmem:[%s3335_s14 + $0x44] sm:$0x1] }
  0x87   : > { %3010 = vmatmul.mubr.bf16.vlgmr.msra.gmra.mrb[0].mxu0 %v3213_v34  ;;  %3049 = vmatpush3.bf16.msra.mxu1 %v3214_v14  ;;  %v2009_v33 = vor.u32 %v2008_v23, %v2005_v22  ;;  %v2012_v34 = vshll.u32 %v2650_v21, 16  ;;  %v2026_v36 = vshll.u32 %v2652_v30, 16 }
  0x88   : > { %3018 = vmatpush3.bf16.msra.mxu0 %v3214_v14  ;;  %3042 = vmatprep.subr.bf16.mxu1 %v3215_v39  ;;  %v2020_v14 = vshll.u32 %v2651_v6, 16 }
  0x89   : > { %3019 = vmatprep.subr.bf16.mxu0 %v3215_v39  ;;  %2917 = vmatprep.mubr.bf16.mxu1 %v3216_v44  ;;  %v2010_v42 = vrot.slane %v2009_v33, 4  ;;  %v2014_v43 = vrot.slane %v2012_v34, 5  ;;  %v2028_v45 = vrot.slane %v2026_v36, 5 }
  0x8a   : > { %3013 = vmatprep.mubr.bf16.mxu0 %v3217_v49  ;;  %v2022_v25 = vrot.slane %v2020_v14, 5  ;;  %v1968_v49 = vrot.slane %v1967_v40, 4 }
  0x8b   : > { %3050 = vmatpush3.bf16.msra.mxu1 %v3215_v39  ;;  %v2015_v51 = vsel %vm3406_vm2, %v2010_v42, %v2014_v43 }
  0x8c   : > { %3020 = vmatpush3.bf16.msra.mxu0 %v3215_v39  ;;  %3043 = vmatprep.subr.bf16.mxu1 %v3220_v57  ;;  %v2023_v35 = vor.u32 %v2022_v25, %v2019_v24  ;;  %v1956_v39 = vshll.u32 %v2642_v31, 16  ;;  %v1973_v55 = vsel %vm3406_vm2, %v1968_v49, %v1972_v50 }
  0x8d   : > { %3021 = vmatprep.subr.bf16.mxu0 %v3220_v57 }
  0x8e   : > { %2918 = vmatmul.mubr.bf16.gmra.mrb[4].mxu1 %v3218_v61  ;;  %v2024_v44 = vrot.slane %v2023_v35, 4  ;;  %v1958_v48 = vrot.slane %v1956_v39, 5 }
  0x8f   : > { %3014 = vmatmul.mubr.bf16.gmra.mrb[4].mxu0 %v3219_v1  ;;  %3051 = vmatpush3.bf16.msra.mxu1 %v3220_v57 }
  0x90   : > { %3022 = vmatpush3.bf16.msra.mxu0 %v3220_v57  ;;  %3044 = vmatprep.subr.bf16.mxu1 %v3221_v3  ;;  %v2029_v52 = vsel %vm3406_vm2, %v2024_v44, %v2028_v45  ;;  %v1959_v54 = vsel %vm3406_vm2, %v1954_v47, %v1958_v48 }
  0x91   : > { %3023 = vmatprep.subr.bf16.mxu0 %v3221_v3  ;;  %3033 = vmatprep.mubr.bf16.mxu0 %v2669_v7  ;;  %v2672_v56 = vcombine.low %v2015_v51, %v2029_v52  ;;  %v2670_v57 = vcombine.low %v1959_v54, %v1973_v55 }
  0x92   : > { %3037 = vmatprep.mubr.bf16.mxu1 %v2671_v10 }
  0x93   : > { %3052 = vmatpush3.bf16.msra.mxu1 %v3221_v3 }
  0x94   : > { %3024 = vmatpush3.bf16.msra.mxu0 %v3221_v3  ;;  %3045 = vmatprep.subr.bf16.mxu1 %v3222_v15 }
  0x95   : > { %3025 = vmatprep.subr.bf16.mxu0 %v3222_v15 }
  0x97   : > { %3053 = vmatpush3.bf16.msra.mxu1 %v3222_v15 }
  0x98   : > { %3026 = vmatpush3.bf16.msra.mxu0 %v3222_v15  ;;  %3046 = vmatprep.subr.bf16.mxu1 %v3223_v20  ;;  %v2682_v15 = vld [vmem:[%s3673_s3] ss:$0 sm:$0xff] }
  0x99   : > { %3027 = vmatprep.subr.bf16.mxu0 %v3223_v20 }
  0x9b   : > { %3054 = vmatpush3.bf16.msra.mxu1 %v3223_v20 }
  0x9c   : > { %3028 = vmatpush3.bf16.msra.mxu0 %v3223_v20  ;;  %3047 = vmatprep.subr.bf16.mxu1 %v3224_v37 }
  0x9d   : > { %3029 = vmatprep.subr.bf16.mxu0 %v3224_v37 }
  0x9f   : > { %3055 = vmatpush3.bf16.msra.mxu1 %v3224_v37 }
  0xa0   : > { %3030 = vmatpush3.bf16.msra.mxu0 %v3224_v37  ;;  %3048 = vmatprep.subr.bf16.mxu1 %v3225_v46 }
  0xa1   : > { %3031 = vmatprep.subr.bf16.mxu0 %v3225_v46 }
  0xa3   : > { %3056 = vmatpush3.bf16.msra.mxu1 %v3225_v46 }
  0xa4   : > { %3032 = vmatpush3.bf16.msra.mxu0 %v3225_v46 }
  0xa6   : > { %3038 = vmatmul.mubr.bf16.vlgmr.msra.gmra.mrb[8].mxu1 %v2672_v56 }
  0xa7   : > { %3034 = vmatmul.mubr.bf16.vlgmr.msra.gmra.mrb[0].mxu0 %v2670_v57 }
 0x159   : > { %v2915_v58 = vpop.f32.mrb[0].mxu1 }
 0x15a   : > { %v988_v59 = vpop.f32.mrb[1].mxu1 }
 0x15b   : > { %v2916_v60 = vpop.f32.mrb[2].mxu1 }
 0x15c   : > { %v991_v61 = vpop.f32.mrb[3].mxu1 }
 0x161   : > { %v2919_v62 = vpop.f32.mrb[4].mxu1 }
 0x162   : > { %v3015_v63 = vpop.f32.mrb[4].mxu0  ;;  %v1004_v0 = vpop.f32.mrb[5].mxu1 }
 0x163   : > { %v3061_v1 = vadd.f32 %v3015_v63, %v2919_v62  ;;  %v1863_v2 = vpop.f32.mrb[5].mxu0  ;;  %v2920_v3 = vpop.f32.mrb[6].mxu1 }
 0x164   : > { %v3063_v4 = vadd.f32 %v1863_v2, %v1004_v0  ;;  %v3016_v53 = vpop.f32.mrb[6].mxu0  ;;  %v1007_v5 = vpop.f32.mrb[7].mxu1 }
 0x165   : > { %v3065_v6 = vadd.f32 %v3016_v53, %v2920_v3  ;;  %v1866_v7 = vpop.f32.mrb[7].mxu0 }
 0x166   : > { %v3067_v8 = vadd.f32 %v1866_v7, %v1007_v5 }
 0x179   : > { %v3039_v10 = vpop.f32.mrb[8].mxu1 }
 0x17a   : > { %v3035_v11 = vpop.f32.mrb[0].mxu0  ;;  %v3062_v12 = vadd.f32 %v3061_v1, %v3039_v10  ;;  %v2161_v13 = vpop.f32.mrb[9].mxu1 }
 0x17b   : > { %v3057_v14 = vadd.f32 %v3035_v11, %v2915_v58  ;;  %v2145_v16 = vpop.f32.mrb[1].mxu0  ;;  %v3064_v17 = vadd.f32 %v3063_v4, %v2161_v13  ;;  %v3040_v18 = vpop.f32.mrb[10].mxu1 }
 0x17c   : > { %v2221_v19 = vmul.f32 %v3062_v12, %v2681_v9  ;;  %v3058_v20 = vadd.f32 %v2145_v16, %v988_v59  ;;  %v3036_v21 = vpop.f32.mrb[2].mxu0  ;;  %v3066_v22 = vadd.f32 %v3065_v6, %v3040_v18  ;;  %v2164_v23 = vpop.f32.mrb[11].mxu1 }
 0x17d   : > { %v2217_v24 = vmul.f32 %v3057_v14, %v2681_v9  ;;  %v2219_v25 = vmul.f32 %v3064_v17, %v2681_v9  ;;  %v3059_v26 = vadd.f32 %v3036_v21, %v2916_v60  ;;  %v2148_v27 = vpop.f32.mrb[3].mxu0  ;;  %v3068_v28 = vadd.f32 %v3067_v8, %v2164_v23 }
 0x17e   : > { %v3655_v29 = vadd.f32 %v2682_v15, %v2221_v19  ;;  %v2215_v30 = vmul.f32 %v3058_v20, %v2681_v9  ;;  %v2222_v31 = vmul.f32 %v3066_v22, %v2681_v9  ;;  %v3060_v32 = vadd.f32 %v2148_v27, %v991_v61 }
 0x17f   : > { %v2232_v33 = vadd.f32 %v2682_v15, %v2217_v24  ;;  %v3657_v34 = vadd.f32 %v2682_v15, %v2219_v25  ;;  %v2218_v35 = vmul.f32 %v3059_v26, %v2681_v9  ;;  %v2220_v36 = vmul.f32 %v3068_v28, %v2681_v9 }
 0x180   : > { %v2689_v37 = vmul.f32 -1.442695, %v3655_v29  ;;  %v2230_v38 = vadd.f32 %v2682_v15, %v2215_v30  ;;  %v2237_v39 = vadd.f32 %v2682_v15, %v2222_v31  ;;  %v2216_v40 = vmul.f32 %v3060_v32, %v2681_v9 }
 0x181   : > { %v2685_v41 = vmul.f32 -1.442695, %v2232_v33  ;;  %v2687_v42 = vmul.f32 -1.442695, %v3657_v34  ;;  %v2233_v43 = vadd.f32 %v2682_v15, %v2218_v35  ;;  %v2235_v44 = vadd.f32 %v2682_v15, %v2220_v36 }
 0x182   : > { %3226 = vpow2.f32 %v2689_v37  ;;  %v2683_v45 = vmul.f32 -1.442695, %v2230_v38  ;;  %v2231_v46 = vadd.f32 %v2682_v15, %v2216_v40  ;;  %v2690_v48 = vmul.f32 -1.442695, %v2237_v39 }
 0x183   : > { %3228 = vpow2.f32 %v2685_v41  ;;  %v2686_v47 = vmul.f32 -1.442695, %v2233_v43  ;;  %v2688_v50 = vmul.f32 -1.442695, %v2235_v44 }
 0x184   : > { %3230 = vpow2.f32 %v2683_v45  ;;  %v2684_v49 = vmul.f32 -1.442695, %v2231_v46 }
 0x185   : > { %3232 = vpow2.f32 %v2687_v42 }
 0x186   : > { %3234 = vpow2.f32 %v2686_v47 }
 0x187   : > { %3236 = vpow2.f32 %v2690_v48 }
 0x188   : > { %3238 = vpow2.f32 %v2684_v49 }
 0x189   : > { %3240 = vpow2.f32 %v2688_v50 }
 0x18c   : > { %v3227_v51 = vpop.eup %3226 }
 0x18d   : > { %v3229_v52 = vpop.eup %3228  ;;  %v2268_v54 = vadd.f32 1.0, %v3227_v51 }
 0x18e   : > { %v3231_v55 = vpop.eup %3230  ;;  %v2264_v56 = vadd.f32 1.0, %v3229_v52 }
 0x18f   : > { %v3233_v57 = vpop.eup %3232  ;;  %3242 = vrcp.f32 %v2268_v54  ;;  %v2262_v58 = vadd.f32 1.0, %v3231_v55 }
 0x190   : > { %v3235_v59 = vpop.eup %3234  ;;  %3244 = vrcp.f32 %v2264_v56  ;;  %v2266_v60 = vadd.f32 1.0, %v3233_v57 }
 0x191   : > { %v3237_v61 = vpop.eup %3236  ;;  %3246 = vrcp.f32 %v2262_v58  ;;  %v2265_v62 = vadd.f32 1.0, %v3235_v59 }
 0x192   : > { %v3239_v63 = vpop.eup %3238  ;;  %3248 = vrcp.f32 %v2266_v60  ;;  %v2269_v0 = vadd.f32 1.0, %v3237_v61 }
 0x193   : > { %v3241_v1 = vpop.eup %3240  ;;  %3250 = vrcp.f32 %v2265_v62  ;;  %v2263_v2 = vadd.f32 1.0, %v3239_v63 }
 0x194   : > { %3252 = vrcp.f32 %v2269_v0  ;;  %v2267_v3 = vadd.f32 1.0, %v3241_v1 }
 0x195   : > { %3254 = vrcp.f32 %v2263_v2 }
 0x196   : > { %3256 = vrcp.f32 %v2267_v3 }
 0x199   : > { %v3243_v4 = vpop.eup %3242 }
 0x19a   : > { %v3245_v53 = vpop.eup %3244  ;;  %v2292_v12 = vmul.f32 %v3243_v4, %v3655_v29 }
 0x19b   : > { %v3247_v5 = vpop.eup %3246  ;;  %v2288_v9 = vmul.f32 %v3245_v53, %v2232_v33 }
 0x19c   : > { %v3249_v6 = vpop.eup %3248  ;;  %v2286_v15 = vmul.f32 %v3247_v5, %v2230_v38 }
 0x19d   : > { %v3251_v7 = vpop.eup %3250  ;;  %v2290_v18 = vmul.f32 %v3249_v6, %v3657_v34 }
 0x19e   : > { %v3253_v8 = vpop.eup %3252  ;;  %v2289_v10 = vmul.f32 %v3251_v7, %v2233_v43 }
 0x19f   : > { %v3255_v11 = vpop.eup %3254  ;;  %v2293_v13 = vmul.f32 %v3253_v8, %v2237_v39 }
 0x1a0   : > { %v3257_v14 = vpop.eup %3256  ;;  %v2702_v16 = vpack.c.bf16 %v2289_v10, %v2288_v9  ;;  %v2287_v17 = vmul.f32 %v3255_v11, %v2231_v46 }
 0x1a1   : > { %v2712_v19 = vpack.c.bf16 %v2293_v13, %v2292_v12  ;;  %v2291_v20 = vmul.f32 %v3257_v14, %v2235_v44 }
 0x1a2   : > { %2714 = vst [vmem:[%s197_s6 + $0x8] sm:$0xff] %v2702_v16   ;;  %v2697_v21 = vpack.c.bf16 %v2287_v17, %v2286_v15 }
 0x1a3   : > { %2716 = vst [vmem:[%s197_s6 + $0x18] sm:$0xff] %v2712_v19   ;;  %v2707_v22 = vpack.c.bf16 %v2291_v20, %v2290_v18 }
 0x1a4   : > { %2698 = vst [vmem:[%s197_s6] sm:$0xff] %v2697_v21  }
 0x1a5   : > { %2715 = vst [vmem:[%s197_s6 + $0x10] sm:$0xff] %v2707_v22  }
 0x1a6 PF: > { %s14_s15 = sadd.s32 1, %s3264_s15  }
 0x1a7   : > { %p11_p4 = scmp.ge.s32.totalorder %s14_s15, 4  }
 0x1a9   :  { %13 = sbr.rel (!%p11_p4) target bundleno = 1 (0x1), region = 79 }

// kernel: run.17
= control target key start
LH: loop header
LB: loop body
LE: loop exit
PB: predicated region body
PF: predicated region fallthrough
CT: control target
= control target key end

     0   :  { %v491_v0 = vmov 0.0   ;;  %vm492_vm0 = vmmov 0   ;;  %vm77_vm1 = vcmask 1041409   ;;  %vm80_vm2 = vcmask 1042434   ;;  %s645_s1 = inlined_call_operand.vmem [shape: bf16[128,128], index: 1, kind: input, shape index: {}]   ;;  %s646_s0 = inlined_call_operand.vmem [shape: f32[8,1,128], index: 0, kind: input, shape index: {}]   ;;  %s647_s3 = inlined_call_operand.vmem [shape: bf16[128,128], index: 3, kind: input, shape index: {}]   ;;  %s648_s2 = inlined_call_operand.vmem [shape: f32[1,128], index: 2, kind: input, shape index: {}, may-alias: {2,4}]   ;;  %s649_s4 = inlined_call_operand.vmem [shape: f32[1,128], index: 4, kind: input, shape index: {}, may-alias: {2,4}]   ;;  %s650_s5 = inlined_call_operand.vmem [shape: f32[8,1,128], index: 5, kind: output, shape index: {}]  }
   0x1   :  { %424 = vmatprep.subr.bf16.mxu0 %v491_v0  ;;  %v467_v1 = vld [vmem:[%s645_s1] sm:$0xff]   ;;  %440 = vmatprep.mubr.msk.bf16.mxu0 %vm492_vm0, %v491_v0  ;;  %v468_v2 = vld [vmem:[%s645_s1 + $0x8] sm:$0xff]   ;;  %v469_v3 = vld [vmem:[%s645_s1 + $0x10] sm:$0xff]   ;;  %vm83_vm3 = vcmask 1043459   ;;  %vm86_vm4 = vcmask 1044484   ;;  %vm89_vm5 = vcmask 1045509  }
   0x2   :  { %444 = vmatprep.subr.bf16.mxu1 %v491_v0  ;;  %460 = vmatprep.mubr.msk.bf16.mxu1 %vm492_vm0, %v491_v0  ;;  %v21_v4 = vld [vmem:[%s646_s0] sm:$0x1]  ;;  %v22_v5 = vld [vmem:[%s646_s0 + $0x1] sm:$0x1]  ;;  %v23_v6 = vld [vmem:[%s646_s0 + $0x2] sm:$0x1] }
   0x3   :  { %425 = vmatpush3.bf16.msra.mxu0 %v467_v1  ;;  %v24_v7 = vld [vmem:[%s646_s0 + $0x3] sm:$0x1]  ;;  %v25_v8 = vld [vmem:[%s646_s0 + $0x4] sm:$0x1]  ;;  %v26_v9 = vld [vmem:[%s646_s0 + $0x5] sm:$0x1]  ;;  %v29_v10 = vpack.c.bf16 %v21_v4, %v21_v4  ;;  %v30_v11 = vpack.c.bf16 %v22_v5, %v22_v5  ;;  %v31_v12 = vpack.c.bf16 %v23_v6, %v23_v6 }
   0x4   :  { %426 = vmatprep.subr.bf16.mxu0 %v491_v0  ;;  %v470_v13 = vld [vmem:[%s645_s1 + $0x18] sm:$0xff]   ;;  %v27_v14 = vld [vmem:[%s646_s0 + $0x6] sm:$0x1]  ;;  %v32_v15 = vpack.c.bf16 %v24_v7, %v24_v7  ;;  %v33_v16 = vpack.c.bf16 %v25_v8, %v25_v8  ;;  %v34_v17 = vpack.c.bf16 %v26_v9, %v26_v9  ;;  %v28_v18 = vld [vmem:[%s646_s0 + $0x7] sm:$0x1]  ;;  %vm92_vm6 = vcmask 1046534  }
   0x5   :  { %v35_v19 = vpack.c.bf16 %v27_v14, %v27_v14  ;;  %v68_v20 = vunpack.c.l.b16 %v29_v10  ;;  %v69_v21 = vunpack.c.l.b16 %v30_v11  ;;  %v70_v22 = vunpack.c.l.b16 %v31_v12  ;;  %v471_v27 = vld [vmem:[%s645_s1 + $0x20] sm:$0xff]   ;;  %v472_v37 = vld [vmem:[%s645_s1 + $0x28] sm:$0xff]   ;;  %v473_v42 = vld [vmem:[%s645_s1 + $0x30] sm:$0xff]  }
   0x6   :  { %v71_v23 = vunpack.c.l.b16 %v32_v15  ;;  %v72_v24 = vunpack.c.l.b16 %v33_v16  ;;  %v73_v25 = vunpack.c.l.b16 %v34_v17  ;;  %v36_v28 = vpack.c.bf16 %v28_v18, %v28_v18  ;;  %v474_v45 = vld [vmem:[%s645_s1 + $0x38] sm:$0xff]   ;;  %v475_v48 = vld [vmem:[%s647_s3] sm:$0xff]   ;;  %v476_v49 = vld [vmem:[%s647_s3 + $0x8] sm:$0xff]  }
   0x7   :  { %427 = vmatpush3.bf16.msra.mxu0 %v468_v2  ;;  %v76_v26 = vrot.slane %v69_v21, 7  ;;  %v79_v29 = vrot.slane %v70_v22, 6  ;;  %v74_v32 = vunpack.c.l.b16 %v35_v19  ;;  %vm95_vm7 = vcmask 1047559   ;;  %445 = vmatpush3.bf16.msra.mxu1 %v475_v48  ;;  %v477_v50 = vld [vmem:[%s647_s3 + $0x10] sm:$0xff]   ;;  %v478_v51 = vld [vmem:[%s647_s3 + $0x18] sm:$0xff]   ;;  %v479_v52 = vld [vmem:[%s647_s3 + $0x20] sm:$0xff]  }
   0x8   :  { %428 = vmatprep.subr.bf16.mxu0 %v491_v0  ;;  %v82_v30 = vrot.slane %v71_v23, 5  ;;  %v85_v31 = vrot.slane %v72_v24, 4  ;;  %v88_v35 = vrot.slane %v73_v25, 3  ;;  %v75_v38 = vunpack.c.l.b16 %v36_v28  ;;  %446 = vmatprep.subr.bf16.mxu1 %v491_v0  ;;  %v480_v53 = vld [vmem:[%s647_s3 + $0x28] sm:$0xff]   ;;  %v481_v54 = vld [vmem:[%s647_s3 + $0x30] sm:$0xff]   ;;  %v482_v55 = vld [vmem:[%s647_s3 + $0x38] sm:$0xff]  }
   0x9   :  { %v78_v33 = vsel %vm77_vm1, %v76_v26, %v68_v20  ;;  %v91_v40 = vrot.slane %v74_v32, 2  ;;  %v382_v56 = vld [vmem:[%s648_s2] ss:$0 sm:$0xff]  ;;  %v317_v15 = vlaneseq }
   0xa   :  { %v81_v34 = vsel %vm80_vm2, %v79_v29, %v78_v33  ;;  %v94_v43 = vrot.slane %v75_v38, 1  ;;  %v392_v4 = vld [vmem:[%s649_s4] ss:$0 sm:$0xff] }
   0xb   :  { %429 = vmatpush3.bf16.msra.mxu0 %v469_v3  ;;  %v84_v36 = vsel %vm83_vm3, %v82_v30, %v81_v34  ;;  %447 = vmatpush3.bf16.msra.mxu1 %v476_v49  ;;  %v318_v17 = vshrl.u32 %v317_v15, 7 }
   0xc   :  { %430 = vmatprep.subr.bf16.mxu0 %v491_v0  ;;  %v87_v39 = vsel %vm86_vm4, %v85_v31, %v84_v36  ;;  %448 = vmatprep.subr.bf16.mxu1 %v491_v0 }
   0xd   :  { %v90_v41 = vsel %vm89_vm5, %v88_v35, %v87_v39 }
   0xe   :  { %v93_v44 = vsel %vm92_vm6, %v91_v40, %v90_v41 }
   0xf   :  { %431 = vmatpush3.bf16.msra.mxu0 %v470_v13  ;;  %v96_v46 = vsel %vm95_vm7, %v94_v43, %v93_v44  ;;  %449 = vmatpush3.bf16.msra.mxu1 %v477_v50  ;;  %v493_v13 = vmov 1966171168  }
  0x10   :  { %432 = vmatprep.subr.bf16.mxu0 %v491_v0  ;;  %v97_v47 = vpack.c.b16 %v96_v46, %v96_v46  ;;  %450 = vmatprep.subr.bf16.mxu1 %v491_v0  ;;  %v315_v14 = vunpack.c.l.s4 %v493_v13 }
  0x12   :  { %v316_v16 = vunpack.c.0.s8 %v315_v14 }
  0x13   :  { %433 = vmatpush3.bf16.msra.mxu0 %v471_v27  ;;  %451 = vmatpush3.bf16.msra.mxu1 %v478_v51 }
  0x14   :  { %434 = vmatprep.subr.bf16.mxu0 %v491_v0  ;;  %452 = vmatprep.subr.bf16.mxu1 %v491_v0  ;;  %v319_v18 = vsub.s32 %v316_v16, %v318_v17 }
  0x17   :  { %435 = vmatpush3.bf16.msra.mxu0 %v472_v37  ;;  %453 = vmatpush3.bf16.msra.mxu1 %v479_v52 }
  0x18   :  { %436 = vmatprep.subr.bf16.mxu0 %v491_v0  ;;  %454 = vmatprep.subr.bf16.mxu1 %v491_v0 }
  0x1b   :  { %437 = vmatpush3.bf16.msra.mxu0 %v473_v42  ;;  %455 = vmatpush3.bf16.msra.mxu1 %v480_v53 }
  0x1c   :  { %438 = vmatprep.subr.bf16.mxu0 %v491_v0  ;;  %456 = vmatprep.subr.bf16.mxu1 %v491_v0 }
  0x1f   :  { %439 = vmatpush3.bf16.msra.mxu0 %v474_v45  ;;  %457 = vmatpush3.bf16.msra.mxu1 %v481_v54 }
  0x20   :  { %458 = vmatprep.subr.bf16.mxu1 %v491_v0 }
  0x22   :  { %441 = vmatmul.mubr.bf16.vlgmr.msra.gmra.mrb[0].mxu0 %v97_v47 }
  0x23   :  { %459 = vmatpush3.bf16.msra.mxu1 %v482_v55 }
  0xf5   :  { %v181_v57 = vpop.f32.mrb[0].mxu0 }
  0xf6   :  { %v182_v58 = vadd.f32 %v382_v56, %v181_v57  ;;  %v442_v59 = vpop.f32.mrb[1].mxu0 }
  0xf7   :  { %v184_v60 = vpop.f32.mrb[2].mxu0 }
  0xf8   :  { %v391_v61 = vmul.f32 -1.442695, %v182_v58  ;;  %v443_v62 = vpop.f32.mrb[3].mxu0 }
  0xfa   :  { %483 = vpow2.f32 %v391_v61 }
 0x104   :  { %v484_v63 = vpop.eup %483 }
 0x105   :  { %v190_v1 = vadd.f32 1.0, %v484_v63 }
 0x107   :  { %485 = vrcp.f32 %v190_v1 }
 0x111   :  { %v486_v0 = vpop.eup %485 }
 0x112   :  { %v193_v2 = vmul.f32 %v486_v0, %v182_v58 }
 0x114   :  { %v194_v3 = vpack.c.bf16 %v193_v2, %v193_v2 }
 0x116   :  { %461 = vmatmul.mubr.bf16.vlgmr.msra.gmra.mrb[0].mxu1 %v194_v3 }
 0x1e9   :  { %v300_v5 = vpop.f32.mrb[0].mxu1 }
 0x1ea   :  { %v301_v6 = vadd.f32 %v392_v4, %v300_v5  ;;  %v462_v7 = vpop.f32.mrb[1].mxu1 }
 0x1eb   :  { %v303_v8 = vpop.f32.mrb[2].mxu1 }
 0x1ec   :  { %v401_v9 = vmul.f32 -1.442695, %v301_v6  ;;  %v463_v10 = vpop.f32.mrb[3].mxu1 }
 0x1ee   :  { %487 = vpow2.f32 %v401_v9 }
 0x1f8   :  { %v488_v11 = vpop.eup %487 }
 0x1f9   :  { %v309_v12 = vadd.f32 1.0, %v488_v11 }
 0x1fb   :  { %489 = vrcp.f32 %v309_v12 }
 0x205   :  { %v490_v19 = vpop.eup %489 }
 0x206   :  { %v313_v20 = vcombine.high %v490_v19, %v490_v19  ;;  %v320_v21 = vrot.slane %v490_v19, %v319_v18 }
 0x208   :  { %v327_v22 = vrot.slane %v313_v20, %v319_v18  ;;  %v328_v23 = vcombine.high %v320_v21, %v320_v21  ;;  %v336_v24 = vrot.slane %v320_v21, %v319_v18  ;;  %402 = vst.sshfl [vmem:[%s650_s5] sm:$0x1 pattern:$0x73625140] %v320_v21 }
 0x20a   :  { %v329_v25 = vcombine.high %v327_v22, %v327_v22  ;;  %v343_v26 = vrot.slane %v327_v22, %v319_v18  ;;  %v350_v27 = vrot.slane %v328_v23, %v319_v18  ;;  %v358_v28 = vcombine.high %v336_v24, %v336_v24  ;;  %403 = vst.sshfl [vmem:[%s650_s5 + $0x1] sm:$0x1 pattern:$0x73625140] %v328_v23 }
 0x20b   :  { %404 = vst.sshfl [vmem:[%s650_s5 + $0x4] sm:$0x1 pattern:$0x73625140] %v327_v22 }
 0x20c   :  { %v357_v29 = vrot.slane %v329_v25, %v319_v18  ;;  %v359_v30 = vcombine.high %v343_v26, %v343_v26  ;;  %v360_v31 = vcombine.high %v350_v27, %v350_v27  ;;  %372 = vst [vmem:[%s650_s5 + $0x2] sm:$0x1] %v358_v28  ;;  %405 = vst.sshfl [vmem:[%s650_s5 + $0x5] sm:$0x1 pattern:$0x73625140] %v329_v25 }
 0x20e   :  { %v361_v32 = vcombine.high %v357_v29, %v357_v29  ;;  %373 = vst [vmem:[%s650_s5 + $0x3] sm:$0x1] %v360_v31  ;;  %376 = vst [vmem:[%s650_s5 + $0x6] sm:$0x1] %v359_v30 }
 0x210   :  { %377 = vst [vmem:[%s650_s5 + $0x7] sm:$0x1] %v361_v32 }

// kernel: run.16
= control target key start
LH: loop header
LB: loop body
LE: loop exit
PB: predicated region body
PF: predicated region fallthrough
CT: control target
= control target key end

     0   :  { %s797_s18 = smov 0   ;;  %s879_s0 = inlined_call_operand.vmem [shape: bf16[2,20,5,128], index: 0, kind: input, shape index: {}]   ;;  %s880_s1 = inlined_call_operand.vmem [shape: f32[9,1,128], index: 1, kind: input, shape index: {}]   ;;  %s881_s2 = inlined_call_operand.vmem [shape: f32[1,128], index: 2, kind: input, shape index: {}]   ;;  %s882_s3 = inlined_call_operand.vmem [shape: f32[1,128], index: 3, kind: input, shape index: {}]   ;;  %s883_s4 = inlined_call_operand.vmem [shape: bf16[2,4,4,128], index: 4, kind: output, shape index: {0}]   ;;  %s884_s5 = inlined_call_operand.vmem [shape: f32[2,1,128], index: 5, kind: output, shape index: {1}]  }
   0x1 LB: > { %s700_s19 = sadd.s32 4294967295, %s765_s18   ;;  %p704_p0 = scmp.ge.s32.totalorder %s765_s18, 1  ;;  %s765_s18 = sphi %s797_s18, %s16_s18  }
   0x2   : > { %p190_p1 = scmp.lt.s32.totalorder %s765_s18, 3 }
   0x4   : > { %p191_p2 = pnand %p704_p0, %p190_p1 }
   0x5   : > { %p221_p3 = scmp.lt.s32.totalorder (!%p191_p2), %s700_s19, 1  ;;  %v708_v36 = vld [vmem:[%s880_s1] ss:$0 sm:$0xff] (!%p191_p2)  ;;  %v710_v45 = vld [vmem:[%s880_s1 + $0x1] ss:$0 sm:$0xff] (!%p191_p2)  ;;  %vm604_vm0 = vcmask (!%p191_p2), 1043456  }
   0x6   : > { %194 = sbr.rel (%p191_p2) target bundleno = 173 (0xad), region = 36  ;;  %v712_v62 = vld [vmem:[%s880_s1 + $0x2] ss:$0 sm:$0xff] (!%p191_p2) }
   0xd   : > { %s886_s19 = smov (!%p221_p3, %s700_s19), 1 }
   0xe   : > { %s734_s20 = smul.u32 80, %s886_s19  ;;  %s233_s29 = scalar_lea.vmem %s884_s5, %s886_s19 }
  0x10   : > { %s811_s23 = scalar_lea.vmem %s879_s0, %s734_s20 }
  0x11   : > { %v234_v0 = vld [vmem:[%s811_s23] sm:$0x7]  ;;  %v235_v1 = vld [vmem:[%s811_s23 + $0x4] sm:$0x7]  ;;  %v236_v2 = vld [vmem:[%s811_s23 + $0x8] sm:$0x7] }
  0x12   : > { %v254_v3 = vunpack.c.l.bf16 %v234_v0  ;;  %v255_v4 = vunpack.c.l.bf16 %v235_v1  ;;  %v256_v5 = vunpack.c.l.bf16 %v236_v2  ;;  %v237_v6 = vld [vmem:[%s811_s23 + $0xc] sm:$0x7]  ;;  %v239_v7 = vld [vmem:[%s811_s23 + $0x14] sm:$0x7]  ;;  %v240_v8 = vld [vmem:[%s811_s23 + $0x18] sm:$0x7] }
  0x13   : > { %v257_v9 = vunpack.c.l.bf16 %v237_v6  ;;  %v259_v10 = vunpack.c.l.bf16 %v239_v7  ;;  %v260_v11 = vunpack.c.l.bf16 %v240_v8  ;;  %v241_v12 = vld [vmem:[%s811_s23 + $0x1c] sm:$0x7]  ;;  %v242_v13 = vld [vmem:[%s811_s23 + $0x20] sm:$0x7]  ;;  %v244_v14 = vld [vmem:[%s811_s23 + $0x28] sm:$0x7] }
  0x14   : > { %274 = vst [vmem:[#allocation2] sm:$0x1f] %v254_v3  ;;  %275 = vst [vmem:[#allocation2 + $0x8] sm:$0x1f] %v255_v4  ;;  %v261_v15 = vunpack.c.l.bf16 %v241_v12  ;;  %v262_v16 = vunpack.c.l.bf16 %v242_v13  ;;  %v264_v17 = vunpack.c.l.bf16 %v244_v14  ;;  %v245_v18 = vld [vmem:[%s811_s23 + $0x2c] sm:$0x7] }
  0x15   : > { %276 = vst [vmem:[#allocation2 + $0x10] sm:$0x1f] %v256_v5  ;;  %v246_v19 = vld [vmem:[%s811_s23 + $0x30] sm:$0x7]  ;;  %v247_v20 = vld [vmem:[%s811_s23 + $0x34] sm:$0x7]  ;;  %v265_v21 = vunpack.c.l.bf16 %v245_v18 }
  0x16   : > { %277 = vst [vmem:[#allocation2 + $0x18] sm:$0x1f] %v257_v9  ;;  %279 = vst [vmem:[#allocation2 + $0x28] sm:$0x1f] %v259_v10  ;;  %v266_v22 = vunpack.c.l.bf16 %v246_v19  ;;  %v267_v23 = vunpack.c.l.bf16 %v247_v20  ;;  %v249_v24 = vld [vmem:[%s811_s23 + $0x3c] sm:$0x7] }
  0x17   : > { %280 = vst [vmem:[#allocation2 + $0x30] sm:$0x1f] %v260_v11  ;;  %v250_v25 = vld [vmem:[%s811_s23 + $0x40] sm:$0x7]  ;;  %v251_v26 = vld [vmem:[%s811_s23 + $0x44] sm:$0x7]  ;;  %v269_v27 = vunpack.c.l.bf16 %v249_v24 }
  0x18   : > { %281 = vst [vmem:[#allocation2 + $0x38] sm:$0x1f] %v261_v15  ;;  %282 = vst [vmem:[#allocation2 + $0x40] sm:$0x1f] %v262_v16  ;;  %v270_v28 = vunpack.c.l.bf16 %v250_v25  ;;  %v271_v29 = vunpack.c.l.bf16 %v251_v26  ;;  %v252_v30 = vld [vmem:[%s811_s23 + $0x48] sm:$0x7] }
  0x19   : > { %284 = vst [vmem:[#allocation2 + $0x50] sm:$0x1f] %v264_v17  ;;  %v238_v31 = vld [vmem:[%s811_s23 + $0x10] sm:$0x7]  ;;  %v243_v32 = vld [vmem:[%s811_s23 + $0x24] sm:$0x7]  ;;  %v272_v33 = vunpack.c.l.bf16 %v252_v30 }
  0x1a   : > { %285 = vst [vmem:[#allocation2 + $0x58] sm:$0x1f] %v265_v21  ;;  %286 = vst [vmem:[#allocation2 + $0x60] sm:$0x1f] %v266_v22  ;;  %v258_v34 = vunpack.c.l.bf16 %v238_v31  ;;  %v263_v35 = vunpack.c.l.bf16 %v243_v32  ;;  %v714_v15 = vld [vmem:[%s880_s1 + $0x3] ss:$0 sm:$0xff] }
  0x1b   : > { %287 = vst [vmem:[#allocation2 + $0x68] sm:$0x1f] %v267_v23  ;;  %289 = vst [vmem:[#allocation2 + $0x78] sm:$0x1f] %v269_v27  ;;  %v294_v37 = vld [vmem:[#allocation2] sm:$0xf] }
  0x1c   : > { %290 = vst [vmem:[#allocation2 + $0x80] sm:$0x1f] %v270_v28  ;;  %291 = vst [vmem:[#allocation2 + $0x88] sm:$0x1f] %v271_v29  ;;  %v295_v38 = vld [vmem:[#allocation2 + $0x8] sm:$0xf]  ;;  %v305_v40 = vmul.f32 %v708_v36, %v294_v37 }
  0x1d   : > { %292 = vst [vmem:[#allocation2 + $0x90] sm:$0x1f] %v272_v33  ;;  %278 = vst [vmem:[#allocation2 + $0x20] sm:$0x1f] %v258_v34  ;;  %v296_v39 = vld [vmem:[#allocation2 + $0x10] sm:$0xf]  ;;  %v306_v41 = vmul.f32 %v708_v36, %v295_v38 }
  0x1e   : > { %283 = vst [vmem:[#allocation2 + $0x48] sm:$0x1f] %v263_v35  ;;  %v307_v42 = vmul.f32 %v708_v36, %v296_v39  ;;  %v297_v43 = vld [vmem:[#allocation2 + $0x18] sm:$0xf]  ;;  %309 = vst [vmem:[#allocation3] sm:$0xf] %v305_v40 }
  0x1f   : > { %v308_v44 = vmul.f32 %v708_v36, %v297_v43  ;;  %310 = vst [vmem:[#allocation3 + $0x4] sm:$0xf] %v306_v41  ;;  %v314_v46 = vld [vmem:[#allocation2 + $0x28] sm:$0xf]  ;;  %v315_v47 = vld [vmem:[#allocation2 + $0x30] sm:$0xf] }
  0x20   : > { %311 = vst [vmem:[#allocation3 + $0x8] sm:$0xf] %v307_v42  ;;  %v316_v48 = vld [vmem:[#allocation2 + $0x38] sm:$0xf]  ;;  %v317_v49 = vld [vmem:[#allocation2 + $0x40] sm:$0xf]  ;;  %v326_v50 = vmul.f32 %v710_v45, %v314_v46  ;;  %v327_v51 = vmul.f32 %v710_v45, %v315_v47 }
  0x21   : > { %312 = vst [vmem:[#allocation3 + $0xc] sm:$0xf] %v308_v44  ;;  %v328_v52 = vmul.f32 %v710_v45, %v316_v48  ;;  %v329_v53 = vmul.f32 %v710_v45, %v317_v49  ;;  %v342_v63 = vld [vmem:[#allocation2 + $0x1] sm:$0xf]  ;;  %v343_v0 = vld [vmem:[#allocation2 + $0x9] sm:$0xf] }
  0x22   : > { %v344_v1 = vld [vmem:[#allocation2 + $0x11] sm:$0xf]  ;;  %v345_v2 = vld [vmem:[#allocation2 + $0x19] sm:$0xf]  ;;  %v354_v3 = vmul.f32 %v712_v62, %v342_v63  ;;  %v355_v4 = vmul.f32 %v712_v62, %v343_v0  ;;  %v373_v18 = vld [vmem:[#allocation2 + $0x60] sm:$0xf] }
  0x23   : > { %v356_v5 = vmul.f32 %v712_v62, %v344_v1  ;;  %v357_v9 = vmul.f32 %v712_v62, %v345_v2  ;;  %v371_v16 = vld [vmem:[#allocation2 + $0x50] sm:$0xf]  ;;  %v372_v17 = vld [vmem:[#allocation2 + $0x58] sm:$0xf]  ;;  %v374_v19 = vld [vmem:[#allocation2 + $0x68] sm:$0xf]  ;;  %v385_v22 = vmul.f32 %v714_v15, %v373_v18 }
  0x24   : > { %v383_v20 = vmul.f32 %v714_v15, %v371_v16  ;;  %v384_v21 = vmul.f32 %v714_v15, %v372_v17  ;;  %v386_v23 = vmul.f32 %v714_v15, %v374_v19  ;;  %v716_v32 = vld [vmem:[%s880_s1 + $0x4] ss:$0 sm:$0xff]  ;;  %v400_v33 = vld [vmem:[#allocation2 + $0x78] sm:$0xf]  ;;  %v401_v34 = vld [vmem:[#allocation2 + $0x80] sm:$0xf] }
  0x25   : > { %v330_v54 = vld [vmem:[#allocation3] sm:$0xf]  ;;  %v402_v35 = vld [vmem:[#allocation2 + $0x88] sm:$0xf]  ;;  %v403_v36 = vld [vmem:[#allocation2 + $0x90] sm:$0xf]  ;;  %v412_v37 = vmul.f32 %v716_v32, %v400_v33  ;;  %v413_v38 = vmul.f32 %v716_v32, %v401_v34 }
  0x26   : > { %v331_v55 = vld [vmem:[#allocation3 + $0x4] sm:$0xf]  ;;  %v334_v57 = vadd.f32 %v330_v54, %v326_v50  ;;  %v414_v39 = vmul.f32 %v716_v32, %v402_v35  ;;  %v415_v40 = vmul.f32 %v716_v32, %v403_v36  ;;  %v428_v50 = vld [vmem:[#allocation2 + $0x51] sm:$0xf]  ;;  %v724_v36 = vld [vmem:[%s880_s1 + $0x8] ss:$0 sm:$0xff] }
  0x27   : > { %v332_v56 = vld [vmem:[#allocation3 + $0x8] sm:$0xf]  ;;  %v335_v58 = vadd.f32 %v331_v55, %v327_v51  ;;  %v718_v49 = vld [vmem:[%s880_s1 + $0x5] ss:$0 sm:$0xff]  ;;  %v429_v51 = vld [vmem:[#allocation2 + $0x59] sm:$0xf] }
  0x28   : > { %v336_v59 = vadd.f32 %v332_v56, %v328_v52  ;;  %v333_v60 = vld [vmem:[#allocation3 + $0xc] sm:$0xf]  ;;  %338 = vst [vmem:[#allocation3] sm:$0xf] %v334_v57  ;;  %v430_v52 = vld [vmem:[#allocation2 + $0x61] sm:$0xf]  ;;  %v440_v54 = vmul.f32 %v718_v49, %v428_v50  ;;  %v441_v55 = vmul.f32 %v718_v49, %v429_v51 }
  0x29   : > { %v337_v61 = vadd.f32 %v333_v60, %v329_v53  ;;  %339 = vst [vmem:[#allocation3 + $0x4] sm:$0xf] %v335_v58  ;;  %v431_v53 = vld [vmem:[#allocation2 + $0x69] sm:$0xf]  ;;  %v442_v56 = vmul.f32 %v718_v49, %v430_v52  ;;  %v720_v2 = vld [vmem:[%s880_s1 + $0x6] ss:$0 sm:$0xff] }
  0x2a   : > { %340 = vst [vmem:[#allocation3 + $0x8] sm:$0xf] %v336_v59  ;;  %v443_v60 = vmul.f32 %v718_v49, %v431_v53  ;;  %v722_v19 = vld [vmem:[%s880_s1 + $0x7] ss:$0 sm:$0xff]  ;;  %v725_v53 = vld [vmem:[%s881_s2] ss:$0 sm:$0xff] }
  0x2b   : > { %341 = vst [vmem:[#allocation3 + $0xc] sm:$0xf] %v337_v61  ;;  %s733_s23 = sshll.u32 %s886_s19, 3 }
  0x2c   : > { %s230_s26 = scalar_lea.vmem %s883_s4, %s733_s23 }
  0x2f   : > { %v358_v6 = vld [vmem:[#allocation3] sm:$0xf] }
  0x30   : > { %v359_v7 = vld [vmem:[#allocation3 + $0x4] sm:$0xf]  ;;  %v362_v10 = vadd.f32 %v358_v6, %v354_v3  ;;  %v460_v3 = vld [vmem:[#allocation2 + $0x20] sm:$0xf]  ;;  %v459_v6 = vld [vmem:[#allocation2 + $0x18] sm:$0xf] }
  0x31   : > { %v360_v8 = vld [vmem:[#allocation3 + $0x8] sm:$0xf]  ;;  %v363_v11 = vadd.f32 %v359_v7, %v355_v4  ;;  %v472_v7 = vmul.f32 %v720_v2, %v460_v3 }
  0x32   : > { %v364_v12 = vadd.f32 %v360_v8, %v356_v5  ;;  %v361_v13 = vld [vmem:[#allocation3 + $0xc] sm:$0xf]  ;;  %366 = vst [vmem:[#allocation3] sm:$0xf] %v362_v10  ;;  %v457_v4 = vld [vmem:[#allocation2 + $0x8] sm:$0xf]  ;;  %v471_v10 = vmul.f32 %v720_v2, %v459_v6 }
  0x33   : > { %v365_v14 = vadd.f32 %v361_v13, %v357_v9  ;;  %367 = vst [vmem:[#allocation3 + $0x4] sm:$0xf] %v363_v11  ;;  %v458_v5 = vld [vmem:[#allocation2 + $0x10] sm:$0xf]  ;;  %v469_v8 = vmul.f32 %v720_v2, %v457_v4 }
  0x34   : > { %368 = vst [vmem:[#allocation3 + $0x8] sm:$0xf] %v364_v12  ;;  %v470_v9 = vmul.f32 %v720_v2, %v458_v5 }
  0x35   : > { %369 = vst [vmem:[#allocation3 + $0xc] sm:$0xf] %v365_v14 }
  0x39   : > { %v387_v24 = vld [vmem:[#allocation3] sm:$0xf] }
  0x3a   : > { %v388_v25 = vld [vmem:[#allocation3 + $0x4] sm:$0xf]  ;;  %v391_v27 = vadd.f32 %v387_v24, %v383_v20  ;;  %v489_v20 = vld [vmem:[#allocation2 + $0x48] sm:$0xf] }
  0x3b   : > { %v389_v26 = vld [vmem:[#allocation3 + $0x8] sm:$0xf]  ;;  %v392_v28 = vadd.f32 %v388_v25, %v384_v21  ;;  %v486_v21 = vld [vmem:[#allocation2 + $0x30] sm:$0xf]  ;;  %v501_v24 = vmul.f32 %v722_v19, %v489_v20 }
  0x3c   : > { %v393_v29 = vadd.f32 %v389_v26, %v385_v22  ;;  %v390_v30 = vld [vmem:[#allocation3 + $0xc] sm:$0xf]  ;;  %395 = vst [vmem:[#allocation3] sm:$0xf] %v391_v27  ;;  %v487_v22 = vld [vmem:[#allocation2 + $0x38] sm:$0xf]  ;;  %v498_v25 = vmul.f32 %v722_v19, %v486_v21 }
  0x3d   : > { %v394_v31 = vadd.f32 %v390_v30, %v386_v23  ;;  %396 = vst [vmem:[#allocation3 + $0x4] sm:$0xf] %v392_v28  ;;  %v488_v23 = vld [vmem:[#allocation2 + $0x40] sm:$0xf]  ;;  %v499_v26 = vmul.f32 %v722_v19, %v487_v22 }
  0x3e   : > { %397 = vst [vmem:[#allocation3 + $0x8] sm:$0xf] %v393_v29  ;;  %v500_v27 = vmul.f32 %v722_v19, %v488_v23 }
  0x3f   : > { %398 = vst [vmem:[#allocation3 + $0xc] sm:$0xf] %v394_v31 }
  0x43   : > { %v416_v41 = vld [vmem:[#allocation3] sm:$0xf] }
  0x44   : > { %v417_v42 = vld [vmem:[#allocation3 + $0x4] sm:$0xf]  ;;  %v420_v44 = vadd.f32 %v416_v41, %v412_v37  ;;  %v514_v37 = vld [vmem:[#allocation2 + $0x9] sm:$0xf] }
  0x45   : > { %v418_v43 = vld [vmem:[#allocation3 + $0x8] sm:$0xf]  ;;  %v421_v45 = vadd.f32 %v417_v42, %v413_v38  ;;  %v515_v38 = vld [vmem:[#allocation2 + $0x11] sm:$0xf]  ;;  %v526_v41 = vmul.f32 %v724_v36, %v514_v37 }
  0x46   : > { %v422_v46 = vadd.f32 %v418_v43, %v414_v39  ;;  %v419_v47 = vld [vmem:[#allocation3 + $0xc] sm:$0xf]  ;;  %424 = vst [vmem:[#allocation3] sm:$0xf] %v420_v44  ;;  %v516_v39 = vld [vmem:[#allocation2 + $0x19] sm:$0xf]  ;;  %v527_v42 = vmul.f32 %v724_v36, %v515_v38 }
  0x47   : > { %v423_v48 = vadd.f32 %v419_v47, %v415_v40  ;;  %425 = vst [vmem:[#allocation3 + $0x4] sm:$0xf] %v421_v45  ;;  %v517_v40 = vld [vmem:[#allocation2 + $0x21] sm:$0xf]  ;;  %v528_v43 = vmul.f32 %v724_v36, %v516_v39 }
  0x48   : > { %426 = vst [vmem:[#allocation3 + $0x8] sm:$0xf] %v422_v46  ;;  %v529_v47 = vmul.f32 %v724_v36, %v517_v40 }
  0x49   : > { %427 = vst [vmem:[#allocation3 + $0xc] sm:$0xf] %v423_v48 }
  0x4d   : > { %v444_v57 = vld [vmem:[#allocation3] sm:$0xf] }
  0x4e   : > { %v445_v58 = vld [vmem:[#allocation3 + $0x4] sm:$0xf]  ;;  %v448_v61 = vadd.f32 %v444_v57, %v440_v54  ;;  %v726_v54 = vld [vmem:[%s882_s3] ss:$0 sm:$0xff] }
  0x4f   : > { %v446_v59 = vld [vmem:[#allocation3 + $0x8] sm:$0xf]  ;;  %v449_v62 = vadd.f32 %v445_v58, %v441_v55 }
  0x50   : > { %v450_v63 = vadd.f32 %v446_v59, %v442_v56  ;;  %v447_v0 = vld [vmem:[#allocation3 + $0xc] sm:$0xf]  ;;  %452 = vst [vmem:[#allocation3] sm:$0xf] %v448_v61 }
  0x51   : > { %v451_v1 = vadd.f32 %v447_v0, %v443_v60  ;;  %453 = vst [vmem:[#allocation3 + $0x4] sm:$0xf] %v449_v62 }
  0x52   : > { %454 = vst [vmem:[#allocation3 + $0x8] sm:$0xf] %v450_v63 }
  0x53   : > { %455 = vst [vmem:[#allocation3 + $0xc] sm:$0xf] %v451_v1 }
  0x57   : > { %v473_v11 = vld [vmem:[#allocation3] sm:$0xf] }
  0x58   : > { %v474_v12 = vld [vmem:[#allocation3 + $0x4] sm:$0xf]  ;;  %v477_v14 = vadd.f32 %v473_v11, %v469_v8 }
  0x59   : > { %v475_v13 = vld [vmem:[#allocation3 + $0x8] sm:$0xf]  ;;  %v478_v15 = vadd.f32 %v474_v12, %v470_v9 }
  0x5a   : > { %v479_v16 = vadd.f32 %v475_v13, %v471_v10  ;;  %v476_v17 = vld [vmem:[#allocation3 + $0xc] sm:$0xf]  ;;  %481 = vst [vmem:[#allocation3] sm:$0xf] %v477_v14 }
  0x5b   : > { %v480_v18 = vadd.f32 %v476_v17, %v472_v7  ;;  %482 = vst [vmem:[#allocation3 + $0x4] sm:$0xf] %v478_v15 }
  0x5c   : > { %483 = vst [vmem:[#allocation3 + $0x8] sm:$0xf] %v479_v16 }
  0x5d   : > { %484 = vst [vmem:[#allocation3 + $0xc] sm:$0xf] %v480_v18 }
  0x61   : > { %v502_v28 = vld [vmem:[#allocation3] sm:$0xf] }
  0x62   : > { %v503_v29 = vld [vmem:[#allocation3 + $0x4] sm:$0xf]  ;;  %v506_v31 = vadd.f32 %v502_v28, %v498_v25 }
  0x63   : > { %v504_v30 = vld [vmem:[#allocation3 + $0x8] sm:$0xf]  ;;  %v507_v32 = vadd.f32 %v503_v29, %v499_v26 }
  0x64   : > { %v508_v33 = vadd.f32 %v504_v30, %v500_v27  ;;  %v505_v34 = vld [vmem:[#allocation3 + $0xc] sm:$0xf]  ;;  %510 = vst [vmem:[#allocation3] sm:$0xf] %v506_v31 }
  0x65   : > { %v509_v35 = vadd.f32 %v505_v34, %v501_v24  ;;  %511 = vst [vmem:[#allocation3 + $0x4] sm:$0xf] %v507_v32 }
  0x66   : > { %512 = vst [vmem:[#allocation3 + $0x8] sm:$0xf] %v508_v33 }
  0x67   : > { %513 = vst [vmem:[#allocation3 + $0xc] sm:$0xf] %v509_v35 }
  0x6b   : > { %v530_v44 = vld [vmem:[#allocation3] sm:$0xf] }
  0x6c   : > { %v531_v45 = vld [vmem:[#allocation3 + $0x4] sm:$0xf]  ;;  %v534_v48 = vadd.f32 %v530_v44, %v526_v41 }
  0x6d   : > { %v532_v46 = vld [vmem:[#allocation3 + $0x8] sm:$0xf]  ;;  %v535_v49 = vadd.f32 %v531_v45, %v527_v42 }
  0x6e   : > { %v536_v50 = vadd.f32 %v532_v46, %v528_v43  ;;  %v533_v51 = vld [vmem:[#allocation3 + $0xc] sm:$0xf]  ;;  %538 = vst [vmem:[#allocation3] sm:$0xf] %v534_v48 }
  0x6f   : > { %v537_v52 = vadd.f32 %v533_v51, %v529_v47  ;;  %539 = vst [vmem:[#allocation3 + $0x4] sm:$0xf] %v535_v49 }
  0x70   : > { %540 = vst [vmem:[#allocation3 + $0x8] sm:$0xf] %v536_v50 }
  0x71   : > { %541 = vst [vmem:[#allocation3 + $0xc] sm:$0xf] %v537_v52 }
  0x75   : > { %v542_v55 = vld [vmem:[#allocation3] sm:$0xf] }
  0x76   : > { %v543_v56 = vld [vmem:[#allocation3 + $0x4] sm:$0xf]  ;;  %v553_v58 = vmul.f32 %v725_v53, %v542_v55 }
  0x77   : > { %v544_v57 = vld [vmem:[#allocation3 + $0x8] sm:$0xf]  ;;  %v554_v59 = vmul.f32 %v725_v53, %v543_v56 }
  0x78   : > { %v555_v60 = vmul.f32 %v725_v53, %v544_v57  ;;  %v545_v61 = vld [vmem:[#allocation3 + $0xc] sm:$0xf]  ;;  %v564_v63 = vadd.f32 %v726_v54, %v553_v58 }
  0x79   : > { %v556_v62 = vmul.f32 %v725_v53, %v545_v61  ;;  %v565_v0 = vadd.f32 %v726_v54, %v554_v59 }
  0x7a   : > { %v566_v1 = vadd.f32 %v726_v54, %v555_v60  ;;  %v727_v3 = vmul.f32 -1.442695, %v564_v63 }
  0x7b   : > { %v567_v2 = vadd.f32 %v726_v54, %v556_v62  ;;  %v728_v4 = vmul.f32 -1.442695, %v565_v0 }
  0x7c   : > { %v729_v5 = vmul.f32 -1.442695, %v566_v1  ;;  %743 = vpow2.f32 %v727_v3 }
  0x7d   : > { %v730_v6 = vmul.f32 -1.442695, %v567_v2  ;;  %745 = vpow2.f32 %v728_v4 }
  0x7e   : > { %747 = vpow2.f32 %v729_v5 }
  0x7f   : > { %749 = vpow2.f32 %v730_v6 }
  0x86   : > { %v744_v7 = vpop.eup %743 }
  0x87   : > { %v746_v8 = vpop.eup %745  ;;  %v580_v9 = vadd.f32 1.0, %v744_v7 }
  0x88   : > { %v748_v10 = vpop.eup %747  ;;  %v581_v11 = vadd.f32 1.0, %v746_v8 }
  0x89   : > { %v750_v12 = vpop.eup %749  ;;  %751 = vrcp.f32 %v580_v9  ;;  %v582_v13 = vadd.f32 1.0, %v748_v10 }
  0x8a   : > { %753 = vrcp.f32 %v581_v11  ;;  %v583_v14 = vadd.f32 1.0, %v750_v12 }
  0x8b   : > { %755 = vrcp.f32 %v582_v13 }
  0x8c   : > { %757 = vrcp.f32 %v583_v14 }
  0x93   : > { %v752_v15 = vpop.eup %751 }
  0x94   : > { %v754_v16 = vpop.eup %753  ;;  %v592_v17 = vmul.f32 %v752_v15, %v564_v63 }
  0x95   : > { %v756_v18 = vpop.eup %755  ;;  %v593_v19 = vmul.f32 %v754_v16, %v565_v0 }
  0x96   : > { %v758_v20 = vpop.eup %757  ;;  %v596_v21 = vpack.c.bf16 %v592_v17, %v592_v17  ;;  %v605_v22 = vsel %vm604_vm0, %v592_v17, 0.0  ;;  %v594_v23 = vmul.f32 %v756_v18, %v566_v1 }
  0x97   : > { %v597_v24 = vpack.c.bf16 %v593_v19, %v593_v19  ;;  %v606_v25 = vsel %vm604_vm0, %v593_v19, 0.0  ;;  %v595_v26 = vmul.f32 %v758_v20, %v567_v2 }
  0x98   : > { %600 = vst [vmem:[%s230_s26] sm:$0x3] %v596_v21  ;;  %v607_v27 = vadd.f32 %v606_v25, %v605_v22  ;;  %v598_v28 = vpack.c.bf16 %v594_v23, %v594_v23  ;;  %v608_v29 = vsel %vm604_vm0, %v594_v23, 0.0 }
  0x99   : > { %601 = vst [vmem:[%s230_s26 + $0x2] sm:$0x3] %v597_v24  ;;  %v599_v30 = vpack.c.bf16 %v595_v26, %v595_v26  ;;  %v610_v32 = vsel %vm604_vm0, %v595_v26, 0.0 }
  0x9a   : > { %602 = vst [vmem:[%s230_s26 + $0x4] sm:$0x3] %v598_v28  ;;  %v609_v31 = vadd.f32 %v608_v29, %v607_v27 }
  0x9b   : > { %603 = vst [vmem:[%s230_s26 + $0x6] sm:$0x3] %v599_v30 }
  0x9c   : > { %v611_v33 = vadd.f32 %v610_v32, %v609_v31 }
  0x9e   : > { %v612_v34 = vrot.slane %v611_v33, 4 }
  0xa0   : > { %v613_v35 = vadd.f32 %v612_v34, %v611_v33 }
  0xa2   : > { %v614_v36 = vrot.slane %v613_v35, 2 }
  0xa4   : > { %v615_v37 = vadd.f32 %v614_v36, %v613_v35 }
  0xa6   : > { %v616_v38 = vrot.slane %v615_v37, 1 }
  0xa8   : > { %v617_v39 = vadd.f32 %v616_v38, %v615_v37 }
  0xaa   : > { %v618_v40 = vmul.f32 0.0625, %v617_v39 }
  0xac   : > { %619 = vst [vmem:[%s233_s29] sm:$0x1] %v618_v40 }
  0xad PF: > { %s16_s18 = sadd.s32 1, %s765_s18  }
  0xae   : > { %p13_p4 = scmp.ge.s32.totalorder %s16_s18, 4  }
  0xb0   :  { %15 = sbr.rel (!%p13_p4) target bundleno = 1 (0x1), region = 91 }

// kernel: run.11
= control target key start
LH: loop header
LB: loop body
LE: loop exit
PB: predicated region body
PF: predicated region fallthrough
CT: control target
= control target key end

     0   :  { %s8347_s15 = smov 0   ;;  %s9681_s0 = inlined_call_operand.vmem [shape: bf16[2,18,18,128], index: 0, kind: input, shape index: {}]   ;;  %s9682_s1 = inlined_call_operand.vmem [shape: bf16[9,128,128], index: 1, kind: input, shape index: {}]   ;;  %s9683_s2 = inlined_call_operand.vmem [shape: f32[1,128], index: 2, kind: input, shape index: {}]   ;;  %s9684_s3 = inlined_call_operand.vmem [shape: f32[1,128], index: 3, kind: input, shape index: {}]   ;;  %s9685_s4 = inlined_call_operand.vmem [shape: bf16[2,16,16,128], index: 4, kind: output, shape index: {}]  }
   0x1 LB: > { %s6277_s16 = sadd.s32 4294967295, %s8320_s15   ;;  %p6281_p0 = scmp.ge.s32.totalorder %s8320_s15, 1  ;;  %s8320_s15 = sphi %s8347_s15, %s14_s15  }
   0x2   : > { %p162_p1 = scmp.lt.s32.totalorder %s8320_s15, 3 }
   0x4   : > { %p163_p2 = pnand %p6281_p0, %p162_p1 }
   0x5   : > { %v8058_v0 = vld [vmem:[%s9682_s1] sm:$0xff] (!%p163_p2)   ;;  %v8060_v2 = vld [vmem:[%s9682_s1 + $0x8] sm:$0xff] (!%p163_p2)   ;;  %p188_p3 = scmp.lt.s32.totalorder (!%p163_p2), %s6277_s16, 1  ;;  %v8062_v4 = vld [vmem:[%s9682_s1 + $0x10] sm:$0xff] (!%p163_p2)   ;;  %vm632_vm0 = vsmask.f32 (!%p163_p2), 3328 }
   0x6   : > { %166 = sbr.rel (%p163_p2) target bundleno = 596 (0x254), region = 36  ;;  %v8059_v1 = vld [vmem:[%s9682_s1 + $0x100] sm:$0xff] (!%p163_p2)   ;;  %7345 = vmatprep.subr.bf16.mxu1 (!%p163_p2), %v8058_v0  ;;  %v8061_v3 = vld [vmem:[%s9682_s1 + $0x108] sm:$0xff] (!%p163_p2)   ;;  %v8063_v5 = vld [vmem:[%s9682_s1 + $0x110] sm:$0xff] (!%p163_p2)   ;;  %vm633_vm1 = vsmask.f32 (!%p163_p2), 7440 }
   0x7   : > { %7537 = vmatprep.subr.bf16.mxu0 (!%p163_p2), %v8059_v1  ;;  %7346 = vmatpush3.bf16.msra.mxu1 (!%p163_p2), %v8058_v0  ;;  %v8064_v6 = vld [vmem:[%s9682_s1 + $0x18] sm:$0xff] (!%p163_p2)   ;;  %v8066_v8 = vld [vmem:[%s9682_s1 + $0x20] sm:$0xff] (!%p163_p2)   ;;  %v8068_v10 = vld [vmem:[%s9682_s1 + $0x28] sm:$0xff] (!%p163_p2)   ;;  %vm1501_vm3 = vcmask (!%p163_p2), 1042432   ;;  %vm1502_vm4 = vcmask (!%p163_p2), 1046532  }
   0x8   : > { %7538 = vmatpush3.bf16.msra.mxu0 (!%p163_p2), %v8059_v1  ;;  %7347 = vmatprep.subr.bf16.mxu1 (!%p163_p2), %v8060_v2  ;;  %v8065_v7 = vld [vmem:[%s9682_s1 + $0x118] sm:$0xff] (!%p163_p2)   ;;  %v8067_v9 = vld [vmem:[%s9682_s1 + $0x120] sm:$0xff] (!%p163_p2)   ;;  %v8069_v11 = vld [vmem:[%s9682_s1 + $0x128] sm:$0xff] (!%p163_p2)  }
   0x9   : > { %7539 = vmatprep.subr.bf16.mxu0 (!%p163_p2), %v8061_v3  ;;  %v8070_v18 = vld [vmem:[%s9682_s1 + $0x30] sm:$0xff] (!%p163_p2)   ;;  %v8072_v32 = vld [vmem:[%s9682_s1 + $0x38] sm:$0xff] (!%p163_p2)   ;;  %vm8417_vm2 = vmor (!%p163_p2), %vm632_vm0, %vm633_vm1 }
   0xa   : > { %v8071_v24 = vld [vmem:[%s9682_s1 + $0x130] sm:$0xff] (!%p163_p2)   ;;  %v8073_v38 = vld [vmem:[%s9682_s1 + $0x138] sm:$0xff] (!%p163_p2)   ;;  %v8076_v47 = vld [vmem:[%s9682_s1 + $0x40] sm:$0xff] (!%p163_p2)  }
   0xb   : > { %7348 = vmatpush3.bf16.msra.mxu1 (!%p163_p2), %v8060_v2  ;;  %v8077_v52 = vld [vmem:[%s9682_s1 + $0x140] sm:$0xff] (!%p163_p2)   ;;  %vm8517_vm5 = vmor (!%p163_p2), %vm1501_vm3, %vm1502_vm4 }
   0xc   : > { %7540 = vmatpush3.bf16.msra.mxu0 (!%p163_p2), %v8061_v3  ;;  %7349 = vmatprep.subr.bf16.mxu1 (!%p163_p2), %v8062_v4 }
   0xd   : > { %s9691_s16 = smov (!%p188_p3, %s6277_s16), 1  ;;  %7541 = vmatprep.subr.bf16.mxu0 %v8063_v5 }
   0xe   : > { %s8049_s7 = smul.u32 216, %s9691_s16  ;;  %s7001_s22 = sshll.u32 %s9691_s16, 7 }
   0xf   : > { %7350 = vmatpush3.bf16.msra.mxu1 %v8062_v4  ;;  %s9551_s24 = scalar_lea.vmem %s9685_s4, %s7001_s22 }
  0x10   : > { %7542 = vmatpush3.bf16.msra.mxu0 %v8063_v5  ;;  %7351 = vmatprep.subr.bf16.mxu1 %v8064_v6  ;;  %s8394_s18 = scalar_lea.vmem %s9681_s0, %s8049_s7 }
  0x11   : > { %7543 = vmatprep.subr.bf16.mxu0 %v8065_v7  ;;  %v8074_v12 = vld [vmem:[%s8394_s18] sm:$0xff]   ;;  %v6477_v13 = vld [vmem:[%s8394_s18 + $0xc] sm:$0xf]  ;;  %v6478_v14 = vld [vmem:[%s8394_s18 + $0x10] sm:$0xf] }
  0x12   : > { %7361 = vmatprep.mubr.bf16.mxu1 %v8074_v12  ;;  %v6479_v15 = vld [vmem:[%s8394_s18 + $0x14] sm:$0x1]  ;;  %v2502_v16 = vshrl.u32 %v6477_v13, 16  ;;  %v2505_v17 = vshll.u32 %v6477_v13, 16  ;;  %v2511_v19 = vshll.u32 %v6478_v14, 16  ;;  %v2515_v20 = vshrl.u32 %v6478_v14, 16 }
  0x13   : > { %7352 = vmatpush3.bf16.msra.mxu1 %v8064_v6  ;;  %v2521_v21 = vshll.u32 %v6479_v15, 16  ;;  %v6480_v29 = vld [vmem:[%s8394_s18 + $0x18] sm:$0xf]  ;;  %v6481_v30 = vld [vmem:[%s8394_s18 + $0x1c] sm:$0xf]  ;;  %v8075_v55 = vld [vmem:[%s8394_s18 + $0xc] sm:$0xff]  }
  0x14   : > { %7544 = vmatpush3.bf16.msra.mxu0 %v8065_v7  ;;  %7353 = vmatprep.subr.bf16.mxu1 %v8066_v8  ;;  %v2504_v22 = vrot.slane %v2502_v16, 4  ;;  %v2507_v23 = vrot.slane %v2505_v17, 5  ;;  %v2513_v25 = vrot.slane %v2511_v19, 5  ;;  %v2517_v26 = vrot.slane %v2515_v20, 4  ;;  %v6482_v31 = vld [vmem:[%s8394_s18 + $0x20] sm:$0x1] }
  0x15   : > { %7545 = vmatprep.subr.bf16.mxu0 %v8067_v9  ;;  %v2523_v27 = vrot.slane %v2521_v21, 5  ;;  %v2526_v35 = vshrl.u32 %v6480_v29, 16  ;;  %v2529_v36 = vshll.u32 %v6480_v29, 16  ;;  %v2535_v37 = vshll.u32 %v6481_v30, 16  ;;  %v6483_v53 = vld [vmem:[%s8394_s18 + $0x24] sm:$0xf] }
  0x16   : > { %v2508_v28 = vor.u32 %v2507_v23, %v2504_v22  ;;  %v2518_v34 = vor.u32 %v2517_v26, %v2513_v25  ;;  %v2539_v40 = vshrl.u32 %v6481_v30, 16  ;;  %v2545_v41 = vshll.u32 %v6482_v31, 16  ;;  %v6484_v57 = vld [vmem:[%s8394_s18 + $0x28] sm:$0xf]  ;;  %v6485_v58 = vld [vmem:[%s8394_s18 + $0x2c] sm:$0x1] }
  0x17   : > { %7354 = vmatpush3.bf16.msra.mxu1 %v8066_v8  ;;  %v2528_v43 = vrot.slane %v2526_v35, 4  ;;  %v2531_v44 = vrot.slane %v2529_v36, 5  ;;  %v2537_v45 = vrot.slane %v2535_v37, 5  ;;  %v2550_v59 = vshrl.u32 %v6483_v53, 16  ;;  %v8079_v2 = vld [vmem:[%s8394_s18 + $0x18] sm:$0xff]   ;;  %v8078_v6 = vld [vmem:[%s9682_s1 + $0x148] sm:$0xff]  }
  0x18   : > { %7546 = vmatpush3.bf16.msra.mxu0 %v8067_v9  ;;  %7355 = vmatprep.subr.bf16.mxu1 %v8068_v10  ;;  %v2509_v39 = vrot.slane %v2508_v28, 4  ;;  %v2519_v42 = vrot.slane %v2518_v34, 4  ;;  %v2541_v48 = vrot.slane %v2539_v40, 4  ;;  %v2547_v51 = vrot.slane %v2545_v41, 5  ;;  %v6486_v13 = vld [vmem:[%s8394_s18 + $0x30] sm:$0xf] }
  0x19   : > { %7547 = vmatprep.subr.bf16.mxu0 %v8069_v11  ;;  %v2532_v50 = vor.u32 %v2531_v44, %v2528_v43  ;;  %v2553_v60 = vshll.u32 %v6483_v53, 16  ;;  %v2559_v62 = vshll.u32 %v6484_v57, 16  ;;  %v2563_v63 = vshrl.u32 %v6484_v57, 16  ;;  %v6487_v14 = vld [vmem:[%s8394_s18 + $0x34] sm:$0xf]  ;;  %v8080_v28 = vld [vmem:[%s8394_s18 + $0x24] sm:$0xff]  }
  0x1a   : > { %v2514_v46 = vsel %vm8417_vm2, %v2509_v39, %v2513_v25  ;;  %v2524_v49 = vsel %vm8417_vm2, %v2519_v42, %v2523_v27  ;;  %v2542_v56 = vor.u32 %v2541_v48, %v2537_v45  ;;  %v2569_v0 = vshll.u32 %v6485_v58, 16  ;;  %v6488_v17 = vld [vmem:[%s8394_s18 + $0x38] sm:$0x1]  ;;  %v8082_v31 = vld [vmem:[%s9682_s1 + $0x150] sm:$0xff]   ;;  %v6489_v39 = vld [vmem:[%s8394_s18 + $0x3c] sm:$0xf] }
  0x1b   : > { %7356 = vmatpush3.bf16.msra.mxu1 %v8068_v10  ;;  %v6541_v54 = vcombine.low %v2514_v46, %v2524_v49  ;;  %v2533_v61 = vrot.slane %v2532_v50, 4  ;;  %v2552_v3 = vrot.slane %v2550_v59, 4  ;;  %v2555_v4 = vrot.slane %v2553_v60, 5  ;;  %v8081_v10 = vld [vmem:[%s9682_s1 + $0x48] sm:$0xff]   ;;  %v8084_v36 = vld [vmem:[%s8394_s18 + $0x30] sm:$0xff]  }
  0x1c   : > { %7548 = vmatpush3.bf16.msra.mxu0 %v8069_v11  ;;  %7357 = vmatprep.subr.bf16.mxu1 %v8070_v18  ;;  %v2543_v1 = vrot.slane %v2542_v56, 4  ;;  %v2561_v7 = vrot.slane %v2559_v62, 5  ;;  %v2565_v8 = vrot.slane %v2563_v63, 4  ;;  %v2571_v9 = vrot.slane %v2569_v0, 5  ;;  %v6490_v40 = vld [vmem:[%s8394_s18 + $0x40] sm:$0xf] }
  0x1d   : > { %7549 = vmatprep.subr.bf16.mxu0 %v8071_v24  ;;  %7553 = vmatprep.mubr.bf16.mxu0 %v6541_v54  ;;  %v2538_v5 = vsel %vm8417_vm2, %v2533_v61, %v2537_v45  ;;  %v2556_v12 = vor.u32 %v2555_v4, %v2552_v3  ;;  %v2577_v19 = vshll.u32 %v6486_v13, 16  ;;  %v2583_v21 = vshll.u32 %v6487_v14, 16  ;;  %v6491_v41 = vld [vmem:[%s8394_s18 + $0x44] sm:$0x1]  ;;  %v8086_v54 = vld [vmem:[%s9682_s1 + $0x50] sm:$0xff]  }
  0x1e   : > { %v2548_v11 = vsel %vm8417_vm2, %v2543_v1, %v2547_v51  ;;  %v2566_v16 = vor.u32 %v2565_v8, %v2561_v7  ;;  %v2587_v22 = vshrl.u32 %v6487_v14, 16  ;;  %v2593_v23 = vshll.u32 %v6488_v17, 16  ;;  %v6492_v58 = vld [vmem:[%s8394_s18 + $0x48] sm:$0xf]  ;;  %v6493_v61 = vld [vmem:[%s8394_s18 + $0x4c] sm:$0xf] }
  0x1f   : > { %7358 = vmatpush3.bf16.msra.mxu1 %v8070_v18  ;;  %v6542_v15 = vcombine.low %v2538_v5, %v2548_v11  ;;  %v2574_v18 = vshrl.u32 %v6486_v13, 16  ;;  %v2557_v20 = vrot.slane %v2556_v12, 4  ;;  %v2579_v26 = vrot.slane %v2577_v19, 5  ;;  %v6494_v62 = vld [vmem:[%s8394_s18 + $0x50] sm:$0x1]  ;;  %v8087_v8 = vld [vmem:[%s9682_s1 + $0x160] sm:$0xff]  }
  0x20   : > { %7550 = vmatpush3.bf16.msra.mxu0 %v8071_v24  ;;  %7359 = vmatprep.subr.bf16.mxu1 %v8072_v32  ;;  %v2567_v24 = vrot.slane %v2566_v16, 4  ;;  %v2585_v29 = vrot.slane %v2583_v21, 5  ;;  %v2589_v30 = vrot.slane %v2587_v22, 4  ;;  %v2595_v35 = vrot.slane %v2593_v23, 5  ;;  %v6495_v19 = vld [vmem:[%s8394_s18 + $0x54] sm:$0xf] }
  0x21   : > { %7551 = vmatprep.subr.bf16.mxu0 %v8073_v38  ;;  %v2576_v25 = vrot.slane %v2574_v18, 4  ;;  %v2562_v27 = vsel %vm8417_vm2, %v2557_v20, %v2561_v7  ;;  %v2598_v43 = vshrl.u32 %v6489_v39, 16  ;;  %v2601_v44 = vshll.u32 %v6489_v39, 16  ;;  %v8089_v18 = vld [vmem:[%s8394_s18 + $0x48] sm:$0xff]   ;;  %v6496_v20 = vld [vmem:[%s8394_s18 + $0x58] sm:$0xf] }
  0x22   : > { %v2607_v45 = vshll.u32 %v6490_v40, 16  ;;  %v2611_v48 = vshrl.u32 %v6490_v40, 16  ;;  %v2617_v49 = vshll.u32 %v6491_v41, 16  ;;  %v2622_v63 = vshrl.u32 %v6492_v58, 16  ;;  %v8088_v23 = vld [vmem:[%s9682_s1 + $0x168] sm:$0xff]   ;;  %v8090_v39 = vld [vmem:[%s8394_s18 + $0x54] sm:$0xff]  }
  0x23   : > { %7360 = vmatpush3.bf16.msra.mxu1 %v8072_v32  ;;  %v2572_v32 = vsel %vm8417_vm2, %v2567_v24, %v2571_v9  ;;  %v2580_v34 = vor.u32 %v2579_v26, %v2576_v25  ;;  %v2600_v51 = vrot.slane %v2598_v43, 4  ;;  %v2625_v0 = vshll.u32 %v6492_v58, 16  ;;  %v6497_v24 = vld [vmem:[%s8394_s18 + $0x5c] sm:$0x1]  ;;  %v6498_v43 = vld [vmem:[%s8394_s18 + $0x60] sm:$0xf] }
  0x24   : > { %7552 = vmatpush3.bf16.msra.mxu0 %v8073_v38  ;;  %7393 = vmatprep.subr.bf16.mxu1 %v8076_v47  ;;  %v6543_v37 = vcombine.low %v2562_v27, %v2572_v32  ;;  %v2590_v38 = vor.u32 %v2589_v30, %v2585_v29  ;;  %v2609_v53 = vrot.slane %v2607_v45, 5  ;;  %v2613_v56 = vrot.slane %v2611_v48, 4  ;;  %v8091_v40 = vld [vmem:[%s9682_s1 + $0x58] sm:$0xff]   ;;  %v6500_v45 = vld [vmem:[%s8394_s18 + $0x68] sm:$0x1] }
  0x25   : > { %7585 = vmatprep.subr.bf16.mxu0 %v8077_v52  ;;  %v2581_v42 = vrot.slane %v2580_v34, 4  ;;  %v2619_v57 = vrot.slane %v2617_v49, 5  ;;  %v2635_v3 = vshrl.u32 %v6493_v61, 16  ;;  %v2641_v4 = vshll.u32 %v6494_v62, 16 }
  0x26   : > { %7362 = vmatmul.mubr.bf16.vlgmr.msra.gmra.mrb[0].mxu1 %v8075_v55  ;;  %v2591_v46 = vrot.slane %v2590_v38, 4  ;;  %v2614_v1 = vor.u32 %v2613_v56, %v2609_v53  ;;  %v2627_v7 = vrot.slane %v2625_v0, 5  ;;  %v2646_v25 = vshrl.u32 %v6495_v19, 16  ;;  %v6565_v0 = vld [vmem:[%s8394_s18 + $0xc] sm:$0xe] }
  0x27   : > { %7554 = vmatmul.mubr.bf16.vlgmr.msra.gmra.mrb[0].mxu0 %v6542_v15  ;;  %7394 = vmatpush3.bf16.msra.mxu1 %v8076_v47  ;;  %v8083_v47 = vld [vmem:[%s9682_s1 + $0x158] sm:$0xff]   ;;  %v2586_v50 = vsel %vm8417_vm2, %v2581_v42, %v2585_v29  ;;  %v2637_v12 = vrot.slane %v2635_v3, 4  ;;  %v2643_v17 = vrot.slane %v2641_v4, 5  ;;  %v2649_v26 = vshll.u32 %v6495_v19, 16 }
  0x28   : > { %7586 = vmatpush3.bf16.msra.mxu0 %v8077_v52  ;;  %7365 = vmatprep.mubr.bf16.mxu1 %v8079_v2  ;;  %v2603_v52 = vrot.slane %v2601_v44, 5  ;;  %v2596_v55 = vsel %vm8417_vm2, %v2591_v46, %v2595_v35  ;;  %v2631_v2 = vshll.u32 %v6493_v61, 16  ;;  %v2615_v9 = vrot.slane %v2614_v1, 4  ;;  %v6499_v44 = vld [vmem:[%s8394_s18 + $0x64] sm:$0xf] }
  0x29   : > { %7587 = vmatprep.subr.bf16.mxu0 %v8078_v6  ;;  %7395 = vmatprep.subr.bf16.mxu1 %v8081_v10  ;;  %v6544_v59 = vcombine.low %v2586_v50, %v2596_v55  ;;  %v2659_v29 = vshrl.u32 %v6496_v20, 16  ;;  %v2665_v30 = vshll.u32 %v6497_v24, 16  ;;  %v2648_v32 = vrot.slane %v2646_v25, 4  ;;  %v8092_v50 = vld [vmem:[%s9682_s1 + $0x170] sm:$0xff]  }
  0x2a   : > { %7557 = vmatprep.mubr.bf16.mxu0 %v6543_v37  ;;  %v2604_v60 = vor.u32 %v2603_v52, %v2600_v51  ;;  %v2633_v11 = vrot.slane %v2631_v2, 5  ;;  %v2620_v15 = vsel %vm8417_vm2, %v2615_v9, %v2619_v57  ;;  %v2651_v34 = vrot.slane %v2649_v26, 5 }
  0x2b   : > { %7396 = vmatpush3.bf16.msra.mxu1 %v8081_v10  ;;  %v8085_v10 = vld [vmem:[%s8394_s18 + $0x3c] sm:$0xff]   ;;  %v2661_v37 = vrot.slane %v2659_v29, 4  ;;  %v2667_v38 = vrot.slane %v2665_v30, 5  ;;  %v2673_v48 = vshll.u32 %v6498_v43, 16  ;;  %v2679_v49 = vshll.u32 %v6499_v44, 16 }
  0x2c   : > { %7588 = vmatpush3.bf16.msra.mxu0 %v8078_v6  ;;  %7397 = vmatprep.subr.bf16.mxu1 %v8086_v54  ;;  %v2605_v5 = vrot.slane %v2604_v60, 4  ;;  %v2624_v6 = vrot.slane %v2622_v63, 4  ;;  %v2638_v16 = vor.u32 %v2637_v12, %v2633_v11  ;;  %v2652_v42 = vor.u32 %v2651_v34, %v2648_v32  ;;  %v8093_v60 = vld [vmem:[%s9682_s1 + $0x178] sm:$0xff]   ;;  %v8094_v63 = vld [vmem:[%s8394_s18 + $0x60] sm:$0xff]   ;;  %v6573_v32 = vld [vmem:[%s8394_s18 + $0x2c] sm:$0x1] }
  0x2d   : > { %7589 = vmatprep.subr.bf16.mxu0 %v8082_v31  ;;  %v2683_v52 = vshrl.u32 %v6499_v44, 16  ;;  %v2675_v56 = vrot.slane %v2673_v48, 5  ;;  %v2681_v57 = vrot.slane %v2679_v49, 5  ;;  %v6571_v29 = vld [vmem:[%s8394_s18 + $0x24] sm:$0xe]  ;;  %v8101_v48 = vld [vmem:[%s9682_s1 + $0x188] sm:$0xff]  }
  0x2e   : > { %7366 = vmatmul.mubr.bf16.gmra.mrb[4].mxu1 %v8080_v28  ;;  %v2610_v13 = vsel %vm8417_vm2, %v2605_v5, %v2609_v53  ;;  %v2628_v14 = vor.u32 %v2627_v7, %v2624_v6  ;;  %v2639_v27 = vrot.slane %v2638_v16, 4  ;;  %v2655_v28 = vshll.u32 %v6496_v20, 16  ;;  %v6566_v5 = vld [vmem:[%s8394_s18 + $0x10] sm:$0xf]  ;;  %v6567_v6 = vld [vmem:[%s8394_s18 + $0x14] sm:$0x1] }
  0x2f   : > { %7369 = vmatprep.mubr.bf16.mxu1 %v8084_v36  ;;  %7398 = vmatpush3.bf16.msra.mxu1 %v8086_v54  ;;  %v6545_v21 = vcombine.low %v2610_v13, %v2620_v15  ;;  %v2653_v51 = vrot.slane %v2652_v42, 4  ;;  %v2689_v53 = vshll.u32 %v6500_v45, 16  ;;  %v6613_v7 = vrot.slane %v6565_v0, 9  ;;  %v8097_v13 = vld [vmem:[%s9682_s1 + $0x180] sm:$0xff]   ;;  %v6569_v20 = vld [vmem:[%s8394_s18 + $0x1c] sm:$0xf] }
  0x30   : > { %7590 = vmatpush3.bf16.msra.mxu0 %v8082_v31  ;;  %v2629_v22 = vrot.slane %v2628_v14, 4  ;;  %v2644_v35 = vsel %vm8417_vm2, %v2639_v27, %v2643_v17  ;;  %v2657_v36 = vrot.slane %v2655_v28, 5  ;;  %7399 = vmatprep.subr.bf16.mxu1 %v8091_v40  ;;  %v3369_v9 = vrot.slane %v6566_v5, 5  ;;  %v8095_v17 = vld [vmem:[%s8394_s18 + $0x6c] sm:$0xff]   ;;  %v8099_v42 = vld [vmem:[%s8394_s18 + $0x84] sm:$0xff]  }
  0x31   : > { %7558 = vmatmul.mubr.bf16.gmra.mrb[4].mxu0 %v6544_v59  ;;  %7591 = vmatprep.subr.bf16.mxu0 %v8083_v47  ;;  %v2685_v59 = vrot.slane %v2683_v52, 4  ;;  %v2691_v3 = vrot.slane %v2689_v53, 5  ;;  %v3376_v26 = vrot.slane %v6569_v20, 5  ;;  %v6615_v34 = vrot.slane %v6571_v29, 9  ;;  %v6575_v44 = vld [vmem:[%s8394_s18 + $0x34] sm:$0xf] }
  0x32   : > { %7561 = vmatprep.mubr.bf16.mxu0 %v6545_v21  ;;  %v2634_v31 = vsel %vm8417_vm2, %v2629_v22, %v2633_v11  ;;  %v2662_v46 = vor.u32 %v2661_v37, %v2657_v36  ;;  %v2658_v58 = vsel %vm8417_vm2, %v2653_v51, %v2657_v36  ;;  %v8096_v11 = vld [vmem:[%s9682_s1 + $0x60] sm:$0xff]   ;;  %v3370_v15 = vsel %vm8517_vm5, %v6613_v7, %v3369_v9  ;;  %v6580_v0 = vld [vmem:[%s8394_s18 + $0x48] sm:$0xe]  ;;  %v6581_v5 = vld [vmem:[%s8394_s18 + $0x4c] sm:$0xf] }
  0x33   : > { %v6546_v41 = vcombine.low %v2634_v31, %v2644_v35  ;;  %7400 = vmatpush3.bf16.msra.mxu1 %v8091_v40  ;;  %v2686_v2 = vor.u32 %v2685_v59, %v2681_v57  ;;  %v3371_v16 = vrot.slane %v3369_v9, 4  ;;  %v6570_v21 = vld [vmem:[%s8394_s18 + $0x20] sm:$0x1]  ;;  %v3378_v30 = vrot.slane %v3376_v26, 4  ;;  %v6572_v31 = vld [vmem:[%s8394_s18 + $0x28] sm:$0xf] }
  0x34   : > { %7592 = vmatpush3.bf16.msra.mxu0 %v8083_v47  ;;  %v2670_v47 = vshrl.u32 %v6498_v43, 16  ;;  %v2663_v54 = vrot.slane %v2662_v46, 4  ;;  %7401 = vmatprep.subr.bf16.mxu1 %v8096_v11  ;;  %v3379_v27 = vrot.slane %v6570_v21, 5  ;;  %v3383_v36 = vrot.slane %v6572_v31, 5  ;;  %v6574_v43 = vld [vmem:[%s8394_s18 + $0x30] sm:$0xe] }
  0x35   : > { %7593 = vmatprep.subr.bf16.mxu0 %v8087_v8  ;;  %v2687_v12 = vrot.slane %v2686_v2, 4  ;;  %v3386_v37 = vrot.slane %v6573_v32, 5  ;;  %v6576_v46 = vld [vmem:[%s8394_s18 + $0x38] sm:$0x1]  ;;  %v8104_v59 = vld [vmem:[%s9682_s1 + $0x70] sm:$0xff]   ;;  %v6618_v7 = vrot.slane %v6580_v0, 9 }
  0x36   : > { %7370 = vmatmul.mubr.bf16.gmra.mrb[8].mxu1 %v8085_v10  ;;  %v2672_v55 = vrot.slane %v2670_v47, 4  ;;  %v2668_v61 = vsel %vm8417_vm2, %v2663_v54, %v2667_v38  ;;  %v3372_v10 = vrot.slane %v6567_v6, 5  ;;  %v3380_v38 = vsel %vm8517_vm5, %v3378_v30, %v3379_v27  ;;  %v8102_v54 = vld [vmem:[%s8394_s18 + $0x90] sm:$0xff]   ;;  %v6586_v27 = vld [vmem:[%s8394_s18 + $0x60] sm:$0xe]  ;;  %v8109_v31 = vld [vmem:[%s9682_s1 + $0x198] sm:$0xff]  }
  0x37   : > { %7373 = vmatprep.mubr.bf16.mxu1 %v8089_v18  ;;  %v6547_v1 = vcombine.low %v2658_v58, %v2668_v61  ;;  %v6568_v18 = vld [vmem:[%s8394_s18 + $0x18] sm:$0xe]  ;;  %v2692_v19 = vsel %vm8417_vm2, %v2687_v12, %v2691_v3  ;;  %7402 = vmatpush3.bf16.msra.mxu1 %v8096_v11  ;;  %v3384_v40 = vsel %vm8517_vm5, %v6615_v34, %v3383_v36  ;;  %v3390_v47 = vrot.slane %v6575_v44, 5  ;;  %v8103_v3 = vld [vmem:[%s8394_s18 + $0x9c] sm:$0xff]   ;;  %v6582_v6 = vld [vmem:[%s8394_s18 + $0x50] sm:$0x1] }
  0x38   : > { %7594 = vmatpush3.bf16.msra.mxu0 %v8087_v8  ;;  %v2676_v62 = vor.u32 %v2675_v56, %v2672_v55  ;;  %v6614_v22 = vrot.slane %v6568_v18, 9  ;;  %v3373_v25 = vsel %vm8517_vm5, %v3371_v16, %v3372_v10  ;;  %v3393_v51 = vrot.slane %v6576_v46, 5  ;;  %v6577_v55 = vld [vmem:[%s8394_s18 + $0x3c] sm:$0xe]  ;;  %v6578_v56 = vld [vmem:[%s8394_s18 + $0x40] sm:$0xf] }
  0x39   : > { %7595 = vmatprep.subr.bf16.mxu0 %v8088_v23  ;;  %7562 = vmatmul.mubr.bf16.gmra.mrb[8].mxu0 %v6546_v41  ;;  %v6645_v28 = vcombine.low %v3370_v15, %v3373_v25  ;;  %v3385_v41 = vrot.slane %v3383_v36, 4  ;;  %v3392_v53 = vrot.slane %v3390_v47, 4  ;;  %v6617_v58 = vrot.slane %v6577_v55, 9  ;;  %v8105_v12 = vld [vmem:[%s9682_s1 + $0x190] sm:$0xff]   ;;  %v8106_v15 = vld [vmem:[%s8394_s18 + $0xa8] sm:$0xff]  }
  0x3a   : > { %v2677_v8 = vrot.slane %v2676_v62, 4  ;;  %7565 = vmatprep.mubr.bf16.mxu0 %v6547_v1  ;;  %v3377_v35 = vsel %vm8517_vm5, %v6614_v22, %v3376_v26  ;;  %v3407_v11 = vrot.slane %v6582_v6, 5  ;;  %v6583_v16 = vld [vmem:[%s8394_s18 + $0x54] sm:$0xe]  ;;  %v6585_v18 = vld [vmem:[%s8394_s18 + $0x5c] sm:$0x1] }
  0x3b   : > { %v6646_v45 = vcombine.low %v3377_v35, %v3380_v38  ;;  %v3387_v49 = vsel %vm8517_vm5, %v3385_v41, %v3386_v37  ;;  %v3414_v21 = vrot.slane %v6585_v18, 5  ;;  %v8108_v26 = vld [vmem:[%s9682_s1 + $0x78] sm:$0xff]   ;;  %v6588_v29 = vld [vmem:[%s8394_s18 + $0x68] sm:$0x1]  ;;  %v6620_v30 = vrot.slane %v6586_v27, 9 }
  0x3c   : > { %7596 = vmatpush3.bf16.msra.mxu0 %v8088_v23  ;;  %v2682_v14 = vsel %vm8417_vm2, %v2677_v8, %v2681_v57  ;;  %v8098_v23 = vld [vmem:[%s8394_s18 + $0x78] sm:$0xff]   ;;  %v6647_v52 = vcombine.low %v3384_v40, %v3387_v49  ;;  %v6579_v57 = vld [vmem:[%s8394_s18 + $0x44] sm:$0x1]  ;;  %v3404_v8 = vrot.slane %v6581_v5, 5  ;;  %v3421_v36 = vrot.slane %v6588_v29, 5 }
  0x3d   : > { %7597 = vmatprep.subr.bf16.mxu0 %v8092_v50  ;;  %v6548_v24 = vcombine.low %v2682_v14, %v2692_v19  ;;  %v3400_v61 = vrot.slane %v6579_v57, 5  ;;  %v6619_v19 = vrot.slane %v6583_v16, 9  ;;  %v8107_v34 = vld [vmem:[%s8394_s18 + $0xb4] sm:$0xff]   ;;  %v585_v40 = vld [vmem:[%s8394_s18 + $0x4] sm:$0xf] }
  0x3e   : > { %7374 = vmatmul.mubr.bf16.gmra.mrb[12].mxu1 %v8090_v39  ;;  %v8100_v39 = vld [vmem:[%s9682_s1 + $0x68] sm:$0xff]   ;;  %v3406_v14 = vrot.slane %v3404_v8, 4  ;;  %v3405_v22 = vsel %vm8517_vm5, %v6618_v7, %v3404_v8  ;;  %v649_v49 = vshrl.u32 %v585_v40, 16  ;;  %v588_v5 = vld [vmem:[%s8394_s18 + $0x10] sm:$0xf] }
  0x3f   : > { %7377 = vmatprep.mubr.bf16.mxu1 %v8094_v63  ;;  %7403 = vmatprep.subr.bf16.mxu1 %v8100_v39  ;;  %v3394_v63 = vsel %vm8517_vm5, %v3392_v53, %v3393_v51  ;;  %v586_v41 = vld [vmem:[%s8394_s18 + $0x8] sm:$0x1]  ;;  %v6589_v46 = vld [vmem:[%s8394_s18 + $0x6c] sm:$0xe]  ;;  %v6590_v51 = vld [vmem:[%s8394_s18 + $0x70] sm:$0xf] }
  0x40   : > { %7598 = vmatpush3.bf16.msra.mxu0 %v8092_v50  ;;  %v6616_v50 = vrot.slane %v6574_v43, 9  ;;  %7404 = vmatpush3.bf16.msra.mxu1 %v8100_v39  ;;  %v584_v39 = vld [vmem:[%s8394_s18] sm:$0xf]  ;;  %v3425_v57 = vrot.slane %v6590_v51, 5  ;;  %v589_v6 = vld [vmem:[%s8394_s18 + $0x14] sm:$0x1] }
  0x41   : > { %7599 = vmatprep.subr.bf16.mxu0 %v8093_v60  ;;  %7566 = vmatmul.mubr.bf16.gmra.mrb[12].mxu0 %v6548_v24  ;;  %v636_v44 = vshrl.u32 %v584_v39, 16  ;;  %v6594_v29 = vld [vmem:[%s8394_s18 + $0x80] sm:$0x1] }
  0x42   : > { %7601 = vmatprep.mubr.bf16.mxu0 %v6645_v28  ;;  %v3391_v62 = vsel %vm8517_vm5, %v6616_v50, %v3390_v47  ;;  %7405 = vmatprep.subr.bf16.mxu1 %v8104_v59  ;;  %v6587_v28 = vld [vmem:[%s8394_s18 + $0x64] sm:$0xf]  ;;  %v655_v50 = vshll.u32 %v586_v41, 16  ;;  %v591_v41 = vld [vmem:[%s8394_s18 + $0x1c] sm:$0xf] }
  0x43   : > { %v6648_v9 = vcombine.low %v3391_v62, %v3394_v63  ;;  %v3418_v35 = vrot.slane %v6587_v28, 5  ;;  %v8618_v47 = vld [vmem:[%s9682_s1 + $0x80] sm:$0xff]   ;;  %v587_v63 = vld [vmem:[%s8394_s18 + $0xc] sm:$0xf]  ;;  %v697_v51 = vshrl.u32 %v591_v41, 16 }
  0x44   : > { %7600 = vmatpush3.bf16.msra.mxu0 %v8093_v60  ;;  %v3397_v60 = vrot.slane %v6578_v56, 5  ;;  %7406 = vmatpush3.bf16.msra.mxu1 %v8104_v59  ;;  %v6591_v56 = vld [vmem:[%s8394_s18 + $0x74] sm:$0x1]  ;;  %v657_v62 = vrot.slane %v655_v50, 5  ;;  %v660_v8 = vshrl.u32 %v587_v63, 16 }
  0x45   : > { %7633 = vmatprep.subr.bf16.mxu0 %v8097_v13  ;;  %7407 = vmatprep.subr.bf16.mxu1 %v8108_v26  ;;  %v3420_v43 = vrot.slane %v3418_v35, 4 }
  0x46   : > { %7378 = vmatmul.mubr.bf16.gmra.mrb[16].mxu1 %v8095_v17  ;;  %v3398_v1 = vsel %vm8517_vm5, %v6617_v58, %v3397_v60  ;;  %v3399_v2 = vrot.slane %v3397_v60, 4  ;;  %v6584_v17 = vld [vmem:[%s8394_s18 + $0x58] sm:$0xf]  ;;  %v8111_v58 = vld [vmem:[%s9682_s1 + $0x1a0] sm:$0xff]   ;;  %v662_v18 = vrot.slane %v660_v8, 4 }
  0x47   : > { %7381 = vmatprep.mubr.bf16.mxu1 %v8098_v23  ;;  %v3411_v20 = vrot.slane %v6584_v17, 5  ;;  %v3408_v23 = vsel %vm8517_vm5, %v3406_v14, %v3407_v11  ;;  %v3422_v53 = vsel %vm8517_vm5, %v3420_v43, %v3421_v36  ;;  %v8113_v11 = vld [vmem:[%s9682_s1 + $0x1a8] sm:$0xff]   ;;  %v673_v14 = vshrl.u32 %v588_v5, 16  ;;  %v590_v36 = vld [vmem:[%s8394_s18 + $0x18] sm:$0xf] }
  0x48   : > { %v3401_v10 = vsel %vm8517_vm5, %v3399_v2, %v3400_v61  ;;  %v6650_v37 = vcombine.low %v3405_v22, %v3408_v23  ;;  %7408 = vmatpush3.bf16.msra.mxu1 %v8108_v26  ;;  %v651_v61 = vrot.slane %v649_v49, 4  ;;  %v3427_v2 = vrot.slane %v3425_v57, 4  ;;  %v6593_v26 = vld [vmem:[%s8394_s18 + $0x7c] sm:$0xf] }
  0x49   : > { %7602 = vmatmul.mubr.bf16.vlgmr.msra.gmra.mrb[0].mxu0 %v6646_v45  ;;  %v3412_v24 = vsel %vm8517_vm5, %v6619_v19, %v3411_v20  ;;  %v3413_v25 = vrot.slane %v3411_v20, 4  ;;  %v639_v45 = vshll.u32 %v584_v39, 16  ;;  %7441 = vmatprep.subr.bf16.mxu1 %v8618_v47  ;;  %v6592_v20 = vld [vmem:[%s8394_s18 + $0x78] sm:$0xe] }
  0x4a   : > { %7634 = vmatpush3.bf16.msra.mxu0 %v8097_v13  ;;  %7605 = vmatprep.mubr.bf16.mxu0 %v6647_v52  ;;  %v6649_v13 = vcombine.low %v3398_v1, %v3401_v10  ;;  %v6621_v52 = vrot.slane %v6589_v46, 9  ;;  %v669_v10 = vshll.u32 %v588_v5, 16  ;;  %v693_v46 = vshll.u32 %v591_v41, 16 }
  0x4b   : > { %7635 = vmatprep.subr.bf16.mxu0 %v8101_v48  ;;  %v3415_v32 = vsel %vm8517_vm5, %v3413_v25, %v3414_v21  ;;  %v641_v55 = vrot.slane %v639_v45, 5  ;;  %v8115_v21 = vld [vmem:[%s9682_s1 + $0x1b0] sm:$0xff]   ;;  %v687_v45 = vshll.u32 %v590_v36, 16 }
  0x4c   : > { %v6651_v38 = vcombine.low %v3412_v24, %v3415_v32  ;;  %v3426_v1 = vsel %vm8517_vm5, %v6621_v52, %v3425_v57  ;;  %v671_v23 = vrot.slane %v669_v10, 5  ;;  %v675_v24 = vrot.slane %v673_v14, 4 }
  0x4e   : > { %7382 = vmatmul.mubr.bf16.gmra.mrb[20].mxu1 %v8099_v42  ;;  %7636 = vmatpush3.bf16.msra.mxu0 %v8101_v48  ;;  %v8612_v42 = vsel %vm8517_vm5, %v6620_v30, %v3418_v35  ;;  %v645_v48 = vshll.u32 %v585_v40, 16  ;;  %v6622_v30 = vrot.slane %v6592_v20, 9  ;;  %v3435_v35 = vrot.slane %v6594_v29, 5 }
  0x4f   : > { %7385 = vmatprep.mubr.bf16.mxu1 %v8102_v54  ;;  %7637 = vmatprep.subr.bf16.mxu0 %v8105_v12  ;;  %v638_v54 = vrot.slane %v636_v44, 4  ;;  %v6652_v59 = vcombine.low %v8612_v42, %v3422_v53  ;;  %v592_v42 = vld [vmem:[%s8394_s18 + $0x20] sm:$0x1]  ;;  %v684_v44 = vshrl.u32 %v590_v36, 16  ;;  %v6596_v53 = vld [vmem:[%s8394_s18 + $0x88] sm:$0xf] }
  0x50   : > { %v647_v60 = vrot.slane %v645_v48, 5  ;;  %v6595_v48 = vld [vmem:[%s8394_s18 + $0x84] sm:$0xe]  ;;  %v703_v52 = vshll.u32 %v592_v42, 16 }
  0x51   : > { %7606 = vmatmul.mubr.bf16.gmra.mrb[4].mxu0 %v6648_v9  ;;  %v642_v0 = vor.u32 %v641_v55, %v638_v54  ;;  %v663_v9 = vshll.u32 %v587_v63, 16  ;;  %v6597_v54 = vld [vmem:[%s8394_s18 + $0x8c] sm:$0x1]  ;;  %v686_v57 = vrot.slane %v684_v44, 4  ;;  %v699_v63 = vrot.slane %v697_v51, 4 }
  0x52   : > { %7609 = vmatprep.mubr.bf16.mxu0 %v6649_v13  ;;  %7638 = vmatpush3.bf16.msra.mxu0 %v8105_v12  ;;  %v652_v7 = vor.u32 %v651_v61, %v647_v60  ;;  %v6623_v5 = vrot.slane %v6595_v48, 9  ;;  %v6602_v51 = vld [vmem:[%s8394_s18 + $0xa0] sm:$0xf] }
  0x53   : > { %7639 = vmatprep.subr.bf16.mxu0 %v8109_v31  ;;  %v643_v12 = vrot.slane %v642_v0, 4  ;;  %v665_v19 = vrot.slane %v663_v9, 5  ;;  %v705_v0 = vrot.slane %v703_v52, 5 }
  0x54   : > { %v653_v16 = vrot.slane %v652_v7, 4  ;;  %v3442_v7 = vrot.slane %v6597_v54, 5 }
  0x55   : > { %v648_v22 = vsel %vm8417_vm2, %v643_v12, %v647_v60  ;;  %v666_v28 = vor.u32 %v665_v19, %v662_v18  ;;  %v594_v60 = vld [vmem:[%s8394_s18 + $0x28] sm:$0xf]  ;;  %v8114_v12 = vld [vmem:[%s9682_s1 + $0x90] sm:$0xff]   ;;  %v8682_v18 = vld [vmem:[%s9682_s1 + $0x1c0] sm:$0xff]  }
  0x56   : > { %7386 = vmatmul.mubr.bf16.gmra.mrb[24].mxu1 %v8103_v3  ;;  %7640 = vmatpush3.bf16.msra.mxu0 %v8109_v31  ;;  %v3428_v3 = vrot.slane %v6591_v56, 5  ;;  %v658_v27 = vsel %vm8417_vm2, %v653_v16, %v657_v62  ;;  %v3432_v31 = vrot.slane %v6593_v26, 5  ;;  %v695_v62 = vrot.slane %v693_v46, 5 }
  0x57   : > { %7389 = vmatprep.mubr.bf16.mxu1 %v8106_v15  ;;  %7641 = vmatprep.subr.bf16.mxu0 %v8111_v58  ;;  %v679_v15 = vshll.u32 %v589_v6, 16  ;;  %v6325_v32 = vcombine.low %v648_v22, %v658_v27  ;;  %v3439_v6 = vrot.slane %v6596_v53, 5  ;;  %v721_v16 = vshrl.u32 %v594_v60, 16  ;;  %v6600_v27 = vld [vmem:[%s8394_s18 + $0x98] sm:$0x1] }
  0x58   : > { %v3429_v13 = vsel %vm8517_vm5, %v3427_v2, %v3428_v3  ;;  %v3433_v39 = vsel %vm8517_vm5, %v6622_v30, %v3432_v31  ;;  %v3434_v40 = vrot.slane %v3432_v31, 4  ;;  %v8112_v2 = vld [vmem:[%s9682_s1 + $0x88] sm:$0xff]   ;;  %v700_v8 = vor.u32 %v699_v63, %v695_v62 }
  0x59   : > { %7610 = vmatmul.mubr.bf16.gmra.mrb[8].mxu0 %v6650_v37  ;;  %v6653_v17 = vcombine.low %v3426_v1, %v3429_v13  ;;  %v681_v25 = vrot.slane %v679_v15, 5  ;;  %v8117_v37 = vld [vmem:[%s9682_s1 + $0x1b8] sm:$0xff]   ;;  %v595_v1 = vld [vmem:[%s8394_s18 + $0x2c] sm:$0x1]  ;;  %v3440_v14 = vsel %vm8517_vm5, %v6623_v5, %v3439_v6  ;;  %v3441_v15 = vrot.slane %v3439_v6, 4  ;;  %v8119_v5 = vld [vmem:[%s9682_s1 + $0xa0] sm:$0xff]  }
  0x5a   : > { %7613 = vmatprep.mubr.bf16.mxu0 %v6651_v38  ;;  %7642 = vmatpush3.bf16.msra.mxu0 %v8111_v58  ;;  %v667_v38 = vrot.slane %v666_v28, 4  ;;  %v3436_v50 = vsel %vm8517_vm5, %v3434_v40, %v3435_v35  ;;  %v689_v58 = vrot.slane %v687_v45, 5  ;;  %v701_v19 = vrot.slane %v700_v8, 4  ;;  %v598_v40 = vld [vmem:[%s8394_s18 + $0x38] sm:$0x1] }
  0x5b   : > { %7643 = vmatprep.subr.bf16.mxu0 %v8113_v11  ;;  %v6654_v56 = vcombine.low %v3433_v39, %v3436_v50  ;;  %v727_v26 = vshll.u32 %v595_v1, 16  ;;  %v597_v39 = vld [vmem:[%s8394_s18 + $0x34] sm:$0xf]  ;;  %v3449_v42 = vrot.slane %v6600_v27, 5  ;;  %v6601_v45 = vld [vmem:[%s8394_s18 + $0x9c] sm:$0xe] }
  0x5c   : > { %v672_v49 = vsel %vm8417_vm2, %v667_v38, %v671_v23  ;;  %v690_v3 = vor.u32 %v689_v58, %v686_v57  ;;  %v706_v28 = vsel %vm8417_vm2, %v701_v19, %v705_v0  ;;  %v741_v50 = vshll.u32 %v597_v39, 16 }
  0x5d   : > { %v3453_v8 = vrot.slane %v6602_v51, 5 }
  0x5e   : > { %7390 = vmatmul.mubr.bf16.gmra.mrb[28].mxu1 %v8107_v34  ;;  %v676_v34 = vor.u32 %v675_v24, %v671_v23  ;;  %7644 = vmatpush3.bf16.msra.mxu0 %v8113_v11  ;;  %v717_v11 = vshll.u32 %v594_v60, 16  ;;  %v691_v13 = vrot.slane %v690_v3, 4  ;;  %v3443_v24 = vsel %vm8517_vm5, %v3441_v15, %v3442_v7  ;;  %v601_v3 = vld [vmem:[%s8394_s18 + $0x44] sm:$0x1] }
  0x5f   : > { %7645 = vmatprep.subr.bf16.mxu0 %v8115_v21  ;;  %7409 = vmatprep.mubr.bf16.mxu1 %v6325_v32  ;;  %v6655_v29 = vcombine.low %v3440_v14, %v3443_v24  ;;  %v596_v32 = vld [vmem:[%s8394_s18 + $0x30] sm:$0xf]  ;;  %v751_v60 = vshll.u32 %v598_v40, 16  ;;  %v6625_v7 = vrot.slane %v6601_v45, 9  ;;  %v6604_v14 = vld [vmem:[%s8394_s18 + $0xa8] sm:$0xe] }
  0x60   : > { %v677_v43 = vrot.slane %v676_v34, 4  ;;  %v719_v22 = vrot.slane %v717_v11, 5  ;;  %v696_v23 = vsel %vm8417_vm2, %v691_v13, %v695_v62  ;;  %v8116_v34 = vld [vmem:[%s9682_s1 + $0x98] sm:$0xff]   ;;  %v735_v44 = vshll.u32 %v596_v32, 16  ;;  %v600_v62 = vld [vmem:[%s8394_s18 + $0x40] sm:$0xf] }
  0x61   : > { %7614 = vmatmul.mubr.bf16.gmra.mrb[12].mxu0 %v6652_v59  ;;  %v593_v59 = vld [vmem:[%s8394_s18 + $0x24] sm:$0xf]  ;;  %v6327_v35 = vcombine.low %v696_v23, %v706_v28  ;;  %v753_v6 = vrot.slane %v751_v60, 5  ;;  %v3454_v15 = vsel %vm8517_vm5, %v6625_v7, %v3453_v8  ;;  %v769_v19 = vshrl.u32 %v600_v62, 16  ;;  %v6606_v24 = vld [vmem:[%s8394_s18 + $0xb0] sm:$0x1] }
  0x62   : > { %7617 = vmatprep.mubr.bf16.mxu0 %v6653_v17  ;;  %v682_v55 = vsel %vm8417_vm2, %v677_v43, %v681_v25  ;;  %7646 = vmatpush3.bf16.msra.mxu0 %v8115_v21  ;;  %v708_v9 = vshrl.u32 %v593_v59, 16  ;;  %v711_v10 = vshll.u32 %v593_v59, 16  ;;  %v6598_v17 = vld [vmem:[%s8394_s18 + $0x90] sm:$0xe]  ;;  %v723_v25 = vrot.slane %v721_v16, 4  ;;  %v8131_v7 = vld [vmem:[%s9682_s1 + $0xb8] sm:$0xff]  }
  0x63   : > { %v6326_v61 = vcombine.low %v672_v49, %v682_v55  ;;  %7647 = vmatprep.subr.bf16.mxu0 %v8117_v37  ;;  %v6624_v31 = vrot.slane %v6598_v17, 9  ;;  %v732_v43 = vshrl.u32 %v596_v32, 16  ;;  %v737_v54 = vrot.slane %v735_v44, 5 }
  0x64   : > { %v710_v20 = vrot.slane %v708_v9, 4  ;;  %v713_v21 = vrot.slane %v711_v10, 5  ;;  %v724_v36 = vor.u32 %v723_v25, %v719_v22  ;;  %v745_v55 = vshrl.u32 %v597_v39, 16  ;;  %v8123_v25 = vld [vmem:[%s9682_s1 + $0xa8] sm:$0xff]  }
  0x65   : > { %v734_v53 = vrot.slane %v732_v43, 4  ;;  %v743_v59 = vrot.slane %v741_v50, 5  ;;  %v3455_v16 = vrot.slane %v3453_v8, 4  ;;  %v765_v17 = vshll.u32 %v600_v62, 16 }
  0x66   : > { %7410 = vmatmul.mubr.bf16.vlgmr.msra.gmra.mrb[0].mxu1 %v6326_v61  ;;  %7648 = vmatpush3.bf16.msra.mxu0 %v8117_v37  ;;  %v714_v30 = vor.u32 %v713_v21, %v710_v20  ;;  %v729_v37 = vrot.slane %v727_v26, 5  ;;  %v725_v46 = vrot.slane %v724_v36, 4  ;;  %v599_v61 = vld [vmem:[%s8394_s18 + $0x3c] sm:$0xf]  ;;  %v6605_v20 = vld [vmem:[%s8394_s18 + $0xac] sm:$0xf] }
  0x67   : > { %7442 = vmatpush3.bf16.msra.mxu1 %v8618_v47  ;;  %v6599_v47 = vld [vmem:[%s8394_s18 + $0x94] sm:$0xf]  ;;  %7681 = vmatprep.subr.bf16.mxu0 %v8682_v18  ;;  %v738_v1 = vor.u32 %v737_v54, %v734_v53  ;;  %v759_v13 = vshll.u32 %v599_v61, 16  ;;  %v767_v27 = vrot.slane %v765_v17, 5  ;;  %v771_v28 = vrot.slane %v769_v19, 4 }
  0x68   : > { %7443 = vmatprep.subr.bf16.mxu1 %v8112_v2  ;;  %v3446_v38 = vrot.slane %v6599_v47, 5  ;;  %v715_v41 = vrot.slane %v714_v30, 4  ;;  %7413 = vmatprep.mubr.bf16.mxu1 %v6327_v35  ;;  %v730_v57 = vsel %vm8417_vm2, %v725_v46, %v729_v37  ;;  %v602_v35 = vld [vmem:[%s8394_s18 + $0x48] sm:$0xf]  ;;  %v8127_v36 = vld [vmem:[%s9682_s1 + $0xb0] sm:$0xff]   ;;  %v3460_v40 = vrot.slane %v6605_v20, 5 }
  0x69   : > { %7618 = vmatmul.mubr.bf16.gmra.mrb[16].mxu0 %v6654_v56  ;;  %v6603_v56 = vld [vmem:[%s8394_s18 + $0xa4] sm:$0x1]  ;;  %v739_v10 = vrot.slane %v738_v1, 4  ;;  %v761_v23 = vrot.slane %v759_v13, 5  ;;  %v3463_v44 = vrot.slane %v6606_v24, 5  ;;  %v780_v45 = vshrl.u32 %v602_v35, 16 }
  0x6a   : > { %7621 = vmatprep.mubr.bf16.mxu0 %v6655_v29  ;;  %v3447_v48 = vsel %vm8517_vm5, %v6624_v31, %v3446_v38  ;;  %v3448_v49 = vrot.slane %v3446_v38, 4  ;;  %v720_v52 = vsel %vm8417_vm2, %v715_v41, %v719_v22  ;;  %v3456_v9 = vrot.slane %v6603_v56, 5  ;;  %v603_v41 = vld [vmem:[%s8394_s18 + $0x4c] sm:$0xf]  ;;  %v6608_v53 = vld [vmem:[%s8394_s18 + $0xb8] sm:$0xf] }
  0x6b   : > { %7444 = vmatpush3.bf16.msra.mxu1 %v8112_v2  ;;  %v6328_v63 = vcombine.low %v720_v52, %v730_v57  ;;  %v747_v2 = vrot.slane %v745_v55, 4  ;;  %v744_v21 = vsel %vm8417_vm2, %v739_v10, %v743_v59  ;;  %v775_v29 = vshll.u32 %v601_v3, 16 }
  0x6c   : > { %7445 = vmatprep.subr.bf16.mxu1 %v8114_v12  ;;  %v3450_v58 = vsel %vm8517_vm5, %v3448_v49, %v3449_v42  ;;  %v3457_v26 = vsel %vm8517_vm5, %v3455_v16, %v3456_v9  ;;  %v772_v38 = vor.u32 %v771_v28, %v767_v27  ;;  %v604_v42 = vld [vmem:[%s8394_s18 + $0x50] sm:$0x1]  ;;  %v783_v46 = vshll.u32 %v602_v35, 16  ;;  %v6610_v16 = vld [vmem:[%s8394_s18 + $0xc0] sm:$0xe] }
  0x6d   : > { %v6656_v0 = vcombine.low %v3447_v48, %v3450_v58  ;;  %v748_v11 = vor.u32 %v747_v2, %v743_v59  ;;  %v6657_v31 = vcombine.low %v3454_v15, %v3457_v26  ;;  %v777_v39 = vrot.slane %v775_v29, 5  ;;  %v6607_v48 = vld [vmem:[%s8394_s18 + $0xb4] sm:$0xe]  ;;  %v6609_v58 = vld [vmem:[%s8394_s18 + $0xbc] sm:$0x1] }
  0x6e   : > { %7414 = vmatmul.mubr.bf16.gmra.mrb[4].mxu1 %v6328_v63  ;;  %v773_v49 = vrot.slane %v772_v38, 4  ;;  %v3462_v51 = vrot.slane %v3460_v40, 4  ;;  %v789_v52 = vshll.u32 %v603_v41, 16  ;;  %v782_v55 = vrot.slane %v780_v45, 4  ;;  %v605_v63 = vld [vmem:[%s8394_s18 + $0x54] sm:$0xf] }
  0x6f   : > { %7446 = vmatpush3.bf16.msra.mxu1 %v8114_v12  ;;  %v756_v12 = vshrl.u32 %v599_v61, 16  ;;  %v749_v22 = vrot.slane %v748_v11, 4  ;;  %v785_v56 = vrot.slane %v783_v46, 5  ;;  %v793_v57 = vshrl.u32 %v603_v41, 16  ;;  %v6612_v26 = vld [vmem:[%s8394_s18 + $0xc8] sm:$0x1] }
  0x70   : > { %7447 = vmatprep.subr.bf16.mxu1 %v8116_v34  ;;  %v778_v59 = vsel %vm8417_vm2, %v773_v49, %v777_v39  ;;  %v3464_v60 = vsel %vm8517_vm5, %v3462_v51, %v3463_v44  ;;  %v791_v61 = vrot.slane %v789_v52, 5  ;;  %v799_v62 = vshll.u32 %v604_v42, 16  ;;  %v609_v42 = vld [vmem:[%s8394_s18 + $0x64] sm:$0xf] }
  0x71   : > { %7622 = vmatmul.mubr.bf16.gmra.mrb[20].mxu0 %v6656_v0  ;;  %v758_v47 = vrot.slane %v756_v12, 4  ;;  %v754_v30 = vsel %vm8417_vm2, %v749_v22, %v753_v6  ;;  %v606_v0 = vld [vmem:[%s8394_s18 + $0x58] sm:$0xf]  ;;  %v786_v3 = vor.u32 %v785_v56, %v782_v55  ;;  %v607_v6 = vld [vmem:[%s8394_s18 + $0x5c] sm:$0x1]  ;;  %v6627_v9 = vrot.slane %v6607_v48, 9 }
  0x72   : > { %v6329_v37 = vcombine.low %v744_v21, %v754_v30  ;;  %7625 = vmatprep.mubr.bf16.mxu0 %v6657_v31  ;;  %v801_v8 = vrot.slane %v799_v62, 5  ;;  %v3467_v10 = vrot.slane %v6608_v53, 5  ;;  %v3470_v11 = vrot.slane %v6609_v58, 5  ;;  %v6611_v22 = vld [vmem:[%s8394_s18 + $0xc4] sm:$0xf] }
  0x73   : > { %7448 = vmatpush3.bf16.msra.mxu1 %v8116_v34  ;;  %v762_v32 = vor.u32 %v761_v23, %v758_v47  ;;  %v6626_v34 = vrot.slane %v6604_v14, 9  ;;  %v787_v12 = vrot.slane %v786_v3, 4  ;;  %v804_v14 = vshrl.u32 %v605_v63, 16  ;;  %v611_v58 = vld [vmem:[%s8394_s18 + $0x6c] sm:$0xf] }
  0x74   : > { %7449 = vmatprep.subr.bf16.mxu1 %v8119_v5  ;;  %7417 = vmatprep.mubr.bf16.mxu1 %v6329_v37  ;;  %v807_v15 = vshll.u32 %v605_v63, 16  ;;  %v3468_v17 = vsel %vm8517_vm5, %v6627_v9, %v3467_v10  ;;  %v3469_v19 = vrot.slane %v3467_v10, 4  ;;  %v813_v20 = vshll.u32 %v606_v0, 16  ;;  %v608_v37 = vld [vmem:[%s8394_s18 + $0x60] sm:$0xf] }
  0x75   : > { %v763_v43 = vrot.slane %v762_v32, 4  ;;  %v3461_v50 = vsel %vm8517_vm5, %v6626_v34, %v3460_v40  ;;  %v817_v21 = vshrl.u32 %v606_v0, 16  ;;  %v792_v47 = vsel %vm8417_vm2, %v787_v12, %v791_v61  ;;  %v612_v63 = vld [vmem:[%s8394_s18 + $0x70] sm:$0xf]  ;;  %v613_v0 = vld [vmem:[%s8394_s18 + $0x74] sm:$0x1] }
  0x76   : > { %v6658_v2 = vcombine.low %v3461_v50, %v3464_v60  ;;  %v806_v24 = vrot.slane %v804_v14, 4  ;;  %v3471_v28 = vsel %vm8517_vm5, %v3469_v19, %v3470_v11  ;;  %v815_v29 = vrot.slane %v813_v20, 5 }
  0x77   : > { %7450 = vmatpush3.bf16.msra.mxu1 %v8119_v5  ;;  %v768_v54 = vsel %vm8417_vm2, %v763_v43, %v767_v27  ;;  %v795_v5 = vrot.slane %v793_v57, 4  ;;  %v8763_v27 = vld [vmem:[%s9682_s1 + $0xc0] sm:$0xff]   ;;  %v819_v30 = vrot.slane %v817_v21, 4  ;;  %v823_v31 = vshll.u32 %v607_v6, 16  ;;  %v610_v43 = vld [vmem:[%s8394_s18 + $0x68] sm:$0x1] }
  0x78   : > { %7451 = vmatprep.subr.bf16.mxu1 %v8123_v25  ;;  %v6330_v1 = vcombine.low %v768_v54, %v778_v59  ;;  %v6659_v34 = vcombine.low %v3468_v17, %v3471_v28  ;;  %v3474_v41 = vrot.slane %v6611_v22, 5  ;;  %v3477_v45 = vrot.slane %v6612_v26, 5  ;;  %v8118_v57 = vld [vmem:[%s8394_s18 + $0x18] sm:$0xff]   ;;  %v8120_v22 = vld [vmem:[%s8394_s18 + $0x24] sm:$0xff]   ;;  %v8122_v26 = vld [vmem:[%s8394_s18 + $0x30] sm:$0xff]  }
  0x79   : > { %7626 = vmatmul.mubr.bf16.gmra.mrb[24].mxu0 %v6658_v2  ;;  %v796_v13 = vor.u32 %v795_v5, %v791_v61  ;;  %v820_v39 = vor.u32 %v819_v30, %v815_v29  ;;  %v825_v40 = vrot.slane %v823_v31, 5  ;;  %v828_v46 = vshrl.u32 %v608_v37, 16 }
  0x7a   : > { %7418 = vmatmul.mubr.bf16.gmra.mrb[8].mxu1 %v6330_v1  ;;  %7629 = vmatprep.mubr.bf16.mxu0 %v6659_v34  ;;  %v831_v48 = vshll.u32 %v608_v37, 16  ;;  %v3476_v51 = vrot.slane %v3474_v41, 4  ;;  %v837_v52 = vshll.u32 %v609_v42, 16  ;;  %v841_v56 = vshrl.u32 %v609_v42, 16  ;;  %v617_v37 = vld [vmem:[%s8394_s18 + $0x84] sm:$0xf] }
  0x7b   : > { %7452 = vmatpush3.bf16.msra.mxu1 %v8123_v25  ;;  %v797_v23 = vrot.slane %v796_v13, 4  ;;  %v809_v25 = vrot.slane %v807_v15, 5  ;;  %v821_v49 = vrot.slane %v820_v39, 4  ;;  %v830_v54 = vrot.slane %v828_v46, 4 }
  0x7c   : > { %7453 = vmatprep.subr.bf16.mxu1 %v8127_v36  ;;  %v833_v55 = vrot.slane %v831_v48, 5  ;;  %v3478_v60 = vsel %vm8517_vm5, %v3476_v51, %v3477_v45  ;;  %v839_v61 = vrot.slane %v837_v52, 5  ;;  %v847_v62 = vshll.u32 %v610_v43, 16  ;;  %v618_v43 = vld [vmem:[%s8394_s18 + $0x88] sm:$0xf] }
  0x7d   : > { %v802_v32 = vsel %vm8417_vm2, %v797_v23, %v801_v8  ;;  %v810_v35 = vor.u32 %v809_v25, %v806_v24  ;;  %v826_v59 = vsel %vm8417_vm2, %v821_v49, %v825_v40  ;;  %v843_v5 = vrot.slane %v841_v56, 4  ;;  %v614_v23 = vld [vmem:[%s8394_s18 + $0x78] sm:$0xf]  ;;  %v615_v24 = vld [vmem:[%s8394_s18 + $0x7c] sm:$0xf] }
  0x7e   : > { %v6331_v38 = vcombine.low %v792_v47, %v802_v32  ;;  %v834_v3 = vor.u32 %v833_v55, %v830_v54  ;;  %v849_v6 = vrot.slane %v847_v62, 5  ;;  %v855_v8 = vshll.u32 %v611_v58, 16  ;;  %v616_v25 = vld [vmem:[%s8394_s18 + $0x80] sm:$0x1]  ;;  %v619_v48 = vld [vmem:[%s8394_s18 + $0x8c] sm:$0x1] }
  0x7f   : > { %7454 = vmatpush3.bf16.msra.mxu1 %v8127_v36  ;;  %v6628_v36 = vrot.slane %v6610_v16, 9  ;;  %v811_v44 = vrot.slane %v810_v35, 4  ;;  %v861_v9 = vshll.u32 %v612_v63, 16  ;;  %v844_v11 = vor.u32 %v843_v5, %v839_v61  ;;  %v8129_v54 = vld [vmem:[%s9682_s1 + $0x1d0] sm:$0xff]  }
  0x80   : > { %7455 = vmatprep.subr.bf16.mxu1 %v8131_v7  ;;  %7421 = vmatprep.mubr.bf16.mxu1 %v6331_v38  ;;  %v835_v10 = vrot.slane %v834_v3, 4  ;;  %v865_v12 = vshrl.u32 %v612_v63, 16  ;;  %v871_v13 = vshll.u32 %v613_v0, 16  ;;  %v857_v15 = vrot.slane %v855_v8, 5  ;;  %v8125_v38 = vld [vmem:[%s9682_s1 + $0x1c8] sm:$0xff]   ;;  %v8124_v63 = vld [vmem:[%s8394_s18 + $0x3c] sm:$0xff]  }
  0x81   : > { %v3475_v50 = vsel %vm8517_vm5, %v6628_v36, %v3474_v41  ;;  %v816_v53 = vsel %vm8417_vm2, %v811_v44, %v815_v29  ;;  %v863_v16 = vrot.slane %v861_v9, 5  ;;  %v845_v19 = vrot.slane %v844_v11, 4  ;;  %v8126_v3 = vld [vmem:[%s8394_s18 + $0x48] sm:$0xff]   ;;  %v621_v8 = vld [vmem:[%s8394_s18 + $0x94] sm:$0xf] }
  0x82   : > { %v6332_v1 = vcombine.low %v816_v53, %v826_v59  ;;  %v6660_v2 = vcombine.low %v3475_v50, %v3478_v60  ;;  %v840_v17 = vsel %vm8417_vm2, %v835_v10, %v839_v61  ;;  %v867_v20 = vrot.slane %v865_v12, 4  ;;  %v622_v9 = vld [vmem:[%s8394_s18 + $0x98] sm:$0x1] }
  0x83   : > { %7456 = vmatpush3.bf16.msra.mxu1 %v8131_v7  ;;  %v852_v7 = vshrl.u32 %v611_v58, 16  ;;  %v873_v21 = vrot.slane %v871_v13, 5  ;;  %v850_v28 = vsel %vm8417_vm2, %v845_v19, %v849_v6  ;;  %v876_v30 = vshrl.u32 %v614_v23, 16 }
  0x84   : > { %7489 = vmatprep.subr.bf16.mxu1 %v8763_v27  ;;  %7422 = vmatmul.mubr.bf16.gmra.mrb[12].mxu1 %v6332_v1  ;;  %v868_v29 = vor.u32 %v867_v20, %v863_v16  ;;  %v879_v31 = vshll.u32 %v614_v23, 16  ;;  %v6333_v32 = vcombine.low %v840_v17, %v850_v28  ;;  %v885_v35 = vshll.u32 %v615_v24, 16  ;;  %v623_v20 = vld [vmem:[%s8394_s18 + $0x9c] sm:$0xf] }
  0x85   : > { %7630 = vmatmul.mubr.bf16.gmra.mrb[28].mxu0 %v6660_v2  ;;  %v854_v14 = vrot.slane %v852_v7, 4  ;;  %v889_v36 = vshrl.u32 %v615_v24, 16  ;;  %v878_v40 = vrot.slane %v876_v30, 4  ;;  %v895_v42 = vshll.u32 %v616_v25, 16  ;;  %v620_v2 = vld [vmem:[%s8394_s18 + $0x90] sm:$0xf] }
  0x86   : > { %7649 = vmatprep.mubr.bf16.mxu0 %v8118_v57  ;;  %v869_v39 = vrot.slane %v868_v29, 4  ;;  %v881_v41 = vrot.slane %v879_v31, 5  ;;  %7425 = vmatprep.mubr.bf16.mxu1 %v6333_v32  ;;  %v887_v45 = vrot.slane %v885_v35, 5  ;;  %v900_v49 = vshrl.u32 %v617_v37, 16  ;;  %v624_v24 = vld [vmem:[%s8394_s18 + $0xa0] sm:$0xf] }
  0x87   : > { %v858_v47 = vor.u32 %v857_v15, %v854_v14  ;;  %v891_v46 = vrot.slane %v889_v36, 4  ;;  %v897_v52 = vrot.slane %v895_v42, 5  ;;  %v903_v53 = vshll.u32 %v617_v37, 16  ;;  %v8133_v14 = vld [vmem:[%s9682_s1 + $0x1d8] sm:$0xff]   ;;  %v625_v29 = vld [vmem:[%s8394_s18 + $0xa4] sm:$0x1] }
  0x88   : > { %v874_v50 = vsel %vm8417_vm2, %v869_v39, %v873_v21  ;;  %v882_v51 = vor.u32 %v881_v41, %v878_v40  ;;  %v902_v57 = vrot.slane %v900_v49, 4  ;;  %v909_v58 = vshll.u32 %v618_v43, 16  ;;  %v8137_v36 = vld [vmem:[%s9682_s1 + $0x1e0] sm:$0xff]  }
  0x89   : > { %v859_v34 = vrot.slane %v858_v47, 4  ;;  %v892_v56 = vor.u32 %v891_v46, %v887_v45  ;;  %v905_v60 = vrot.slane %v903_v53, 5  ;;  %v913_v61 = vshrl.u32 %v618_v43, 16  ;;  %v626_v53 = vld [vmem:[%s8394_s18 + $0xa8] sm:$0xf] }
  0x8a   : > { %v883_v59 = vrot.slane %v882_v51, 4  ;;  %v919_v62 = vshll.u32 %v619_v48, 16  ;;  %v911_v1 = vrot.slane %v909_v58, 5  ;;  %v924_v11 = vshrl.u32 %v620_v2, 16  ;;  %v628_v58 = vld [vmem:[%s8394_s18 + $0xb0] sm:$0x1] }
  0x8b   : > { %v864_v44 = vsel %vm8417_vm2, %v859_v34, %v863_v16  ;;  %v893_v0 = vrot.slane %v892_v56, 4  ;;  %v906_v5 = vor.u32 %v905_v60, %v902_v57  ;;  %v915_v6 = vrot.slane %v913_v61, 4 }
  0x8c   : > { %v6334_v55 = vcombine.low %v864_v44, %v874_v50  ;;  %v921_v7 = vrot.slane %v919_v62, 5  ;;  %v927_v12 = vshll.u32 %v620_v2, 16  ;;  %v933_v13 = vshll.u32 %v621_v8, 16  ;;  %v8130_v50 = vld [vmem:[%s8394_s18 + $0x60] sm:$0xff]  }
  0x8d   : > { %7650 = vmatmul.mubr.bf16.vlgmr.msra.gmra.mrb[0].mxu0 %v8120_v22  ;;  %v898_v10 = vsel %vm8417_vm2, %v893_v0, %v897_v52  ;;  %v907_v16 = vrot.slane %v906_v5, 4  ;;  %v916_v17 = vor.u32 %v915_v6, %v911_v1  ;;  %v937_v19 = vshrl.u32 %v621_v8, 16  ;;  %v8141_v0 = vld [vmem:[%s9682_s1 + $0x1e8] sm:$0xff]   ;;  %v629_v5 = vld [vmem:[%s8394_s18 + $0xb4] sm:$0xf] }
  0x8e   : > { %7682 = vmatpush3.bf16.msra.mxu0 %v8682_v18  ;;  %7653 = vmatprep.mubr.bf16.mxu0 %v8122_v26  ;;  %v888_v18 = vsel %vm8417_vm2, %v883_v59, %v887_v45  ;;  %v926_v21 = vrot.slane %v924_v11, 4  ;;  %v929_v22 = vrot.slane %v927_v12, 5  ;;  %v935_v47 = vrot.slane %v933_v13, 5  ;;  %v8128_v45 = vld [vmem:[%s8394_s18 + $0x54] sm:$0xff]  }
  0x8f   : > { %7683 = vmatprep.subr.bf16.mxu0 %v8125_v38  ;;  %7426 = vmatmul.mubr.bf16.gmra.mrb[16].mxu1 %v6334_v55  ;;  %v6335_v15 = vcombine.low %v888_v18, %v898_v10  ;;  %v943_v23 = vshll.u32 %v622_v9, 16  ;;  %v912_v25 = vsel %vm8417_vm2, %v907_v16, %v911_v1  ;;  %v917_v26 = vrot.slane %v916_v17, 4  ;;  %v630_v9 = vld [vmem:[%s8394_s18 + $0xb8] sm:$0xf]  ;;  %v631_v10 = vld [vmem:[%s8394_s18 + $0xbc] sm:$0x1] }
  0x90   : > { %v939_v28 = vrot.slane %v937_v19, 4  ;;  %v948_v30 = vshrl.u32 %v623_v20, 16  ;;  %v930_v31 = vor.u32 %v929_v22, %v926_v21  ;;  %v951_v34 = vshll.u32 %v623_v20, 16 }
  0x91   : > { %7429 = vmatprep.mubr.bf16.mxu1 %v6335_v15  ;;  %v945_v32 = vrot.slane %v943_v23, 5  ;;  %v957_v35 = vshll.u32 %v624_v24, 16  ;;  %v922_v37 = vsel %vm8417_vm2, %v917_v26, %v921_v7  ;;  %v961_v40 = vshrl.u32 %v624_v24, 16  ;;  %v8145_v15 = vld [vmem:[%s9682_s1 + $0x1f0] sm:$0xff]  }
  0x92   : > { %7684 = vmatpush3.bf16.msra.mxu0 %v8125_v38  ;;  %v940_v38 = vor.u32 %v939_v28, %v935_v47  ;;  %v950_v39 = vrot.slane %v948_v30, 4  ;;  %v6336_v41 = vcombine.low %v912_v25, %v922_v37  ;;  %v931_v42 = vrot.slane %v930_v31, 4  ;;  %v8132_v24 = vld [vmem:[%s8394_s18 + $0x6c] sm:$0xff]   ;;  %v1405_v37 = vld [vmem:[%s8394_s18] sm:$0xe] }
  0x93   : > { %7685 = vmatprep.subr.bf16.mxu0 %v8129_v54  ;;  %v953_v43 = vrot.slane %v951_v34, 5  ;;  %v959_v44 = vrot.slane %v957_v35, 5  ;;  %v963_v48 = vrot.slane %v961_v40, 4  ;;  %v967_v49 = vshll.u32 %v625_v29, 16  ;;  %v8134_v29 = vld [vmem:[%s8394_s18 + $0x78] sm:$0xff]  }
  0x94   : > { %v941_v46 = vrot.slane %v940_v38, 4  ;;  %v936_v51 = vsel %vm8417_vm2, %v931_v42, %v935_v47  ;;  %v972_v59 = vshrl.u32 %v626_v53, 16  ;;  %v975_v62 = vshll.u32 %v626_v53, 16  ;;  %v8149_v34 = vld [vmem:[%s9682_s1 + $0x1f8] sm:$0xff]   ;;  %v1406_v38 = vld [vmem:[%s8394_s18 + $0x4] sm:$0xf] }
  0x95   : > { %7654 = vmatmul.mubr.bf16.gmra.mrb[4].mxu0 %v8124_v63  ;;  %v954_v52 = vor.u32 %v953_v43, %v950_v39  ;;  %v964_v56 = vor.u32 %v963_v48, %v959_v44  ;;  %v969_v57 = vrot.slane %v967_v49, 5  ;;  %v991_v18 = vshll.u32 %v628_v58, 16  ;;  %v1407_v39 = vld [vmem:[%s8394_s18 + $0x8] sm:$0x1]  ;;  %v1408_v48 = vld [vmem:[%s8394_s18 + $0xc] sm:$0xe] }
  0x96   : > { %7657 = vmatprep.mubr.bf16.mxu0 %v8126_v3  ;;  %7686 = vmatpush3.bf16.msra.mxu0 %v8129_v54  ;;  %v627_v54 = vld [vmem:[%s8394_s18 + $0xac] sm:$0xf]  ;;  %v946_v55 = vsel %vm8417_vm2, %v941_v46, %v945_v32  ;;  %v974_v2 = vrot.slane %v972_v59, 4  ;;  %v977_v7 = vrot.slane %v975_v62, 5  ;;  %v999_v19 = vshll.u32 %v629_v5, 16 }
  0x97   : > { %7687 = vmatprep.subr.bf16.mxu0 %v8133_v14  ;;  %7430 = vmatmul.mubr.bf16.gmra.mrb[20].mxu1 %v6336_v41  ;;  %v6337_v60 = vcombine.low %v936_v51, %v946_v55  ;;  %v955_v61 = vrot.slane %v954_v52, 4  ;;  %v981_v63 = vshll.u32 %v627_v54, 16  ;;  %v965_v1 = vrot.slane %v964_v56, 4  ;;  %v1409_v49 = vld [vmem:[%s8394_s18 + $0x10] sm:$0xf]  ;;  %v8136_v55 = vld [vmem:[%s8394_s18 + $0x84] sm:$0xff]  }
  0x98   : > { %v985_v3 = vshrl.u32 %v627_v54, 16  ;;  %v993_v13 = vrot.slane %v991_v18, 5  ;;  %v978_v17 = vor.u32 %v977_v7, %v974_v2  ;;  %v1005_v20 = vshll.u32 %v630_v9, 16  ;;  %v1410_v53 = vld [vmem:[%s8394_s18 + $0x14] sm:$0x1]  ;;  %v8873_v56 = vld [vmem:[%s9682_s1 + $0x200] sm:$0xff]  }
  0x99   : > { %7433 = vmatprep.mubr.bf16.mxu1 %v6337_v60  ;;  %v960_v6 = vsel %vm8417_vm2, %v955_v61, %v959_v44  ;;  %v983_v8 = vrot.slane %v981_v63, 5  ;;  %v970_v11 = vsel %vm8417_vm2, %v965_v1, %v969_v57  ;;  %v1009_v47 = vshrl.u32 %v630_v9, 16  ;;  %v1411_v1 = vld [vmem:[%s8394_s18 + $0x18] sm:$0xe]  ;;  %v8138_v2 = vld [vmem:[%s8394_s18 + $0x90] sm:$0xff]  }
  0x9a   : > { %7688 = vmatpush3.bf16.msra.mxu0 %v8133_v14  ;;  %v987_v12 = vrot.slane %v985_v3, 4  ;;  %v996_v14 = vshrl.u32 %v629_v5, 16  ;;  %v6338_v16 = vcombine.low %v960_v6, %v970_v11  ;;  %v1015_v23 = vshll.u32 %v631_v10, 16  ;;  %v1412_v3 = vld [vmem:[%s8394_s18 + $0x1c] sm:$0xf] }
  0x9b   : > { %7689 = vmatprep.subr.bf16.mxu0 %v8137_v36  ;;  %v979_v25 = vrot.slane %v978_v17, 4  ;;  %v1001_v26 = vrot.slane %v999_v19, 5  ;;  %v1007_v28 = vrot.slane %v1005_v20, 5  ;;  %v1011_v31 = vrot.slane %v1009_v47, 4  ;;  %v1413_v18 = vld [vmem:[%s8394_s18 + $0x20] sm:$0x1] }
  0x9c   : > { %v988_v21 = vor.u32 %v987_v12, %v983_v8  ;;  %v998_v22 = vrot.slane %v996_v14, 4  ;;  %v1017_v32 = vrot.slane %v1015_v23, 5  ;;  %v6349_v42 = vrot.slane %v1405_v37, 9  ;;  %v1414_v10 = vld [vmem:[%s8394_s18 + $0x24] sm:$0xe]  ;;  %v8140_v47 = vld [vmem:[%s8394_s18 + $0x9c] sm:$0xff]  }
  0x9d   : > { %7658 = vmatmul.mubr.bf16.gmra.mrb[8].mxu0 %v8128_v45  ;;  %v984_v35 = vsel %vm8417_vm2, %v979_v25, %v983_v8  ;;  %v1012_v41 = vor.u32 %v1011_v31, %v1007_v28  ;;  %v1506_v43 = vrot.slane %v1406_v38, 5  ;;  %v1509_v46 = vrot.slane %v1407_v39, 5  ;;  %v1415_v11 = vld [vmem:[%s8394_s18 + $0x28] sm:$0xf]  ;;  %v1416_v12 = vld [vmem:[%s8394_s18 + $0x2c] sm:$0x1] }
  0x9e   : > { %7661 = vmatprep.mubr.bf16.mxu0 %v8130_v50  ;;  %7690 = vmatpush3.bf16.msra.mxu0 %v8137_v36  ;;  %v989_v30 = vrot.slane %v988_v21, 4  ;;  %v1002_v36 = vor.u32 %v1001_v26, %v998_v22  ;;  %v6350_v54 = vrot.slane %v1408_v48, 9  ;;  %v1513_v58 = vrot.slane %v1409_v49, 5  ;;  %v8139_v22 = vld [vmem:[%s9682_s1 + $0xc8] sm:$0xff]   ;;  %v1418_v25 = vld [vmem:[%s8394_s18 + $0x34] sm:$0xf] }
  0x9f   : > { %7691 = vmatprep.subr.bf16.mxu0 %v8141_v0  ;;  %7434 = vmatmul.mubr.bf16.gmra.mrb[24].mxu1 %v6338_v16  ;;  %v1013_v50 = vrot.slane %v1012_v41, 4  ;;  %v1507_v51 = vsel %vm8517_vm5, %v6349_v42, %v1506_v43  ;;  %v1508_v52 = vrot.slane %v1506_v43, 4  ;;  %v1516_v59 = vrot.slane %v1410_v53, 5  ;;  %v1419_v26 = vld [vmem:[%s8394_s18 + $0x38] sm:$0x1]  ;;  %v8142_v31 = vld [vmem:[%s8394_s18 + $0xa8] sm:$0xff]  }
  0xa0   : > { %v994_v40 = vsel %vm8417_vm2, %v989_v30, %v993_v13  ;;  %v1003_v45 = vrot.slane %v1002_v36, 4  ;;  %v6351_v5 = vrot.slane %v1411_v1, 9  ;;  %v1520_v6 = vrot.slane %v1412_v3, 5  ;;  %v1422_v36 = vld [vmem:[%s8394_s18 + $0x44] sm:$0x1]  ;;  %v8144_v48 = vld [vmem:[%s8394_s18 + $0xb4] sm:$0xff]  }
  0xa1   : > { %v6339_v44 = vcombine.low %v984_v35, %v994_v40  ;;  %v1018_v60 = vsel %vm8417_vm2, %v1013_v50, %v1017_v32  ;;  %v1510_v61 = vsel %vm8517_vm5, %v1508_v52, %v1509_v46  ;;  %v1523_v7 = vrot.slane %v1413_v18, 5  ;;  %v1420_v32 = vld [vmem:[%s8394_s18 + $0x3c] sm:$0xe]  ;;  %v1421_v35 = vld [vmem:[%s8394_s18 + $0x40] sm:$0xf]  ;;  %v8143_v40 = vld [vmem:[%s9682_s1 + $0xd0] sm:$0xff]  }
  0xa2   : > { %7692 = vmatpush3.bf16.msra.mxu0 %v8141_v0  ;;  %v1008_v57 = vsel %vm8417_vm2, %v1003_v45, %v1007_v28  ;;  %v6381_v63 = vcombine.low %v1507_v51, %v1510_v61  ;;  %v1515_v0 = vrot.slane %v1513_v58, 4  ;;  %v1514_v8 = vsel %vm8517_vm5, %v6350_v54, %v1513_v58  ;;  %v1424_v49 = vld [vmem:[%s8394_s18 + $0x4c] sm:$0xf]  ;;  %v1425_v50 = vld [vmem:[%s8394_s18 + $0x50] sm:$0x1]  ;;  %v8147_v52 = vld [vmem:[%s9682_s1 + $0xd8] sm:$0xff]  }
  0xa3   : > { %7693 = vmatprep.subr.bf16.mxu0 %v8145_v15  ;;  %7437 = vmatprep.mubr.bf16.mxu1 %v6339_v44  ;;  %v6340_v62 = vcombine.low %v1008_v57, %v1018_v60  ;;  %v1521_v13 = vsel %vm8517_vm5, %v6351_v5, %v1520_v6  ;;  %v1522_v14 = vrot.slane %v1520_v6, 4  ;;  %v6352_v16 = vrot.slane %v1414_v10, 9  ;;  %v1423_v44 = vld [vmem:[%s8394_s18 + $0x48] sm:$0xe]  ;;  %v1426_v57 = vld [vmem:[%s8394_s18 + $0x54] sm:$0xe] }
  0xa4   : > { %v1517_v9 = vsel %vm8517_vm5, %v1515_v0, %v1516_v59  ;;  %v1530_v21 = vrot.slane %v1416_v12, 5  ;;  %v1537_v30 = vrot.slane %v1419_v26, 5  ;;  %v1541_v39 = vrot.slane %v1421_v35, 5  ;;  %v1427_v58 = vld [vmem:[%s8394_s18 + $0x58] sm:$0xf]  ;;  %v8146_v61 = vld [vmem:[%s8394_s18 + $0xc0] sm:$0xff]  }
  0xa5   : > { %7662 = vmatmul.mubr.bf16.gmra.mrb[12].mxu0 %v8132_v24  ;;  %v6382_v17 = vcombine.low %v1514_v8, %v1517_v9  ;;  %v1524_v19 = vsel %vm8517_vm5, %v1522_v14, %v1523_v7  ;;  %v1417_v24 = vld [vmem:[%s8394_s18 + $0x30] sm:$0xe]  ;;  %v6354_v42 = vrot.slane %v1420_v32, 9  ;;  %v1544_v43 = vrot.slane %v1422_v36, 5  ;;  %v1428_v59 = vld [vmem:[%s8394_s18 + $0x5c] sm:$0x1] }
  0xa6   : > { %7665 = vmatprep.mubr.bf16.mxu0 %v8134_v29  ;;  %7694 = vmatpush3.bf16.msra.mxu0 %v8145_v15  ;;  %v1527_v15 = vrot.slane %v1415_v11, 5  ;;  %v6383_v23 = vcombine.low %v1521_v13, %v1524_v19  ;;  %v6353_v28 = vrot.slane %v1417_v24, 9  ;;  %v1534_v29 = vrot.slane %v1418_v25, 5  ;;  %v8150_v6 = vld [vmem:[%s9682_s1 + $0xe0] sm:$0xff]   ;;  %v1431_v11 = vld [vmem:[%s8394_s18 + $0x68] sm:$0x1] }
  0xa7   : > { %7695 = vmatprep.subr.bf16.mxu0 %v8149_v34  ;;  %7438 = vmatmul.mubr.bf16.gmra.mrb[28].mxu1 %v6340_v62  ;;  %v1543_v46 = vrot.slane %v1541_v39, 4  ;;  %v6355_v51 = vrot.slane %v1423_v44, 9  ;;  %v1548_v54 = vrot.slane %v1424_v49, 5  ;;  %v6356_v62 = vrot.slane %v1426_v57, 9  ;;  %v1429_v7 = vld [vmem:[%s8394_s18 + $0x60] sm:$0xe] }
  0xa8   : > { %7457 = vmatprep.mubr.bf16.mxu1 %v6381_v63  ;;  %v1529_v20 = vrot.slane %v1527_v15, 4  ;;  %v1528_v37 = vsel %vm8517_vm5, %v6352_v16, %v1527_v15  ;;  %v1555_v63 = vrot.slane %v1427_v58, 5  ;;  %v1542_v0 = vsel %vm8517_vm5, %v6354_v42, %v1541_v39  ;;  %v1430_v8 = vld [vmem:[%s8394_s18 + $0x64] sm:$0xf]  ;;  %v6741_v13 = vld [vmem:[%s8394_s18 + $0x18] sm:$0xf] }
  0xa9   : > { %v1550_v60 = vrot.slane %v1548_v54, 4  ;;  %v1545_v1 = vsel %vm8517_vm5, %v1543_v46, %v1544_v43  ;;  %v1549_v3 = vsel %vm8517_vm5, %v6355_v51, %v1548_v54  ;;  %v1562_v12 = vrot.slane %v1430_v8, 5  ;;  %v8148_v16 = vld [vmem:[%s8394_s18 + $0xcc] sm:$0xff]   ;;  %v6742_v19 = vld [vmem:[%s8394_s18 + $0x1c] sm:$0xf] }
  0xaa   : > { %7696 = vmatpush3.bf16.msra.mxu0 %v8149_v34  ;;  %v1536_v34 = vrot.slane %v1534_v29, 4  ;;  %v1531_v38 = vsel %vm8517_vm5, %v1529_v20, %v1530_v21  ;;  %v1557_v5 = vrot.slane %v1555_v63, 4  ;;  %v6386_v9 = vcombine.low %v1542_v0, %v1545_v1  ;;  %v6743_v20 = vld [vmem:[%s8394_s18 + $0x20] sm:$0x1]  ;;  %v1432_v26 = vld [vmem:[%s8394_s18 + $0x6c] sm:$0xe] }
  0xab   : > { %7729 = vmatprep.subr.bf16.mxu0 %v8873_v56  ;;  %v6384_v45 = vcombine.low %v1528_v37, %v1531_v38  ;;  %v8946_v10 = vsel %vm8517_vm5, %v6356_v62, %v1555_v63  ;;  %v4365_v21 = vshrl.u32 %v6741_v13, 16  ;;  %v4368_v24 = vshll.u32 %v6741_v13, 16  ;;  %v1434_v36 = vld [vmem:[%s8394_s18 + $0x74] sm:$0x1]  ;;  %v6744_v46 = vld [vmem:[%s8394_s18 + $0x24] sm:$0xf] }
  0xac   : > { %v1538_v41 = vsel %vm8517_vm5, %v1536_v34, %v1537_v30  ;;  %v4374_v25 = vshll.u32 %v6742_v19, 16  ;;  %v4384_v30 = vshll.u32 %v6743_v20, 16  ;;  %v6358_v32 = vrot.slane %v1432_v26, 9  ;;  %v6746_v51 = vld [vmem:[%s8394_s18 + $0x2c] sm:$0x1] }
  0xad   : > { %7666 = vmatmul.mubr.bf16.gmra.mrb[16].mxu0 %v8136_v55  ;;  %v1551_v55 = vrot.slane %v1425_v50, 5  ;;  %v4370_v34 = vrot.slane %v4368_v24, 5  ;;  %v6745_v50 = vld [vmem:[%s8394_s18 + $0x28] sm:$0xf]  ;;  %v1437_v8 = vld [vmem:[%s8394_s18 + $0x80] sm:$0x1] }
  0xae   : > { %7669 = vmatprep.mubr.bf16.mxu0 %v8138_v2  ;;  %v1558_v2 = vrot.slane %v1428_v59, 5  ;;  %v4376_v35 = vrot.slane %v4374_v25, 5  ;;  %v4386_v44 = vrot.slane %v4384_v30, 5  ;;  %v4398_v57 = vshll.u32 %v6745_v50, 16  ;;  %v6749_v20 = vld [vmem:[%s8394_s18 + $0x38] sm:$0x1] }
  0xaf   : > { %7458 = vmatmul.mubr.bf16.vlgmr.msra.gmra.mrb[0].mxu1 %v6382_v17  ;;  %v1552_v18 = vsel %vm8517_vm5, %v1550_v60, %v1551_v55  ;;  %v6357_v17 = vrot.slane %v1429_v7, 9  ;;  %v4402_v58 = vshrl.u32 %v6745_v50, 16  ;;  %v1436_v7 = vld [vmem:[%s8394_s18 + $0x7c] sm:$0xf]  ;;  %v1438_v26 = vld [vmem:[%s8394_s18 + $0x84] sm:$0xe] }
  0xb0   : > { %7490 = vmatpush3.bf16.msra.mxu1 %v8763_v27  ;;  %7461 = vmatprep.mubr.bf16.mxu1 %v6383_v23  ;;  %v1535_v27 = vsel %vm8517_vm5, %v6353_v28, %v1534_v29  ;;  %v6387_v14 = vcombine.low %v1549_v3, %v1552_v18  ;;  %v8952_v15 = vsel %vm8517_vm5, %v1557_v5, %v1558_v2  ;;  %v1565_v23 = vrot.slane %v1431_v11, 5  ;;  %v1435_v3 = vld [vmem:[%s8394_s18 + $0x78] sm:$0xe] }
  0xb1   : > { %7491 = vmatprep.subr.bf16.mxu1 %v8139_v22  ;;  %v6385_v53 = vcombine.low %v1535_v27, %v1538_v41  ;;  %v4367_v28 = vrot.slane %v4365_v21, 4  ;;  %v4378_v29 = vshrl.u32 %v6742_v19, 16  ;;  %v6388_v38 = vcombine.low %v8946_v10, %v8952_v15  ;;  %v8154_v41 = vld [vmem:[%s9682_s1 + $0xf0] sm:$0xff]   ;;  %v8156_v10 = vld [vmem:[%s9682_s1 + $0xf8] sm:$0xff]  }
  0xb2   : > { %v1563_v39 = vsel %vm8517_vm5, %v6357_v17, %v1562_v12  ;;  %v1572_v27 = vrot.slane %v1434_v36, 5  ;;  %v4400_v0 = vrot.slane %v4398_v57, 5  ;;  %v4404_v1 = vrot.slane %v4402_v58, 4  ;;  %v6747_v15 = vld [vmem:[%s8394_s18 + $0x30] sm:$0xf] }
  0xb3   : > { %v4371_v43 = vor.u32 %v4370_v34, %v4367_v28  ;;  %v4408_v2 = vshll.u32 %v6746_v51, 16  ;;  %v1579_v19 = vrot.slane %v1437_v8, 5  ;;  %v4413_v21 = vshrl.u32 %v6747_v15, 16 }
  0xb4   : > { %7492 = vmatpush3.bf16.msra.mxu1 %v8139_v22  ;;  %v8152_v22 = vld [vmem:[%s9682_s1 + $0xe8] sm:$0xff]  }
  0xb5   : > { %7670 = vmatmul.mubr.bf16.gmra.mrb[20].mxu0 %v8140_v47  ;;  %7493 = vmatprep.subr.bf16.mxu1 %v8143_v40  ;;  %v1564_v47 = vrot.slane %v1562_v12, 4  ;;  %v4372_v54 = vrot.slane %v4371_v43, 4  ;;  %v4405_v12 = vor.u32 %v4404_v1, %v4400_v0  ;;  %v4410_v13 = vrot.slane %v4408_v2, 5  ;;  %v6750_v43 = vld [vmem:[%s8394_s18 + $0x3c] sm:$0xf] }
  0xb6   : > { %7673 = vmatprep.mubr.bf16.mxu0 %v8142_v31  ;;  %v1433_v31 = vld [vmem:[%s8394_s18 + $0x70] sm:$0xf] }
  0xb7   : > { %7462 = vmatmul.mubr.bf16.gmra.mrb[4].mxu1 %v6384_v45  ;;  %v1569_v37 = vrot.slane %v1433_v31, 5  ;;  %v1566_v42 = vsel %vm8517_vm5, %v1564_v47, %v1565_v23  ;;  %v4377_v63 = vsel %vm8417_vm2, %v4372_v54, %v4376_v35  ;;  %v4406_v47 = vrot.slane %v4405_v12, 4  ;;  %v8157_v12 = vld [vmem:[%s9682_s1 + $0x218] sm:$0xff]  }
  0xb8   : > { %7465 = vmatprep.mubr.bf16.mxu1 %v6385_v53  ;;  %7494 = vmatpush3.bf16.msra.mxu1 %v8143_v40  ;;  %v4380_v40 = vrot.slane %v4378_v29, 4  ;;  %v4392_v53 = vshll.u32 %v6744_v46, 16  ;;  %v6389_v59 = vcombine.low %v1563_v39, %v1566_v42  ;;  %v4415_v29 = vrot.slane %v4413_v21, 4 }
  0xb9   : > { %7495 = vmatprep.subr.bf16.mxu1 %v8147_v52  ;;  %v1571_v45 = vrot.slane %v1569_v37, 4  ;;  %v8975_v49 = vsel %vm8517_vm5, %v6358_v32, %v1569_v37  ;;  %v1439_v32 = vld [vmem:[%s8394_s18 + $0x88] sm:$0xf]  ;;  %v4411_v34 = vsel %vm8417_vm2, %v4406_v47, %v4410_v13  ;;  %v4432_v37 = vshll.u32 %v6749_v20, 16 }
  0xba   : > { %v4394_v62 = vrot.slane %v4392_v53, 5  ;;  %v4437_v53 = vshrl.u32 %v6750_v43, 16  ;;  %v4440_v54 = vshll.u32 %v6750_v43, 16 }
  0xbb   : > { %v8981_v55 = vsel %vm8517_vm5, %v1571_v45, %v1572_v27  ;;  %v6360_v45 = vrot.slane %v1438_v26, 9 }
  0xbc   : > { %7496 = vmatpush3.bf16.msra.mxu1 %v8147_v52  ;;  %v4389_v52 = vshrl.u32 %v6744_v46, 16  ;;  %v6390_v5 = vcombine.low %v8975_v49, %v8981_v55  ;;  %v1583_v46 = vrot.slane %v1439_v32, 5  ;;  %v6751_v49 = vld [vmem:[%s8394_s18 + $0x40] sm:$0xf] }
  0xbd   : > { %7674 = vmatmul.mubr.bf16.gmra.mrb[24].mxu0 %v8144_v48  ;;  %7497 = vmatprep.subr.bf16.mxu1 %v8150_v6  ;;  %v4381_v48 = vor.u32 %v4380_v40, %v4376_v35  ;;  %v4446_v58 = vshll.u32 %v6751_v49, 16 }
  0xbe   : > { %7677 = vmatprep.mubr.bf16.mxu0 %v8146_v61  ;;  %v4391_v61 = vrot.slane %v4389_v52, 4  ;;  %v6752_v52 = vld [vmem:[%s8394_s18 + $0x44] sm:$0x1]  ;;  %v1584_v55 = vsel %vm8517_vm5, %v6360_v45, %v1583_v46  ;;  %v1585_v57 = vrot.slane %v1583_v46, 4 }
  0xbf   : > { %7466 = vmatmul.mubr.bf16.gmra.mrb[8].mxu1 %v6386_v9  ;;  %v4382_v60 = vrot.slane %v4381_v48, 4  ;;  %v6359_v9 = vrot.slane %v1435_v3, 9  ;;  %v4448_v2 = vrot.slane %v4446_v58, 5  ;;  %v8160_v45 = vld [vmem:[%s9682_s1 + $0x220] sm:$0xff]  }
  0xc0   : > { %7469 = vmatprep.mubr.bf16.mxu1 %v6387_v14  ;;  %7498 = vmatpush3.bf16.msra.mxu1 %v8150_v6  ;;  %v4395_v6 = vor.u32 %v4394_v62, %v4391_v61  ;;  %v1576_v14 = vrot.slane %v1436_v7, 5  ;;  %v4439_v62 = vrot.slane %v4437_v53, 4 }
  0xc1   : > { %7499 = vmatprep.subr.bf16.mxu1 %v8152_v22  ;;  %v4387_v18 = vsel %vm8417_vm2, %v4382_v60, %v4386_v44  ;;  %v4434_v44 = vrot.slane %v4432_v37, 5  ;;  %v9021_v60 = vld [vmem:[%s9682_s1 + $0x100] sm:$0xff]  }
  0xc2   : > { %v6805_v11 = vcombine.low %v4377_v63, %v4387_v18  ;;  %v4396_v17 = vrot.slane %v4395_v6, 4  ;;  %v1577_v23 = vsel %vm8517_vm5, %v6359_v9, %v1576_v14  ;;  %v1578_v24 = vrot.slane %v1576_v14, 4  ;;  %v1442_v9 = vld [vmem:[%s8394_s18 + $0x94] sm:$0xf] }
  0xc3   : > { %v4442_v63 = vrot.slane %v4440_v54, 5  ;;  %v4456_v18 = vshll.u32 %v6752_v52, 16  ;;  %v6758_v54 = vld [vmem:[%s8394_s18 + $0x5c] sm:$0x1] }
  0xc4   : > { %7500 = vmatpush3.bf16.msra.mxu1 %v8152_v22  ;;  %v4416_v22 = vshll.u32 %v6747_v15, 16  ;;  %v4401_v28 = vsel %vm8417_vm2, %v4396_v17, %v4400_v0  ;;  %v1580_v35 = vsel %vm8517_vm5, %v1578_v24, %v1579_v19  ;;  %v8155_v0 = vld [vmem:[%s9682_s1 + $0x210] sm:$0xff]   ;;  %v6753_v17 = vld [vmem:[%s8394_s18 + $0x48] sm:$0xf]  ;;  %v6754_v19 = vld [vmem:[%s8394_s18 + $0x4c] sm:$0xf] }
  0xc5   : > { %7678 = vmatmul.mubr.bf16.gmra.mrb[28].mxu0 %v8148_v16  ;;  %7501 = vmatprep.subr.bf16.mxu1 %v8154_v41  ;;  %v6748_v16 = vld [vmem:[%s8394_s18 + $0x34] sm:$0xf]  ;;  %v6806_v39 = vcombine.low %v4401_v28, %v4411_v34  ;;  %v6391_v40 = vcombine.low %v1577_v23, %v1580_v35  ;;  %v4443_v8 = vor.u32 %v4442_v63, %v4439_v62  ;;  %v4458_v15 = vrot.slane %v4456_v18, 5  ;;  %v1445_v35 = vld [vmem:[%s8394_s18 + $0xa0] sm:$0xf] }
  0xc6   : > { %7697 = vmatprep.mubr.bf16.mxu0 %v6805_v11  ;;  %v4422_v25 = vshll.u32 %v6748_v16, 16  ;;  %v4418_v30 = vrot.slane %v4416_v22, 5  ;;  %v4426_v31 = vshrl.u32 %v6748_v16, 16  ;;  %v1590_v16 = vrot.slane %v1442_v9, 5  ;;  %v6755_v22 = vld [vmem:[%s8394_s18 + $0x50] sm:$0x1] }
  0xc7   : > { %7470 = vmatmul.mubr.bf16.gmra.mrb[12].mxu1 %v6388_v38  ;;  %v1440_v38 = vld [vmem:[%s8394_s18 + $0x8c] sm:$0x1]  ;;  %v4444_v20 = vrot.slane %v4443_v8, 4  ;;  %v4461_v47 = vshrl.u32 %v6753_v17, 16  ;;  %v4464_v23 = vshll.u32 %v6753_v17, 16  ;;  %v4470_v28 = vshll.u32 %v6754_v19, 16 }
  0xc8   : > { %7473 = vmatprep.mubr.bf16.mxu1 %v6389_v59  ;;  %7502 = vmatpush3.bf16.msra.mxu1 %v8154_v41  ;;  %v4424_v36 = vrot.slane %v4422_v25, 5  ;;  %v4419_v27 = vor.u32 %v4418_v30, %v4415_v29  ;;  %v4428_v42 = vrot.slane %v4426_v31, 4  ;;  %v8153_v41 = vld [vmem:[%s9682_s1 + $0x208] sm:$0xff]   ;;  %v1586_v48 = vrot.slane %v1440_v38, 5  ;;  %v1444_v29 = vld [vmem:[%s8394_s18 + $0x9c] sm:$0xe] }
  0xc9   : > { %7503 = vmatprep.subr.bf16.mxu1 %v8156_v10  ;;  %v4450_v59 = vshrl.u32 %v6751_v49, 16  ;;  %v1592_v26 = vrot.slane %v1590_v16, 4  ;;  %v4449_v30 = vsel %vm8417_vm2, %v4444_v20, %v4448_v2  ;;  %v4463_v31 = vrot.slane %v4461_v47, 4  ;;  %v6759_v20 = vld [vmem:[%s8394_s18 + $0x60] sm:$0xf] }
  0xca   : > { %v4420_v50 = vrot.slane %v4419_v27, 4  ;;  %v4429_v51 = vor.u32 %v4428_v42, %v4424_v36  ;;  %v1587_v1 = vsel %vm8517_vm5, %v1585_v57, %v1586_v48  ;;  %v4466_v32 = vrot.slane %v4464_v23, 5  ;;  %v6761_v23 = vld [vmem:[%s8394_s18 + $0x68] sm:$0x1] }
  0xcb   : > { %v4452_v3 = vrot.slane %v4450_v59, 4  ;;  %v6392_v7 = vcombine.low %v1584_v55, %v1587_v1  ;;  %v4474_v34 = vshrl.u32 %v6754_v19, 16  ;;  %v4472_v38 = vrot.slane %v4470_v28, 5 }
  0xcc   : > { %7504 = vmatpush3.bf16.msra.mxu1 %v8156_v10  ;;  %v4425_v61 = vsel %vm8417_vm2, %v4420_v50, %v4424_v36  ;;  %v1443_v10 = vld [vmem:[%s8394_s18 + $0x98] sm:$0x1]  ;;  %v4467_v43 = vor.u32 %v4466_v32, %v4463_v31  ;;  %v6362_v48 = vrot.slane %v1444_v29, 9  ;;  %v1597_v49 = vrot.slane %v1445_v35, 5  ;;  %v1450_v31 = vld [vmem:[%s8394_s18 + $0xb4] sm:$0xe] }
  0xcd   : > { %7698 = vmatmul.mubr.bf16.vlgmr.msra.gmra.mrb[0].mxu0 %v6806_v39  ;;  %7777 = vmatprep.subr.bf16.mxu1 %v9021_v60  ;;  %v4453_v14 = vor.u32 %v4452_v3, %v4448_v2  ;;  %v1593_v21 = vrot.slane %v1443_v10, 5  ;;  %v4480_v39 = vshll.u32 %v6755_v22, 16  ;;  %v8163_v2 = vld [vmem:[%s9682_s1 + $0x228] sm:$0xff]  }
  0xce   : > { %7730 = vmatpush3.bf16.msra.mxu0 %v8873_v56  ;;  %v4430_v56 = vrot.slane %v4429_v51, 4  ;;  %v6757_v51 = vld [vmem:[%s8394_s18 + $0x58] sm:$0xf]  ;;  %v4468_v52 = vrot.slane %v4467_v43, 4  ;;  %v1598_v58 = vsel %vm8517_vm5, %v6362_v48, %v1597_v49  ;;  %v1599_v59 = vrot.slane %v1597_v49, 4 }
  0xcf   : > { %7474 = vmatmul.mubr.bf16.gmra.mrb[16].mxu1 %v6390_v5  ;;  %7731 = vmatprep.subr.bf16.mxu0 %v8153_v41  ;;  %v1441_v5 = vld [vmem:[%s8394_s18 + $0x90] sm:$0xe]  ;;  %v4454_v24 = vrot.slane %v4453_v14, 4  ;;  %v1594_v37 = vsel %vm8517_vm5, %v1592_v26, %v1593_v21  ;;  %v4482_v46 = vrot.slane %v4480_v39, 5  ;;  %v6760_v21 = vld [vmem:[%s8394_s18 + $0x64] sm:$0xf] }
  0xd0   : > { %7477 = vmatprep.mubr.bf16.mxu1 %v6391_v40  ;;  %v4435_v6 = vsel %vm8417_vm2, %v4430_v56, %v4434_v44  ;;  %v6361_v11 = vrot.slane %v1441_v5, 9  ;;  %v1446_v40 = vld [vmem:[%s8394_s18 + $0xa4] sm:$0x1]  ;;  %v6756_v44 = vld [vmem:[%s8394_s18 + $0x54] sm:$0xf]  ;;  %v4498_v56 = vshrl.u32 %v6757_v51, 16  ;;  %v4473_v62 = vsel %vm8417_vm2, %v4468_v52, %v4472_v38 }
  0xd1   : > { %v6807_v13 = vcombine.low %v4425_v61, %v4435_v6  ;;  %v4459_v36 = vsel %vm8417_vm2, %v4454_v24, %v4458_v15  ;;  %v1600_v50 = vrot.slane %v1446_v40, 5  ;;  %v4485_v55 = vshrl.u32 %v6756_v44, 16  ;;  %v8166_v14 = vld [vmem:[%s9682_s1 + $0x230] sm:$0xff]   ;;  %v8169_v48 = vld [vmem:[%s9682_s1 + $0x238] sm:$0xff]  }
  0xd2   : > { %7732 = vmatpush3.bf16.msra.mxu0 %v8153_v41  ;;  %v1591_v25 = vsel %vm8517_vm5, %v6361_v11, %v1590_v16  ;;  %v6808_v27 = vcombine.low %v4449_v30, %v4459_v36  ;;  %v4476_v41 = vrot.slane %v4474_v34, 4  ;;  %v4488_v57 = vshll.u32 %v6756_v44, 16  ;;  %v1448_v11 = vld [vmem:[%s8394_s18 + $0xac] sm:$0xf] }
  0xd3   : > { %7733 = vmatprep.subr.bf16.mxu0 %v8155_v0  ;;  %7701 = vmatprep.mubr.bf16.mxu0 %v6807_v13  ;;  %v6393_v42 = vcombine.low %v1591_v25, %v1594_v37  ;;  %v4494_v61 = vshll.u32 %v6757_v51, 16  ;;  %v1601_v3 = vsel %vm8517_vm5, %v1599_v59, %v1600_v50  ;;  %v4500_v5 = vrot.slane %v4498_v56, 4  ;;  %v1451_v37 = vld [vmem:[%s8394_s18 + $0xb8] sm:$0xf] }
  0xd4   : > { %v4477_v53 = vor.u32 %v4476_v41, %v4472_v38  ;;  %v4490_v1 = vrot.slane %v4488_v57, 5  ;;  %v4504_v6 = vshll.u32 %v6758_v54, 16  ;;  %v6394_v9 = vcombine.low %v1598_v58, %v1601_v3  ;;  %v6764_v57 = vld [vmem:[%s8394_s18 + $0x74] sm:$0x1] }
  0xd5   : > { %7702 = vmatmul.mubr.bf16.gmra.mrb[4].mxu0 %v6808_v27  ;;  %v4496_v18 = vrot.slane %v4494_v61, 5  ;;  %v1604_v19 = vrot.slane %v1448_v11, 5  ;;  %v4509_v24 = vshrl.u32 %v6759_v20, 16  ;;  %v4512_v25 = vshll.u32 %v6759_v20, 16 }
  0xd6   : > { %7734 = vmatpush3.bf16.msra.mxu0 %v8155_v0  ;;  %v4478_v63 = vrot.slane %v4477_v53, 4  ;;  %v4487_v0 = vrot.slane %v4485_v55, 4  ;;  %v4506_v17 = vrot.slane %v4504_v6, 5  ;;  %v4518_v30 = vshll.u32 %v6760_v21, 16  ;;  %v6763_v53 = vld [vmem:[%s8394_s18 + $0x70] sm:$0xf] }
  0xd7   : > { %7478 = vmatmul.mubr.bf16.gmra.mrb[20].mxu1 %v6392_v7  ;;  %7735 = vmatprep.subr.bf16.mxu0 %v8157_v12  ;;  %v1447_v7 = vld [vmem:[%s8394_s18 + $0xa8] sm:$0xe]  ;;  %v4501_v16 = vor.u32 %v4500_v5, %v4496_v18  ;;  %v1606_v29 = vrot.slane %v1604_v19, 4  ;;  %v4511_v34 = vrot.slane %v4509_v24, 4  ;;  %v4514_v35 = vrot.slane %v4512_v25, 5 }
  0xd8   : > { %7481 = vmatprep.mubr.bf16.mxu1 %v6393_v42  ;;  %v4483_v8 = vsel %vm8417_vm2, %v4478_v63, %v4482_v46  ;;  %v4491_v10 = vor.u32 %v4490_v1, %v4487_v0  ;;  %v6363_v13 = vrot.slane %v1447_v7, 9  ;;  %v4522_v36 = vshrl.u32 %v6760_v21, 16  ;;  %v1452_v42 = vld [vmem:[%s8394_s18 + $0xbc] sm:$0x1]  ;;  %v6762_v46 = vld [vmem:[%s8394_s18 + $0x6c] sm:$0xf] }
  0xd9   : > { %v6809_v15 = vcombine.low %v4473_v62, %v4483_v8  ;;  %v4502_v26 = vrot.slane %v4501_v16, 4  ;;  %v4520_v40 = vrot.slane %v4518_v30, 5  ;;  %v4528_v27 = vshll.u32 %v6761_v23, 16  ;;  %v8158_v8 = vld [vmem:[%s8394_s18 + $0xc] sm:$0xff]  }
  0xda   : > { %7736 = vmatpush3.bf16.msra.mxu0 %v8157_v12  ;;  %v1449_v12 = vld [vmem:[%s8394_s18 + $0xb0] sm:$0x1]  ;;  %v4492_v22 = vrot.slane %v4491_v10, 4  ;;  %v1605_v28 = vsel %vm8517_vm5, %v6363_v13, %v1604_v19  ;;  %v4515_v44 = vor.u32 %v4514_v35, %v4511_v34  ;;  %v6364_v50 = vrot.slane %v1450_v31, 9  ;;  %v6766_v13 = vld [vmem:[%s8394_s18 + $0x7c] sm:$0xf] }
  0xdb   : > { %7737 = vmatprep.subr.bf16.mxu0 %v8160_v45  ;;  %v1607_v47 = vrot.slane %v1449_v12, 5  ;;  %7705 = vmatprep.mubr.bf16.mxu0 %v6809_v15  ;;  %v4507_v38 = vsel %vm8417_vm2, %v4502_v26, %v4506_v17  ;;  %v4530_v49 = vrot.slane %v4528_v27, 5  ;;  %v1611_v51 = vrot.slane %v1451_v37, 5  ;;  %v6765_v12 = vld [vmem:[%s8394_s18 + $0x78] sm:$0xf] }
  0xdc   : > { %v4497_v32 = vsel %vm8417_vm2, %v4492_v22, %v4496_v18  ;;  %v1614_v52 = vrot.slane %v1452_v42, 5  ;;  %v4516_v54 = vrot.slane %v4515_v44, 4  ;;  %v4533_v58 = vshrl.u32 %v6762_v46, 16  ;;  %v6767_v17 = vld [vmem:[%s8394_s18 + $0x80] sm:$0x1] }
  0xdd   : > { %v1608_v39 = vsel %vm8517_vm5, %v1606_v29, %v1607_v47  ;;  %v6810_v43 = vcombine.low %v4497_v32, %v4507_v38  ;;  %v4536_v59 = vshll.u32 %v6762_v46, 16  ;;  %v1612_v61 = vsel %vm8517_vm5, %v6364_v50, %v1611_v51  ;;  %v6768_v26 = vld [vmem:[%s8394_s18 + $0x84] sm:$0xf]  ;;  %v6769_v32 = vld [vmem:[%s8394_s18 + $0x88] sm:$0xf] }
  0xde   : > { %7738 = vmatpush3.bf16.msra.mxu0 %v8160_v45  ;;  %v6395_v41 = vcombine.low %v1605_v28, %v1608_v39  ;;  %v4524_v45 = vrot.slane %v4522_v36, 4  ;;  %v1613_v56 = vrot.slane %v1611_v51, 4  ;;  %v4542_v62 = vshll.u32 %v6763_v53, 16  ;;  %v8159_v36 = vld [vmem:[%s8394_s18 + $0x18] sm:$0xff]   ;;  %v6770_v37 = vld [vmem:[%s8394_s18 + $0x8c] sm:$0x1] }
  0xdf   : > { %7482 = vmatmul.mubr.bf16.gmra.mrb[24].mxu1 %v6394_v9  ;;  %7739 = vmatprep.subr.bf16.mxu0 %v8163_v2  ;;  %v4546_v63 = vshrl.u32 %v6763_v53, 16  ;;  %v4521_v0 = vsel %vm8417_vm2, %v4516_v54, %v4520_v40  ;;  %v4538_v3 = vrot.slane %v4536_v59, 5  ;;  %v4552_v7 = vshll.u32 %v6764_v57, 16  ;;  %v6772_v57 = vld [vmem:[%s8394_s18 + $0x94] sm:$0xf] }
  0xe0   : > { %7706 = vmatmul.mubr.bf16.gmra.mrb[8].mxu0 %v6810_v43  ;;  %7485 = vmatprep.mubr.bf16.mxu1 %v6395_v41  ;;  %v4525_v55 = vor.u32 %v4524_v45, %v4520_v40  ;;  %v1615_v18 = vsel %vm8517_vm5, %v1613_v56, %v1614_v52  ;;  %v4544_v5 = vrot.slane %v4542_v62, 5  ;;  %v4557_v19 = vshrl.u32 %v6765_v12, 16  ;;  %v8161_v41 = vld [vmem:[%s8394_s18 + $0x24] sm:$0xff]  }
  0xe1   : > { %v4548_v6 = vrot.slane %v4546_v63, 4  ;;  %v6396_v10 = vcombine.low %v1612_v61, %v1615_v18  ;;  %v4554_v16 = vrot.slane %v4552_v7, 5  ;;  %v4560_v21 = vshll.u32 %v6765_v12, 16  ;;  %v6773_v61 = vld [vmem:[%s8394_s18 + $0x98] sm:$0x1] }
  0xe2   : > { %7740 = vmatpush3.bf16.msra.mxu0 %v8163_v2  ;;  %v4526_v1 = vrot.slane %v4525_v55, 4  ;;  %v4535_v2 = vrot.slane %v4533_v58, 4  ;;  %v4566_v22 = vshll.u32 %v6766_v13, 16  ;;  %v4570_v47 = vshrl.u32 %v6766_v13, 16  ;;  %v6771_v55 = vld [vmem:[%s8394_s18 + $0x90] sm:$0xf] }
  0xe3   : > { %7741 = vmatprep.subr.bf16.mxu0 %v8166_v14  ;;  %v4549_v15 = vor.u32 %v4548_v6, %v4544_v5  ;;  %v4559_v24 = vrot.slane %v4557_v19, 4  ;;  %v4576_v25 = vshll.u32 %v6767_v17, 16  ;;  %v4562_v29 = vrot.slane %v4560_v21, 5  ;;  %v6776_v12 = vld [vmem:[%s8394_s18 + $0xa4] sm:$0x1]  ;;  %v8162_v17 = vld [vmem:[%s8394_s18 + $0x30] sm:$0xff]  }
  0xe4   : > { %v4531_v9 = vsel %vm8417_vm2, %v4526_v1, %v4530_v49  ;;  %v4539_v11 = vor.u32 %v4538_v3, %v4535_v2  ;;  %v4568_v30 = vrot.slane %v4566_v22, 5  ;;  %v4572_v31 = vrot.slane %v4570_v47, 4  ;;  %v6774_v3 = vld [vmem:[%s8394_s18 + $0x9c] sm:$0xf] }
  0xe5   : > { %v4550_v23 = vrot.slane %v4549_v15, 4  ;;  %v4578_v35 = vrot.slane %v4576_v25, 5  ;;  %v4581_v38 = vshrl.u32 %v6768_v26, 16  ;;  %v4584_v39 = vshll.u32 %v6768_v26, 16 }
  0xe6   : > { %7742 = vmatpush3.bf16.msra.mxu0 %v8166_v14  ;;  %v6811_v14 = vcombine.low %v4521_v0, %v4531_v9  ;;  %v4540_v20 = vrot.slane %v4539_v11, 4  ;;  %v4563_v27 = vor.u32 %v4562_v29, %v4559_v24  ;;  %v4573_v42 = vor.u32 %v4572_v31, %v4568_v30  ;;  %v6775_v9 = vld [vmem:[%s8394_s18 + $0xa0] sm:$0xf]  ;;  %v8308_v29 = vld [vmem:[%s9682_s1 + $0x110] sm:$0xff]  }
  0xe7   : > { %7743 = vmatprep.subr.bf16.mxu0 %v8169_v48  ;;  %7486 = vmatmul.mubr.bf16.gmra.mrb[28].mxu1 %v6396_v10  ;;  %v4555_v34 = vsel %vm8417_vm2, %v4550_v23, %v4554_v16  ;;  %v4590_v43 = vshll.u32 %v6769_v32, 16  ;;  %v4583_v44 = vrot.slane %v4581_v38, 4  ;;  %v4586_v45 = vrot.slane %v4584_v39, 5  ;;  %v8164_v23 = vld [vmem:[%s8394_s18 + $0x3c] sm:$0xff]   ;;  %v6778_v38 = vld [vmem:[%s8394_s18 + $0xac] sm:$0xf] }
  0xe8   : > { %7709 = vmatprep.mubr.bf16.mxu0 %v6811_v14  ;;  %7505 = vmatprep.mubr.bf16.mxu1 %v8158_v8  ;;  %v4545_v28 = vsel %vm8417_vm2, %v4540_v20, %v4544_v5  ;;  %v4594_v46 = vshrl.u32 %v6769_v32, 16  ;;  %v4564_v49 = vrot.slane %v4563_v27, 4  ;;  %v4574_v50 = vrot.slane %v4573_v42, 4  ;;  %v8307_v8 = vld [vmem:[%s9682_s1 + $0x108] sm:$0xff]   ;;  %v6779_v39 = vld [vmem:[%s8394_s18 + $0xb0] sm:$0x1] }
  0xe9   : > { %v6812_v40 = vcombine.low %v4545_v28, %v4555_v34  ;;  %v4592_v51 = vrot.slane %v4590_v43, 5  ;;  %v4587_v52 = vor.u32 %v4586_v45, %v4583_v44  ;;  %v4605_v56 = vshrl.u32 %v6771_v55, 16  ;;  %v6777_v34 = vld [vmem:[%s8394_s18 + $0xa8] sm:$0xf] }
  0xea   : > { %7744 = vmatpush3.bf16.msra.mxu0 %v8169_v48  ;;  %v4600_v48 = vshll.u32 %v6770_v37, 16  ;;  %v4596_v53 = vrot.slane %v4594_v46, 4  ;;  %v4569_v58 = vsel %vm8417_vm2, %v4564_v49, %v4568_v30  ;;  %v4579_v59 = vsel %vm8417_vm2, %v4574_v50, %v4578_v35  ;;  %v8165_v49 = vld [vmem:[%s8394_s18 + $0x48] sm:$0xff]   ;;  %v8309_v50 = vld [vmem:[%s9682_s1 + $0x118] sm:$0xff]  }
  0xeb   : > { %7710 = vmatmul.mubr.bf16.gmra.mrb[12].mxu0 %v6812_v40  ;;  %v4608_v62 = vshll.u32 %v6771_v55, 16  ;;  %v6813_v63 = vcombine.low %v4569_v58, %v4579_v59  ;;  %v4588_v0 = vrot.slane %v4587_v52, 4  ;;  %v4614_v2 = vshll.u32 %v6772_v57, 16  ;;  %v6780_v55 = vld [vmem:[%s8394_s18 + $0xb4] sm:$0xf] }
  0xec   : > { %v4602_v54 = vrot.slane %v4600_v48, 5  ;;  %v4597_v1 = vor.u32 %v4596_v53, %v4592_v51  ;;  %v4607_v18 = vrot.slane %v4605_v56, 4  ;;  %v4618_v6 = vshrl.u32 %v6772_v57, 16  ;;  %v8167_v57 = vld [vmem:[%s8394_s18 + $0x54] sm:$0xff]  }
  0xed   : > { %v4610_v5 = vrot.slane %v4608_v62, 5  ;;  %v4624_v7 = vshll.u32 %v6773_v61, 16  ;;  %7713 = vmatprep.mubr.bf16.mxu0 %v6813_v63  ;;  %v4593_v10 = vsel %vm8417_vm2, %v4588_v0, %v4592_v51  ;;  %v4616_v11 = vrot.slane %v4614_v2, 5  ;;  %v6781_v56 = vld [vmem:[%s8394_s18 + $0xb8] sm:$0xf] }
  0xee   : > { %v4629_v13 = vshrl.u32 %v6774_v3, 16  ;;  %v4620_v15 = vrot.slane %v4618_v6, 4  ;;  %v4632_v19 = vshll.u32 %v6774_v3, 16  ;;  %v4638_v22 = vshll.u32 %v6775_v9, 16  ;;  %v6782_v62 = vld [vmem:[%s8394_s18 + $0xbc] sm:$0x1] }
  0xef   : > { %7506 = vmatmul.mubr.bf16.vlgmr.msra.gmra.mrb[0].mxu1 %v8159_v36  ;;  %v4611_v14 = vor.u32 %v4610_v5, %v4607_v18  ;;  %v4626_v16 = vrot.slane %v4624_v7, 5  ;;  %v4642_v47 = vshrl.u32 %v6775_v9, 16  ;;  %v4648_v32 = vshll.u32 %v6776_v12, 16  ;;  %v8310_v7 = vld [vmem:[%s9682_s1 + $0x120] sm:$0xff]  }
  0xf0   : > { %7785 = vmatpush3.bf16.msra.mxu1 %v9021_v60  ;;  %7509 = vmatprep.mubr.bf16.mxu1 %v8161_v41  ;;  %v4598_v60 = vrot.slane %v4597_v1, 4  ;;  %v4631_v21 = vrot.slane %v4629_v13, 4  ;;  %v4621_v26 = vor.u32 %v4620_v15, %v4616_v11  ;;  %v4634_v28 = vrot.slane %v4632_v19, 5  ;;  %v6784_v15 = vld [vmem:[%s8394_s18 + $0xc4] sm:$0xf] }
  0xf1   : > { %7778 = vmatprep.subr.bf16.mxu1 %v8307_v8  ;;  %v4612_v25 = vrot.slane %v4611_v14, 4  ;;  %v4640_v30 = vrot.slane %v4638_v22, 5  ;;  %v4644_v31 = vrot.slane %v4642_v47, 4  ;;  %v4653_v40 = vshrl.u32 %v6777_v34, 16 }
  0xf2   : > { %v4603_v20 = vsel %vm8417_vm2, %v4598_v60, %v4602_v54  ;;  %v4622_v36 = vrot.slane %v4621_v26, 4  ;;  %v4635_v37 = vor.u32 %v4634_v28, %v4631_v21  ;;  %v4650_v42 = vrot.slane %v4648_v32, 5  ;;  %v6785_v21 = vld [vmem:[%s8394_s18 + $0xc8] sm:$0x1]  ;;  %v8168_v26 = vld [vmem:[%s8394_s18 + $0x60] sm:$0xff]  }
  0xf3   : > { %v6814_v24 = vcombine.low %v4593_v10, %v4603_v20  ;;  %v4617_v35 = vsel %vm8417_vm2, %v4612_v25, %v4616_v11  ;;  %v4645_v27 = vor.u32 %v4644_v31, %v4640_v30  ;;  %v4656_v43 = vshll.u32 %v6777_v34, 16  ;;  %v6783_v11 = vld [vmem:[%s8394_s18 + $0xc0] sm:$0xf]  ;;  %v8311_v28 = vld [vmem:[%s9682_s1 + $0x128] sm:$0xff]  }
  0xf4   : > { %7786 = vmatpush3.bf16.msra.mxu1 %v8307_v8  ;;  %v4662_v41 = vshll.u32 %v6778_v38, 16  ;;  %v4627_v44 = vsel %vm8417_vm2, %v4622_v36, %v4626_v16  ;;  %v4636_v45 = vrot.slane %v4635_v37, 4  ;;  %v4655_v46 = vrot.slane %v4653_v40, 4  ;;  %v6786_v34 = vld [vmem:[%s8394_s18 + $0xcc] sm:$0xf] }
  0xf5   : > { %7779 = vmatprep.subr.bf16.mxu1 %v8308_v29  ;;  %7714 = vmatmul.mubr.bf16.gmra.mrb[16].mxu0 %v6814_v24  ;;  %v4666_v48 = vshrl.u32 %v6778_v38, 16  ;;  %v6815_v51 = vcombine.low %v4617_v35, %v4627_v44  ;;  %v4646_v52 = vrot.slane %v4645_v27, 4  ;;  %v4658_v53 = vrot.slane %v4656_v43, 5  ;;  %v6787_v35 = vld [vmem:[%s8394_s18 + $0xd0] sm:$0xf] }
  0xf6   : > { %v4664_v54 = vrot.slane %v4662_v41, 5  ;;  %v4641_v58 = vsel %vm8417_vm2, %v4636_v45, %v4640_v30  ;;  %v4672_v61 = vshll.u32 %v6779_v39, 16  ;;  %v4677_v1 = vshrl.u32 %v6780_v55, 16  ;;  %v8170_v36 = vld [vmem:[%s8394_s18 + $0x6c] sm:$0xff]   ;;  %v6788_v40 = vld [vmem:[%s8394_s18 + $0xd4] sm:$0x1] }
  0xf7   : > { %7510 = vmatmul.mubr.bf16.gmra.mrb[4].mxu1 %v8162_v17  ;;  %v4668_v59 = vrot.slane %v4666_v48, 4  ;;  %7717 = vmatprep.mubr.bf16.mxu0 %v6815_v51  ;;  %v4651_v63 = vsel %vm8417_vm2, %v4646_v52, %v4650_v42  ;;  %v4659_v0 = vor.u32 %v4658_v53, %v4655_v46  ;;  %v4680_v2 = vshll.u32 %v6780_v55, 16 }
  0xf8   : > { %7513 = vmatprep.mubr.bf16.mxu1 %v8164_v23  ;;  %7787 = vmatpush3.bf16.msra.mxu1 %v8308_v29  ;;  %v6816_v3 = vcombine.low %v4641_v58, %v4651_v63  ;;  %v4674_v5 = vrot.slane %v4672_v61, 5  ;;  %v4686_v6 = vshll.u32 %v6781_v56, 16  ;;  %v4679_v9 = vrot.slane %v4677_v1, 4  ;;  %v6829_v61 = vld [vmem:[%s8394_s18 + $0x18] sm:$0xe] }
  0xf9   : > { %7780 = vmatprep.subr.bf16.mxu1 %v8309_v50  ;;  %v4669_v18 = vor.u32 %v4668_v59, %v4664_v54  ;;  %v4660_v8 = vrot.slane %v4659_v0, 4  ;;  %v4682_v10 = vrot.slane %v4680_v2, 5  ;;  %v4690_v60 = vshrl.u32 %v6781_v56, 16  ;;  %v6830_v56 = vld [vmem:[%s8394_s18 + $0x1c] sm:$0xf] }
  0xfa   : > { %v4688_v13 = vrot.slane %v4686_v6, 5  ;;  %v4696_v14 = vshll.u32 %v6782_v62, 16  ;;  %v4701_v16 = vshrl.u32 %v6783_v11, 16  ;;  %v4704_v22 = vshll.u32 %v6783_v11, 16  ;;  %v6831_v0 = vld [vmem:[%s8394_s18 + $0x20] sm:$0x1] }
  0xfb   : > { %v4670_v12 = vrot.slane %v4669_v18, 4  ;;  %v4665_v17 = vsel %vm8417_vm2, %v4660_v8, %v4664_v54  ;;  %v4683_v19 = vor.u32 %v4682_v10, %v4679_v9  ;;  %v4692_v20 = vrot.slane %v4690_v60, 4  ;;  %v8171_v6 = vld [vmem:[%s8394_s18 + $0x78] sm:$0xff]   ;;  %v6832_v60 = vld [vmem:[%s8394_s18 + $0x24] sm:$0xe] }
  0xfc   : > { %7788 = vmatpush3.bf16.msra.mxu1 %v8309_v50  ;;  %v4698_v23 = vrot.slane %v4696_v14, 5  ;;  %v4703_v24 = vrot.slane %v4701_v16, 4  ;;  %v4710_v25 = vshll.u32 %v6784_v15, 16  ;;  %v4706_v32 = vrot.slane %v4704_v22, 5  ;;  %v8312_v50 = vld [vmem:[%s9682_s1 + $0x130] sm:$0xff]   ;;  %v8172_v16 = vld [vmem:[%s8394_s18 + $0x84] sm:$0xff]  }
  0xfd   : > { %7781 = vmatprep.subr.bf16.mxu1 %v8310_v7  ;;  %7718 = vmatmul.mubr.bf16.gmra.mrb[20].mxu0 %v6816_v3  ;;  %v4675_v47 = vsel %vm8417_vm2, %v4670_v12, %v4674_v5  ;;  %v4684_v30 = vrot.slane %v4683_v19, 4  ;;  %v4693_v31 = vor.u32 %v4692_v20, %v4688_v13  ;;  %v4714_v38 = vshrl.u32 %v6784_v15, 16  ;;  %v6833_v11 = vld [vmem:[%s8394_s18 + $0x28] sm:$0xf]  ;;  %v6834_v15 = vld [vmem:[%s8394_s18 + $0x2c] sm:$0x1] }
  0xfe   : > { %v6817_v29 = vcombine.low %v4665_v17, %v4675_v47  ;;  %v4712_v37 = vrot.slane %v4710_v25, 5  ;;  %v4720_v39 = vshll.u32 %v6785_v21, 16  ;;  %v4725_v27 = vshrl.u32 %v6786_v34, 16  ;;  %v6835_v22 = vld [vmem:[%s8394_s18 + $0x30] sm:$0xe] }
  0xff   : > { %7514 = vmatmul.mubr.bf16.gmra.mrb[8].mxu1 %v8165_v49  ;;  %v4689_v42 = vsel %vm8417_vm2, %v4684_v30, %v4688_v13  ;;  %v4694_v43 = vrot.slane %v4693_v31, 4  ;;  %v4707_v41 = vor.u32 %v4706_v32, %v4703_v24  ;;  %v4728_v44 = vshll.u32 %v6786_v34, 16  ;;  %v6836_v25 = vld [vmem:[%s8394_s18 + $0x34] sm:$0xf] }
 0x100   : > { %7517 = vmatprep.mubr.bf16.mxu1 %v8167_v57  ;;  %7789 = vmatpush3.bf16.msra.mxu1 %v8310_v7  ;;  %v4716_v45 = vrot.slane %v4714_v38, 4  ;;  %v4722_v46 = vrot.slane %v4720_v39, 5  ;;  %v4727_v48 = vrot.slane %v4725_v27, 4  ;;  %v4734_v49 = vshll.u32 %v6787_v35, 16  ;;  %v8313_v7 = vld [vmem:[%s9682_s1 + $0x138] sm:$0xff]  }
 0x101   : > { %7782 = vmatprep.subr.bf16.mxu1 %v8311_v28  ;;  %7721 = vmatprep.mubr.bf16.mxu0 %v6817_v29  ;;  %v4699_v51 = vsel %vm8417_vm2, %v4694_v43, %v4698_v23  ;;  %v4708_v52 = vrot.slane %v4707_v41, 4  ;;  %v4730_v53 = vrot.slane %v4728_v44, 5  ;;  %v4738_v54 = vshrl.u32 %v6787_v35, 16  ;;  %v6840_v38 = vld [vmem:[%s8394_s18 + $0x44] sm:$0x1] }
 0x102   : > { %v6818_v55 = vcombine.low %v4689_v42, %v4699_v51  ;;  %v4717_v57 = vor.u32 %v4716_v45, %v4712_v37  ;;  %v4736_v58 = vrot.slane %v4734_v49, 5  ;;  %v4744_v59 = vshll.u32 %v6788_v40, 16  ;;  %v8173_v42 = vld [vmem:[%s8394_s18 + $0x90] sm:$0xff]   ;;  %v6841_v41 = vld [vmem:[%s8394_s18 + $0x48] sm:$0xe] }
 0x103   : > { %v4731_v62 = vor.u32 %v4730_v53, %v4727_v48  ;;  %v4740_v63 = vrot.slane %v4738_v54, 4  ;;  %v6877_v1 = vrot.slane %v6829_v61, 9  ;;  %v4713_v2 = vsel %vm8417_vm2, %v4708_v52, %v4712_v37  ;;  %v6839_v37 = vld [vmem:[%s8394_s18 + $0x40] sm:$0xf]  ;;  %v6842_v49 = vld [vmem:[%s8394_s18 + $0x4c] sm:$0xf] }
 0x104   : > { %7790 = vmatpush3.bf16.msra.mxu1 %v8311_v28  ;;  %v4718_v3 = vrot.slane %v4717_v57, 4  ;;  %v5232_v18 = vrot.slane %v6830_v56, 5  ;;  %v5235_v5 = vrot.slane %v6831_v0, 5  ;;  %v4746_v10 = vrot.slane %v4744_v59, 5  ;;  %v8174_v48 = vld [vmem:[%s8394_s18 + $0x9c] sm:$0xff]  }
 0x105   : > { %7783 = vmatprep.subr.bf16.mxu1 %v8312_v50  ;;  %7722 = vmatmul.mubr.bf16.gmra.mrb[24].mxu0 %v6818_v55  ;;  %v4732_v8 = vrot.slane %v4731_v62, 4  ;;  %v4741_v9 = vor.u32 %v4740_v63, %v4736_v58  ;;  %v5239_v21 = vrot.slane %v6833_v11, 5  ;;  %v6878_v23 = vrot.slane %v6832_v60, 9  ;;  %v6844_v57 = vld [vmem:[%s8394_s18 + $0x54] sm:$0xe] }
 0x106   : > { %v4723_v12 = vsel %vm8417_vm2, %v4718_v3, %v4722_v46  ;;  %v5233_v13 = vsel %vm8517_vm5, %v6877_v1, %v5232_v18  ;;  %v5234_v14 = vrot.slane %v5232_v18, 4  ;;  %v5242_v24 = vrot.slane %v6834_v15, 5  ;;  %v6846_v59 = vld [vmem:[%s8394_s18 + $0x5c] sm:$0x1]  ;;  %v6847_v18 = vld [vmem:[%s8394_s18 + $0x60] sm:$0xe] }
 0x107   : > { %7518 = vmatmul.mubr.bf16.gmra.mrb[12].mxu1 %v8168_v26  ;;  %v6819_v17 = vcombine.low %v4713_v2, %v4723_v12  ;;  %v4737_v19 = vsel %vm8417_vm2, %v4732_v8, %v4736_v58  ;;  %v4742_v20 = vrot.slane %v4741_v9, 4  ;;  %v6837_v26 = vld [vmem:[%s8394_s18 + $0x38] sm:$0x1]  ;;  %v5241_v30 = vrot.slane %v5239_v21, 4  ;;  %v6849_v8 = vld [vmem:[%s8394_s18 + $0x68] sm:$0x1] }
 0x108   : > { %7521 = vmatprep.mubr.bf16.mxu1 %v8170_v36  ;;  %7791 = vmatpush3.bf16.msra.mxu1 %v8312_v50  ;;  %v5236_v47 = vsel %vm8517_vm5, %v5234_v14, %v5235_v5  ;;  %v6879_v31 = vrot.slane %v6835_v22, 9  ;;  %v5246_v34 = vrot.slane %v6836_v25, 5  ;;  %v5249_v35 = vrot.slane %v6837_v26, 5  ;;  %v6838_v36 = vld [vmem:[%s8394_s18 + $0x3c] sm:$0xe]  ;;  %v8175_v15 = vld [vmem:[%s8394_s18 + $0xa8] sm:$0xff]  }
 0x109   : > { %7784 = vmatprep.subr.bf16.mxu1 %v8313_v7  ;;  %7725 = vmatprep.mubr.bf16.mxu0 %v6819_v17  ;;  %v4747_v28 = vsel %vm8417_vm2, %v4742_v20, %v4746_v10  ;;  %v6909_v29 = vcombine.low %v5233_v13, %v5236_v47  ;;  %v6880_v39 = vrot.slane %v6838_v36, 9  ;;  %v5253_v40 = vrot.slane %v6839_v37, 5  ;;  %v6843_v50 = vld [vmem:[%s8394_s18 + $0x50] sm:$0x1]  ;;  %v6845_v58 = vld [vmem:[%s8394_s18 + $0x58] sm:$0xf] }
 0x10a   : > { %v6820_v32 = vcombine.low %v4737_v19, %v4747_v28  ;;  %v5248_v27 = vrot.slane %v5246_v34, 4  ;;  %v5256_v43 = vrot.slane %v6840_v38, 5  ;;  %v5240_v44 = vsel %vm8517_vm5, %v6878_v23, %v5239_v21  ;;  %v6848_v5 = vld [vmem:[%s8394_s18 + $0x64] sm:$0xf]  ;;  %v6850_v13 = vld [vmem:[%s8394_s18 + $0x6c] sm:$0xe] }
 0x10b   : > { %v5243_v45 = vsel %vm8517_vm5, %v5241_v30, %v5242_v24  ;;  %v5255_v46 = vrot.slane %v5253_v40, 4  ;;  %v6881_v51 = vrot.slane %v6841_v41, 9  ;;  %v5247_v52 = vsel %vm8517_vm5, %v6879_v31, %v5246_v34  ;;  %v6851_v19 = vld [vmem:[%s8394_s18 + $0x70] sm:$0xf]  ;;  %v6852_v20 = vld [vmem:[%s8394_s18 + $0x74] sm:$0x1] }
 0x10c   : > { %7792 = vmatpush3.bf16.msra.mxu1 %v8313_v7  ;;  %v5250_v53 = vsel %vm8517_vm5, %v5248_v27, %v5249_v35  ;;  %v5260_v54 = vrot.slane %v6842_v49, 5  ;;  %v5263_v55 = vrot.slane %v6843_v50, 5  ;;  %v6910_v61 = vcombine.low %v5240_v44, %v5243_v45  ;;  %v8176_v23 = vld [vmem:[%s8394_s18 + $0xb4] sm:$0xff]   ;;  %v6501_v26 = vld [vmem:[%s8394_s18 + $0x6c] sm:$0xf] }
 0x10d   : > { %7726 = vmatmul.mubr.bf16.gmra.mrb[28].mxu0 %v6820_v32  ;;  %v9231_v56 = vsel %vm8517_vm5, %v6880_v39, %v5253_v40  ;;  %v6882_v63 = vrot.slane %v6844_v57, 9  ;;  %v6911_v0 = vcombine.low %v5247_v52, %v5250_v53  ;;  %v9235_v1 = vsel %vm8517_vm5, %v5255_v46, %v5256_v43  ;;  %v6502_v28 = vld [vmem:[%s8394_s18 + $0x70] sm:$0xf]  ;;  %v6503_v31 = vld [vmem:[%s8394_s18 + $0x74] sm:$0x1] }
 0x10e   : > { %7745 = vmatprep.mubr.bf16.mxu0 %v6909_v29  ;;  %v5262_v62 = vrot.slane %v5260_v54, 4  ;;  %v5267_v2 = vrot.slane %v6845_v58, 5  ;;  %v5270_v3 = vrot.slane %v6846_v59, 5  ;;  %v6883_v9 = vrot.slane %v6847_v18, 9  ;;  %v6853_v35 = vld [vmem:[%s8394_s18 + $0x78] sm:$0xe] }
 0x10f   : > { %7522 = vmatmul.mubr.bf16.gmra.mrb[16].mxu1 %v8171_v6  ;;  %v9241_v6 = vsel %vm8517_vm5, %v6881_v51, %v5260_v54  ;;  %v5274_v10 = vrot.slane %v6848_v5, 5  ;;  %v5277_v12 = vrot.slane %v6849_v8, 5  ;;  %v6912_v14 = vcombine.low %v9231_v56, %v9235_v1  ;;  %v6854_v40 = vld [vmem:[%s8394_s18 + $0x7c] sm:$0xf]  ;;  %v6855_v27 = vld [vmem:[%s8394_s18 + $0x80] sm:$0x1] }
 0x110   : > { %7525 = vmatprep.mubr.bf16.mxu1 %v8172_v16  ;;  %v9245_v7 = vsel %vm8517_vm5, %v5262_v62, %v5263_v55  ;;  %v9250_v60 = vsel %vm8517_vm5, %v6882_v63, %v5267_v2  ;;  %v5269_v11 = vrot.slane %v5267_v2, 4  ;;  %v6884_v21 = vrot.slane %v6850_v13, 9  ;;  %v6504_v45 = vld [vmem:[%s8394_s18 + $0x78] sm:$0xf]  ;;  %v6505_v51 = vld [vmem:[%s8394_s18 + $0x7c] sm:$0xf] }
 0x111   : > { %v9258_v16 = vsel %vm8517_vm5, %v6883_v9, %v5274_v10  ;;  %v5276_v17 = vrot.slane %v5274_v10, 4  ;;  %v6913_v22 = vcombine.low %v9241_v6, %v9245_v7  ;;  %v5281_v24 = vrot.slane %v6851_v19, 5  ;;  %v6506_v57 = vld [vmem:[%s8394_s18 + $0x80] sm:$0x1]  ;;  %v6856_v62 = vld [vmem:[%s8394_s18 + $0x84] sm:$0xe] }
 0x112   : > { %v9266_v47 = vsel %vm8517_vm5, %v5269_v11, %v5270_v3  ;;  %v5284_v25 = vrot.slane %v6852_v20, 5  ;;  %v2694_v32 = vshrl.u32 %v6501_v26, 16  ;;  %v2697_v34 = vshll.u32 %v6501_v26, 16  ;;  %v6857_v3 = vld [vmem:[%s8394_s18 + $0x88] sm:$0xf]  ;;  %v8177_v9 = vld [vmem:[%s8394_s18 + $0xc0] sm:$0xff]  }
 0x113   : > { %v6914_v29 = vcombine.low %v9250_v60, %v9266_v47  ;;  %v9275_v30 = vsel %vm8517_vm5, %v5276_v17, %v5277_v12  ;;  %v9283_v37 = vsel %vm8517_vm5, %v6884_v21, %v5281_v24  ;;  %v5283_v38 = vrot.slane %v5281_v24, 4  ;;  %v6858_v8 = vld [vmem:[%s8394_s18 + $0x8c] sm:$0x1]  ;;  %v6508_v21 = vld [vmem:[%s8394_s18 + $0x88] sm:$0xf] }
 0x114   : > { %v6915_v36 = vcombine.low %v9258_v16, %v9275_v30  ;;  %v2703_v39 = vshll.u32 %v6502_v28, 16  ;;  %v2699_v43 = vrot.slane %v2697_v34, 5  ;;  %v2707_v41 = vshrl.u32 %v6502_v28, 16 }
 0x115   : > { %7746 = vmatmul.mubr.bf16.vlgmr.msra.gmra.mrb[0].mxu0 %v6910_v61  ;;  %v2713_v44 = vshll.u32 %v6503_v31, 16  ;;  %v9290_v46 = vsel %vm8517_vm5, %v5283_v38, %v5284_v25  ;;  %v6885_v49 = vrot.slane %v6853_v35, 9  ;;  %v5288_v50 = vrot.slane %v6854_v40, 5  ;;  %v6509_v31 = vld [vmem:[%s8394_s18 + $0x8c] sm:$0x1] }
 0x116   : > { %7749 = vmatprep.mubr.bf16.mxu0 %v6911_v0  ;;  %v6916_v52 = vcombine.low %v9283_v37, %v9290_v46  ;;  %v2709_v54 = vrot.slane %v2707_v41, 4  ;;  %v5291_v61 = vrot.slane %v6855_v27, 5  ;;  %v2718_v56 = vshrl.u32 %v6504_v45, 16  ;;  %v6859_v27 = vld [vmem:[%s8394_s18 + $0x90] sm:$0xe] }
 0x117   : > { %7526 = vmatmul.mubr.bf16.gmra.mrb[20].mxu1 %v8173_v42  ;;  %v2696_v42 = vrot.slane %v2694_v32, 4  ;;  %v2715_v55 = vrot.slane %v2713_v44, 5  ;;  %v9298_v58 = vsel %vm8517_vm5, %v6885_v49, %v5288_v50  ;;  %v5290_v59 = vrot.slane %v5288_v50, 4 }
 0x118   : > { %7529 = vmatprep.mubr.bf16.mxu1 %v8174_v48  ;;  %v2705_v48 = vrot.slane %v2703_v39, 5  ;;  %v2721_v1 = vshll.u32 %v6504_v45, 16  ;;  %v2727_v2 = vshll.u32 %v6505_v51, 16  ;;  %v2720_v5 = vrot.slane %v2718_v56, 4  ;;  %v6860_v45 = vld [vmem:[%s8394_s18 + $0x94] sm:$0xf] }
 0x119   : > { %v2700_v53 = vor.u32 %v2699_v43, %v2696_v42  ;;  %v9304_v18 = vsel %vm8517_vm5, %v5290_v59, %v5291_v61  ;;  %v2731_v6 = vshrl.u32 %v6505_v51, 16  ;;  %v2737_v7 = vshll.u32 %v6506_v57, 16  ;;  %v6511_v57 = vld [vmem:[%s8394_s18 + $0x94] sm:$0xf] }
 0x11a   : > { %v2710_v0 = vor.u32 %v2709_v54, %v2705_v48  ;;  %v6917_v12 = vcombine.low %v9298_v58, %v9304_v18  ;;  %v2723_v13 = vrot.slane %v2721_v1, 5  ;;  %v6886_v20 = vrot.slane %v6856_v62, 9  ;;  %v6510_v54 = vld [vmem:[%s8394_s18 + $0x90] sm:$0xf]  ;;  %v6862_v1 = vld [vmem:[%s8394_s18 + $0x9c] sm:$0xe] }
 0x11b   : > { %v2701_v63 = vrot.slane %v2700_v53, 4  ;;  %v2733_v17 = vrot.slane %v2731_v6, 4  ;;  %v2739_v19 = vrot.slane %v2737_v7, 5  ;;  %v5295_v24 = vrot.slane %v6857_v3, 5  ;;  %v6861_v53 = vld [vmem:[%s8394_s18 + $0x98] sm:$0x1] }
 0x11c   : > { %v2711_v11 = vrot.slane %v2710_v0, 4  ;;  %v5298_v25 = vrot.slane %v6858_v8, 5  ;;  %v2751_v40 = vshll.u32 %v6508_v21, 16  ;;  %v2755_v44 = vshrl.u32 %v6508_v21, 16  ;;  %v6863_v7 = vld [vmem:[%s8394_s18 + $0xa0] sm:$0xf] }
 0x11d   : > { %7750 = vmatmul.mubr.bf16.gmra.mrb[4].mxu0 %v6912_v14  ;;  %v2706_v10 = vsel %vm8417_vm2, %v2701_v63, %v2705_v48  ;;  %v6507_v14 = vld [vmem:[%s8394_s18 + $0x84] sm:$0xf]  ;;  %v9319_v38 = vsel %vm8517_vm5, %v6886_v20, %v5295_v24  ;;  %v5297_v39 = vrot.slane %v5295_v24, 4  ;;  %v2761_v51 = vshll.u32 %v6509_v31, 16  ;;  %v6512_v63 = vld [vmem:[%s8394_s18 + $0x98] sm:$0x1] }
 0x11e   : > { %7753 = vmatprep.mubr.bf16.mxu0 %v6913_v22  ;;  %v2716_v22 = vsel %vm8417_vm2, %v2711_v11, %v2715_v55  ;;  %v2742_v32 = vshrl.u32 %v6507_v14, 16  ;;  %v2745_v34 = vshll.u32 %v6507_v14, 16  ;;  %v2753_v50 = vrot.slane %v2751_v40, 5  ;;  %v6513_v20 = vld [vmem:[%s8394_s18 + $0x9c] sm:$0xf] }
 0x11f   : > { %7530 = vmatmul.mubr.bf16.gmra.mrb[24].mxu1 %v8175_v15  ;;  %v2729_v15 = vrot.slane %v2727_v2, 5  ;;  %v6549_v26 = vcombine.low %v2706_v10, %v2716_v22  ;;  %v9330_v49 = vsel %vm8517_vm5, %v5297_v39, %v5298_v25  ;;  %v2757_v55 = vrot.slane %v2755_v44, 4  ;;  %v6514_v25 = vld [vmem:[%s8394_s18 + $0xa0] sm:$0xf]  ;;  %v6515_v39 = vld [vmem:[%s8394_s18 + $0xa4] sm:$0x1] }
 0x120   : > { %7533 = vmatprep.mubr.bf16.mxu1 %v8176_v23  ;;  %v2724_v23 = vor.u32 %v2723_v13, %v2720_v5  ;;  %v2744_v43 = vrot.slane %v2742_v32, 4  ;;  %v2747_v41 = vrot.slane %v2745_v34, 5  ;;  %v6918_v47 = vcombine.low %v9319_v38, %v9330_v49  ;;  %v6864_v13 = vld [vmem:[%s8394_s18 + $0xa4] sm:$0x1]  ;;  %v6866_v44 = vld [vmem:[%s8394_s18 + $0xac] sm:$0xf] }
 0x121   : > { %v2734_v28 = vor.u32 %v2733_v17, %v2729_v15  ;;  %v2763_v61 = vrot.slane %v2761_v51, 5  ;;  %v6887_v56 = vrot.slane %v6859_v27, 9  ;;  %v5302_v62 = vrot.slane %v6860_v45, 5 }
 0x122   : > { %v2725_v35 = vrot.slane %v2724_v23, 4  ;;  %v2758_v16 = vor.u32 %v2757_v55, %v2753_v50  ;;  %v5305_v30 = vrot.slane %v6861_v53, 5  ;;  %v2769_v5 = vshll.u32 %v6510_v54, 16  ;;  %v6867_v53 = vld [vmem:[%s8394_s18 + $0xb0] sm:$0x1] }
 0x123   : > { %v2735_v42 = vrot.slane %v2734_v28, 4  ;;  %v9346_v2 = vsel %vm8517_vm5, %v6887_v56, %v5302_v62  ;;  %v5304_v3 = vrot.slane %v5302_v62, 4  ;;  %v2775_v6 = vshll.u32 %v6511_v57, 16 }
 0x124   : > { %v2730_v48 = vsel %vm8417_vm2, %v2725_v35, %v2729_v15  ;;  %v2779_v11 = vshrl.u32 %v6511_v57, 16  ;;  %v2771_v15 = vrot.slane %v2769_v5, 5  ;;  %v6888_v24 = vrot.slane %v6862_v1, 9 }
 0x125   : > { %7754 = vmatmul.mubr.bf16.gmra.mrb[8].mxu0 %v6914_v29  ;;  %v2740_v60 = vsel %vm8417_vm2, %v2735_v42, %v2739_v19  ;;  %v2748_v29 = vor.u32 %v2747_v41, %v2744_v43  ;;  %v5306_v14 = vsel %vm8517_vm5, %v5304_v3, %v5305_v30  ;;  %v2777_v17 = vrot.slane %v2775_v6, 5  ;;  %v6865_v43 = vld [vmem:[%s8394_s18 + $0xa8] sm:$0xe] }
 0x126   : > { %7757 = vmatprep.mubr.bf16.mxu0 %v6915_v36  ;;  %v6550_v59 = vcombine.low %v2730_v48, %v2740_v60  ;;  %v2766_v36 = vshrl.u32 %v6510_v54, 16  ;;  %v2785_v19 = vshll.u32 %v6512_v63, 16  ;;  %v6919_v22 = vcombine.low %v9346_v2, %v5306_v14  ;;  %v6516_v54 = vld [vmem:[%s8394_s18 + $0xa8] sm:$0xf]  ;;  %v6868_v2 = vld [vmem:[%s8394_s18 + $0xb4] sm:$0xe] }
 0x127   : > { %7534 = vmatmul.mubr.bf16.gmra.mrb[28].mxu1 %v8177_v9  ;;  %v2749_v0 = vrot.slane %v2748_v29, 4  ;;  %v2759_v9 = vrot.slane %v2758_v16, 4  ;;  %v2781_v23 = vrot.slane %v2779_v11, 4  ;;  %v5309_v32 = vrot.slane %v6863_v7, 5  ;;  %v6870_v14 = vld [vmem:[%s8394_s18 + $0xbc] sm:$0x1] }
 0x128   : > { %7569 = vmatprep.mubr.bf16.mxu1 %v6549_v26  ;;  %v2768_v10 = vrot.slane %v2766_v36, 4  ;;  %v2787_v31 = vrot.slane %v2785_v19, 5  ;;  %v5312_v35 = vrot.slane %v6864_v13, 5  ;;  %v2790_v40 = vshrl.u32 %v6513_v20, 16 }
 0x129   : > { %v2754_v8 = vsel %vm8417_vm2, %v2749_v0, %v2753_v50  ;;  %v2764_v21 = vsel %vm8417_vm2, %v2759_v9, %v2763_v61  ;;  %v2782_v34 = vor.u32 %v2781_v23, %v2777_v17  ;;  %v2793_v27 = vshll.u32 %v6513_v20, 16  ;;  %v6518_v0 = vld [vmem:[%s8394_s18 + $0xb0] sm:$0x1]  ;;  %v6520_v23 = vld [vmem:[%s8394_s18 + $0xb8] sm:$0xf] }
 0x12a   : > { %v6551_v26 = vcombine.low %v2754_v8, %v2764_v21  ;;  %v2772_v28 = vor.u32 %v2771_v15, %v2768_v10  ;;  %v9368_v46 = vsel %vm8517_vm5, %v6888_v24, %v5309_v32  ;;  %v2799_v42 = vshll.u32 %v6514_v25, 16  ;;  %v6869_v8 = vld [vmem:[%s8394_s18 + $0xb8] sm:$0xf] }
 0x12b   : > { %v2783_v58 = vrot.slane %v2782_v34, 4  ;;  %v2792_v18 = vrot.slane %v2790_v40, 4  ;;  %v2803_v41 = vshrl.u32 %v6514_v25, 16  ;;  %v2809_v51 = vshll.u32 %v6515_v39, 16  ;;  %v6521_v34 = vld [vmem:[%s8394_s18 + $0xbc] sm:$0x1] }
 0x12c   : > { %v2773_v37 = vrot.slane %v2772_v28, 4  ;;  %v2801_v50 = vrot.slane %v2799_v42, 5  ;;  %v6889_v62 = vrot.slane %v6865_v43, 9  ;;  %v5316_v63 = vrot.slane %v6866_v44, 5 }
 0x12d   : > { %7758 = vmatmul.mubr.bf16.gmra.mrb[12].mxu0 %v6916_v52  ;;  %v5311_v52 = vrot.slane %v5309_v32, 4  ;;  %v2788_v60 = vsel %vm8417_vm2, %v2783_v58, %v2787_v31  ;;  %v2805_v57 = vrot.slane %v2803_v41, 4  ;;  %v2811_v56 = vrot.slane %v2809_v51, 5  ;;  %v6522_v51 = vld [vmem:[%s8394_s18 + $0xc0] sm:$0xf] }
 0x12e   : > { %7761 = vmatprep.mubr.bf16.mxu0 %v6917_v12  ;;  %v2795_v12 = vrot.slane %v2793_v27, 5  ;;  %v2778_v45 = vsel %vm8417_vm2, %v2773_v37, %v2777_v17  ;;  %v5319_v36 = vrot.slane %v6867_v53, 5  ;;  %v2814_v1 = vshrl.u32 %v6516_v54, 16  ;;  %v6519_v17 = vld [vmem:[%s8394_s18 + $0xb4] sm:$0xf] }
 0x12f   : > { %7570 = vmatmul.mubr.bf16.vlgmr.msra.gmra.mrb[16].mxu1 %v6550_v59  ;;  %v9376_v48 = vsel %vm8517_vm5, %v5311_v52, %v5312_v35  ;;  %v6517_v59 = vld [vmem:[%s8394_s18 + $0xac] sm:$0xf]  ;;  %v6552_v61 = vcombine.low %v2778_v45, %v2788_v60  ;;  %v2806_v30 = vor.u32 %v2805_v57, %v2801_v50  ;;  %v5317_v3 = vsel %vm8517_vm5, %v6889_v62, %v5316_v63  ;;  %v6871_v52 = vld [vmem:[%s8394_s18 + $0xc0] sm:$0xe] }
 0x130   : > { %7573 = vmatprep.mubr.bf16.mxu1 %v6551_v26  ;;  %v6920_v29 = vcombine.low %v9368_v46, %v9376_v48  ;;  %v2796_v55 = vor.u32 %v2795_v12, %v2792_v18  ;;  %v5318_v5 = vrot.slane %v5316_v63, 4  ;;  %v2817_v6 = vshll.u32 %v6516_v54, 16  ;;  %v6872_v12 = vld [vmem:[%s8394_s18 + $0xc4] sm:$0xf] }
 0x131   : > { %v2823_v7 = vshll.u32 %v6517_v59, 16  ;;  %v2807_v10 = vrot.slane %v2806_v30, 4  ;;  %v2816_v11 = vrot.slane %v2814_v1, 4  ;;  %v2827_v13 = vshrl.u32 %v6517_v59, 16 }
 0x132   : > { %v2797_v16 = vrot.slane %v2796_v55, 4  ;;  %v5320_v38 = vsel %vm8517_vm5, %v5318_v5, %v5319_v36  ;;  %v2819_v49 = vrot.slane %v2817_v6, 5  ;;  %v2833_v15 = vshll.u32 %v6518_v0, 16  ;;  %v6874_v5 = vld [vmem:[%s8394_s18 + $0xcc] sm:$0xe] }
 0x133   : > { %v2812_v19 = vsel %vm8417_vm2, %v2807_v10, %v2811_v56  ;;  %v6921_v20 = vcombine.low %v5317_v3, %v5320_v38  ;;  %v2829_v21 = vrot.slane %v2827_v13, 4  ;;  %v5323_v28 = vrot.slane %v6869_v8, 5  ;;  %v6875_v10 = vld [vmem:[%s8394_s18 + $0xd0] sm:$0xf] }
 0x134   : > { %v2802_v9 = vsel %vm8417_vm2, %v2797_v16, %v2801_v50  ;;  %v2820_v25 = vor.u32 %v2819_v49, %v2816_v11  ;;  %v2835_v26 = vrot.slane %v2833_v15, 5  ;;  %v5326_v32 = vrot.slane %v6870_v14, 5  ;;  %v6873_v50 = vld [vmem:[%s8394_s18 + $0xc8] sm:$0x1]  ;;  %v6876_v49 = vld [vmem:[%s8394_s18 + $0xd4] sm:$0x1] }
 0x135   : > { %7762 = vmatmul.mubr.bf16.gmra.mrb[16].mxu0 %v6918_v47  ;;  %v2825_v47 = vrot.slane %v2823_v7, 5  ;;  %v6553_v24 = vcombine.low %v2802_v9, %v2812_v19  ;;  %v2838_v35 = vshrl.u32 %v6519_v17, 16  ;;  %v2841_v39 = vshll.u32 %v6519_v17, 16  ;;  %v6524_v16 = vld [vmem:[%s8394_s18 + $0xc8] sm:$0x1] }
 0x136   : > { %7765 = vmatprep.mubr.bf16.mxu0 %v6919_v22  ;;  %v6890_v22 = vrot.slane %v6868_v2, 9  ;;  %v2821_v40 = vrot.slane %v2820_v25, 4  ;;  %v5325_v37 = vrot.slane %v5323_v28, 4  ;;  %v2847_v46 = vshll.u32 %v6520_v23, 16 }
 0x137   : > { %7574 = vmatmul.mubr.bf16.gmra.mrb[20].mxu1 %v6552_v61  ;;  %v2830_v31 = vor.u32 %v2829_v21, %v2825_v47  ;;  %v2840_v43 = vrot.slane %v2838_v35, 4  ;;  %v2843_v58 = vrot.slane %v2841_v39, 5  ;;  %v2851_v18 = vshrl.u32 %v6520_v23, 16 }
 0x138   : > { %7577 = vmatprep.mubr.bf16.mxu1 %v6553_v24  ;;  %v5324_v27 = vsel %vm8517_vm5, %v6890_v22, %v5323_v28  ;;  %v2826_v41 = vsel %vm8417_vm2, %v2821_v40, %v2825_v47  ;;  %v5327_v44 = vsel %vm8517_vm5, %v5325_v37, %v5326_v32  ;;  %v2849_v45 = vrot.slane %v2847_v46, 5 }
 0x139   : > { %v2831_v42 = vrot.slane %v2830_v31, 4  ;;  %v2857_v48 = vshll.u32 %v6521_v34, 16  ;;  %v6922_v54 = vcombine.low %v5324_v27, %v5327_v44  ;;  %v2844_v60 = vor.u32 %v2843_v58, %v2840_v43 }
 0x13a   : > { %v2853_v55 = vrot.slane %v2851_v18, 4  ;;  %v6891_v61 = vrot.slane %v6871_v52, 9  ;;  %v5330_v56 = vrot.slane %v6872_v12, 5  ;;  %v5333_v0 = vrot.slane %v6873_v50, 5 }
 0x13b   : > { %v2836_v53 = vsel %vm8417_vm2, %v2831_v42, %v2835_v26  ;;  %v2859_v59 = vrot.slane %v2857_v48, 5  ;;  %v2845_v62 = vrot.slane %v2844_v60, 4  ;;  %v2862_v30 = vshrl.u32 %v6522_v51, 16 }
 0x13c   : > { %v6554_v57 = vcombine.low %v2826_v41, %v2836_v53  ;;  %v2854_v63 = vor.u32 %v2853_v55, %v2849_v45  ;;  %v5331_v36 = vsel %vm8517_vm5, %v6891_v61, %v5330_v56  ;;  %v5332_v1 = vrot.slane %v5330_v56, 4 }
 0x13d   : > { %7766 = vmatmul.mubr.bf16.gmra.mrb[20].mxu0 %v6920_v29  ;;  %v6523_v29 = vld [vmem:[%s8394_s18 + $0xc4] sm:$0xf]  ;;  %v2865_v2 = vshll.u32 %v6522_v51, 16  ;;  %v2850_v6 = vsel %vm8417_vm2, %v2845_v62, %v2849_v45  ;;  %v2864_v8 = vrot.slane %v2862_v30, 4  ;;  %v2881_v38 = vshll.u32 %v6524_v16, 16 }
 0x13e   : > { %7769 = vmatprep.mubr.bf16.mxu0 %v6921_v20  ;;  %v2871_v3 = vshll.u32 %v6523_v29, 16  ;;  %v2855_v7 = vrot.slane %v2854_v63, 4  ;;  %v2875_v9 = vshrl.u32 %v6523_v29, 16  ;;  %v5334_v11 = vsel %vm8517_vm5, %v5332_v1, %v5333_v0  ;;  %v9454_v29 = vld [vmem:[%s9684_s3] ss:$0 sm:$0xff] }
 0x13f   : > { %7578 = vmatmul.mubr.bf16.gmra.mrb[24].mxu1 %v6554_v57  ;;  %v2867_v13 = vrot.slane %v2865_v2, 5  ;;  %v6923_v15 = vcombine.low %v5331_v36, %v5334_v11  ;;  %v6892_v19 = vrot.slane %v6874_v5, 9  ;;  %v5337_v22 = vrot.slane %v6875_v10, 5 }
 0x140   : > { %v2873_v14 = vrot.slane %v2871_v3, 5  ;;  %v2860_v47 = vsel %vm8417_vm2, %v2855_v7, %v2859_v59  ;;  %v2877_v17 = vrot.slane %v2875_v9, 4  ;;  %v2883_v24 = vrot.slane %v2881_v38, 5 }
 0x141   : > { %v6555_v20 = vcombine.low %v2850_v6, %v2860_v47  ;;  %v2868_v21 = vor.u32 %v2867_v13, %v2864_v8  ;;  %v5340_v25 = vrot.slane %v6876_v49, 5  ;;  %v5338_v28 = vsel %vm8517_vm5, %v6892_v19, %v5337_v22 }
 0x142   : > { %v2878_v23 = vor.u32 %v2877_v17, %v2873_v14  ;;  %v5339_v31 = vrot.slane %v5337_v22, 4 }
 0x143   : > { %7581 = vmatprep.mubr.bf16.mxu1 %v6555_v20  ;;  %v2869_v26 = vrot.slane %v2868_v21, 4 }
 0x144   : > { %v2879_v32 = vrot.slane %v2878_v23, 4  ;;  %v5341_v35 = vsel %vm8517_vm5, %v5339_v31, %v5340_v25 }
 0x145   : > { %7770 = vmatmul.mubr.bf16.gmra.mrb[24].mxu0 %v6922_v54  ;;  %v2874_v34 = vsel %vm8417_vm2, %v2869_v26, %v2873_v14  ;;  %v6924_v40 = vcombine.low %v5338_v28, %v5341_v35  ;;  %v9449_v54 = vld [vmem:[%s9683_s2] ss:$0 sm:$0xff] }
 0x146   : > { %7773 = vmatprep.mubr.bf16.mxu0 %v6923_v15  ;;  %v2884_v39 = vsel %vm8417_vm2, %v2879_v32, %v2883_v24 }
 0x147   : > { %v6556_v27 = vcombine.low %v2874_v34, %v2884_v39 }
 0x149   : > { %7582 = vmatmul.mubr.bf16.gmra.mrb[28].mxu1 %v6556_v27 }
 0x14d   : > { %7774 = vmatmul.mubr.bf16.gmra.mrb[28].mxu0 %v6924_v40 }
 0x1c2   : > { %v7507_v37 = vpop.f32.mrb[0].mxu1 }
 0x1c3   : > { %v2230_v46 = vpop.f32.mrb[1].mxu1 }
 0x1c4   : > { %v7508_v52 = vpop.f32.mrb[2].mxu1 }
 0x1c5   : > { %v2233_v42 = vpop.f32.mrb[3].mxu1 }
 0x1ca   : > { %v7511_v43 = vpop.f32.mrb[4].mxu1 }
 0x1cb   : > { %v2246_v58 = vpop.f32.mrb[5].mxu1 }
 0x1cc   : > { %v7512_v18 = vpop.f32.mrb[6].mxu1 }
 0x1cd   : > { %v2249_v12 = vpop.f32.mrb[7].mxu1 }
 0x1d2   : > { %v7515_v41 = vpop.f32.mrb[8].mxu1 }
 0x1d3   : > { %v2262_v44 = vpop.f32.mrb[9].mxu1 }
 0x1d4   : > { %v7516_v45 = vpop.f32.mrb[10].mxu1 }
 0x1d5   : > { %v9436_v4 = vpop.f32.mrb[11].mxu1 }
 0x1da   : > { %v9438_v48 = vpop.f32.mrb[12].mxu1 }
 0x1db   : > { %v9440_v33 = vpop.f32.mrb[13].mxu1 }
 0x1dc   : > { %v9442_v50 = vpop.f32.mrb[14].mxu1 }
 0x1dd   : > { %v9444_v51 = vpop.f32.mrb[15].mxu1 }
 0x1e8   : > { %v7747_v53 = vpop.f32.mrb[0].mxu0 }
 0x1e9   : > { %v7793_v60 = vadd.f32 %v7747_v53, %v7507_v37  ;;  %v5505_v55 = vpop.f32.mrb[1].mxu0 }
 0x1ea   : > { %v7794_v57 = vadd.f32 %v5505_v55, %v2230_v46  ;;  %v7748_v59 = vpop.f32.mrb[2].mxu0 }
 0x1eb   : > { %v5769_v61 = vmul.f32 %v7793_v60, %v9449_v54  ;;  %v7795_v56 = vadd.f32 %v7748_v59, %v7508_v52  ;;  %v5508_v62 = vpop.f32.mrb[3].mxu0 }
 0x1ec   : > { %v5767_v63 = vmul.f32 %v7794_v57, %v9449_v54  ;;  %v7796_v0 = vadd.f32 %v5508_v62, %v2233_v42 }
 0x1ed   : > { %v9459_v16 = vadd.f32 %v9454_v29, %v5769_v61  ;;  %v5770_v30 = vmul.f32 %v7795_v56, %v9449_v54 }
 0x1ee   : > { %v9463_v36 = vadd.f32 %v9454_v29, %v5767_v63  ;;  %v5768_v1 = vmul.f32 %v7796_v0, %v9449_v54 }
 0x1ef   : > { %v6937_v2 = vmul.f32 -1.442695, %v9459_v16  ;;  %v9468_v3 = vadd.f32 %v9454_v29, %v5770_v30 }
 0x1f0   : > { %v6935_v5 = vmul.f32 -1.442695, %v9463_v36  ;;  %v9472_v6 = vadd.f32 %v9454_v29, %v5768_v1  ;;  %v7751_v7 = vpop.f32.mrb[4].mxu0 }
 0x1f1   : > { %8178 = vpow2.f32 %v6937_v2  ;;  %v6938_v8 = vmul.f32 -1.442695, %v9468_v3  ;;  %v7797_v9 = vadd.f32 %v7751_v7, %v7511_v43  ;;  %v5521_v10 = vpop.f32.mrb[5].mxu0 }
 0x1f2   : > { %8180 = vpow2.f32 %v6935_v5  ;;  %v6936_v11 = vmul.f32 -1.442695, %v9472_v6  ;;  %v7798_v13 = vadd.f32 %v5521_v10, %v2246_v58  ;;  %v7752_v14 = vpop.f32.mrb[6].mxu0 }
 0x1f3   : > { %8182 = vpow2.f32 %v6938_v8  ;;  %v5773_v38 = vmul.f32 %v7797_v9, %v9449_v54  ;;  %v7799_v49 = vadd.f32 %v7752_v14, %v7512_v18  ;;  %v5524_v47 = vpop.f32.mrb[7].mxu0 }
 0x1f4   : > { %8184 = vpow2.f32 %v6936_v11  ;;  %v5771_v15 = vmul.f32 %v7798_v13, %v9449_v54  ;;  %v7800_v17 = vadd.f32 %v5524_v47, %v2249_v12 }
 0x1f5   : > { %v9479_v19 = vadd.f32 %v9454_v29, %v5773_v38  ;;  %v5774_v20 = vmul.f32 %v7799_v49, %v9449_v54 }
 0x1f6   : > { %v9483_v21 = vadd.f32 %v9454_v29, %v5771_v15  ;;  %v5772_v22 = vmul.f32 %v7800_v17, %v9449_v54 }
 0x1f7   : > { %v6941_v23 = vmul.f32 -1.442695, %v9479_v19  ;;  %v9488_v24 = vadd.f32 %v9454_v29, %v5774_v20 }
 0x1f8   : > { %v6939_v25 = vmul.f32 -1.442695, %v9483_v21  ;;  %v9492_v26 = vadd.f32 %v9454_v29, %v5772_v22  ;;  %v7755_v28 = vpop.f32.mrb[8].mxu0 }
 0x1f9   : > { %8186 = vpow2.f32 %v6941_v23  ;;  %v6942_v31 = vmul.f32 -1.442695, %v9488_v24  ;;  %v7801_v32 = vadd.f32 %v7755_v28, %v7515_v41  ;;  %v5537_v34 = vpop.f32.mrb[9].mxu0 }
 0x1fa   : > { %8188 = vpow2.f32 %v6939_v25  ;;  %v6940_v35 = vmul.f32 -1.442695, %v9492_v26  ;;  %v7802_v39 = vadd.f32 %v5537_v34, %v2262_v44  ;;  %v7756_v40 = vpop.f32.mrb[10].mxu0 }
 0x1fb   : > { %v8179_v27 = vpop.eup %8178  ;;  %8190 = vpow2.f32 %v6942_v31  ;;  %v5777_v37 = vmul.f32 %v7801_v32, %v9449_v54  ;;  %v7803_v46 = vadd.f32 %v7756_v40, %v7516_v45  ;;  %v5540_v52 = vpop.f32.mrb[11].mxu0 }
 0x1fc   : > { %v8181_v42 = vpop.eup %8180  ;;  %v5936_v43 = vadd.f32 1.0, %v8179_v27  ;;  %8192 = vpow2.f32 %v6940_v35  ;;  %v5775_v58 = vmul.f32 %v7802_v39, %v9449_v54  ;;  %v7804_v18 = vadd.f32 %v5540_v52, %v9436_v4 }
 0x1fd   : > { %v8183_v12 = vpop.eup %8182  ;;  %v5934_v41 = vadd.f32 1.0, %v8181_v42  ;;  %v9500_v53 = vadd.f32 %v9454_v29, %v5777_v37  ;;  %v5778_v44 = vmul.f32 %v7803_v46, %v9449_v54 }
 0x1fe   : > { %v8185_v60 = vpop.eup %8184  ;;  %8194 = vrcp.f32 %v5936_v43  ;;  %v5937_v55 = vadd.f32 1.0, %v8183_v12  ;;  %v9504_v45 = vadd.f32 %v9454_v29, %v5775_v58  ;;  %v5776_v57 = vmul.f32 %v7804_v18, %v9449_v54 }
 0x1ff   : > { %8196 = vrcp.f32 %v5934_v41  ;;  %v5935_v61 = vadd.f32 1.0, %v8185_v60  ;;  %v6945_v4 = vmul.f32 -1.442695, %v9500_v53  ;;  %v9509_v56 = vadd.f32 %v9454_v29, %v5778_v44 }
 0x200   : > { %8198 = vrcp.f32 %v5937_v55  ;;  %v6943_v63 = vmul.f32 -1.442695, %v9504_v45  ;;  %v9513_v0 = vadd.f32 %v9454_v29, %v5776_v57  ;;  %v7759_v30 = vpop.f32.mrb[12].mxu0 }
 0x201   : > { %8200 = vrcp.f32 %v5935_v61  ;;  %v6946_v2 = vmul.f32 -1.442695, %v9509_v56  ;;  %v7805_v5 = vadd.f32 %v7759_v30, %v9438_v48  ;;  %v5553_v7 = vpop.f32.mrb[13].mxu0 }
 0x202   : > { %v7571_v59 = vpop.f32.mrb[16].mxu1  ;;  %8202 = vpow2.f32 %v6945_v4  ;;  %v6944_v9 = vmul.f32 -1.442695, %v9513_v0  ;;  %v7806_v10 = vadd.f32 %v5553_v7, %v9440_v33  ;;  %v7760_v11 = vpop.f32.mrb[14].mxu0 }
 0x203   : > { %v3112_v62 = vpop.f32.mrb[17].mxu1  ;;  %v8187_v13 = vpop.eup %8186  ;;  %8204 = vpow2.f32 %v6943_v63  ;;  %v5781_v14 = vmul.f32 %v7805_v5, %v9449_v54  ;;  %v7807_v38 = vadd.f32 %v7760_v11, %v9442_v50 }
 0x204   : > { %v7572_v1 = vpop.f32.mrb[18].mxu1  ;;  %v5556_v49 = vpop.f32.mrb[15].mxu0  ;;  %v5940_v15 = vadd.f32 1.0, %v8187_v13  ;;  %8206 = vpow2.f32 %v6946_v2  ;;  %v5779_v48 = vmul.f32 %v7806_v10, %v9449_v54 }
 0x205   : > { %v3115_v8 = vpop.f32.mrb[19].mxu1  ;;  %v8189_v47 = vpop.eup %8188  ;;  %v7808_v17 = vadd.f32 %v5556_v49, %v9444_v51  ;;  %8208 = vpow2.f32 %v6944_v9  ;;  %v9524_v33 = vadd.f32 %v9454_v29, %v5781_v14  ;;  %v5782_v23 = vmul.f32 %v7807_v38, %v9449_v54 }
 0x206   : > { %v8191_v20 = vpop.eup %8190  ;;  %v5938_v22 = vadd.f32 1.0, %v8189_v47  ;;  %8210 = vrcp.f32 %v5940_v15  ;;  %v9528_v28 = vadd.f32 %v9454_v29, %v5779_v48 }
 0x207   : > { %v8193_v25 = vpop.eup %8192  ;;  %v5941_v50 = vadd.f32 1.0, %v8191_v20  ;;  %v5780_v31 = vmul.f32 %v7808_v17, %v9449_v54  ;;  %v6949_v51 = vmul.f32 -1.442695, %v9524_v33  ;;  %v9533_v34 = vadd.f32 %v9454_v29, %v5782_v23 }
 0x208   : > { %8212 = vrcp.f32 %v5938_v22  ;;  %v5939_v32 = vadd.f32 1.0, %v8193_v25  ;;  %v8195_v35 = vpop.eup %8194  ;;  %v6947_v39 = vmul.f32 -1.442695, %v9528_v28  ;;  %v7763_v27 = vpop.f32.mrb[16].mxu0 }
 0x209   : > { %8214 = vrcp.f32 %v5941_v50  ;;  %v9537_v40 = vadd.f32 %v9454_v29, %v5780_v31  ;;  %v8197_v46 = vpop.eup %8196  ;;  %v6032_v52 = vmul.f32 %v8195_v35, %v9459_v16  ;;  %v6950_v42 = vmul.f32 -1.442695, %v9533_v34  ;;  %v5569_v58 = vpop.f32.mrb[17].mxu0 }
 0x20a   : > { %v7575_v37 = vpop.f32.mrb[20].mxu1  ;;  %8216 = vrcp.f32 %v5939_v32  ;;  %v7809_v43 = vadd.f32 %v7763_v27, %v7571_v59  ;;  %v8199_v12 = vpop.eup %8198  ;;  %v6030_v41 = vmul.f32 %v8197_v46, %v9463_v36  ;;  %v7810_v60 = vadd.f32 %v5569_v58, %v3112_v62 }
 0x20b   : > { %v3128_v18 = vpop.f32.mrb[21].mxu1  ;;  %8218 = vpow2.f32 %v6949_v51  ;;  %v6948_v44 = vmul.f32 -1.442695, %v9537_v40  ;;  %v7764_v55 = vpop.f32.mrb[18].mxu0  ;;  %v6033_v4 = vmul.f32 %v8199_v12, %v9468_v3 }
 0x20c   : > { %v7576_v57 = vpop.f32.mrb[22].mxu1  ;;  %v8201_v61 = vpop.eup %8200  ;;  %8220 = vpow2.f32 %v6947_v39  ;;  %v5785_v16 = vmul.f32 %v7809_v43, %v9449_v54  ;;  %v7811_v63 = vadd.f32 %v7764_v55, %v7572_v1  ;;  %v5783_v62 = vmul.f32 %v7810_v60, %v9449_v54 }
 0x20d   : > { %v5572_v30 = vpop.f32.mrb[19].mxu0  ;;  %v9546_v59 = vpop.f32.mrb[23].mxu1  ;;  %v6031_v36 = vmul.f32 %v8201_v61, %v9472_v6  ;;  %8222 = vpow2.f32 %v6950_v42  ;;  %v7042_v7 = vpack.c.bf16 %v6033_v4, %v6032_v52 }
 0x20e   : > { %v8203_v2 = vpop.eup %8202  ;;  %v7812_v3 = vadd.f32 %v5572_v30, %v3115_v8  ;;  %8224 = vpow2.f32 %v6948_v44  ;;  %v9556_v9 = vadd.f32 %v9454_v29, %v5785_v16  ;;  %v9559_v14 = vadd.f32 %v9454_v29, %v5783_v62 }
 0x20f   : > { %v8205_v5 = vpop.eup %8204  ;;  %v5944_v1 = vadd.f32 1.0, %v8203_v2  ;;  %v7037_v11 = vpack.c.bf16 %v6031_v36, %v6030_v41  ;;  %v5786_v6 = vmul.f32 %v7811_v63, %v9449_v54  ;;  %7114 = vst [vmem:[%s9551_s24 + $0x8] sm:$0xff] %v7042_v7  }
 0x210   : > { %v8207_v10 = vpop.eup %8206  ;;  %v5942_v13 = vadd.f32 1.0, %v8205_v5  ;;  %v6953_v49 = vmul.f32 -1.442695, %v9556_v9  ;;  %v5784_v47 = vmul.f32 %v7812_v3, %v9449_v54  ;;  %v6951_v17 = vmul.f32 -1.442695, %v9559_v14  ;;  %v7767_v22 = vpop.f32.mrb[20].mxu0 }
 0x211   : > { %v8209_v38 = vpop.eup %8208  ;;  %8226 = vrcp.f32 %v5944_v1  ;;  %v5945_v8 = vadd.f32 1.0, %v8207_v10  ;;  %7038 = vst [vmem:[%s9551_s24] sm:$0xff] %v7037_v11   ;;  %v9568_v20 = vadd.f32 %v9454_v29, %v5786_v6  ;;  %v7813_v31 = vadd.f32 %v7767_v22, %v7575_v37  ;;  %v5585_v32 = vpop.f32.mrb[21].mxu0 }
 0x212   : > { %v8211_v15 = vpop.eup %8210  ;;  %8228 = vrcp.f32 %v5942_v13  ;;  %v5943_v48 = vadd.f32 1.0, %v8209_v38  ;;  %v9572_v50 = vadd.f32 %v9454_v29, %v5784_v47  ;;  %v7814_v27 = vadd.f32 %v5585_v32, %v3128_v18  ;;  %v7768_v46 = vpop.f32.mrb[22].mxu0 }
 0x213   : > { %v8213_v23 = vpop.eup %8212  ;;  %v6036_v25 = vmul.f32 %v8211_v15, %v9479_v19  ;;  %8230 = vrcp.f32 %v5945_v8  ;;  %v6954_v39 = vmul.f32 -1.442695, %v9568_v20  ;;  %v5789_v43 = vmul.f32 %v7813_v31, %v9449_v54  ;;  %v5588_v58 = vpop.f32.mrb[23].mxu0 }
 0x214   : > { %v8215_v51 = vpop.eup %8214  ;;  %v6034_v35 = vmul.f32 %v8213_v23, %v9483_v21  ;;  %8232 = vrcp.f32 %v5943_v48  ;;  %v6952_v19 = vmul.f32 -1.442695, %v9572_v50  ;;  %v5787_v21 = vmul.f32 %v7814_v27, %v9449_v54  ;;  %v7579_v44 = vpop.f32.mrb[24].mxu1 }
 0x215   : > { %v8217_v52 = vpop.eup %8216  ;;  %v6037_v42 = vmul.f32 %v8215_v51, %v9488_v24  ;;  %8234 = vpow2.f32 %v6953_v49  ;;  %v7815_v41 = vadd.f32 %v7768_v46, %v7576_v57  ;;  %v9582_v24 = vadd.f32 %v9454_v29, %v5789_v43  ;;  %v3144_v61 = vpop.f32.mrb[25].mxu1 }
 0x216   : > { %v8219_v12 = vpop.eup %8218  ;;  %v6035_v37 = vmul.f32 %v8217_v52, %v9492_v26  ;;  %8236 = vpow2.f32 %v6951_v17  ;;  %v9585_v26 = vadd.f32 %v9454_v29, %v5787_v21  ;;  %v7580_v30 = vpop.f32.mrb[26].mxu1  ;;  %v7816_v1 = vadd.f32 %v5588_v58, %v9546_v59 }
 0x217   : > { %v8221_v18 = vpop.eup %8220  ;;  %v7052_v60 = vpack.c.bf16 %v6037_v42, %v6036_v25  ;;  %v5948_v55 = vadd.f32 1.0, %v8219_v12  ;;  %8238 = vpow2.f32 %v6954_v39  ;;  %v6957_v36 = vmul.f32 -1.442695, %v9582_v24  ;;  %v3147_v3 = vpop.f32.mrb[27].mxu1 }
 0x218   : > { %v8223_v4 = vpop.eup %8222  ;;  %v7047_v16 = vpack.c.bf16 %v6035_v37, %v6034_v35  ;;  %v5946_v63 = vadd.f32 1.0, %v8221_v18  ;;  %8240 = vpow2.f32 %v6952_v19  ;;  %v5790_v62 = vmul.f32 %v7815_v41, %v9449_v54  ;;  %v7771_v10 = vpop.f32.mrb[24].mxu0 }
 0x219   : > { %v8225_v2 = vpop.eup %8224  ;;  %7116 = vst [vmem:[%s9551_s24 + $0x18] sm:$0xff] %v7052_v60   ;;  %8242 = vrcp.f32 %v5948_v55  ;;  %v5949_v57 = vadd.f32 1.0, %v8223_v4  ;;  %v6955_v7 = vmul.f32 -1.442695, %v9585_v26  ;;  %v7817_v6 = vadd.f32 %v7771_v10, %v7579_v44  ;;  %v5601_v38 = vpop.f32.mrb[25].mxu0 }
 0x21a   : > { %7115 = vst [vmem:[%s9551_s24 + $0x10] sm:$0xff] %v7047_v16   ;;  %8244 = vrcp.f32 %v5946_v63  ;;  %v5947_v5 = vadd.f32 1.0, %v8225_v2  ;;  %v9594_v13 = vadd.f32 %v9454_v29, %v5790_v62  ;;  %v5788_v47 = vmul.f32 %v7816_v1, %v9449_v54  ;;  %v7772_v48 = vpop.f32.mrb[26].mxu0 }
 0x21b   : > { %v8227_v11 = vpop.eup %8226  ;;  %8246 = vrcp.f32 %v5949_v57  ;;  %v7818_v15 = vadd.f32 %v5601_v38, %v3144_v61  ;;  %v5793_v23 = vmul.f32 %v7817_v6, %v9449_v54  ;;  %v5604_v25 = vpop.f32.mrb[27].mxu0  ;;  %v7819_v27 = vadd.f32 %v7772_v48, %v7580_v30 }
 0x21c   : > { %v8229_v8 = vpop.eup %8228  ;;  %v6040_v49 = vmul.f32 %v8227_v11, %v9500_v53  ;;  %8248 = vrcp.f32 %v5947_v5  ;;  %v6958_v59 = vmul.f32 -1.442695, %v9594_v13  ;;  %v9603_v53 = vadd.f32 %v9454_v29, %v5788_v47  ;;  %v7583_v60 = vpop.f32.mrb[28].mxu1 }
 0x21d   : > { %v8231_v17 = vpop.eup %8230  ;;  %v6038_v22 = vmul.f32 %v8229_v8, %v9504_v45  ;;  %8250 = vpow2.f32 %v6957_v36  ;;  %v5791_v51 = vmul.f32 %v7818_v15, %v9449_v54  ;;  %v9608_v45 = vadd.f32 %v9454_v29, %v5793_v23  ;;  %v3160_v30 = vpop.f32.mrb[29].mxu1 }
 0x21e   : > { %v8233_v31 = vpop.eup %8232  ;;  %v6041_v32 = vmul.f32 %v8231_v17, %v9509_v56  ;;  %8252 = vpow2.f32 %v6955_v7  ;;  %v6956_v56 = vmul.f32 -1.442695, %v9603_v53  ;;  %v7820_v18 = vadd.f32 %v5604_v25, %v3147_v3  ;;  %v7584_v3 = vpop.f32.mrb[30].mxu1 }
 0x21f   : > { %v8235_v35 = vpop.eup %8234  ;;  %v6039_v39 = vmul.f32 %v8233_v31, %v9513_v0  ;;  %8254 = vpow2.f32 %v6958_v59  ;;  %v9612_v19 = vadd.f32 %v9454_v29, %v5791_v51  ;;  %v6961_v37 = vmul.f32 -1.442695, %v9608_v45  ;;  %v3163_v38 = vpop.f32.mrb[31].mxu1 }
 0x220   : > { %v8237_v46 = vpop.eup %8236  ;;  %v7062_v52 = vpack.c.bf16 %v6041_v32, %v6040_v49  ;;  %v5952_v42 = vadd.f32 1.0, %v8235_v35  ;;  %v5794_v0 = vmul.f32 %v7819_v27, %v9449_v54  ;;  %v7775_v55 = vpop.f32.mrb[28].mxu0  ;;  %v5792_v62 = vmul.f32 %v7820_v18, %v9449_v54 }
 0x221   : > { %v8239_v43 = vpop.eup %8238  ;;  %v7057_v58 = vpack.c.bf16 %v6039_v39, %v6038_v22  ;;  %v5950_v12 = vadd.f32 1.0, %v8237_v46  ;;  %v6959_v44 = vmul.f32 -1.442695, %v9612_v19  ;;  %v7821_v63 = vadd.f32 %v7775_v55, %v7583_v60  ;;  %v5617_v2 = vpop.f32.mrb[29].mxu0 }
 0x222   : > { %v8241_v21 = vpop.eup %8240  ;;  %7118 = vst [vmem:[%s9551_s24 + $0x28] sm:$0xff] %v7062_v52   ;;  %8256 = vrcp.f32 %v5952_v42  ;;  %v5953_v41 = vadd.f32 1.0, %v8239_v43  ;;  %v9620_v16 = vadd.f32 %v9454_v29, %v5794_v0  ;;  %v7822_v5 = vadd.f32 %v5617_v2, %v3160_v30  ;;  %v7776_v7 = vpop.f32.mrb[30].mxu0 }
 0x223   : > { %v8243_v61 = vpop.eup %8242  ;;  %7117 = vst [vmem:[%s9551_s24 + $0x20] sm:$0xff] %v7057_v58   ;;  %8258 = vrcp.f32 %v5950_v12  ;;  %v5951_v4 = vadd.f32 1.0, %v8241_v21  ;;  %v5797_v6 = vmul.f32 %v7821_v63, %v9449_v54  ;;  %v5620_v8 = vpop.f32.mrb[31].mxu0  ;;  %v7823_v22 = vadd.f32 %v7776_v7, %v7584_v3 }
 0x224   : > { %v8245_v57 = vpop.eup %8244  ;;  %v6044_v36 = vmul.f32 %v8243_v61, %v9524_v33  ;;  %8260 = vrcp.f32 %v5953_v41  ;;  %v6962_v11 = vmul.f32 -1.442695, %v9620_v16  ;;  %v9629_v33 = vadd.f32 %v9454_v29, %v5792_v62 }
 0x225   : > { %v8247_v1 = vpop.eup %8246  ;;  %v6042_v10 = vmul.f32 %v8245_v57, %v9528_v28  ;;  %8262 = vrcp.f32 %v5951_v4  ;;  %v5795_v15 = vmul.f32 %v7822_v5, %v9449_v54  ;;  %v9634_v17 = vadd.f32 %v9454_v29, %v5797_v6 }
 0x226   : > { %v8249_v49 = vpop.eup %8248  ;;  %v6045_v47 = vmul.f32 %v8247_v1, %v9533_v34  ;;  %8264 = vpow2.f32 %v6956_v56  ;;  %v6960_v32 = vmul.f32 -1.442695, %v9629_v33  ;;  %v5798_v39 = vmul.f32 %v7823_v22, %v9449_v54 }
 0x227   : > { %v8251_v48 = vpop.eup %8250  ;;  %v6043_v28 = vmul.f32 %v8249_v49, %v9537_v40  ;;  %8266 = vpow2.f32 %v6961_v37  ;;  %v6965_v51 = vmul.f32 -1.442695, %v9634_v17  ;;  %v9640_v35 = vadd.f32 %v9454_v29, %v5795_v15 }
 0x228   : > { %v8253_v59 = vpop.eup %8252  ;;  %v7072_v23 = vpack.c.bf16 %v6045_v47, %v6044_v36  ;;  %v5956_v25 = vadd.f32 1.0, %v8251_v48  ;;  %8268 = vpow2.f32 %v6959_v44  ;;  %v7824_v46 = vadd.f32 %v5620_v8, %v3163_v38 }
 0x229   : > { %v8255_v34 = vpop.eup %8254  ;;  %v7067_v31 = vpack.c.bf16 %v6043_v28, %v6042_v10  ;;  %8270 = vpow2.f32 %v6962_v11  ;;  %v5954_v27 = vadd.f32 1.0, %v8253_v59  ;;  %v9645_v42 = vadd.f32 %v9454_v29, %v5798_v39 }
 0x22a   : > { %7120 = vst [vmem:[%s9551_s24 + $0x38] sm:$0xff] %v7072_v23   ;;  %8272 = vrcp.f32 %v5956_v25  ;;  %v5957_v40 = vadd.f32 1.0, %v8255_v34  ;;  %v6963_v43 = vmul.f32 -1.442695, %v9640_v35  ;;  %v5796_v58 = vmul.f32 %v7824_v46, %v9449_v54 }
 0x22b   : > { %7119 = vst [vmem:[%s9551_s24 + $0x30] sm:$0xff] %v7067_v31   ;;  %v6966_v37 = vmul.f32 -1.442695, %v9645_v42 }
 0x22c   : > { %v8257_v52 = vpop.eup %8256  ;;  %8274 = vrcp.f32 %v5957_v40  ;;  %v9653_v44 = vadd.f32 %v9454_v29, %v5796_v58 }
 0x22d   : > { %v8259_v56 = vpop.eup %8258  ;;  %8276 = vpow2.f32 %v6960_v32  ;;  %v6048_v21 = vmul.f32 %v8257_v52, %v9556_v9 }
 0x22e   : > { %v8261_v12 = vpop.eup %8260  ;;  %8278 = vpow2.f32 %v6965_v51  ;;  %v6046_v60 = vmul.f32 %v8259_v56, %v9559_v14  ;;  %v6964_v29 = vmul.f32 -1.442695, %v9653_v44 }
 0x22f   : > { %v8263_v0 = vpop.eup %8262  ;;  %v6049_v41 = vmul.f32 %v8261_v12, %v9568_v20  ;;  %8280 = vrcp.f32 %v5954_v27 }
 0x230   : > { %v8265_v18 = vpop.eup %8264  ;;  %v6047_v54 = vmul.f32 %v8263_v0, %v9572_v50  ;;  %8282 = vpow2.f32 %v6966_v37 }
 0x231   : > { %v8267_v55 = vpop.eup %8266  ;;  %v7082_v61 = vpack.c.bf16 %v6049_v41, %v6048_v21  ;;  %v5955_v4 = vadd.f32 1.0, %v8265_v18  ;;  %8284 = vpow2.f32 %v6963_v43 }
 0x232   : > { %v8269_v63 = vpop.eup %8268  ;;  %v7077_v9 = vpack.c.bf16 %v6047_v54, %v6046_v60  ;;  %v5960_v30 = vadd.f32 1.0, %v8267_v55 }
 0x233   : > { %v8271_v2 = vpop.eup %8270  ;;  %7122 = vst [vmem:[%s9551_s24 + $0x48] sm:$0xff] %v7082_v61   ;;  %8286 = vrcp.f32 %v5955_v4  ;;  %v5958_v57 = vadd.f32 1.0, %v8269_v63 }
 0x234   : > { %v8273_v20 = vpop.eup %8272  ;;  %7121 = vst [vmem:[%s9551_s24 + $0x40] sm:$0xff] %v7077_v9   ;;  %8288 = vrcp.f32 %v5960_v30  ;;  %v5961_v14 = vadd.f32 1.0, %v8271_v2 }
 0x235   : > { %v6052_v62 = vmul.f32 %v8273_v20, %v9582_v24 }
 0x236   : > { %v8275_v50 = vpop.eup %8274  ;;  %8290 = vrcp.f32 %v5961_v14 }
 0x237   : > { %v8277_v36 = vpop.eup %8276  ;;  %v6053_v5 = vmul.f32 %v8275_v50, %v9594_v13  ;;  %8292 = vpow2.f32 %v6964_v29 }
 0x238   : > { %v8279_v3 = vpop.eup %8278  ;;  %8294 = vrcp.f32 %v5958_v57  ;;  %v5959_v7 = vadd.f32 1.0, %v8277_v36 }
 0x239   : > { %v8281_v1 = vpop.eup %8280  ;;  %v7092_v10 = vpack.c.bf16 %v6053_v5, %v6052_v62  ;;  %v5964_v11 = vadd.f32 1.0, %v8279_v3 }
 0x23a   : > { %v8283_v6 = vpop.eup %8282  ;;  %8296 = vrcp.f32 %v5959_v7  ;;  %v6050_v24 = vmul.f32 %v8281_v1, %v9585_v26 }
 0x23b   : > { %v8285_v38 = vpop.eup %8284  ;;  %7124 = vst [vmem:[%s9551_s24 + $0x58] sm:$0xff] %v7092_v10   ;;  %8298 = vrcp.f32 %v5964_v11  ;;  %v5965_v8 = vadd.f32 1.0, %v8283_v6 }
 0x23c   : > { %v5962_v15 = vadd.f32 1.0, %v8285_v38 }
 0x23d   : > { %v8287_v49 = vpop.eup %8286  ;;  %8300 = vrcp.f32 %v5965_v8 }
 0x23e   : > { %v8289_v47 = vpop.eup %8288  ;;  %v6051_v13 = vmul.f32 %v8287_v49, %v9603_v53  ;;  %8302 = vrcp.f32 %v5962_v15 }
 0x23f   : > { %v6056_v59 = vmul.f32 %v8289_v47, %v9608_v45 }
 0x240   : > { %v8291_v48 = vpop.eup %8290  ;;  %v7087_v28 = vpack.c.bf16 %v6051_v13, %v6050_v24 }
 0x241   : > { %v8293_v22 = vpop.eup %8292  ;;  %v6057_v23 = vmul.f32 %v8291_v48, %v9620_v16 }
 0x242   : > { %v8295_v25 = vpop.eup %8294  ;;  %7123 = vst [vmem:[%s9551_s24 + $0x50] sm:$0xff] %v7087_v28   ;;  %v5963_v34 = vadd.f32 1.0, %v8293_v22 }
 0x243   : > { %v7102_v31 = vpack.c.bf16 %v6057_v23, %v6056_v59  ;;  %v6054_v53 = vmul.f32 %v8295_v25, %v9612_v19 }
 0x244   : > { %v8297_v32 = vpop.eup %8296  ;;  %8304 = vrcp.f32 %v5963_v34 }
 0x245   : > { %v8299_v26 = vpop.eup %8298  ;;  %7126 = vst [vmem:[%s9551_s24 + $0x68] sm:$0xff] %v7102_v31   ;;  %v6055_v51 = vmul.f32 %v8297_v32, %v9629_v33 }
 0x246   : > { %v6060_v16 = vmul.f32 %v8299_v26, %v9634_v17 }
 0x247   : > { %v8301_v40 = vpop.eup %8300  ;;  %v7097_v45 = vpack.c.bf16 %v6055_v51, %v6054_v53 }
 0x248   : > { %v6061_v39 = vmul.f32 %v8301_v40, %v9645_v42  ;;  %v8303_v46 = vpop.eup %8302 }
 0x249   : > { %7125 = vst [vmem:[%s9551_s24 + $0x60] sm:$0xff] %v7097_v45   ;;  %v6058_v56 = vmul.f32 %v8303_v46, %v9640_v35 }
 0x24a   : > { %v7112_v27 = vpack.c.bf16 %v6061_v39, %v6060_v16 }
 0x24c   : > { %7128 = vst [vmem:[%s9551_s24 + $0x78] sm:$0xff] %v7112_v27  }
 0x24e   : > { %v8305_v52 = vpop.eup %8304 }
 0x24f   : > { %v6059_v43 = vmul.f32 %v8305_v52, %v9653_v44 }
 0x251   : > { %v7107_v58 = vpack.c.bf16 %v6059_v43, %v6058_v56 }
 0x253   : > { %7127 = vst [vmem:[%s9551_s24 + $0x70] sm:$0xff] %v7107_v58  }
 0x254 PF: > { %s14_s15 = sadd.s32 1, %s8320_s15  }
 0x255   : > { %p11_p4 = scmp.ge.s32.totalorder %s14_s15, 4  }
 0x257   :  { %13 = sbr.rel (!%p11_p4) target bundleno = 1 (0x1), region = 76 }

// kernel: run.18
= control target key start
LH: loop header
LB: loop body
LE: loop exit
PB: predicated region body
PF: predicated region fallthrough
CT: control target
= control target key end

     0   :  { %s770_s18 = smov 0   ;;  %s772_s19 = smov 0   ;;  %s844_s0 = inlined_call_operand.vmem [shape: bf16[2,16,128], index: 0, kind: input, shape index: {}]   ;;  %s845_s1 = inlined_call_operand.vmem [shape: bf16[1,128,128], index: 1, kind: input, shape index: {}]   ;;  %s846_s2 = inlined_call_operand.vmem [shape: f32[1,128], index: 2, kind: input, shape index: {}]   ;;  %s847_s3 = inlined_call_operand.vmem [shape: f32[1,128], index: 3, kind: input, shape index: {}]   ;;  %s848_s4 = inlined_call_operand.vmem [shape: bf16[2,1,128], index: 4, kind: input, shape index: {}]   ;;  %s849_s5 = inlined_call_operand.vmem [shape: bf16[2,16,128], index: 5, kind: output, shape index: {}]  }
   0x1   :  { %s774_s20 = smov 0  }
   0x2 LB: > { %s34_s21 = sadd.s32 1, %s732_s19  ;;  %p621_p0 = scmp.ge.s32.totalorder %s736_s20, 1  ;;  %s736_s20 = sphi %s774_s20, %s15_s20   ;;  %s732_s19 = sphi %s772_s19, %s851_s19   ;;  %s728_s18 = sphi %s770_s18, %s850_s18  }
   0x3   : > { %p36_p1 = scmp.ge.s32.totalorder %s34_s21, 2  ;;  %p241_p2 = scmp.lt.s32.totalorder %s736_s20, 3 }
   0x5   : > { %s853_s21 = smov (%p36_p1, %s34_s21), 0  ;;  %p242_p3 = pnand %p621_p0, %p241_p2 }
   0x6   : > { %v706_v0 = vld [vmem:[%s845_s1] sm:$0xff] (!%p242_p3)   ;;  %v738_v1 = vmov (!%p242_p3), 0.0   ;;  %v707_v2 = vld [vmem:[%s845_s1 + $0x8] sm:$0xff] (!%p242_p3)   ;;  %vm739_vm0 = vmmov (!%p242_p3), 0   ;;  %p290_p4 = scmp.lt.s32.totalorder (!%p242_p3), %s728_s18, 1  ;;  %v328_v3 = vlaneseq (!%p242_p3)  ;;  %v708_v4 = vld [vmem:[%s845_s1 + $0x10] sm:$0xff] (!%p242_p3)  }
   0x7   : > { %245 = sbr.rel (%p242_p3) target bundleno = 260 (0x104), region = 40  ;;  %660 = vmatprep.subr.bf16.mxu0 (!%p242_p3), %v738_v1  ;;  %676 = vmatprep.mubr.msk.bf16.mxu0 (!%p242_p3), %vm739_vm0, %v738_v1  ;;  %v709_v6 = vld [vmem:[%s845_s1 + $0x18] sm:$0xff] (!%p242_p3)   ;;  %v710_v10 = vld [vmem:[%s845_s1 + $0x20] sm:$0xff] (!%p242_p3)   ;;  %v711_v12 = vld [vmem:[%s845_s1 + $0x28] sm:$0xff] (!%p242_p3)  }
   0x8   : > { %661 = vmatpush3.bf16.msra.mxu0 (!%p242_p3), %v706_v0  ;;  %v329_v5 = vshrl.u32 (!%p242_p3), %v328_v3, 7  ;;  %v712_v14 = vld [vmem:[%s845_s1 + $0x30] sm:$0xff] (!%p242_p3)   ;;  %v713_v19 = vld [vmem:[%s845_s1 + $0x38] sm:$0xff] (!%p242_p3)   ;;  %v636_v21 = vld [vmem:[%s846_s2] ss:$0 sm:$0xff] (!%p242_p3) }
   0x9   : > { %662 = vmatprep.subr.bf16.mxu0 (!%p242_p3), %v738_v1  ;;  %v637_v25 = vld [vmem:[%s847_s3] ss:$0 sm:$0xff] (!%p242_p3) }
   0xa   : > { %v330_v9 = vsub.s32 (!%p242_p3), 0, %v329_v5 }
   0xc   : > { %663 = vmatpush3.bf16.msra.mxu0 (!%p242_p3), %v707_v2 }
   0xd   : > { %664 = vmatprep.subr.bf16.mxu0 (!%p242_p3), %v738_v1 }
   0xe   : > { %s855_s18 = smov (!%p290_p4, %s728_s18), 1 }
   0xf   : > { %s307_s30 = scalar_lea.vmem %s848_s4, %s855_s18  ;;  %s642_s10 = sshll.u32 %s855_s18, 3 }
  0x10   : > { %665 = vmatpush3.bf16.msra.mxu0 %v708_v4  ;;  %v324_v7 = vld [vmem:[%s307_s30] sm:$0x1]  ;;  %s297_s15 = scalar_lea.vmem %s844_s0, %s642_s10  ;;  %s319_s30 = scalar_lea.vmem %s849_s5, %s642_s10 }
  0x11   : > { %666 = vmatprep.subr.bf16.mxu0 %v738_v1  ;;  %v326_v8 = vpack.i.b16 %v324_v7, %v324_v7  ;;  %v322_v15 = vld [vmem:[%s297_s15] sm:$0xf]  ;;  %v323_v16 = vld [vmem:[%s297_s15 + $0x4] sm:$0xf] }
  0x13   : > { %v331_v11 = vrot.slane %v326_v8, %v330_v9 }
  0x14   : > { %667 = vmatpush3.bf16.msra.mxu0 %v709_v6 }
  0x15   : > { %668 = vmatprep.subr.bf16.mxu0 %v738_v1  ;;  %v626_v13 = vcombine.low %v331_v11, %v331_v11 }
  0x17   : > { %v336_v17 = vmul.bf16 %v626_v13, %v322_v15  ;;  %v337_v18 = vmul.bf16 %v626_v13, %v323_v16 }
  0x18   : > { %669 = vmatpush3.bf16.msra.mxu0 %v710_v10 }
  0x19   : > { %670 = vmatprep.subr.bf16.mxu0 %v738_v1  ;;  %v627_v20 = vcombine.low %v336_v17, %v337_v18 }
  0x1c   : > { %671 = vmatpush3.bf16.msra.mxu0 %v711_v12 }
  0x1d   : > { %672 = vmatprep.subr.bf16.mxu0 %v738_v1 }
  0x20   : > { %673 = vmatpush3.bf16.msra.mxu0 %v712_v14 }
  0x21   : > { %674 = vmatprep.subr.bf16.mxu0 %v738_v1 }
  0x24   : > { %675 = vmatpush3.bf16.msra.mxu0 %v713_v19 }
  0x27   : > { %677 = vmatmul.mubr.bf16.vlgmr.msra.gmra.mrb[0].mxu0 %v627_v20 }
  0xfa   : > { %v445_v22 = vpop.f32.mrb[0].mxu0 }
  0xfb   : > { %v459_v23 = vmul.f32 %v636_v21, %v445_v22  ;;  %v678_v24 = vpop.f32.mrb[1].mxu0 }
  0xfc   : > { %v448_v26 = vpop.f32.mrb[2].mxu0 }
  0xfd   : > { %v460_v27 = vmul.f32 %v636_v21, %v448_v26  ;;  %v679_v28 = vpop.f32.mrb[3].mxu0  ;;  %v468_v29 = vadd.f32 %v637_v25, %v459_v23 }
  0xff   : > { %v469_v30 = vadd.f32 %v637_v25, %v460_v27 }
 0x101   : > { %v649_v31 = vpack.c.bf16 %v469_v30, %v468_v29 }
 0x103   : > { %650 = vst [vmem:[%s319_s30] sm:$0xff] %v649_v31  }
 0x104 PF: > { %s15_s20 = sadd.s32 1, %s736_s20   ;;  %s850_s18 = smov %s732_s19 }
 0x105   : > { %p12_p5 = scmp.ge.s32.totalorder %s15_s20, 4   ;;  %s851_s19 = smov %s853_s21 }
 0x107   :  { %14 = sbr.rel (!%p12_p5) target bundleno = 2 (0x2), region = 80 }

// kernel: run.19
= control target key start
LH: loop header
LB: loop body
LE: loop exit
PB: predicated region body
PF: predicated region fallthrough
CT: control target
= control target key end

     0   :  { %s793_s15 = smov 0   ;;  %s795_s16 = smov 0   ;;  %s891_s0 = inlined_call_operand.vmem [shape: bf16[2,16,128], index: 0, kind: input, shape index: {}]   ;;  %s892_s1 = inlined_call_operand.vmem [shape: bf16[7,128,256], index: 1, kind: input, shape index: {}]   ;;  %s893_s2 = inlined_call_operand.vmem [shape: f32[1,1792], index: 2, kind: input, shape index: {}]   ;;  %s894_s3 = inlined_call_operand.vmem [shape: f32[1,1792], index: 3, kind: input, shape index: {}]   ;;  %s895_s4 = inlined_call_operand.vmem [shape: f32[2,1,1792], index: 4, kind: output, shape index: {}]  }
   0x1   :  { %s797_s17 = smov 0   ;;  %s799_s18 = smov 0  }
   0x2   :  { %s801_s19 = smov 0  }
   0x3 LB: > { %s23_s20 = sadd.s32 1, %s756_s17  ;;  %s26_s21 = sadd.s32 1, %s760_s18  ;;  %s764_s19 = sphi %s801_s19, %s14_s19   ;;  %s760_s18 = sphi %s799_s18, %s899_s18   ;;  %s756_s17 = sphi %s797_s17, %s898_s17   ;;  %s752_s16 = sphi %s795_s16, %s897_s16   ;;  %s748_s15 = sphi %s793_s15, %s896_s15  }
   0x4   : > { %p24_p0 = scmp.ge.s32.totalorder %s23_s20, 7  ;;  %p609_p1 = scmp.ge.s32.totalorder %s764_s19, 1 }
   0x5   : > { %p196_p2 = scmp.lt.s32.totalorder %s764_s19, 15 }
   0x6   : > { %s901_s20 = smov (%p24_p0, %s23_s20), 0  ;;  %s903_s21 = smov (!%p24_p0, %s26_s21), %s760_s18 }
   0x7   : > { %p197_p3 = pnand %p609_p1, %p196_p2  ;;  %p28_p4 = scmp.ge.s32.totalorder %s903_s21, 2 }
   0x8   : > { %s641_s22 = sshll.u32 (!%p197_p3), %s748_s15, 7  ;;  %p233_p5 = scmp.lt.s32.totalorder (!%p197_p3), %s752_s16, 1  ;;  %v766_v0 = vmov (!%p197_p3), 0   ;;  %v410_v18 = vlaneseq (!%p197_p3) }
   0x9   : > { %s905_s21 = smov (%p28_p4, %s903_s21), 0  ;;  %200 = sbr.rel (%p197_p3) target bundleno = 314 (0x13a), region = 36 }
   0xa   : > { %s829_s25 = scalar_lea.vmem (!%p197_p3), %s892_s1, %s641_s22  ;;  %397 = vmatprep.mubr.bf16.mxu0 (!%p197_p3), %v766_v0  ;;  %s612_s30 = sshll.u32 (!%p197_p3), %s748_s15, 1  ;;  %v857_v19 = vshrl.u32 (!%p197_p3), %v410_v18, 7  ;;  %vm504_vm0 = vcmp.lt.s32.totalorder (!%p197_p3), %v410_v18, 256 }
   0xb   : > { %v685_v1 = vld [vmem:[%s829_s25 + $0x4] ss:$8 sps:$4 sm:$0xff] (!%p197_p3)   ;;  %v687_v2 = vld [vmem:[%s829_s25] ss:$8 sps:$4 sm:$0xff] (!%p197_p3)   ;;  %v688_v3 = vld [vmem:[%s829_s25 + $0x14] ss:$8 sps:$4 sm:$0xff] (!%p197_p3)  }
   0xc   : > { %365 = vmatprep.subr.bf16.mxu0 (!%p197_p3), %v685_v1  ;;  %v690_v4 = vld [vmem:[%s829_s25 + $0x10] ss:$8 sps:$4 sm:$0xff] (!%p197_p3)   ;;  %v691_v5 = vld [vmem:[%s829_s25 + $0x24] ss:$8 sps:$4 sm:$0xff] (!%p197_p3)   ;;  %v693_v6 = vld [vmem:[%s829_s25 + $0x20] ss:$8 sps:$4 sm:$0xff] (!%p197_p3)  }
   0xd   : > { %366 = vmatpush1.bf16.msra.mxu0 (!%p197_p3), %v687_v2  ;;  %v694_v7 = vld [vmem:[%s829_s25 + $0x34] ss:$8 sps:$4 sm:$0xff] (!%p197_p3)   ;;  %v696_v8 = vld [vmem:[%s829_s25 + $0x30] ss:$8 sps:$4 sm:$0xff] (!%p197_p3)   ;;  %v697_v9 = vld [vmem:[%s829_s25 + $0x44] ss:$8 sps:$4 sm:$0xff] (!%p197_p3)  }
   0xe   : > { %367 = vmatprep.subr.bf16.mxu0 (!%p197_p3), %v688_v3  ;;  %v699_v10 = vld [vmem:[%s829_s25 + $0x40] ss:$8 sps:$4 sm:$0xff] (!%p197_p3)   ;;  %v700_v11 = vld [vmem:[%s829_s25 + $0x54] ss:$8 sps:$4 sm:$0xff] (!%p197_p3)   ;;  %v702_v12 = vld [vmem:[%s829_s25 + $0x50] ss:$8 sps:$4 sm:$0xff] (!%p197_p3)  }
   0xf   : > { %v703_v13 = vld [vmem:[%s829_s25 + $0x64] ss:$8 sps:$4 sm:$0xff] (!%p197_p3)   ;;  %v705_v14 = vld [vmem:[%s829_s25 + $0x60] ss:$8 sps:$4 sm:$0xff] (!%p197_p3)   ;;  %v706_v15 = vld [vmem:[%s829_s25 + $0x74] ss:$8 sps:$4 sm:$0xff] (!%p197_p3)  }
  0x10   : > { %s907_s16 = smov (!%p233_p5, %s752_s16), 1  ;;  %v708_v16 = vld [vmem:[%s829_s25 + $0x70] ss:$8 sps:$4 sm:$0xff]   ;;  %p239_p6 = scmp.lt.s32.totalorder %s612_s30, 13  ;;  %v412_v20 = vsub.s32 0, %v857_v19  ;;  %v416_v22 = vsub.s32 1, %v857_v19 }
  0x11   : > { %s640_s26 = sshll.u32 %s907_s16, 3  ;;  %368 = vmatpush1.bf16.msra.mxu0 %v690_v4  ;;  %v767_v3 = vmov 1966171168   ;;  %s642_s11 = smul.u32 14, %s907_s16 }
  0x12   : > { %369 = vmatprep.subr.bf16.mxu0 %v691_v5  ;;  %s237_s29 = scalar_lea.vmem %s891_s0, %s640_s26  ;;  %s909_s30 = smov (!%p239_p6, %s612_s30), 13  ;;  %v488_v4 = vunpack.c.l.s4 %v767_v3 }
  0x13   : > { %v709_v17 = vld [vmem:[%s237_s29] sm:$0xff]   ;;  %s241_s7 = scalar_lea.vmem %s893_s2, %s909_s30  ;;  %s246_s10 = scalar_lea.vmem %s894_s3, %s909_s30 }
  0x14   : > { %v408_v21 = vld [vmem:[%s241_s7] sm:$0x3]  ;;  %s254_s12 = sadd.s32 %s642_s11, %s909_s30 }
  0x15   : > { %370 = vmatpush1.bf16.msra.mxu0 %v693_v6  ;;  %v424_v23 = vld [vmem:[%s246_s10] sm:$0x3]  ;;  %v413_v24 = vrot.slane %v408_v21, %v412_v20  ;;  %v417_v25 = vrot.slane %v408_v21, %v416_v22  ;;  %s255_s15 = scalar_lea.vmem %s895_s4, %s254_s12 }
  0x16   : > { %371 = vmatprep.subr.bf16.mxu0 %v694_v7  ;;  %v429_v26 = vrot.slane %v424_v23, %v412_v20  ;;  %v433_v28 = vrot.slane %v424_v23, %v416_v22 }
  0x19   : > { %372 = vmatpush1.bf16.msra.mxu0 %v696_v8 }
  0x1a   : > { %373 = vmatprep.subr.bf16.mxu0 %v697_v9  ;;  %v489_v9 = vunpack.c.0.s8 %v488_v4 }
  0x1d   : > { %374 = vmatpush1.bf16.msra.mxu0 %v699_v10 }
  0x1e   : > { %375 = vmatprep.subr.bf16.mxu0 %v700_v11 }
  0x21   : > { %376 = vmatpush1.bf16.msra.mxu0 %v702_v12 }
  0x22   : > { %377 = vmatprep.subr.bf16.mxu0 %v703_v13 }
  0x25   : > { %378 = vmatpush1.bf16.msra.mxu0 %v705_v14  ;;  %v492_v14 = vsub.s32 %v489_v9, %v857_v19 }
  0x26   : > { %379 = vmatprep.subr.bf16.mxu0 %v706_v15 }
  0x29   : > { %380 = vmatpush1.bf16.msra.mxu0 %v708_v16 }
  0x2c   : > { %398 = vmatmul.mubr.bf16.vlgmr.msra.gmra.mrb[0].mxu0 %v709_v17 }
  0xff   : > { %v399_v27 = vpop.f32.mrb[0].mxu0 }
 0x100   : > { %v420_v29 = vmul.f32 %v413_v24, %v399_v27  ;;  %v401_v30 = vpop.f32.mrb[1].mxu0 }
 0x101   : > { %v421_v31 = vmul.f32 %v417_v25, %v401_v30  ;;  %v403_v32 = vpop.f32.mrb[2].mxu0 }
 0x102   : > { %v436_v33 = vadd.f32 %v429_v26, %v420_v29  ;;  %v422_v34 = vmul.f32 %v413_v24, %v403_v32  ;;  %v405_v35 = vpop.f32.mrb[3].mxu0 }
 0x103   : > { %v437_v36 = vadd.f32 %v433_v28, %v421_v31  ;;  %v423_v37 = vmul.f32 %v417_v25, %v405_v35 }
 0x104   : > { %v634_v38 = vmul.f32 -1.442695, %v436_v33  ;;  %v438_v39 = vadd.f32 %v429_v26, %v422_v34 }
 0x105   : > { %v635_v40 = vmul.f32 -1.442695, %v437_v36  ;;  %v439_v41 = vadd.f32 %v433_v28, %v423_v37 }
 0x106   : > { %710 = vpow2.f32 %v634_v38  ;;  %v636_v42 = vmul.f32 -1.442695, %v438_v39 }
 0x107   : > { %712 = vpow2.f32 %v635_v40  ;;  %v637_v43 = vmul.f32 -1.442695, %v439_v41 }
 0x108   : > { %714 = vpow2.f32 %v636_v42 }
 0x109   : > { %716 = vpow2.f32 %v637_v43 }
 0x110   : > { %v711_v44 = vpop.eup %710 }
 0x111   : > { %v713_v45 = vpop.eup %712  ;;  %v452_v46 = vadd.f32 1.0, %v711_v44 }
 0x112   : > { %v715_v47 = vpop.eup %714  ;;  %v453_v48 = vadd.f32 1.0, %v713_v45 }
 0x113   : > { %v717_v49 = vpop.eup %716  ;;  %718 = vrcp.f32 %v452_v46  ;;  %v454_v50 = vadd.f32 1.0, %v715_v47 }
 0x114   : > { %720 = vrcp.f32 %v453_v48  ;;  %v455_v51 = vadd.f32 1.0, %v717_v49 }
 0x115   : > { %722 = vrcp.f32 %v454_v50 }
 0x116   : > { %724 = vrcp.f32 %v455_v51 }
 0x11d   : > { %v719_v52 = vpop.eup %718 }
 0x11e   : > { %v721_v53 = vpop.eup %720  ;;  %v464_v56 = vmul.f32 %v719_v52, %v436_v33 }
 0x11f   : > { %v723_v54 = vpop.eup %722  ;;  %v465_v58 = vmul.f32 %v721_v53, %v437_v36 }
 0x120   : > { %v725_v55 = vpop.eup %724  ;;  %v466_v57 = vmul.f32 %v723_v54, %v438_v39 }
 0x121   : > { %v467_v59 = vmul.f32 %v725_v55, %v439_v41 }
 0x122   : > { %v468_v60 = vadd.f32 %v466_v57, %v464_v56 }
 0x123   : > { %v475_v61 = vadd.f32 %v467_v59, %v465_v58 }
 0x124   : > { %v469_v62 = vrot.slane %v468_v60, 4 }
 0x125   : > { %v476_v63 = vrot.slane %v475_v61, 4 }
 0x126   : > { %v470_v0 = vadd.f32 %v469_v62, %v468_v60 }
 0x127   : > { %v477_v1 = vadd.f32 %v476_v63, %v475_v61 }
 0x128   : > { %v471_v2 = vrot.slane %v470_v0, 2 }
 0x129   : > { %v478_v5 = vrot.slane %v477_v1, 2 }
 0x12a   : > { %v472_v6 = vadd.f32 %v471_v2, %v470_v0 }
 0x12b   : > { %v479_v7 = vadd.f32 %v478_v5, %v477_v1 }
 0x12c   : > { %v473_v8 = vrot.slane %v472_v6, 1 }
 0x12d   : > { %v480_v10 = vrot.slane %v479_v7, 1 }
 0x12e   : > { %v474_v11 = vadd.f32 %v473_v8, %v472_v6 }
 0x12f   : > { %v481_v12 = vadd.f32 %v480_v10, %v479_v7 }
 0x130   : > { %v482_v13 = vmul.f32 0.0625, %v474_v11 }
 0x131   : > { %v483_v15 = vmul.f32 0.0625, %v481_v12 }
 0x133   : > { %v486_v16 = vcombine.low %v482_v13, %v483_v15 }
 0x135   : > { %v493_v17 = vrot.slane %v486_v16, %v492_v14 }
 0x137   : > { %v500_v20 = vrot.slane %v493_v17, %v492_v14 }
 0x139   : > { %506 = vst.msk [vmem:[%s255_s15] sm:$0x3] %vm504_vm0, %v500_v20 }
 0x13a PF: > { %s14_s19 = sadd.s32 1, %s764_s19   ;;  %s896_s15 = smov %s756_s17 }
 0x13b   : > { %p11_p7 = scmp.ge.s32.totalorder %s14_s19, 16   ;;  %s897_s16 = smov %s760_s18 }
 0x13c   : > { %s898_s17 = smov %s901_s20  ;;  %s899_s18 = smov %s905_s21 }
 0x13d   :  { %13 = sbr.rel (!%p11_p7) target bundleno = 3 (0x3), region = 73 }

</bundles_post_ra>
